<compile_context>
chip_gen: v7x
topology: tpu7x:2x2x1
jax: 0.10.0
libtpu: 0.0.40
codegen_flags: <defaults>
</compile_context>

<pallas_src>
import functools

import numpy as np
import jax
import jax.numpy as jnp
from jax.experimental import pallas as pl
from jax.experimental.pallas import tpu as pltpu


# ----------------------- host-built 0/1 matrices (numpy) -------------------- #

def _shift8_matrices():
    """S[k] with (x @ S[k])[:, n] = x[:, n + dy*8 + dx] (zero outside the 8x8 map)."""
    S = np.zeros((9, 64, 64), np.float32)
    n = np.arange(64)
    r, c = n // 8, n % 8
    for k in range(9):
        dy, dx = k // 3 - 1, k % 3 - 1
        valid = (r + dy >= 0) & (r + dy < 8) & (c + dx >= 0) & (c + dx < 8)
        S[k, (n + dy * 8 + dx)[valid], n[valid]] = 1.0
    return S


def _convT_select(h, w, i, j):
    """Parity-baked scatter for ConvTranspose2d(k=2,s=2): (HW, 4HW)."""
    HW = h * w
    S = np.zeros((HW, 4 * HW), np.float32)
    r = np.arange(HW)
    N = (2 * (r // w) + i) * (2 * w) + 2 * (r % w) + j
    S[r, N] = 1.0
    return S


def _upsample_select(h, w, f):
    """Nearest-upsample-by-f along flat spatial: (HW, f*f*HW)."""
    HW, HW2, W2 = h * w, h * w * f * f, w * f
    U = np.zeros((HW, HW2), np.float32)
    R = np.arange(HW2)
    src = (R // W2 // f) * w + (R % W2) // f
    U[src, R] = 1.0
    return U


_SHIFT8 = _shift8_matrices()                                        # (9, 64, 64)
_SEL_SMALL = np.stack([_convT_select(8, 8, q // 2, q % 2) for q in range(4)]
                      + [_upsample_select(8, 8, 2)], axis=0)        # (5, 64, 256)
_SEL_BIG = np.zeros((5, 256, 1024), np.float32)                     # (5, 256, 1024)
for _q in range(4):
    _SEL_BIG[_q] = _convT_select(16, 16, _q // 2, _q % 2)
_SEL_BIG[4, :64, :] = _upsample_select(8, 8, 4)


# ----------------------------- constant packing ----------------------------- #

_CONV3 = (('enc1', 1, 16), ('enc2', 16, 32), ('bott', 32, 64),
          ('dec1', 64, 32), ('dec2', 32, 16))
_CONVT = (('up1', 64, 32), ('up2', 32, 16))


def _pack_consts(p):
    """Pack all weights/biases into 2 f32 arrays + 2 bf16 selection packs."""
    f32 = jnp.float32
    # 3x3 conv taps (layer, k, Cout, Cin), bias at tap index 9 column 0,
    # 8x8 shift matrices at layer index 5.
    w3 = jnp.zeros((6, 10, 64, 64), f32)
    for li, (nm, ci, co) in enumerate(_CONV3):
        wk = jnp.transpose(p[nm + '_w'], (2, 3, 0, 1)).reshape(9, co, ci)
        w3 = w3.at[li, :9, :co, :ci].set(wk.astype(f32))
        w3 = w3.at[li, 9, :co, 0].set(p[nm + '_b'].astype(f32))
    w3 = w3.at[5, :9, :, :].set(jnp.asarray(_SHIFT8, f32))

    # 2x2 transposed-conv taps (layer, q=2i+j, Cout, Cin), bias at index 4;
    # layer 2 holds the folded (up3 o final-1x1) weight/bias.
    wt = jnp.zeros((3, 5, 32, 64), f32)
    for li, (nm, ci, co) in enumerate(_CONVT):
        wq = jnp.transpose(p[nm + '_w'], (2, 3, 1, 0)).reshape(4, co, ci)
        wt = wt.at[li, :4, :co, :ci].set(wq.astype(f32))
        wt = wt.at[li, 4, :co, 0].set(p[nm + '_b'].astype(f32))
    fin_v = p['fin_w'].reshape(-1).astype(f32)                      # (8,)
    wfin = jnp.einsum('coij,o->cij', p['up3_w'].astype(f32), fin_v).reshape(16, 4)
    bfin = jnp.dot(p['up3_b'].astype(f32), fin_v) + p['fin_b'][0]
    wt = wt.at[2, 0, :4, :16].set(wfin.T)
    wt = wt.at[2, 4, :4, 0].set(jnp.broadcast_to(bfin, (4,)))

    ssmall = jnp.asarray(_SEL_SMALL, jnp.bfloat16)                  # (5, 64, 256)
    sbig = jnp.asarray(_SEL_BIG, jnp.bfloat16)                      # (5, 256, 1024)
    return w3, wt, ssmall, sbig


# ------------------------------- fused kernel ------------------------------- #

def _unet_kernel(x_ref, w3_ref, wt_ref, ss_ref, sb_ref, out_ref, *, bblk):
    f32, bf16 = jnp.float32, jnp.bfloat16
    PAD = 128   # lane padding (multiple of 128 -> aligned concat) for decoder convs

    def col_masks(W, HW):
        # W is a power of two (16 / 32).
        col = jax.lax.broadcasted_iota(jnp.int32, (1, HW), 1) & (W - 1)
        return {-1: col >= 1, 0: None, 1: col <= W - 2}

    cm16 = col_masks(16, 256)     # hoisted once, reused by every 16x16 tap
    cm32 = col_masks(32, 1024)    # hoisted once, reused by every 32x32 tap

    def conv3_8x8(x, layer, cin, cout):
        # 8x8 conv: spatial shift via exact 0/1 shift matrices on the MXU.
        acc = None
        for k in range(9):
            shx = jnp.dot(x, w3_ref[5, k], preferred_element_type=f32)   # (cin, 64)
            wk = w3_ref[layer, k][:cout, :cin]
            c = wk * shx if cin == 1 else jnp.dot(wk, shx, preferred_element_type=f32)
            acc = c if acc is None else acc + c
        return jnp.maximum(acc + w3_ref[layer, 9][:cout, 0:1], 0.0)

    def conv3_big(x, layer, cin, cout, W, HW, cmask):
        # 16x16 / 32x32 conv: 128-lane zero pad + static lane slices + col masks.
        z = jnp.zeros((cin, PAD), f32)
        xp = jnp.concatenate([z, x, z], axis=1)                    # (cin, HW+256)
        acc = None
        for k in range(9):
            dy, dx = k // 3 - 1, k % 3 - 1
            start = PAD + dy * W + dx
            sh = xp[:, start:start + HW]                           # (cin, HW)
            m = cmask[dx]
            if m is not None:
                sh = jnp.where(m, sh, 0.0)
            wk = w3_ref[layer, k][:cout, :cin]
            c = jnp.dot(wk, sh, preferred_element_type=f32)
            acc = c if acc is None else acc + c
        return jnp.maximum(acc + w3_ref[layer, 9][:cout, 0:1], 0.0)

    def conv_t2x2(x, layer, cin, cout, sel_ref):
        # ConvTranspose2d(k=2,s=2): per-parity tap matmul scattered by the
        # parity-baked 0/1 selection matrices (no VPU selects).
        acc = None
        for q in range(4):
            wq = wt_ref[layer, q][:cout, :cin]
            t = jnp.dot(wq, x, preferred_element_type=f32).astype(bf16)
            y = jnp.dot(t, sel_ref[q], preferred_element_type=f32)
            acc = y if acc is None else acc + y
        return acc + wt_ref[layer, 4][:cout, 0:1]

    for bb in range(bblk):                                         # batch block
        x = x_ref[bb]                                              # (1, 64)

        # encoder / bottleneck at 8x8
        x1 = conv3_8x8(x, 0, 1, 16)                                # (16, 64)
        x2 = conv3_8x8(x1, 1, 16, 32)                              # (32, 64)
        xb = conv3_8x8(x2, 2, 32, 64)                              # (64, 64)

        # decoder stage 1: 8x8 -> 16x16
        u1 = conv_t2x2(xb, 0, 64, 32, ss_ref)                      # (32, 256)
        s2 = jnp.dot(x2.astype(bf16), ss_ref[4],
                     preferred_element_type=f32)                   # (32, 256) skip
        d1 = conv3_big(jnp.concatenate([u1, s2], axis=0),
                       3, 64, 32, 16, 256, cm16)                   # (32, 256)

        # decoder stage 2: 16x16 -> 32x32
        u2 = conv_t2x2(d1, 1, 32, 16, sb_ref)                      # (16, 1024)
        s1 = jnp.dot(x1.astype(bf16), sb_ref[4, :64, :],
                     preferred_element_type=f32)                   # (16, 1024) skip
        d2 = conv3_big(jnp.concatenate([u2, s1], axis=0),
                       4, 32, 16, 32, 1024, cm32)                  # (16, 1024)

        # up3 + final 1x1 conv + sigmoid, folded: lane-dense (4, 1024) output.
        wfinT = wt_ref[2, 0][:4, :16]
        bfin = wt_ref[2, 4][:4, 0:1]
        logits = jnp.dot(wfinT, d2, preferred_element_type=f32) + bfin
        out_ref[bb] = jax.nn.sigmoid(logits)                       # (4, 1024)


# ------------------------------ forward wrapper ------------------------------ #

def _pick_bblk(batch):
    # Amortize per-grid-step overhead, but keep >=2 grid steps (v7x has 2 TCs).
    if batch < 4:
        return 1
    for cand in (8, 4, 2):
        if batch % cand == 0 and batch // cand >= 2:
            return cand
    return 1


def unet_forward(params, x_nchw):
    B = x_nchw.shape[0]
    bblk = _pick_bblk(B)
    # NCHW (B,1,8,8) -> channel-major flat (B, C=1, HW=64); exact reshape (C == 1).
    x_flat = x_nchw.astype(jnp.float32).reshape(B, 1, 64)
    w3, wt, ssmall, sbig = _pack_consts(params)

    kernel = functools.partial(_unet_kernel, bblk=bblk)
    y = pl.pallas_call(
        kernel,
        out_shape=jax.ShapeDtypeStruct((B, 4, 1024), jnp.float32),
        grid=(B // bblk,),
        in_specs=[
            pl.BlockSpec((bblk, 1, 64), lambda g: (g, 0, 0)),
            pl.BlockSpec(w3.shape, lambda g: (0, 0, 0, 0)),
            pl.BlockSpec(wt.shape, lambda g: (0, 0, 0, 0)),
            pl.BlockSpec(ssmall.shape, lambda g: (0, 0, 0)),
            pl.BlockSpec(sbig.shape, lambda g: (0, 0, 0)),
        ],
        out_specs=pl.BlockSpec((bblk, 4, 1024), lambda g: (g, 0, 0)),
        compiler_params=pltpu.CompilerParams(
            dimension_semantics=("parallel",),
            vmem_limit_bytes=32 * 1024 * 1024),
    )(x_flat, w3, wt, ssmall, sbig)

    # Pure-layout unfold of the parity planes (16 KiB / image):
    # y[b, 2i+j, h*32+w] -> out[b, 0, 2h+i, 2w+j]
    return (y.reshape(B, 2, 2, 32, 32)
             .transpose(0, 3, 1, 4, 2)
             .reshape(B, 1, 64, 64))


# ----------------------------------- params ---------------------------------- #

def init_params(key):
    def conv_init(k, cin, cout, ksz):
        kw, kb = jax.random.split(k)
        bound = 1.0 / np.sqrt(cin * ksz * ksz)
        w = jax.random.uniform(kw, (cout, cin, ksz, ksz), jnp.float32, -bound, bound)
        b = jax.random.uniform(kb, (cout,), jnp.float32, -bound, bound)
        return w, b

    def convT_init(k, cin, cout, ksz):
        kw, kb = jax.random.split(k)
        bound = 1.0 / np.sqrt(cout * ksz * ksz)
        w = jax.random.uniform(kw, (cin, cout, ksz, ksz), jnp.float32, -bound, bound)
        b = jax.random.uniform(kb, (cout,), jnp.float32, -bound, bound)
        return w, b

    ks = jax.random.split(key, 9)
    p = {}
    p['enc1_w'], p['enc1_b'] = conv_init(ks[0], 1, 16, 3)
    p['enc2_w'], p['enc2_b'] = conv_init(ks[1], 16, 32, 3)
    p['bott_w'], p['bott_b'] = conv_init(ks[2], 32, 64, 3)
    p['up1_w'], p['up1_b'] = convT_init(ks[3], 64, 32, 2)
    p['dec1_w'], p['dec1_b'] = conv_init(ks[4], 64, 32, 3)
    p['up2_w'], p['up2_b'] = convT_init(ks[5], 32, 16, 2)
    p['dec2_w'], p['dec2_b'] = conv_init(ks[6], 32, 16, 3)
    p['up3_w'], p['up3_b'] = convT_init(ks[7], 16, 8, 2)
    p['fin_w'], p['fin_b'] = conv_init(ks[8], 8, 1, 1)
    return p


# ----------------------------- pure-XLA reference ----------------------------- #

def unet_reference(p, x):
    hp = jax.lax.Precision.HIGHEST

    def conv(x, w, b, pad):
        y = jax.lax.conv_general_dilated(
            x, w, (1, 1), ((pad, pad), (pad, pad)),
            dimension_numbers=('NCHW', 'OIHW', 'NCHW'), precision=hp)
        return y + b[None, :, None, None]

    def convT(x, w, b):
        wf = jnp.transpose(w, (1, 0, 2, 3))[:, :, ::-1, ::-1]
        y = jax.lax.conv_general_dilated(
            x, wf, (1, 1), ((1, 1), (1, 1)), lhs_dilation=(2, 2),
            dimension_numbers=('NCHW', 'OIHW', 'NCHW'), precision=hp)
        return y + b[None, :, None, None]

    def up(x, f):
        return jnp.repeat(jnp.repeat(x, f, axis=2), f, axis=3)

    relu = lambda v: jnp.maximum(v, 0.0)
    x1 = relu(conv(x, p['enc1_w'], p['enc1_b'], 1))
    x2 = relu(conv(x1, p['enc2_w'], p['enc2_b'], 1))
    xb = relu(conv(x2, p['bott_w'], p['bott_b'], 1))
    u1 = convT(xb, p['up1_w'], p['up1_b'])
    d1 = relu(conv(jnp.concatenate([u1, up(x2, 2)], axis=1), p['dec1_w'], p['dec1_b'], 1))
    u2 = convT(d1, p['up2_w'], p['up2_b'])
    d2 = relu(conv(jnp.concatenate([u2, up(x1, 4)], axis=1), p['dec2_w'], p['dec2_b'], 1))
    u3 = convT(d2, p['up3_w'], p['up3_b'])
    return jax.nn.sigmoid(conv(u3, p['fin_w'], p['fin_b'], 0))


# ------------------------------------ main ------------------------------------ #

if __name__ == "__main__":
    key = jax.random.PRNGKey(0)
    pkey, xkey = jax.random.split(key)
    params = init_params(pkey)
    x = jax.random.normal(xkey, (2, 1, 8, 8), jnp.float32)   # NCHW 8x8 radio map

    out = jax.block_until_ready(jax.jit(unet_forward)(params, x))

    assert out.shape == (2, 1, 64, 64), out.shape
    assert out.dtype == jnp.float32
    assert bool(jnp.all((out >= 0.0) & (out <= 1.0)))

    ref = jax.block_until_ready(jax.jit(unet_reference)(params, x))
    # Kernel uses default (bf16-pass) MXU precision; reference is HIGHEST-precision
    # XLA, so tolerance accounts for that (same tolerance passed previously).
    np.testing.assert_allclose(np.asarray(out), np.asarray(ref),
                               atol=5e-3, rtol=5e-3)

    print("KERNEL_OK")
</pallas_src>

<mosaic_0001>
module attributes {stable_mosaic.version = 11 : i64} {
  func.func @_unet_kernel(%arg0: i32, %arg1: memref<1x1x64xf32, #tpu.memory_space<vmem>>, %arg2: memref<6x10x64x64xf32, #tpu.memory_space<vmem>>, %arg3: memref<3x5x32x64xf32, #tpu.memory_space<vmem>>, %arg4: memref<5x64x256xbf16, #tpu.memory_space<vmem>>, %arg5: memref<5x256x1024xbf16, #tpu.memory_space<vmem>>, %arg6: memref<1x4x1024xf32, #tpu.memory_space<vmem>>) attributes {dimension_semantics = [#tpu.dimension_semantics<parallel>], iteration_bounds = array<i64: 2>, scalar_prefetch = 0 : i64, scratch_operands = 0 : i64, tpu.core_type = #tpu.core_type<tc>, window_params = [{transform_indices = @transform_0, window_bounds = array<i64: 1, 1, 64>}, {pipeline_mode = #tpu.pipeline_mode<synchronous>, transform_indices = @transform_1, window_bounds = array<i64: 6, 10, 64, 64>}, {pipeline_mode = #tpu.pipeline_mode<synchronous>, transform_indices = @transform_2, window_bounds = array<i64: 3, 5, 32, 64>}, {pipeline_mode = #tpu.pipeline_mode<synchronous>, transform_indices = @transform_3, window_bounds = array<i64: 5, 64, 256>}, {pipeline_mode = #tpu.pipeline_mode<synchronous>, transform_indices = @transform_4, window_bounds = array<i64: 5, 256, 1024>}, {transform_indices = @transform_5, window_bounds = array<i64: 1, 4, 1024>}]} {
    %0 = tpu.iota {dimensions = array<i32: 1>} : vector<1x256xi32>
    %c15_i32 = arith.constant 15 : i32
    %1 = vector.broadcast %c15_i32 : i32 to vector<1x256xi32>
    %2 = arith.andi %0, %1 : vector<1x256xi32>
    %c1_i32 = arith.constant 1 : i32
    %3 = vector.broadcast %c1_i32 : i32 to vector<1x256xi32>
    %4 = arith.cmpi sge, %2, %3 : vector<1x256xi32>
    %c14_i32 = arith.constant 14 : i32
    %5 = vector.broadcast %c14_i32 : i32 to vector<1x256xi32>
    %6 = arith.cmpi sle, %2, %5 : vector<1x256xi32>
    %7 = tpu.iota {dimensions = array<i32: 1>} : vector<1x1024xi32>
    %c31_i32 = arith.constant 31 : i32
    %8 = vector.broadcast %c31_i32 : i32 to vector<1x1024xi32>
    %9 = arith.andi %7, %8 : vector<1x1024xi32>
    %c1_i32_0 = arith.constant 1 : i32
    %10 = vector.broadcast %c1_i32_0 : i32 to vector<1x1024xi32>
    %11 = arith.cmpi sge, %9, %10 : vector<1x1024xi32>
    %c30_i32 = arith.constant 30 : i32
    %12 = vector.broadcast %c30_i32 : i32 to vector<1x1024xi32>
    %13 = arith.cmpi sle, %9, %12 : vector<1x1024xi32>
    %c0 = arith.constant 0 : index
    %c0_1 = arith.constant 0 : index
    %c0_2 = arith.constant 0 : index
    %14 = vector.load %arg1[%c0, %c0_1, %c0_2] : memref<1x1x64xf32, #tpu.memory_space<vmem>>, vector<1x1x64xf32>
    %15 = vector.shape_cast %14 : vector<1x1x64xf32> to vector<1x64xf32>
    %c5 = arith.constant 5 : index
    %c0_3 = arith.constant 0 : index
    %c0_4 = arith.constant 0 : index
    %c0_5 = arith.constant 0 : index
    %16 = vector.load %arg2[%c5, %c0_3, %c0_4, %c0_5] : memref<6x10x64x64xf32, #tpu.memory_space<vmem>>, vector<1x1x64x64xf32>
    %17 = vector.shape_cast %16 : vector<1x1x64x64xf32> to vector<64x64xf32>
    %cst = arith.constant dense<0.000000e+00> : vector<1x64xf32>
    %18 = tpu.matmul %15, %17, %cst {dimension_numbers = #tpu.dot_dimension_numbers<[1], [0], [0], [1], [0, 0, 1, 1], [], []>} : vector<1x64xf32>, vector<64x64xf32>, vector<1x64xf32> -> vector<1x64xf32>
    %c0_6 = arith.constant 0 : index
    %c0_7 = arith.constant 0 : index
    %c0_8 = arith.constant 0 : index
    %c0_9 = arith.constant 0 : index
    %19 = vector.load %arg2[%c0_6, %c0_7, %c0_8, %c0_9] : memref<6x10x64x64xf32, #tpu.memory_space<vmem>>, vector<1x1x64x64xf32>
    %20 = vector.shape_cast %19 : vector<1x1x64x64xf32> to vector<64x64xf32>
    %21 = vector.extract_strided_slice %20 {offsets = [0, 0], sizes = [16, 1], strides = [1, 1]} : vector<64x64xf32> to vector<16x1xf32>
    %22 = vector.broadcast %21 : vector<16x1xf32> to vector<16x64xf32>
    %23 = vector.broadcast %18 : vector<1x64xf32> to vector<16x64xf32>
    %24 = arith.mulf %22, %23 : vector<16x64xf32>
    %c5_10 = arith.constant 5 : index
    %c1 = arith.constant 1 : index
    %c0_11 = arith.constant 0 : index
    %c0_12 = arith.constant 0 : index
    %25 = vector.load %arg2[%c5_10, %c1, %c0_11, %c0_12] : memref<6x10x64x64xf32, #tpu.memory_space<vmem>>, vector<1x1x64x64xf32>
    %26 = vector.shape_cast %25 : vector<1x1x64x64xf32> to vector<64x64xf32>
    %cst_13 = arith.constant dense<0.000000e+00> : vector<1x64xf32>
    %27 = tpu.matmul %15, %26, %cst_13 {dimension_numbers = #tpu.dot_dimension_numbers<[1], [0], [0], [1], [0, 0, 1, 1], [], []>} : vector<1x64xf32>, vector<64x64xf32>, vector<1x64xf32> -> vector<1x64xf32>
    %c0_14 = arith.constant 0 : index
    %c1_15 = arith.constant 1 : index
    %c0_16 = arith.constant 0 : index
    %c0_17 = arith.constant 0 : index
    %28 = vector.load %arg2[%c0_14, %c1_15, %c0_16, %c0_17] : memref<6x10x64x64xf32, #tpu.memory_space<vmem>>, vector<1x1x64x64xf32>
    %29 = vector.shape_cast %28 : vector<1x1x64x64xf32> to vector<64x64xf32>
    %30 = vector.extract_strided_slice %29 {offsets = [0, 0], sizes = [16, 1], strides = [1, 1]} : vector<64x64xf32> to vector<16x1xf32>
    %31 = vector.broadcast %30 : vector<16x1xf32> to vector<16x64xf32>
    %32 = vector.broadcast %27 : vector<1x64xf32> to vector<16x64xf32>
    %33 = arith.mulf %31, %32 : vector<16x64xf32>
    %34 = arith.addf %24, %33 : vector<16x64xf32>
    %c5_18 = arith.constant 5 : index
    %c2 = arith.constant 2 : index
    %c0_19 = arith.constant 0 : index
    %c0_20 = arith.constant 0 : index
    %35 = vector.load %arg2[%c5_18, %c2, %c0_19, %c0_20] : memref<6x10x64x64xf32, #tpu.memory_space<vmem>>, vector<1x1x64x64xf32>
    %36 = vector.shape_cast %35 : vector<1x1x64x64xf32> to vector<64x64xf32>
    %cst_21 = arith.constant dense<0.000000e+00> : vector<1x64xf32>
    %37 = tpu.matmul %15, %36, %cst_21 {dimension_numbers = #tpu.dot_dimension_numbers<[1], [0], [0], [1], [0, 0, 1, 1], [], []>} : vector<1x64xf32>, vector<64x64xf32>, vector<1x64xf32> -> vector<1x64xf32>
    %c0_22 = arith.constant 0 : index
    %c2_23 = arith.constant 2 : index
    %c0_24 = arith.constant 0 : index
    %c0_25 = arith.constant 0 : index
    %38 = vector.load %arg2[%c0_22, %c2_23, %c0_24, %c0_25] : memref<6x10x64x64xf32, #tpu.memory_space<vmem>>, vector<1x1x64x64xf32>
    %39 = vector.shape_cast %38 : vector<1x1x64x64xf32> to vector<64x64xf32>
    %40 = vector.extract_strided_slice %39 {offsets = [0, 0], sizes = [16, 1], strides = [1, 1]} : vector<64x64xf32> to vector<16x1xf32>
    %41 = vector.broadcast %40 : vector<16x1xf32> to vector<16x64xf32>
    %42 = vector.broadcast %37 : vector<1x64xf32> to vector<16x64xf32>
    %43 = arith.mulf %41, %42 : vector<16x64xf32>
    %44 = arith.addf %34, %43 : vector<16x64xf32>
    %c5_26 = arith.constant 5 : index
    %c3 = arith.constant 3 : index
    %c0_27 = arith.constant 0 : index
    %c0_28 = arith.constant 0 : index
    %45 = vector.load %arg2[%c5_26, %c3, %c0_27, %c0_28] : memref<6x10x64x64xf32, #tpu.memory_space<vmem>>, vector<1x1x64x64xf32>
    %46 = vector.shape_cast %45 : vector<1x1x64x64xf32> to vector<64x64xf32>
    %cst_29 = arith.constant dense<0.000000e+00> : vector<1x64xf32>
    %47 = tpu.matmul %15, %46, %cst_29 {dimension_numbers = #tpu.dot_dimension_numbers<[1], [0], [0], [1], [0, 0, 1, 1], [], []>} : vector<1x64xf32>, vector<64x64xf32>, vector<1x64xf32> -> vector<1x64xf32>
    %c0_30 = arith.constant 0 : index
    %c3_31 = arith.constant 3 : index
    %c0_32 = arith.constant 0 : index
    %c0_33 = arith.constant 0 : index
    %48 = vector.load %arg2[%c0_30, %c3_31, %c0_32, %c0_33] : memref<6x10x64x64xf32, #tpu.memory_space<vmem>>, vector<1x1x64x64xf32>
    %49 = vector.shape_cast %48 : vector<1x1x64x64xf32> to vector<64x64xf32>
    %50 = vector.extract_strided_slice %49 {offsets = [0, 0], sizes = [16, 1], strides = [1, 1]} : vector<64x64xf32> to vector<16x1xf32>
    %51 = vector.broadcast %50 : vector<16x1xf32> to vector<16x64xf32>
    %52 = vector.broadcast %47 : vector<1x64xf32> to vector<16x64xf32>
    %53 = arith.mulf %51, %52 : vector<16x64xf32>
    %54 = arith.addf %44, %53 : vector<16x64xf32>
    %c5_34 = arith.constant 5 : index
    %c4 = arith.constant 4 : index
    %c0_35 = arith.constant 0 : index
    %c0_36 = arith.constant 0 : index
    %55 = vector.load %arg2[%c5_34, %c4, %c0_35, %c0_36] : memref<6x10x64x64xf32, #tpu.memory_space<vmem>>, vector<1x1x64x64xf32>
    %56 = vector.shape_cast %55 : vector<1x1x64x64xf32> to vector<64x64xf32>
    %cst_37 = arith.constant dense<0.000000e+00> : vector<1x64xf32>
    %57 = tpu.matmul %15, %56, %cst_37 {dimension_numbers = #tpu.dot_dimension_numbers<[1], [0], [0], [1], [0, 0, 1, 1], [], []>} : vector<1x64xf32>, vector<64x64xf32>, vector<1x64xf32> -> vector<1x64xf32>
    %c0_38 = arith.constant 0 : index
    %c4_39 = arith.constant 4 : index
    %c0_40 = arith.constant 0 : index
    %c0_41 = arith.constant 0 : index
    %58 = vector.load %arg2[%c0_38, %c4_39, %c0_40, %c0_41] : memref<6x10x64x64xf32, #tpu.memory_space<vmem>>, vector<1x1x64x64xf32>
    %59 = vector.shape_cast %58 : vector<1x1x64x64xf32> to vector<64x64xf32>
    %60 = vector.extract_strided_slice %59 {offsets = [0, 0], sizes = [16, 1], strides = [1, 1]} : vector<64x64xf32> to vector<16x1xf32>
    %61 = vector.broadcast %60 : vector<16x1xf32> to vector<16x64xf32>
    %62 = vector.broadcast %57 : vector<1x64xf32> to vector<16x64xf32>
    %63 = arith.mulf %61, %62 : vector<16x64xf32>
    %64 = arith.addf %54, %63 : vector<16x64xf32>
    %c5_42 = arith.constant 5 : index
    %c5_43 = arith.constant 5 : index
    %c0_44 = arith.constant 0 : index
    %c0_45 = arith.constant 0 : index
    %65 = vector.load %arg2[%c5_42, %c5_43, %c0_44, %c0_45] : memref<6x10x64x64xf32, #tpu.memory_space<vmem>>, vector<1x1x64x64xf32>
    %66 = vector.shape_cast %65 : vector<1x1x64x64xf32> to vector<64x64xf32>
    %cst_46 = arith.constant dense<0.000000e+00> : vector<1x64xf32>
    %67 = tpu.matmul %15, %66, %cst_46 {dimension_numbers = #tpu.dot_dimension_numbers<[1], [0], [0], [1], [0, 0, 1, 1], [], []>} : vector<1x64xf32>, vector<64x64xf32>, vector<1x64xf32> -> vector<1x64xf32>
    %c0_47 = arith.constant 0 : index
    %c5_48 = arith.constant 5 : index
    %c0_49 = arith.constant 0 : index
    %c0_50 = arith.constant 0 : index
    %68 = vector.load %arg2[%c0_47, %c5_48, %c0_49, %c0_50] : memref<6x10x64x64xf32, #tpu.memory_space<vmem>>, vector<1x1x64x64xf32>
    %69 = vector.shape_cast %68 : vector<1x1x64x64xf32> to vector<64x64xf32>
    %70 = vector.extract_strided_slice %69 {offsets = [0, 0], sizes = [16, 1], strides = [1, 1]} : vector<64x64xf32> to vector<16x1xf32>
    %71 = vector.broadcast %70 : vector<16x1xf32> to vector<16x64xf32>
    %72 = vector.broadcast %67 : vector<1x64xf32> to vector<16x64xf32>
    %73 = arith.mulf %71, %72 : vector<16x64xf32>
    %74 = arith.addf %64, %73 : vector<16x64xf32>
    %c5_51 = arith.constant 5 : index
    %c6 = arith.constant 6 : index
    %c0_52 = arith.constant 0 : index
    %c0_53 = arith.constant 0 : index
    %75 = vector.load %arg2[%c5_51, %c6, %c0_52, %c0_53] : memref<6x10x64x64xf32, #tpu.memory_space<vmem>>, vector<1x1x64x64xf32>
    %76 = vector.shape_cast %75 : vector<1x1x64x64xf32> to vector<64x64xf32>
    %cst_54 = arith.constant dense<0.000000e+00> : vector<1x64xf32>
    %77 = tpu.matmul %15, %76, %cst_54 {dimension_numbers = #tpu.dot_dimension_numbers<[1], [0], [0], [1], [0, 0, 1, 1], [], []>} : vector<1x64xf32>, vector<64x64xf32>, vector<1x64xf32> -> vector<1x64xf32>
    %c0_55 = arith.constant 0 : index
    %c6_56 = arith.constant 6 : index
    %c0_57 = arith.constant 0 : index
    %c0_58 = arith.constant 0 : index
    %78 = vector.load %arg2[%c0_55, %c6_56, %c0_57, %c0_58] : memref<6x10x64x64xf32, #tpu.memory_space<vmem>>, vector<1x1x64x64xf32>
    %79 = vector.shape_cast %78 : vector<1x1x64x64xf32> to vector<64x64xf32>
    %80 = vector.extract_strided_slice %79 {offsets = [0, 0], sizes = [16, 1], strides = [1, 1]} : vector<64x64xf32> to vector<16x1xf32>
    %81 = vector.broadcast %80 : vector<16x1xf32> to vector<16x64xf32>
    %82 = vector.broadcast %77 : vector<1x64xf32> to vector<16x64xf32>
    %83 = arith.mulf %81, %82 : vector<16x64xf32>
    %84 = arith.addf %74, %83 : vector<16x64xf32>
    %c5_59 = arith.constant 5 : index
    %c7 = arith.constant 7 : index
    %c0_60 = arith.constant 0 : index
    %c0_61 = arith.constant 0 : index
    %85 = vector.load %arg2[%c5_59, %c7, %c0_60, %c0_61] : memref<6x10x64x64xf32, #tpu.memory_space<vmem>>, vector<1x1x64x64xf32>
    %86 = vector.shape_cast %85 : vector<1x1x64x64xf32> to vector<64x64xf32>
    %cst_62 = arith.constant dense<0.000000e+00> : vector<1x64xf32>
    %87 = tpu.matmul %15, %86, %cst_62 {dimension_numbers = #tpu.dot_dimension_numbers<[1], [0], [0], [1], [0, 0, 1, 1], [], []>} : vector<1x64xf32>, vector<64x64xf32>, vector<1x64xf32> -> vector<1x64xf32>
    %c0_63 = arith.constant 0 : index
    %c7_64 = arith.constant 7 : index
    %c0_65 = arith.constant 0 : index
    %c0_66 = arith.constant 0 : index
    %88 = vector.load %arg2[%c0_63, %c7_64, %c0_65, %c0_66] : memref<6x10x64x64xf32, #tpu.memory_space<vmem>>, vector<1x1x64x64xf32>
    %89 = vector.shape_cast %88 : vector<1x1x64x64xf32> to vector<64x64xf32>
    %90 = vector.extract_strided_slice %89 {offsets = [0, 0], sizes = [16, 1], strides = [1, 1]} : vector<64x64xf32> to vector<16x1xf32>
    %91 = vector.broadcast %90 : vector<16x1xf32> to vector<16x64xf32>
    %92 = vector.broadcast %87 : vector<1x64xf32> to vector<16x64xf32>
    %93 = arith.mulf %91, %92 : vector<16x64xf32>
    %94 = arith.addf %84, %93 : vector<16x64xf32>
    %c5_67 = arith.constant 5 : index
    %c8 = arith.constant 8 : index
    %c0_68 = arith.constant 0 : index
    %c0_69 = arith.constant 0 : index
    %95 = vector.load %arg2[%c5_67, %c8, %c0_68, %c0_69] : memref<6x10x64x64xf32, #tpu.memory_space<vmem>>, vector<1x1x64x64xf32>
    %96 = vector.shape_cast %95 : vector<1x1x64x64xf32> to vector<64x64xf32>
    %cst_70 = arith.constant dense<0.000000e+00> : vector<1x64xf32>
    %97 = tpu.matmul %15, %96, %cst_70 {dimension_numbers = #tpu.dot_dimension_numbers<[1], [0], [0], [1], [0, 0, 1, 1], [], []>} : vector<1x64xf32>, vector<64x64xf32>, vector<1x64xf32> -> vector<1x64xf32>
    %c0_71 = arith.constant 0 : index
    %c8_72 = arith.constant 8 : index
    %c0_73 = arith.constant 0 : index
    %c0_74 = arith.constant 0 : index
    %98 = vector.load %arg2[%c0_71, %c8_72, %c0_73, %c0_74] : memref<6x10x64x64xf32, #tpu.memory_space<vmem>>, vector<1x1x64x64xf32>
    %99 = vector.shape_cast %98 : vector<1x1x64x64xf32> to vector<64x64xf32>
    %100 = vector.extract_strided_slice %99 {offsets = [0, 0], sizes = [16, 1], strides = [1, 1]} : vector<64x64xf32> to vector<16x1xf32>
    %101 = vector.broadcast %100 : vector<16x1xf32> to vector<16x64xf32>
    %102 = vector.broadcast %97 : vector<1x64xf32> to vector<16x64xf32>
    %103 = arith.mulf %101, %102 : vector<16x64xf32>
    %104 = arith.addf %94, %103 : vector<16x64xf32>
    %c0_75 = arith.constant 0 : index
    %c9 = arith.constant 9 : index
    %c0_76 = arith.constant 0 : index
    %c0_77 = arith.constant 0 : index
    %105 = vector.load %arg2[%c0_75, %c9, %c0_76, %c0_77] : memref<6x10x64x64xf32, #tpu.memory_space<vmem>>, vector<1x1x64x64xf32>
    %106 = vector.shape_cast %105 : vector<1x1x64x64xf32> to vector<64x64xf32>
    %107 = vector.extract_strided_slice %106 {offsets = [0, 0], sizes = [16, 1], strides = [1, 1]} : vector<64x64xf32> to vector<16x1xf32>
    %108 = vector.broadcast %107 : vector<16x1xf32> to vector<16x64xf32>
    %109 = arith.addf %104, %108 : vector<16x64xf32>
    %cst_78 = arith.constant 0.000000e+00 : f32
    %110 = vector.broadcast %cst_78 : f32 to vector<16x64xf32>
    %111 = arith.maximumf %109, %110 : vector<16x64xf32>
    %c5_79 = arith.constant 5 : index
    %c0_80 = arith.constant 0 : index
    %c0_81 = arith.constant 0 : index
    %c0_82 = arith.constant 0 : index
    %112 = vector.load %arg2[%c5_79, %c0_80, %c0_81, %c0_82] : memref<6x10x64x64xf32, #tpu.memory_space<vmem>>, vector<1x1x64x64xf32>
    %113 = vector.shape_cast %112 : vector<1x1x64x64xf32> to vector<64x64xf32>
    %cst_83 = arith.constant dense<0.000000e+00> : vector<16x64xf32>
    %114 = tpu.matmul %111, %113, %cst_83 {dimension_numbers = #tpu.dot_dimension_numbers<[1], [0], [0], [1], [0, 0, 1, 1], [], []>} : vector<16x64xf32>, vector<64x64xf32>, vector<16x64xf32> -> vector<16x64xf32>
    %c1_84 = arith.constant 1 : index
    %c0_85 = arith.constant 0 : index
    %c0_86 = arith.constant 0 : index
    %c0_87 = arith.constant 0 : index
    %115 = vector.load %arg2[%c1_84, %c0_85, %c0_86, %c0_87] : memref<6x10x64x64xf32, #tpu.memory_space<vmem>>, vector<1x1x64x64xf32>
    %116 = vector.shape_cast %115 : vector<1x1x64x64xf32> to vector<64x64xf32>
    %117 = vector.extract_strided_slice %116 {offsets = [0, 0], sizes = [32, 16], strides = [1, 1]} : vector<64x64xf32> to vector<32x16xf32>
    %cst_88 = arith.constant dense<0.000000e+00> : vector<32x64xf32>
    %118 = tpu.matmul %117, %114, %cst_88 {dimension_numbers = #tpu.dot_dimension_numbers<[1], [0], [0], [1], [0, 0, 1, 1], [], []>} : vector<32x16xf32>, vector<16x64xf32>, vector<32x64xf32> -> vector<32x64xf32>
    %c5_89 = arith.constant 5 : index
    %c1_90 = arith.constant 1 : index
    %c0_91 = arith.constant 0 : index
    %c0_92 = arith.constant 0 : index
    %119 = vector.load %arg2[%c5_89, %c1_90, %c0_91, %c0_92] : memref<6x10x64x64xf32, #tpu.memory_space<vmem>>, vector<1x1x64x64xf32>
    %120 = vector.shape_cast %119 : vector<1x1x64x64xf32> to vector<64x64xf32>
    %cst_93 = arith.constant dense<0.000000e+00> : vector<16x64xf32>
    %121 = tpu.matmul %111, %120, %cst_93 {dimension_numbers = #tpu.dot_dimension_numbers<[1], [0], [0], [1], [0, 0, 1, 1], [], []>} : vector<16x64xf32>, vector<64x64xf32>, vector<16x64xf32> -> vector<16x64xf32>
    %c1_94 = arith.constant 1 : index
    %c1_95 = arith.constant 1 : index
    %c0_96 = arith.constant 0 : index
    %c0_97 = arith.constant 0 : index
    %122 = vector.load %arg2[%c1_94, %c1_95, %c0_96, %c0_97] : memref<6x10x64x64xf32, #tpu.memory_space<vmem>>, vector<1x1x64x64xf32>
    %123 = vector.shape_cast %122 : vector<1x1x64x64xf32> to vector<64x64xf32>
    %124 = vector.extract_strided_slice %123 {offsets = [0, 0], sizes = [32, 16], strides = [1, 1]} : vector<64x64xf32> to vector<32x16xf32>
    %cst_98 = arith.constant dense<0.000000e+00> : vector<32x64xf32>
    %125 = tpu.matmul %124, %121, %cst_98 {dimension_numbers = #tpu.dot_dimension_numbers<[1], [0], [0], [1], [0, 0, 1, 1], [], []>} : vector<32x16xf32>, vector<16x64xf32>, vector<32x64xf32> -> vector<32x64xf32>
    %126 = arith.addf %118, %125 : vector<32x64xf32>
    %c5_99 = arith.constant 5 : index
    %c2_100 = arith.constant 2 : index
    %c0_101 = arith.constant 0 : index
    %c0_102 = arith.constant 0 : index
    %127 = vector.load %arg2[%c5_99, %c2_100, %c0_101, %c0_102] : memref<6x10x64x64xf32, #tpu.memory_space<vmem>>, vector<1x1x64x64xf32>
    %128 = vector.shape_cast %127 : vector<1x1x64x64xf32> to vector<64x64xf32>
    %cst_103 = arith.constant dense<0.000000e+00> : vector<16x64xf32>
    %129 = tpu.matmul %111, %128, %cst_103 {dimension_numbers = #tpu.dot_dimension_numbers<[1], [0], [0], [1], [0, 0, 1, 1], [], []>} : vector<16x64xf32>, vector<64x64xf32>, vector<16x64xf32> -> vector<16x64xf32>
    %c1_104 = arith.constant 1 : index
    %c2_105 = arith.constant 2 : index
    %c0_106 = arith.constant 0 : index
    %c0_107 = arith.constant 0 : index
    %130 = vector.load %arg2[%c1_104, %c2_105, %c0_106, %c0_107] : memref<6x10x64x64xf32, #tpu.memory_space<vmem>>, vector<1x1x64x64xf32>
    %131 = vector.shape_cast %130 : vector<1x1x64x64xf32> to vector<64x64xf32>
    %132 = vector.extract_strided_slice %131 {offsets = [0, 0], sizes = [32, 16], strides = [1, 1]} : vector<64x64xf32> to vector<32x16xf32>
    %cst_108 = arith.constant dense<0.000000e+00> : vector<32x64xf32>
    %133 = tpu.matmul %132, %129, %cst_108 {dimension_numbers = #tpu.dot_dimension_numbers<[1], [0], [0], [1], [0, 0, 1, 1], [], []>} : vector<32x16xf32>, vector<16x64xf32>, vector<32x64xf32> -> vector<32x64xf32>
    %134 = arith.addf %126, %133 : vector<32x64xf32>
    %c5_109 = arith.constant 5 : index
    %c3_110 = arith.constant 3 : index
    %c0_111 = arith.constant 0 : index
    %c0_112 = arith.constant 0 : index
    %135 = vector.load %arg2[%c5_109, %c3_110, %c0_111, %c0_112] : memref<6x10x64x64xf32, #tpu.memory_space<vmem>>, vector<1x1x64x64xf32>
    %136 = vector.shape_cast %135 : vector<1x1x64x64xf32> to vector<64x64xf32>
    %cst_113 = arith.constant dense<0.000000e+00> : vector<16x64xf32>
    %137 = tpu.matmul %111, %136, %cst_113 {dimension_numbers = #tpu.dot_dimension_numbers<[1], [0], [0], [1], [0, 0, 1, 1], [], []>} : vector<16x64xf32>, vector<64x64xf32>, vector<16x64xf32> -> vector<16x64xf32>
    %c1_114 = arith.constant 1 : index
    %c3_115 = arith.constant 3 : index
    %c0_116 = arith.constant 0 : index
    %c0_117 = arith.constant 0 : index
    %138 = vector.load %arg2[%c1_114, %c3_115, %c0_116, %c0_117] : memref<6x10x64x64xf32, #tpu.memory_space<vmem>>, vector<1x1x64x64xf32>
    %139 = vector.shape_cast %138 : vector<1x1x64x64xf32> to vector<64x64xf32>
    %140 = vector.extract_strided_slice %139 {offsets = [0, 0], sizes = [32, 16], strides = [1, 1]} : vector<64x64xf32> to vector<32x16xf32>
    %cst_118 = arith.constant dense<0.000000e+00> : vector<32x64xf32>
    %141 = tpu.matmul %140, %137, %cst_118 {dimension_numbers = #tpu.dot_dimension_numbers<[1], [0], [0], [1], [0, 0, 1, 1], [], []>} : vector<32x16xf32>, vector<16x64xf32>, vector<32x64xf32> -> vector<32x64xf32>
    %142 = arith.addf %134, %141 : vector<32x64xf32>
    %c5_119 = arith.constant 5 : index
    %c4_120 = arith.constant 4 : index
    %c0_121 = arith.constant 0 : index
    %c0_122 = arith.constant 0 : index
    %143 = vector.load %arg2[%c5_119, %c4_120, %c0_121, %c0_122] : memref<6x10x64x64xf32, #tpu.memory_space<vmem>>, vector<1x1x64x64xf32>
    %144 = vector.shape_cast %143 : vector<1x1x64x64xf32> to vector<64x64xf32>
    %cst_123 = arith.constant dense<0.000000e+00> : vector<16x64xf32>
    %145 = tpu.matmul %111, %144, %cst_123 {dimension_numbers = #tpu.dot_dimension_numbers<[1], [0], [0], [1], [0, 0, 1, 1], [], []>} : vector<16x64xf32>, vector<64x64xf32>, vector<16x64xf32> -> vector<16x64xf32>
    %c1_124 = arith.constant 1 : index
    %c4_125 = arith.constant 4 : index
    %c0_126 = arith.constant 0 : index
    %c0_127 = arith.constant 0 : index
    %146 = vector.load %arg2[%c1_124, %c4_125, %c0_126, %c0_127] : memref<6x10x64x64xf32, #tpu.memory_space<vmem>>, vector<1x1x64x64xf32>
    %147 = vector.shape_cast %146 : vector<1x1x64x64xf32> to vector<64x64xf32>
    %148 = vector.extract_strided_slice %147 {offsets = [0, 0], sizes = [32, 16], strides = [1, 1]} : vector<64x64xf32> to vector<32x16xf32>
    %cst_128 = arith.constant dense<0.000000e+00> : vector<32x64xf32>
    %149 = tpu.matmul %148, %145, %cst_128 {dimension_numbers = #tpu.dot_dimension_numbers<[1], [0], [0], [1], [0, 0, 1, 1], [], []>} : vector<32x16xf32>, vector<16x64xf32>, vector<32x64xf32> -> vector<32x64xf32>
    %150 = arith.addf %142, %149 : vector<32x64xf32>
    %c5_129 = arith.constant 5 : index
    %c5_130 = arith.constant 5 : index
    %c0_131 = arith.constant 0 : index
    %c0_132 = arith.constant 0 : index
    %151 = vector.load %arg2[%c5_129, %c5_130, %c0_131, %c0_132] : memref<6x10x64x64xf32, #tpu.memory_space<vmem>>, vector<1x1x64x64xf32>
    %152 = vector.shape_cast %151 : vector<1x1x64x64xf32> to vector<64x64xf32>
    %cst_133 = arith.constant dense<0.000000e+00> : vector<16x64xf32>
    %153 = tpu.matmul %111, %152, %cst_133 {dimension_numbers = #tpu.dot_dimension_numbers<[1], [0], [0], [1], [0, 0, 1, 1], [], []>} : vector<16x64xf32>, vector<64x64xf32>, vector<16x64xf32> -> vector<16x64xf32>
    %c1_134 = arith.constant 1 : index
    %c5_135 = arith.constant 5 : index
    %c0_136 = arith.constant 0 : index
    %c0_137 = arith.constant 0 : index
    %154 = vector.load %arg2[%c1_134, %c5_135, %c0_136, %c0_137] : memref<6x10x64x64xf32, #tpu.memory_space<vmem>>, vector<1x1x64x64xf32>
    %155 = vector.shape_cast %154 : vector<1x1x64x64xf32> to vector<64x64xf32>
    %156 = vector.extract_strided_slice %155 {offsets = [0, 0], sizes = [32, 16], strides = [1, 1]} : vector<64x64xf32> to vector<32x16xf32>
    %cst_138 = arith.constant dense<0.000000e+00> : vector<32x64xf32>
    %157 = tpu.matmul %156, %153, %cst_138 {dimension_numbers = #tpu.dot_dimension_numbers<[1], [0], [0], [1], [0, 0, 1, 1], [], []>} : vector<32x16xf32>, vector<16x64xf32>, vector<32x64xf32> -> vector<32x64xf32>
    %158 = arith.addf %150, %157 : vector<32x64xf32>
    %c5_139 = arith.constant 5 : index
    %c6_140 = arith.constant 6 : index
    %c0_141 = arith.constant 0 : index
    %c0_142 = arith.constant 0 : index
    %159 = vector.load %arg2[%c5_139, %c6_140, %c0_141, %c0_142] : memref<6x10x64x64xf32, #tpu.memory_space<vmem>>, vector<1x1x64x64xf32>
    %160 = vector.shape_cast %159 : vector<1x1x64x64xf32> to vector<64x64xf32>
    %cst_143 = arith.constant dense<0.000000e+00> : vector<16x64xf32>
    %161 = tpu.matmul %111, %160, %cst_143 {dimension_numbers = #tpu.dot_dimension_numbers<[1], [0], [0], [1], [0, 0, 1, 1], [], []>} : vector<16x64xf32>, vector<64x64xf32>, vector<16x64xf32> -> vector<16x64xf32>
    %c1_144 = arith.constant 1 : index
    %c6_145 = arith.constant 6 : index
    %c0_146 = arith.constant 0 : index
    %c0_147 = arith.constant 0 : index
    %162 = vector.load %arg2[%c1_144, %c6_145, %c0_146, %c0_147] : memref<6x10x64x64xf32, #tpu.memory_space<vmem>>, vector<1x1x64x64xf32>
    %163 = vector.shape_cast %162 : vector<1x1x64x64xf32> to vector<64x64xf32>
    %164 = vector.extract_strided_slice %163 {offsets = [0, 0], sizes = [32, 16], strides = [1, 1]} : vector<64x64xf32> to vector<32x16xf32>
    %cst_148 = arith.constant dense<0.000000e+00> : vector<32x64xf32>
    %165 = tpu.matmul %164, %161, %cst_148 {dimension_numbers = #tpu.dot_dimension_numbers<[1], [0], [0], [1], [0, 0, 1, 1], [], []>} : vector<32x16xf32>, vector<16x64xf32>, vector<32x64xf32> -> vector<32x64xf32>
    %166 = arith.addf %158, %165 : vector<32x64xf32>
    %c5_149 = arith.constant 5 : index
    %c7_150 = arith.constant 7 : index
    %c0_151 = arith.constant 0 : index
    %c0_152 = arith.constant 0 : index
    %167 = vector.load %arg2[%c5_149, %c7_150, %c0_151, %c0_152] : memref<6x10x64x64xf32, #tpu.memory_space<vmem>>, vector<1x1x64x64xf32>
    %168 = vector.shape_cast %167 : vector<1x1x64x64xf32> to vector<64x64xf32>
    %cst_153 = arith.constant dense<0.000000e+00> : vector<16x64xf32>
    %169 = tpu.matmul %111, %168, %cst_153 {dimension_numbers = #tpu.dot_dimension_numbers<[1], [0], [0], [1], [0, 0, 1, 1], [], []>} : vector<16x64xf32>, vector<64x64xf32>, vector<16x64xf32> -> vector<16x64xf32>
    %c1_154 = arith.constant 1 : index
    %c7_155 = arith.constant 7 : index
    %c0_156 = arith.constant 0 : index
    %c0_157 = arith.constant 0 : index
    %170 = vector.load %arg2[%c1_154, %c7_155, %c0_156, %c0_157] : memref<6x10x64x64xf32, #tpu.memory_space<vmem>>, vector<1x1x64x64xf32>
    %171 = vector.shape_cast %170 : vector<1x1x64x64xf32> to vector<64x64xf32>
    %172 = vector.extract_strided_slice %171 {offsets = [0, 0], sizes = [32, 16], strides = [1, 1]} : vector<64x64xf32> to vector<32x16xf32>
    %cst_158 = arith.constant dense<0.000000e+00> : vector<32x64xf32>
    %173 = tpu.matmul %172, %169, %cst_158 {dimension_numbers = #tpu.dot_dimension_numbers<[1], [0], [0], [1], [0, 0, 1, 1], [], []>} : vector<32x16xf32>, vector<16x64xf32>, vector<32x64xf32> -> vector<32x64xf32>
    %174 = arith.addf %166, %173 : vector<32x64xf32>
    %c5_159 = arith.constant 5 : index
    %c8_160 = arith.constant 8 : index
    %c0_161 = arith.constant 0 : index
    %c0_162 = arith.constant 0 : index
    %175 = vector.load %arg2[%c5_159, %c8_160, %c0_161, %c0_162] : memref<6x10x64x64xf32, #tpu.memory_space<vmem>>, vector<1x1x64x64xf32>
    %176 = vector.shape_cast %175 : vector<1x1x64x64xf32> to vector<64x64xf32>
    %cst_163 = arith.constant dense<0.000000e+00> : vector<16x64xf32>
    %177 = tpu.matmul %111, %176, %cst_163 {dimension_numbers = #tpu.dot_dimension_numbers<[1], [0], [0], [1], [0, 0, 1, 1], [], []>} : vector<16x64xf32>, vector<64x64xf32>, vector<16x64xf32> -> vector<16x64xf32>
    %c1_164 = arith.constant 1 : index
    %c8_165 = arith.constant 8 : index
    %c0_166 = arith.constant 0 : index
    %c0_167 = arith.constant 0 : index
    %178 = vector.load %arg2[%c1_164, %c8_165, %c0_166, %c0_167] : memref<6x10x64x64xf32, #tpu.memory_space<vmem>>, vector<1x1x64x64xf32>
    %179 = vector.shape_cast %178 : vector<1x1x64x64xf32> to vector<64x64xf32>
    %180 = vector.extract_strided_slice %179 {offsets = [0, 0], sizes = [32, 16], strides = [1, 1]} : vector<64x64xf32> to vector<32x16xf32>
    %cst_168 = arith.constant dense<0.000000e+00> : vector<32x64xf32>
    %181 = tpu.matmul %180, %177, %cst_168 {dimension_numbers = #tpu.dot_dimension_numbers<[1], [0], [0], [1], [0, 0, 1, 1], [], []>} : vector<32x16xf32>, vector<16x64xf32>, vector<32x64xf32> -> vector<32x64xf32>
    %182 = arith.addf %174, %181 : vector<32x64xf32>
    %c1_169 = arith.constant 1 : index
    %c9_170 = arith.constant 9 : index
    %c0_171 = arith.constant 0 : index
    %c0_172 = arith.constant 0 : index
    %183 = vector.load %arg2[%c1_169, %c9_170, %c0_171, %c0_172] : memref<6x10x64x64xf32, #tpu.memory_space<vmem>>, vector<1x1x64x64xf32>
    %184 = vector.shape_cast %183 : vector<1x1x64x64xf32> to vector<64x64xf32>
    %185 = vector.extract_strided_slice %184 {offsets = [0, 0], sizes = [32, 1], strides = [1, 1]} : vector<64x64xf32> to vector<32x1xf32>
    %186 = vector.broadcast %185 : vector<32x1xf32> to vector<32x64xf32>
    %187 = arith.addf %182, %186 : vector<32x64xf32>
    %cst_173 = arith.constant 0.000000e+00 : f32
    %188 = vector.broadcast %cst_173 : f32 to vector<32x64xf32>
    %189 = arith.maximumf %187, %188 : vector<32x64xf32>
    %c5_174 = arith.constant 5 : index
    %c0_175 = arith.constant 0 : index
    %c0_176 = arith.constant 0 : index
    %c0_177 = arith.constant 0 : index
    %190 = vector.load %arg2[%c5_174, %c0_175, %c0_176, %c0_177] : memref<6x10x64x64xf32, #tpu.memory_space<vmem>>, vector<1x1x64x64xf32>
    %191 = vector.shape_cast %190 : vector<1x1x64x64xf32> to vector<64x64xf32>
    %cst_178 = arith.constant dense<0.000000e+00> : vector<32x64xf32>
    %192 = tpu.matmul %189, %191, %cst_178 {dimension_numbers = #tpu.dot_dimension_numbers<[1], [0], [0], [1], [0, 0, 1, 1], [], []>} : vector<32x64xf32>, vector<64x64xf32>, vector<32x64xf32> -> vector<32x64xf32>
    %c2_179 = arith.constant 2 : index
    %c0_180 = arith.constant 0 : index
    %c0_181 = arith.constant 0 : index
    %c0_182 = arith.constant 0 : index
    %193 = vector.load %arg2[%c2_179, %c0_180, %c0_181, %c0_182] : memref<6x10x64x64xf32, #tpu.memory_space<vmem>>, vector<1x1x64x64xf32>
    %194 = vector.shape_cast %193 : vector<1x1x64x64xf32> to vector<64x64xf32>
    %195 = vector.extract_strided_slice %194 {offsets = [0, 0], sizes = [64, 32], strides = [1, 1]} : vector<64x64xf32> to vector<64x32xf32>
    %cst_183 = arith.constant dense<0.000000e+00> : vector<64x64xf32>
    %196 = tpu.matmul %195, %192, %cst_183 {dimension_numbers = #tpu.dot_dimension_numbers<[1], [0], [0], [1], [0, 0, 1, 1], [], []>} : vector<64x32xf32>, vector<32x64xf32>, vector<64x64xf32> -> vector<64x64xf32>
    %c5_184 = arith.constant 5 : index
    %c1_185 = arith.constant 1 : index
    %c0_186 = arith.constant 0 : index
    %c0_187 = arith.constant 0 : index
    %197 = vector.load %arg2[%c5_184, %c1_185, %c0_186, %c0_187] : memref<6x10x64x64xf32, #tpu.memory_space<vmem>>, vector<1x1x64x64xf32>
    %198 = vector.shape_cast %197 : vector<1x1x64x64xf32> to vector<64x64xf32>
    %cst_188 = arith.constant dense<0.000000e+00> : vector<32x64xf32>
    %199 = tpu.matmul %189, %198, %cst_188 {dimension_numbers = #tpu.dot_dimension_numbers<[1], [0], [0], [1], [0, 0, 1, 1], [], []>} : vector<32x64xf32>, vector<64x64xf32>, vector<32x64xf32> -> vector<32x64xf32>
    %c2_189 = arith.constant 2 : index
    %c1_190 = arith.constant 1 : index
    %c0_191 = arith.constant 0 : index
    %c0_192 = arith.constant 0 : index
    %200 = vector.load %arg2[%c2_189, %c1_190, %c0_191, %c0_192] : memref<6x10x64x64xf32, #tpu.memory_space<vmem>>, vector<1x1x64x64xf32>
    %201 = vector.shape_cast %200 : vector<1x1x64x64xf32> to vector<64x64xf32>
    %202 = vector.extract_strided_slice %201 {offsets = [0, 0], sizes = [64, 32], strides = [1, 1]} : vector<64x64xf32> to vector<64x32xf32>
    %cst_193 = arith.constant dense<0.000000e+00> : vector<64x64xf32>
    %203 = tpu.matmul %202, %199, %cst_193 {dimension_numbers = #tpu.dot_dimension_numbers<[1], [0], [0], [1], [0, 0, 1, 1], [], []>} : vector<64x32xf32>, vector<32x64xf32>, vector<64x64xf32> -> vector<64x64xf32>
    %204 = arith.addf %196, %203 : vector<64x64xf32>
    %c5_194 = arith.constant 5 : index
    %c2_195 = arith.constant 2 : index
    %c0_196 = arith.constant 0 : index
    %c0_197 = arith.constant 0 : index
    %205 = vector.load %arg2[%c5_194, %c2_195, %c0_196, %c0_197] : memref<6x10x64x64xf32, #tpu.memory_space<vmem>>, vector<1x1x64x64xf32>
    %206 = vector.shape_cast %205 : vector<1x1x64x64xf32> to vector<64x64xf32>
    %cst_198 = arith.constant dense<0.000000e+00> : vector<32x64xf32>
    %207 = tpu.matmul %189, %206, %cst_198 {dimension_numbers = #tpu.dot_dimension_numbers<[1], [0], [0], [1], [0, 0, 1, 1], [], []>} : vector<32x64xf32>, vector<64x64xf32>, vector<32x64xf32> -> vector<32x64xf32>
    %c2_199 = arith.constant 2 : index
    %c2_200 = arith.constant 2 : index
    %c0_201 = arith.constant 0 : index
    %c0_202 = arith.constant 0 : index
    %208 = vector.load %arg2[%c2_199, %c2_200, %c0_201, %c0_202] : memref<6x10x64x64xf32, #tpu.memory_space<vmem>>, vector<1x1x64x64xf32>
    %209 = vector.shape_cast %208 : vector<1x1x64x64xf32> to vector<64x64xf32>
    %210 = vector.extract_strided_slice %209 {offsets = [0, 0], sizes = [64, 32], strides = [1, 1]} : vector<64x64xf32> to vector<64x32xf32>
    %cst_203 = arith.constant dense<0.000000e+00> : vector<64x64xf32>
    %211 = tpu.matmul %210, %207, %cst_203 {dimension_numbers = #tpu.dot_dimension_numbers<[1], [0], [0], [1], [0, 0, 1, 1], [], []>} : vector<64x32xf32>, vector<32x64xf32>, vector<64x64xf32> -> vector<64x64xf32>
    %212 = arith.addf %204, %211 : vector<64x64xf32>
    %c5_204 = arith.constant 5 : index
    %c3_205 = arith.constant 3 : index
    %c0_206 = arith.constant 0 : index
    %c0_207 = arith.constant 0 : index
    %213 = vector.load %arg2[%c5_204, %c3_205, %c0_206, %c0_207] : memref<6x10x64x64xf32, #tpu.memory_space<vmem>>, vector<1x1x64x64xf32>
    %214 = vector.shape_cast %213 : vector<1x1x64x64xf32> to vector<64x64xf32>
    %cst_208 = arith.constant dense<0.000000e+00> : vector<32x64xf32>
    %215 = tpu.matmul %189, %214, %cst_208 {dimension_numbers = #tpu.dot_dimension_numbers<[1], [0], [0], [1], [0, 0, 1, 1], [], []>} : vector<32x64xf32>, vector<64x64xf32>, vector<32x64xf32> -> vector<32x64xf32>
    %c2_209 = arith.constant 2 : index
    %c3_210 = arith.constant 3 : index
    %c0_211 = arith.constant 0 : index
    %c0_212 = arith.constant 0 : index
    %216 = vector.load %arg2[%c2_209, %c3_210, %c0_211, %c0_212] : memref<6x10x64x64xf32, #tpu.memory_space<vmem>>, vector<1x1x64x64xf32>
    %217 = vector.shape_cast %216 : vector<1x1x64x64xf32> to vector<64x64xf32>
    %218 = vector.extract_strided_slice %217 {offsets = [0, 0], sizes = [64, 32], strides = [1, 1]} : vector<64x64xf32> to vector<64x32xf32>
    %cst_213 = arith.constant dense<0.000000e+00> : vector<64x64xf32>
    %219 = tpu.matmul %218, %215, %cst_213 {dimension_numbers = #tpu.dot_dimension_numbers<[1], [0], [0], [1], [0, 0, 1, 1], [], []>} : vector<64x32xf32>, vector<32x64xf32>, vector<64x64xf32> -> vector<64x64xf32>
    %220 = arith.addf %212, %219 : vector<64x64xf32>
    %c5_214 = arith.constant 5 : index
    %c4_215 = arith.constant 4 : index
    %c0_216 = arith.constant 0 : index
    %c0_217 = arith.constant 0 : index
    %221 = vector.load %arg2[%c5_214, %c4_215, %c0_216, %c0_217] : memref<6x10x64x64xf32, #tpu.memory_space<vmem>>, vector<1x1x64x64xf32>
    %222 = vector.shape_cast %221 : vector<1x1x64x64xf32> to vector<64x64xf32>
    %cst_218 = arith.constant dense<0.000000e+00> : vector<32x64xf32>
    %223 = tpu.matmul %189, %222, %cst_218 {dimension_numbers = #tpu.dot_dimension_numbers<[1], [0], [0], [1], [0, 0, 1, 1], [], []>} : vector<32x64xf32>, vector<64x64xf32>, vector<32x64xf32> -> vector<32x64xf32>
    %c2_219 = arith.constant 2 : index
    %c4_220 = arith.constant 4 : index
    %c0_221 = arith.constant 0 : index
    %c0_222 = arith.constant 0 : index
    %224 = vector.load %arg2[%c2_219, %c4_220, %c0_221, %c0_222] : memref<6x10x64x64xf32, #tpu.memory_space<vmem>>, vector<1x1x64x64xf32>
    %225 = vector.shape_cast %224 : vector<1x1x64x64xf32> to vector<64x64xf32>
    %226 = vector.extract_strided_slice %225 {offsets = [0, 0], sizes = [64, 32], strides = [1, 1]} : vector<64x64xf32> to vector<64x32xf32>
    %cst_223 = arith.constant dense<0.000000e+00> : vector<64x64xf32>
    %227 = tpu.matmul %226, %223, %cst_223 {dimension_numbers = #tpu.dot_dimension_numbers<[1], [0], [0], [1], [0, 0, 1, 1], [], []>} : vector<64x32xf32>, vector<32x64xf32>, vector<64x64xf32> -> vector<64x64xf32>
    %228 = arith.addf %220, %227 : vector<64x64xf32>
    %c5_224 = arith.constant 5 : index
    %c5_225 = arith.constant 5 : index
    %c0_226 = arith.constant 0 : index
    %c0_227 = arith.constant 0 : index
    %229 = vector.load %arg2[%c5_224, %c5_225, %c0_226, %c0_227] : memref<6x10x64x64xf32, #tpu.memory_space<vmem>>, vector<1x1x64x64xf32>
    %230 = vector.shape_cast %229 : vector<1x1x64x64xf32> to vector<64x64xf32>
    %cst_228 = arith.constant dense<0.000000e+00> : vector<32x64xf32>
    %231 = tpu.matmul %189, %230, %cst_228 {dimension_numbers = #tpu.dot_dimension_numbers<[1], [0], [0], [1], [0, 0, 1, 1], [], []>} : vector<32x64xf32>, vector<64x64xf32>, vector<32x64xf32> -> vector<32x64xf32>
    %c2_229 = arith.constant 2 : index
    %c5_230 = arith.constant 5 : index
    %c0_231 = arith.constant 0 : index
    %c0_232 = arith.constant 0 : index
    %232 = vector.load %arg2[%c2_229, %c5_230, %c0_231, %c0_232] : memref<6x10x64x64xf32, #tpu.memory_space<vmem>>, vector<1x1x64x64xf32>
    %233 = vector.shape_cast %232 : vector<1x1x64x64xf32> to vector<64x64xf32>
    %234 = vector.extract_strided_slice %233 {offsets = [0, 0], sizes = [64, 32], strides = [1, 1]} : vector<64x64xf32> to vector<64x32xf32>
    %cst_233 = arith.constant dense<0.000000e+00> : vector<64x64xf32>
    %235 = tpu.matmul %234, %231, %cst_233 {dimension_numbers = #tpu.dot_dimension_numbers<[1], [0], [0], [1], [0, 0, 1, 1], [], []>} : vector<64x32xf32>, vector<32x64xf32>, vector<64x64xf32> -> vector<64x64xf32>
    %236 = arith.addf %228, %235 : vector<64x64xf32>
    %c5_234 = arith.constant 5 : index
    %c6_235 = arith.constant 6 : index
    %c0_236 = arith.constant 0 : index
    %c0_237 = arith.constant 0 : index
    %237 = vector.load %arg2[%c5_234, %c6_235, %c0_236, %c0_237] : memref<6x10x64x64xf32, #tpu.memory_space<vmem>>, vector<1x1x64x64xf32>
    %238 = vector.shape_cast %237 : vector<1x1x64x64xf32> to vector<64x64xf32>
    %cst_238 = arith.constant dense<0.000000e+00> : vector<32x64xf32>
    %239 = tpu.matmul %189, %238, %cst_238 {dimension_numbers = #tpu.dot_dimension_numbers<[1], [0], [0], [1], [0, 0, 1, 1], [], []>} : vector<32x64xf32>, vector<64x64xf32>, vector<32x64xf32> -> vector<32x64xf32>
    %c2_239 = arith.constant 2 : index
    %c6_240 = arith.constant 6 : index
    %c0_241 = arith.constant 0 : index
    %c0_242 = arith.constant 0 : index
    %240 = vector.load %arg2[%c2_239, %c6_240, %c0_241, %c0_242] : memref<6x10x64x64xf32, #tpu.memory_space<vmem>>, vector<1x1x64x64xf32>
    %241 = vector.shape_cast %240 : vector<1x1x64x64xf32> to vector<64x64xf32>
    %242 = vector.extract_strided_slice %241 {offsets = [0, 0], sizes = [64, 32], strides = [1, 1]} : vector<64x64xf32> to vector<64x32xf32>
    %cst_243 = arith.constant dense<0.000000e+00> : vector<64x64xf32>
    %243 = tpu.matmul %242, %239, %cst_243 {dimension_numbers = #tpu.dot_dimension_numbers<[1], [0], [0], [1], [0, 0, 1, 1], [], []>} : vector<64x32xf32>, vector<32x64xf32>, vector<64x64xf32> -> vector<64x64xf32>
    %244 = arith.addf %236, %243 : vector<64x64xf32>
    %c5_244 = arith.constant 5 : index
    %c7_245 = arith.constant 7 : index
    %c0_246 = arith.constant 0 : index
    %c0_247 = arith.constant 0 : index
    %245 = vector.load %arg2[%c5_244, %c7_245, %c0_246, %c0_247] : memref<6x10x64x64xf32, #tpu.memory_space<vmem>>, vector<1x1x64x64xf32>
    %246 = vector.shape_cast %245 : vector<1x1x64x64xf32> to vector<64x64xf32>
    %cst_248 = arith.constant dense<0.000000e+00> : vector<32x64xf32>
    %247 = tpu.matmul %189, %246, %cst_248 {dimension_numbers = #tpu.dot_dimension_numbers<[1], [0], [0], [1], [0, 0, 1, 1], [], []>} : vector<32x64xf32>, vector<64x64xf32>, vector<32x64xf32> -> vector<32x64xf32>
    %c2_249 = arith.constant 2 : index
    %c7_250 = arith.constant 7 : index
    %c0_251 = arith.constant 0 : index
    %c0_252 = arith.constant 0 : index
    %248 = vector.load %arg2[%c2_249, %c7_250, %c0_251, %c0_252] : memref<6x10x64x64xf32, #tpu.memory_space<vmem>>, vector<1x1x64x64xf32>
    %249 = vector.shape_cast %248 : vector<1x1x64x64xf32> to vector<64x64xf32>
    %250 = vector.extract_strided_slice %249 {offsets = [0, 0], sizes = [64, 32], strides = [1, 1]} : vector<64x64xf32> to vector<64x32xf32>
    %cst_253 = arith.constant dense<0.000000e+00> : vector<64x64xf32>
    %251 = tpu.matmul %250, %247, %cst_253 {dimension_numbers = #tpu.dot_dimension_numbers<[1], [0], [0], [1], [0, 0, 1, 1], [], []>} : vector<64x32xf32>, vector<32x64xf32>, vector<64x64xf32> -> vector<64x64xf32>
    %252 = arith.addf %244, %251 : vector<64x64xf32>
    %c5_254 = arith.constant 5 : index
    %c8_255 = arith.constant 8 : index
    %c0_256 = arith.constant 0 : index
    %c0_257 = arith.constant 0 : index
    %253 = vector.load %arg2[%c5_254, %c8_255, %c0_256, %c0_257] : memref<6x10x64x64xf32, #tpu.memory_space<vmem>>, vector<1x1x64x64xf32>
    %254 = vector.shape_cast %253 : vector<1x1x64x64xf32> to vector<64x64xf32>
    %cst_258 = arith.constant dense<0.000000e+00> : vector<32x64xf32>
    %255 = tpu.matmul %189, %254, %cst_258 {dimension_numbers = #tpu.dot_dimension_numbers<[1], [0], [0], [1], [0, 0, 1, 1], [], []>} : vector<32x64xf32>, vector<64x64xf32>, vector<32x64xf32> -> vector<32x64xf32>
    %c2_259 = arith.constant 2 : index
    %c8_260 = arith.constant 8 : index
    %c0_261 = arith.constant 0 : index
    %c0_262 = arith.constant 0 : index
    %256 = vector.load %arg2[%c2_259, %c8_260, %c0_261, %c0_262] : memref<6x10x64x64xf32, #tpu.memory_space<vmem>>, vector<1x1x64x64xf32>
    %257 = vector.shape_cast %256 : vector<1x1x64x64xf32> to vector<64x64xf32>
    %258 = vector.extract_strided_slice %257 {offsets = [0, 0], sizes = [64, 32], strides = [1, 1]} : vector<64x64xf32> to vector<64x32xf32>
    %cst_263 = arith.constant dense<0.000000e+00> : vector<64x64xf32>
    %259 = tpu.matmul %258, %255, %cst_263 {dimension_numbers = #tpu.dot_dimension_numbers<[1], [0], [0], [1], [0, 0, 1, 1], [], []>} : vector<64x32xf32>, vector<32x64xf32>, vector<64x64xf32> -> vector<64x64xf32>
    %260 = arith.addf %252, %259 : vector<64x64xf32>
    %c2_264 = arith.constant 2 : index
    %c9_265 = arith.constant 9 : index
    %c0_266 = arith.constant 0 : index
    %c0_267 = arith.constant 0 : index
    %261 = vector.load %arg2[%c2_264, %c9_265, %c0_266, %c0_267] : memref<6x10x64x64xf32, #tpu.memory_space<vmem>>, vector<1x1x64x64xf32>
    %262 = vector.shape_cast %261 : vector<1x1x64x64xf32> to vector<64x64xf32>
    %263 = vector.extract_strided_slice %262 {offsets = [0, 0], sizes = [64, 1], strides = [1, 1]} : vector<64x64xf32> to vector<64x1xf32>
    %264 = vector.broadcast %263 : vector<64x1xf32> to vector<64x64xf32>
    %265 = arith.addf %260, %264 : vector<64x64xf32>
    %cst_268 = arith.constant 0.000000e+00 : f32
    %266 = vector.broadcast %cst_268 : f32 to vector<64x64xf32>
    %267 = arith.maximumf %265, %266 : vector<64x64xf32>
    %c0_269 = arith.constant 0 : index
    %c0_270 = arith.constant 0 : index
    %c0_271 = arith.constant 0 : index
    %c0_272 = arith.constant 0 : index
    %268 = vector.load %arg3[%c0_269, %c0_270, %c0_271, %c0_272] : memref<3x5x32x64xf32, #tpu.memory_space<vmem>>, vector<1x1x32x64xf32>
    %269 = vector.shape_cast %268 : vector<1x1x32x64xf32> to vector<32x64xf32>
    %cst_273 = arith.constant dense<0.000000e+00> : vector<32x64xf32>
    %270 = tpu.matmul %269, %267, %cst_273 {dimension_numbers = #tpu.dot_dimension_numbers<[1], [0], [0], [1], [0, 0, 1, 1], [], []>} : vector<32x64xf32>, vector<64x64xf32>, vector<32x64xf32> -> vector<32x64xf32>
    %271 = arith.truncf %270 : vector<32x64xf32> to vector<32x64xbf16>
    %c0_274 = arith.constant 0 : index
    %c0_275 = arith.constant 0 : index
    %c0_276 = arith.constant 0 : index
    %272 = vector.load %arg4[%c0_274, %c0_275, %c0_276] : memref<5x64x256xbf16, #tpu.memory_space<vmem>>, vector<1x64x256xbf16>
    %273 = vector.shape_cast %272 : vector<1x64x256xbf16> to vector<64x256xbf16>
    %cst_277 = arith.constant dense<0.000000e+00> : vector<32x256xf32>
    %274 = tpu.matmul %271, %273, %cst_277 {dimension_numbers = #tpu.dot_dimension_numbers<[1], [0], [0], [1], [0, 0, 1, 1], [], []>} : vector<32x64xbf16>, vector<64x256xbf16>, vector<32x256xf32> -> vector<32x256xf32>
    %c0_278 = arith.constant 0 : index
    %c1_279 = arith.constant 1 : index
    %c0_280 = arith.constant 0 : index
    %c0_281 = arith.constant 0 : index
    %275 = vector.load %arg3[%c0_278, %c1_279, %c0_280, %c0_281] : memref<3x5x32x64xf32, #tpu.memory_space<vmem>>, vector<1x1x32x64xf32>
    %276 = vector.shape_cast %275 : vector<1x1x32x64xf32> to vector<32x64xf32>
    %cst_282 = arith.constant dense<0.000000e+00> : vector<32x64xf32>
    %277 = tpu.matmul %276, %267, %cst_282 {dimension_numbers = #tpu.dot_dimension_numbers<[1], [0], [0], [1], [0, 0, 1, 1], [], []>} : vector<32x64xf32>, vector<64x64xf32>, vector<32x64xf32> -> vector<32x64xf32>
    %278 = arith.truncf %277 : vector<32x64xf32> to vector<32x64xbf16>
    %c1_283 = arith.constant 1 : index
    %c0_284 = arith.constant 0 : index
    %c0_285 = arith.constant 0 : index
    %279 = vector.load %arg4[%c1_283, %c0_284, %c0_285] : memref<5x64x256xbf16, #tpu.memory_space<vmem>>, vector<1x64x256xbf16>
    %280 = vector.shape_cast %279 : vector<1x64x256xbf16> to vector<64x256xbf16>
    %cst_286 = arith.constant dense<0.000000e+00> : vector<32x256xf32>
    %281 = tpu.matmul %278, %280, %cst_286 {dimension_numbers = #tpu.dot_dimension_numbers<[1], [0], [0], [1], [0, 0, 1, 1], [], []>} : vector<32x64xbf16>, vector<64x256xbf16>, vector<32x256xf32> -> vector<32x256xf32>
    %282 = arith.addf %274, %281 : vector<32x256xf32>
    %c0_287 = arith.constant 0 : index
    %c2_288 = arith.constant 2 : index
    %c0_289 = arith.constant 0 : index
    %c0_290 = arith.constant 0 : index
    %283 = vector.load %arg3[%c0_287, %c2_288, %c0_289, %c0_290] : memref<3x5x32x64xf32, #tpu.memory_space<vmem>>, vector<1x1x32x64xf32>
    %284 = vector.shape_cast %283 : vector<1x1x32x64xf32> to vector<32x64xf32>
    %cst_291 = arith.constant dense<0.000000e+00> : vector<32x64xf32>
    %285 = tpu.matmul %284, %267, %cst_291 {dimension_numbers = #tpu.dot_dimension_numbers<[1], [0], [0], [1], [0, 0, 1, 1], [], []>} : vector<32x64xf32>, vector<64x64xf32>, vector<32x64xf32> -> vector<32x64xf32>
    %286 = arith.truncf %285 : vector<32x64xf32> to vector<32x64xbf16>
    %c2_292 = arith.constant 2 : index
    %c0_293 = arith.constant 0 : index
    %c0_294 = arith.constant 0 : index
    %287 = vector.load %arg4[%c2_292, %c0_293, %c0_294] : memref<5x64x256xbf16, #tpu.memory_space<vmem>>, vector<1x64x256xbf16>
    %288 = vector.shape_cast %287 : vector<1x64x256xbf16> to vector<64x256xbf16>
    %cst_295 = arith.constant dense<0.000000e+00> : vector<32x256xf32>
    %289 = tpu.matmul %286, %288, %cst_295 {dimension_numbers = #tpu.dot_dimension_numbers<[1], [0], [0], [1], [0, 0, 1, 1], [], []>} : vector<32x64xbf16>, vector<64x256xbf16>, vector<32x256xf32> -> vector<32x256xf32>
    %290 = arith.addf %282, %289 : vector<32x256xf32>
    %c0_296 = arith.constant 0 : index
    %c3_297 = arith.constant 3 : index
    %c0_298 = arith.constant 0 : index
    %c0_299 = arith.constant 0 : index
    %291 = vector.load %arg3[%c0_296, %c3_297, %c0_298, %c0_299] : memref<3x5x32x64xf32, #tpu.memory_space<vmem>>, vector<1x1x32x64xf32>
    %292 = vector.shape_cast %291 : vector<1x1x32x64xf32> to vector<32x64xf32>
    %cst_300 = arith.constant dense<0.000000e+00> : vector<32x64xf32>
    %293 = tpu.matmul %292, %267, %cst_300 {dimension_numbers = #tpu.dot_dimension_numbers<[1], [0], [0], [1], [0, 0, 1, 1], [], []>} : vector<32x64xf32>, vector<64x64xf32>, vector<32x64xf32> -> vector<32x64xf32>
    %294 = arith.truncf %293 : vector<32x64xf32> to vector<32x64xbf16>
    %c3_301 = arith.constant 3 : index
    %c0_302 = arith.constant 0 : index
    %c0_303 = arith.constant 0 : index
    %295 = vector.load %arg4[%c3_301, %c0_302, %c0_303] : memref<5x64x256xbf16, #tpu.memory_space<vmem>>, vector<1x64x256xbf16>
    %296 = vector.shape_cast %295 : vector<1x64x256xbf16> to vector<64x256xbf16>
    %cst_304 = arith.constant dense<0.000000e+00> : vector<32x256xf32>
    %297 = tpu.matmul %294, %296, %cst_304 {dimension_numbers = #tpu.dot_dimension_numbers<[1], [0], [0], [1], [0, 0, 1, 1], [], []>} : vector<32x64xbf16>, vector<64x256xbf16>, vector<32x256xf32> -> vector<32x256xf32>
    %298 = arith.addf %290, %297 : vector<32x256xf32>
    %c0_305 = arith.constant 0 : index
    %c4_306 = arith.constant 4 : index
    %c0_307 = arith.constant 0 : index
    %c0_308 = arith.constant 0 : index
    %299 = vector.load %arg3[%c0_305, %c4_306, %c0_307, %c0_308] : memref<3x5x32x64xf32, #tpu.memory_space<vmem>>, vector<1x1x32x64xf32>
    %300 = vector.shape_cast %299 : vector<1x1x32x64xf32> to vector<32x64xf32>
    %301 = vector.extract_strided_slice %300 {offsets = [0, 0], sizes = [32, 1], strides = [1, 1]} : vector<32x64xf32> to vector<32x1xf32>
    %302 = vector.broadcast %301 : vector<32x1xf32> to vector<32x256xf32>
    %303 = arith.addf %298, %302 : vector<32x256xf32>
    %304 = arith.truncf %189 : vector<32x64xf32> to vector<32x64xbf16>
    %c4_309 = arith.constant 4 : index
    %c0_310 = arith.constant 0 : index
    %c0_311 = arith.constant 0 : index
    %305 = vector.load %arg4[%c4_309, %c0_310, %c0_311] : memref<5x64x256xbf16, #tpu.memory_space<vmem>>, vector<1x64x256xbf16>
    %306 = vector.shape_cast %305 : vector<1x64x256xbf16> to vector<64x256xbf16>
    %cst_312 = arith.constant dense<0.000000e+00> : vector<32x256xf32>
    %307 = tpu.matmul %304, %306, %cst_312 {dimension_numbers = #tpu.dot_dimension_numbers<[1], [0], [0], [1], [0, 0, 1, 1], [], []>} : vector<32x64xbf16>, vector<64x256xbf16>, vector<32x256xf32> -> vector<32x256xf32>
    %308 = tpu.concatenate %303, %307 in 0 : vector<32x256xf32>, vector<32x256xf32> -> vector<64x256xf32>
    %cst_313 = arith.constant 0.000000e+00 : f32
    %309 = vector.broadcast %cst_313 : f32 to vector<64x128xf32>
    %310 = tpu.concatenate %309, %308, %309 in 1 : vector<64x128xf32>, vector<64x256xf32>, vector<64x128xf32> -> vector<64x512xf32>
    %311 = vector.extract_strided_slice %310 {offsets = [0, 111], sizes = [64, 256], strides = [1, 1]} : vector<64x512xf32> to vector<64x256xf32>
    %cst_314 = arith.constant 0.000000e+00 : f32
    %312 = vector.shape_cast %4 : vector<1x256xi1> to vector<1x256xi1>
    %313 = vector.broadcast %312 : vector<1x256xi1> to vector<64x256xi1>
    %314 = vector.broadcast %cst_314 : f32 to vector<64x256xf32>
    %315 = arith.select %313, %311, %314 : vector<64x256xi1>, vector<64x256xf32>
    %c3_315 = arith.constant 3 : index
    %c0_316 = arith.constant 0 : index
    %c0_317 = arith.constant 0 : index
    %c0_318 = arith.constant 0 : index
    %316 = vector.load %arg2[%c3_315, %c0_316, %c0_317, %c0_318] : memref<6x10x64x64xf32, #tpu.memory_space<vmem>>, vector<1x1x64x64xf32>
    %317 = vector.shape_cast %316 : vector<1x1x64x64xf32> to vector<64x64xf32>
    %318 = vector.extract_strided_slice %317 {offsets = [0, 0], sizes = [32, 64], strides = [1, 1]} : vector<64x64xf32> to vector<32x64xf32>
    %cst_319 = arith.constant dense<0.000000e+00> : vector<32x256xf32>
    %319 = tpu.matmul %318, %315, %cst_319 {dimension_numbers = #tpu.dot_dimension_numbers<[1], [0], [0], [1], [0, 0, 1, 1], [], []>} : vector<32x64xf32>, vector<64x256xf32>, vector<32x256xf32> -> vector<32x256xf32>
    %320 = vector.extract_strided_slice %310 {offsets = [0, 112], sizes = [64, 256], strides = [1, 1]} : vector<64x512xf32> to vector<64x256xf32>
    %c3_320 = arith.constant 3 : index
    %c1_321 = arith.constant 1 : index
    %c0_322 = arith.constant 0 : index
    %c0_323 = arith.constant 0 : index
    %321 = vector.load %arg2[%c3_320, %c1_321, %c0_322, %c0_323] : memref<6x10x64x64xf32, #tpu.memory_space<vmem>>, vector<1x1x64x64xf32>
    %322 = vector.shape_cast %321 : vector<1x1x64x64xf32> to vector<64x64xf32>
    %323 = vector.extract_strided_slice %322 {offsets = [0, 0], sizes = [32, 64], strides = [1, 1]} : vector<64x64xf32> to vector<32x64xf32>
    %cst_324 = arith.constant dense<0.000000e+00> : vector<32x256xf32>
    %324 = tpu.matmul %323, %320, %cst_324 {dimension_numbers = #tpu.dot_dimension_numbers<[1], [0], [0], [1], [0, 0, 1, 1], [], []>} : vector<32x64xf32>, vector<64x256xf32>, vector<32x256xf32> -> vector<32x256xf32>
    %325 = arith.addf %319, %324 : vector<32x256xf32>
    %326 = vector.extract_strided_slice %310 {offsets = [0, 113], sizes = [64, 256], strides = [1, 1]} : vector<64x512xf32> to vector<64x256xf32>
    %cst_325 = arith.constant 0.000000e+00 : f32
    %327 = vector.shape_cast %6 : vector<1x256xi1> to vector<1x256xi1>
    %328 = vector.broadcast %327 : vector<1x256xi1> to vector<64x256xi1>
    %329 = vector.broadcast %cst_325 : f32 to vector<64x256xf32>
    %330 = arith.select %328, %326, %329 : vector<64x256xi1>, vector<64x256xf32>
    %c3_326 = arith.constant 3 : index
    %c2_327 = arith.constant 2 : index
    %c0_328 = arith.constant 0 : index
    %c0_329 = arith.constant 0 : index
    %331 = vector.load %arg2[%c3_326, %c2_327, %c0_328, %c0_329] : memref<6x10x64x64xf32, #tpu.memory_space<vmem>>, vector<1x1x64x64xf32>
    %332 = vector.shape_cast %331 : vector<1x1x64x64xf32> to vector<64x64xf32>
    %333 = vector.extract_strided_slice %332 {offsets = [0, 0], sizes = [32, 64], strides = [1, 1]} : vector<64x64xf32> to vector<32x64xf32>
    %cst_330 = arith.constant dense<0.000000e+00> : vector<32x256xf32>
    %334 = tpu.matmul %333, %330, %cst_330 {dimension_numbers = #tpu.dot_dimension_numbers<[1], [0], [0], [1], [0, 0, 1, 1], [], []>} : vector<32x64xf32>, vector<64x256xf32>, vector<32x256xf32> -> vector<32x256xf32>
    %335 = arith.addf %325, %334 : vector<32x256xf32>
    %336 = vector.extract_strided_slice %310 {offsets = [0, 127], sizes = [64, 256], strides = [1, 1]} : vector<64x512xf32> to vector<64x256xf32>
    %cst_331 = arith.constant 0.000000e+00 : f32
    %337 = vector.shape_cast %4 : vector<1x256xi1> to vector<1x256xi1>
    %338 = vector.broadcast %337 : vector<1x256xi1> to vector<64x256xi1>
    %339 = vector.broadcast %cst_331 : f32 to vector<64x256xf32>
    %340 = arith.select %338, %336, %339 : vector<64x256xi1>, vector<64x256xf32>
    %c3_332 = arith.constant 3 : index
    %c3_333 = arith.constant 3 : index
    %c0_334 = arith.constant 0 : index
    %c0_335 = arith.constant 0 : index
    %341 = vector.load %arg2[%c3_332, %c3_333, %c0_334, %c0_335] : memref<6x10x64x64xf32, #tpu.memory_space<vmem>>, vector<1x1x64x64xf32>
    %342 = vector.shape_cast %341 : vector<1x1x64x64xf32> to vector<64x64xf32>
    %343 = vector.extract_strided_slice %342 {offsets = [0, 0], sizes = [32, 64], strides = [1, 1]} : vector<64x64xf32> to vector<32x64xf32>
    %cst_336 = arith.constant dense<0.000000e+00> : vector<32x256xf32>
    %344 = tpu.matmul %343, %340, %cst_336 {dimension_numbers = #tpu.dot_dimension_numbers<[1], [0], [0], [1], [0, 0, 1, 1], [], []>} : vector<32x64xf32>, vector<64x256xf32>, vector<32x256xf32> -> vector<32x256xf32>
    %345 = arith.addf %335, %344 : vector<32x256xf32>
    %346 = vector.extract_strided_slice %310 {offsets = [0, 128], sizes = [64, 256], strides = [1, 1]} : vector<64x512xf32> to vector<64x256xf32>
    %c3_337 = arith.constant 3 : index
    %c4_338 = arith.constant 4 : index
    %c0_339 = arith.constant 0 : index
    %c0_340 = arith.constant 0 : index
    %347 = vector.load %arg2[%c3_337, %c4_338, %c0_339, %c0_340] : memref<6x10x64x64xf32, #tpu.memory_space<vmem>>, vector<1x1x64x64xf32>
    %348 = vector.shape_cast %347 : vector<1x1x64x64xf32> to vector<64x64xf32>
    %349 = vector.extract_strided_slice %348 {offsets = [0, 0], sizes = [32, 64], strides = [1, 1]} : vector<64x64xf32> to vector<32x64xf32>
    %cst_341 = arith.constant dense<0.000000e+00> : vector<32x256xf32>
    %350 = tpu.matmul %349, %346, %cst_341 {dimension_numbers = #tpu.dot_dimension_numbers<[1], [0], [0], [1], [0, 0, 1, 1], [], []>} : vector<32x64xf32>, vector<64x256xf32>, vector<32x256xf32> -> vector<32x256xf32>
    %351 = arith.addf %345, %350 : vector<32x256xf32>
    %352 = vector.extract_strided_slice %310 {offsets = [0, 129], sizes = [64, 256], strides = [1, 1]} : vector<64x512xf32> to vector<64x256xf32>
    %cst_342 = arith.constant 0.000000e+00 : f32
    %353 = vector.shape_cast %6 : vector<1x256xi1> to vector<1x256xi1>
    %354 = vector.broadcast %353 : vector<1x256xi1> to vector<64x256xi1>
    %355 = vector.broadcast %cst_342 : f32 to vector<64x256xf32>
    %356 = arith.select %354, %352, %355 : vector<64x256xi1>, vector<64x256xf32>
    %c3_343 = arith.constant 3 : index
    %c5_344 = arith.constant 5 : index
    %c0_345 = arith.constant 0 : index
    %c0_346 = arith.constant 0 : index
    %357 = vector.load %arg2[%c3_343, %c5_344, %c0_345, %c0_346] : memref<6x10x64x64xf32, #tpu.memory_space<vmem>>, vector<1x1x64x64xf32>
    %358 = vector.shape_cast %357 : vector<1x1x64x64xf32> to vector<64x64xf32>
    %359 = vector.extract_strided_slice %358 {offsets = [0, 0], sizes = [32, 64], strides = [1, 1]} : vector<64x64xf32> to vector<32x64xf32>
    %cst_347 = arith.constant dense<0.000000e+00> : vector<32x256xf32>
    %360 = tpu.matmul %359, %356, %cst_347 {dimension_numbers = #tpu.dot_dimension_numbers<[1], [0], [0], [1], [0, 0, 1, 1], [], []>} : vector<32x64xf32>, vector<64x256xf32>, vector<32x256xf32> -> vector<32x256xf32>
    %361 = arith.addf %351, %360 : vector<32x256xf32>
    %362 = vector.extract_strided_slice %310 {offsets = [0, 143], sizes = [64, 256], strides = [1, 1]} : vector<64x512xf32> to vector<64x256xf32>
    %cst_348 = arith.constant 0.000000e+00 : f32
    %363 = vector.shape_cast %4 : vector<1x256xi1> to vector<1x256xi1>
    %364 = vector.broadcast %363 : vector<1x256xi1> to vector<64x256xi1>
    %365 = vector.broadcast %cst_348 : f32 to vector<64x256xf32>
    %366 = arith.select %364, %362, %365 : vector<64x256xi1>, vector<64x256xf32>
    %c3_349 = arith.constant 3 : index
    %c6_350 = arith.constant 6 : index
    %c0_351 = arith.constant 0 : index
    %c0_352 = arith.constant 0 : index
    %367 = vector.load %arg2[%c3_349, %c6_350, %c0_351, %c0_352] : memref<6x10x64x64xf32, #tpu.memory_space<vmem>>, vector<1x1x64x64xf32>
    %368 = vector.shape_cast %367 : vector<1x1x64x64xf32> to vector<64x64xf32>
    %369 = vector.extract_strided_slice %368 {offsets = [0, 0], sizes = [32, 64], strides = [1, 1]} : vector<64x64xf32> to vector<32x64xf32>
    %cst_353 = arith.constant dense<0.000000e+00> : vector<32x256xf32>
    %370 = tpu.matmul %369, %366, %cst_353 {dimension_numbers = #tpu.dot_dimension_numbers<[1], [0], [0], [1], [0, 0, 1, 1], [], []>} : vector<32x64xf32>, vector<64x256xf32>, vector<32x256xf32> -> vector<32x256xf32>
    %371 = arith.addf %361, %370 : vector<32x256xf32>
    %372 = vector.extract_strided_slice %310 {offsets = [0, 144], sizes = [64, 256], strides = [1, 1]} : vector<64x512xf32> to vector<64x256xf32>
    %c3_354 = arith.constant 3 : index
    %c7_355 = arith.constant 7 : index
    %c0_356 = arith.constant 0 : index
    %c0_357 = arith.constant 0 : index
    %373 = vector.load %arg2[%c3_354, %c7_355, %c0_356, %c0_357] : memref<6x10x64x64xf32, #tpu.memory_space<vmem>>, vector<1x1x64x64xf32>
    %374 = vector.shape_cast %373 : vector<1x1x64x64xf32> to vector<64x64xf32>
    %375 = vector.extract_strided_slice %374 {offsets = [0, 0], sizes = [32, 64], strides = [1, 1]} : vector<64x64xf32> to vector<32x64xf32>
    %cst_358 = arith.constant dense<0.000000e+00> : vector<32x256xf32>
    %376 = tpu.matmul %375, %372, %cst_358 {dimension_numbers = #tpu.dot_dimension_numbers<[1], [0], [0], [1], [0, 0, 1, 1], [], []>} : vector<32x64xf32>, vector<64x256xf32>, vector<32x256xf32> -> vector<32x256xf32>
    %377 = arith.addf %371, %376 : vector<32x256xf32>
    %378 = vector.extract_strided_slice %310 {offsets = [0, 145], sizes = [64, 256], strides = [1, 1]} : vector<64x512xf32> to vector<64x256xf32>
    %cst_359 = arith.constant 0.000000e+00 : f32
    %379 = vector.shape_cast %6 : vector<1x256xi1> to vector<1x256xi1>
    %380 = vector.broadcast %379 : vector<1x256xi1> to vector<64x256xi1>
    %381 = vector.broadcast %cst_359 : f32 to vector<64x256xf32>
    %382 = arith.select %380, %378, %381 : vector<64x256xi1>, vector<64x256xf32>
    %c3_360 = arith.constant 3 : index
    %c8_361 = arith.constant 8 : index
    %c0_362 = arith.constant 0 : index
    %c0_363 = arith.constant 0 : index
    %383 = vector.load %arg2[%c3_360, %c8_361, %c0_362, %c0_363] : memref<6x10x64x64xf32, #tpu.memory_space<vmem>>, vector<1x1x64x64xf32>
    %384 = vector.shape_cast %383 : vector<1x1x64x64xf32> to vector<64x64xf32>
    %385 = vector.extract_strided_slice %384 {offsets = [0, 0], sizes = [32, 64], strides = [1, 1]} : vector<64x64xf32> to vector<32x64xf32>
    %cst_364 = arith.constant dense<0.000000e+00> : vector<32x256xf32>
    %386 = tpu.matmul %385, %382, %cst_364 {dimension_numbers = #tpu.dot_dimension_numbers<[1], [0], [0], [1], [0, 0, 1, 1], [], []>} : vector<32x64xf32>, vector<64x256xf32>, vector<32x256xf32> -> vector<32x256xf32>
    %387 = arith.addf %377, %386 : vector<32x256xf32>
    %c3_365 = arith.constant 3 : index
    %c9_366 = arith.constant 9 : index
    %c0_367 = arith.constant 0 : index
    %c0_368 = arith.constant 0 : index
    %388 = vector.load %arg2[%c3_365, %c9_366, %c0_367, %c0_368] : memref<6x10x64x64xf32, #tpu.memory_space<vmem>>, vector<1x1x64x64xf32>
    %389 = vector.shape_cast %388 : vector<1x1x64x64xf32> to vector<64x64xf32>
    %390 = vector.extract_strided_slice %389 {offsets = [0, 0], sizes = [32, 1], strides = [1, 1]} : vector<64x64xf32> to vector<32x1xf32>
    %391 = vector.broadcast %390 : vector<32x1xf32> to vector<32x256xf32>
    %392 = arith.addf %387, %391 : vector<32x256xf32>
    %cst_369 = arith.constant 0.000000e+00 : f32
    %393 = vector.broadcast %cst_369 : f32 to vector<32x256xf32>
    %394 = arith.maximumf %392, %393 : vector<32x256xf32>
    %c1_370 = arith.constant 1 : index
    %c0_371 = arith.constant 0 : index
    %c0_372 = arith.constant 0 : index
    %c0_373 = arith.constant 0 : index
    %395 = vector.load %arg3[%c1_370, %c0_371, %c0_372, %c0_373] : memref<3x5x32x64xf32, #tpu.memory_space<vmem>>, vector<1x1x32x64xf32>
    %396 = vector.shape_cast %395 : vector<1x1x32x64xf32> to vector<32x64xf32>
    %397 = vector.extract_strided_slice %396 {offsets = [0, 0], sizes = [16, 32], strides = [1, 1]} : vector<32x64xf32> to vector<16x32xf32>
    %cst_374 = arith.constant dense<0.000000e+00> : vector<16x256xf32>
    %398 = tpu.matmul %397, %394, %cst_374 {dimension_numbers = #tpu.dot_dimension_numbers<[1], [0], [0], [1], [0, 0, 1, 1], [], []>} : vector<16x32xf32>, vector<32x256xf32>, vector<16x256xf32> -> vector<16x256xf32>
    %399 = arith.truncf %398 : vector<16x256xf32> to vector<16x256xbf16>
    %c0_375 = arith.constant 0 : index
    %c0_376 = arith.constant 0 : index
    %c0_377 = arith.constant 0 : index
    %400 = vector.load %arg5[%c0_375, %c0_376, %c0_377] : memref<5x256x1024xbf16, #tpu.memory_space<vmem>>, vector<1x256x1024xbf16>
    %401 = vector.shape_cast %400 : vector<1x256x1024xbf16> to vector<256x1024xbf16>
    %cst_378 = arith.constant dense<0.000000e+00> : vector<16x1024xf32>
    %402 = tpu.matmul %399, %401, %cst_378 {dimension_numbers = #tpu.dot_dimension_numbers<[1], [0], [0], [1], [0, 0, 1, 1], [], []>} : vector<16x256xbf16>, vector<256x1024xbf16>, vector<16x1024xf32> -> vector<16x1024xf32>
    %c1_379 = arith.constant 1 : index
    %c1_380 = arith.constant 1 : index
    %c0_381 = arith.constant 0 : index
    %c0_382 = arith.constant 0 : index
    %403 = vector.load %arg3[%c1_379, %c1_380, %c0_381, %c0_382] : memref<3x5x32x64xf32, #tpu.memory_space<vmem>>, vector<1x1x32x64xf32>
    %404 = vector.shape_cast %403 : vector<1x1x32x64xf32> to vector<32x64xf32>
    %405 = vector.extract_strided_slice %404 {offsets = [0, 0], sizes = [16, 32], strides = [1, 1]} : vector<32x64xf32> to vector<16x32xf32>
    %cst_383 = arith.constant dense<0.000000e+00> : vector<16x256xf32>
    %406 = tpu.matmul %405, %394, %cst_383 {dimension_numbers = #tpu.dot_dimension_numbers<[1], [0], [0], [1], [0, 0, 1, 1], [], []>} : vector<16x32xf32>, vector<32x256xf32>, vector<16x256xf32> -> vector<16x256xf32>
    %407 = arith.truncf %406 : vector<16x256xf32> to vector<16x256xbf16>
    %c1_384 = arith.constant 1 : index
    %c0_385 = arith.constant 0 : index
    %c0_386 = arith.constant 0 : index
    %408 = vector.load %arg5[%c1_384, %c0_385, %c0_386] : memref<5x256x1024xbf16, #tpu.memory_space<vmem>>, vector<1x256x1024xbf16>
    %409 = vector.shape_cast %408 : vector<1x256x1024xbf16> to vector<256x1024xbf16>
    %cst_387 = arith.constant dense<0.000000e+00> : vector<16x1024xf32>
    %410 = tpu.matmul %407, %409, %cst_387 {dimension_numbers = #tpu.dot_dimension_numbers<[1], [0], [0], [1], [0, 0, 1, 1], [], []>} : vector<16x256xbf16>, vector<256x1024xbf16>, vector<16x1024xf32> -> vector<16x1024xf32>
    %411 = arith.addf %402, %410 : vector<16x1024xf32>
    %c1_388 = arith.constant 1 : index
    %c2_389 = arith.constant 2 : index
    %c0_390 = arith.constant 0 : index
    %c0_391 = arith.constant 0 : index
    %412 = vector.load %arg3[%c1_388, %c2_389, %c0_390, %c0_391] : memref<3x5x32x64xf32, #tpu.memory_space<vmem>>, vector<1x1x32x64xf32>
    %413 = vector.shape_cast %412 : vector<1x1x32x64xf32> to vector<32x64xf32>
    %414 = vector.extract_strided_slice %413 {offsets = [0, 0], sizes = [16, 32], strides = [1, 1]} : vector<32x64xf32> to vector<16x32xf32>
    %cst_392 = arith.constant dense<0.000000e+00> : vector<16x256xf32>
    %415 = tpu.matmul %414, %394, %cst_392 {dimension_numbers = #tpu.dot_dimension_numbers<[1], [0], [0], [1], [0, 0, 1, 1], [], []>} : vector<16x32xf32>, vector<32x256xf32>, vector<16x256xf32> -> vector<16x256xf32>
    %416 = arith.truncf %415 : vector<16x256xf32> to vector<16x256xbf16>
    %c2_393 = arith.constant 2 : index
    %c0_394 = arith.constant 0 : index
    %c0_395 = arith.constant 0 : index
    %417 = vector.load %arg5[%c2_393, %c0_394, %c0_395] : memref<5x256x1024xbf16, #tpu.memory_space<vmem>>, vector<1x256x1024xbf16>
    %418 = vector.shape_cast %417 : vector<1x256x1024xbf16> to vector<256x1024xbf16>
    %cst_396 = arith.constant dense<0.000000e+00> : vector<16x1024xf32>
    %419 = tpu.matmul %416, %418, %cst_396 {dimension_numbers = #tpu.dot_dimension_numbers<[1], [0], [0], [1], [0, 0, 1, 1], [], []>} : vector<16x256xbf16>, vector<256x1024xbf16>, vector<16x1024xf32> -> vector<16x1024xf32>
    %420 = arith.addf %411, %419 : vector<16x1024xf32>
    %c1_397 = arith.constant 1 : index
    %c3_398 = arith.constant 3 : index
    %c0_399 = arith.constant 0 : index
    %c0_400 = arith.constant 0 : index
    %421 = vector.load %arg3[%c1_397, %c3_398, %c0_399, %c0_400] : memref<3x5x32x64xf32, #tpu.memory_space<vmem>>, vector<1x1x32x64xf32>
    %422 = vector.shape_cast %421 : vector<1x1x32x64xf32> to vector<32x64xf32>
    %423 = vector.extract_strided_slice %422 {offsets = [0, 0], sizes = [16, 32], strides = [1, 1]} : vector<32x64xf32> to vector<16x32xf32>
    %cst_401 = arith.constant dense<0.000000e+00> : vector<16x256xf32>
    %424 = tpu.matmul %423, %394, %cst_401 {dimension_numbers = #tpu.dot_dimension_numbers<[1], [0], [0], [1], [0, 0, 1, 1], [], []>} : vector<16x32xf32>, vector<32x256xf32>, vector<16x256xf32> -> vector<16x256xf32>
    %425 = arith.truncf %424 : vector<16x256xf32> to vector<16x256xbf16>
    %c3_402 = arith.constant 3 : index
    %c0_403 = arith.constant 0 : index
    %c0_404 = arith.constant 0 : index
    %426 = vector.load %arg5[%c3_402, %c0_403, %c0_404] : memref<5x256x1024xbf16, #tpu.memory_space<vmem>>, vector<1x256x1024xbf16>
    %427 = vector.shape_cast %426 : vector<1x256x1024xbf16> to vector<256x1024xbf16>
    %cst_405 = arith.constant dense<0.000000e+00> : vector<16x1024xf32>
    %428 = tpu.matmul %425, %427, %cst_405 {dimension_numbers = #tpu.dot_dimension_numbers<[1], [0], [0], [1], [0, 0, 1, 1], [], []>} : vector<16x256xbf16>, vector<256x1024xbf16>, vector<16x1024xf32> -> vector<16x1024xf32>
    %429 = arith.addf %420, %428 : vector<16x1024xf32>
    %c1_406 = arith.constant 1 : index
    %c4_407 = arith.constant 4 : index
    %c0_408 = arith.constant 0 : index
    %c0_409 = arith.constant 0 : index
    %430 = vector.load %arg3[%c1_406, %c4_407, %c0_408, %c0_409] : memref<3x5x32x64xf32, #tpu.memory_space<vmem>>, vector<1x1x32x64xf32>
    %431 = vector.shape_cast %430 : vector<1x1x32x64xf32> to vector<32x64xf32>
    %432 = vector.extract_strided_slice %431 {offsets = [0, 0], sizes = [16, 1], strides = [1, 1]} : vector<32x64xf32> to vector<16x1xf32>
    %433 = vector.broadcast %432 : vector<16x1xf32> to vector<16x1024xf32>
    %434 = arith.addf %429, %433 : vector<16x1024xf32>
    %435 = arith.truncf %111 : vector<16x64xf32> to vector<16x64xbf16>
    %c4_410 = arith.constant 4 : index
    %c0_411 = arith.constant 0 : index
    %c0_412 = arith.constant 0 : index
    %436 = vector.load %arg5[%c4_410, %c0_411, %c0_412] : memref<5x256x1024xbf16, #tpu.memory_space<vmem>>, vector<1x64x1024xbf16>
    %437 = vector.shape_cast %436 : vector<1x64x1024xbf16> to vector<64x1024xbf16>
    %cst_413 = arith.constant dense<0.000000e+00> : vector<16x1024xf32>
    %438 = tpu.matmul %435, %437, %cst_413 {dimension_numbers = #tpu.dot_dimension_numbers<[1], [0], [0], [1], [0, 0, 1, 1], [], []>} : vector<16x64xbf16>, vector<64x1024xbf16>, vector<16x1024xf32> -> vector<16x1024xf32>
    %439 = tpu.concatenate %434, %438 in 0 : vector<16x1024xf32>, vector<16x1024xf32> -> vector<32x1024xf32>
    %cst_414 = arith.constant 0.000000e+00 : f32
    %440 = vector.broadcast %cst_414 : f32 to vector<32x128xf32>
    %441 = tpu.concatenate %440, %439, %440 in 1 : vector<32x128xf32>, vector<32x1024xf32>, vector<32x128xf32> -> vector<32x1280xf32>
    %442 = vector.extract_strided_slice %441 {offsets = [0, 95], sizes = [32, 1024], strides = [1, 1]} : vector<32x1280xf32> to vector<32x1024xf32>
    %cst_415 = arith.constant 0.000000e+00 : f32
    %443 = vector.shape_cast %11 : vector<1x1024xi1> to vector<1x1024xi1>
    %444 = vector.broadcast %443 : vector<1x1024xi1> to vector<32x1024xi1>
    %445 = vector.broadcast %cst_415 : f32 to vector<32x1024xf32>
    %446 = arith.select %444, %442, %445 : vector<32x1024xi1>, vector<32x1024xf32>
    %c4_416 = arith.constant 4 : index
    %c0_417 = arith.constant 0 : index
    %c0_418 = arith.constant 0 : index
    %c0_419 = arith.constant 0 : index
    %447 = vector.load %arg2[%c4_416, %c0_417, %c0_418, %c0_419] : memref<6x10x64x64xf32, #tpu.memory_space<vmem>>, vector<1x1x64x64xf32>
    %448 = vector.shape_cast %447 : vector<1x1x64x64xf32> to vector<64x64xf32>
    %449 = vector.extract_strided_slice %448 {offsets = [0, 0], sizes = [16, 32], strides = [1, 1]} : vector<64x64xf32> to vector<16x32xf32>
    %cst_420 = arith.constant dense<0.000000e+00> : vector<16x1024xf32>
    %450 = tpu.matmul %449, %446, %cst_420 {dimension_numbers = #tpu.dot_dimension_numbers<[1], [0], [0], [1], [0, 0, 1, 1], [], []>} : vector<16x32xf32>, vector<32x1024xf32>, vector<16x1024xf32> -> vector<16x1024xf32>
    %451 = vector.extract_strided_slice %441 {offsets = [0, 96], sizes = [32, 1024], strides = [1, 1]} : vector<32x1280xf32> to vector<32x1024xf32>
    %c4_421 = arith.constant 4 : index
    %c1_422 = arith.constant 1 : index
    %c0_423 = arith.constant 0 : index
    %c0_424 = arith.constant 0 : index
    %452 = vector.load %arg2[%c4_421, %c1_422, %c0_423, %c0_424] : memref<6x10x64x64xf32, #tpu.memory_space<vmem>>, vector<1x1x64x64xf32>
    %453 = vector.shape_cast %452 : vector<1x1x64x64xf32> to vector<64x64xf32>
    %454 = vector.extract_strided_slice %453 {offsets = [0, 0], sizes = [16, 32], strides = [1, 1]} : vector<64x64xf32> to vector<16x32xf32>
    %cst_425 = arith.constant dense<0.000000e+00> : vector<16x1024xf32>
    %455 = tpu.matmul %454, %451, %cst_425 {dimension_numbers = #tpu.dot_dimension_numbers<[1], [0], [0], [1], [0, 0, 1, 1], [], []>} : vector<16x32xf32>, vector<32x1024xf32>, vector<16x1024xf32> -> vector<16x1024xf32>
    %456 = arith.addf %450, %455 : vector<16x1024xf32>
    %457 = vector.extract_strided_slice %441 {offsets = [0, 97], sizes = [32, 1024], strides = [1, 1]} : vector<32x1280xf32> to vector<32x1024xf32>
    %cst_426 = arith.constant 0.000000e+00 : f32
    %458 = vector.shape_cast %13 : vector<1x1024xi1> to vector<1x1024xi1>
    %459 = vector.broadcast %458 : vector<1x1024xi1> to vector<32x1024xi1>
    %460 = vector.broadcast %cst_426 : f32 to vector<32x1024xf32>
    %461 = arith.select %459, %457, %460 : vector<32x1024xi1>, vector<32x1024xf32>
    %c4_427 = arith.constant 4 : index
    %c2_428 = arith.constant 2 : index
    %c0_429 = arith.constant 0 : index
    %c0_430 = arith.constant 0 : index
    %462 = vector.load %arg2[%c4_427, %c2_428, %c0_429, %c0_430] : memref<6x10x64x64xf32, #tpu.memory_space<vmem>>, vector<1x1x64x64xf32>
    %463 = vector.shape_cast %462 : vector<1x1x64x64xf32> to vector<64x64xf32>
    %464 = vector.extract_strided_slice %463 {offsets = [0, 0], sizes = [16, 32], strides = [1, 1]} : vector<64x64xf32> to vector<16x32xf32>
    %cst_431 = arith.constant dense<0.000000e+00> : vector<16x1024xf32>
    %465 = tpu.matmul %464, %461, %cst_431 {dimension_numbers = #tpu.dot_dimension_numbers<[1], [0], [0], [1], [0, 0, 1, 1], [], []>} : vector<16x32xf32>, vector<32x1024xf32>, vector<16x1024xf32> -> vector<16x1024xf32>
    %466 = arith.addf %456, %465 : vector<16x1024xf32>
    %467 = vector.extract_strided_slice %441 {offsets = [0, 127], sizes = [32, 1024], strides = [1, 1]} : vector<32x1280xf32> to vector<32x1024xf32>
    %cst_432 = arith.constant 0.000000e+00 : f32
    %468 = vector.shape_cast %11 : vector<1x1024xi1> to vector<1x1024xi1>
    %469 = vector.broadcast %468 : vector<1x1024xi1> to vector<32x1024xi1>
    %470 = vector.broadcast %cst_432 : f32 to vector<32x1024xf32>
    %471 = arith.select %469, %467, %470 : vector<32x1024xi1>, vector<32x1024xf32>
    %c4_433 = arith.constant 4 : index
    %c3_434 = arith.constant 3 : index
    %c0_435 = arith.constant 0 : index
    %c0_436 = arith.constant 0 : index
    %472 = vector.load %arg2[%c4_433, %c3_434, %c0_435, %c0_436] : memref<6x10x64x64xf32, #tpu.memory_space<vmem>>, vector<1x1x64x64xf32>
    %473 = vector.shape_cast %472 : vector<1x1x64x64xf32> to vector<64x64xf32>
    %474 = vector.extract_strided_slice %473 {offsets = [0, 0], sizes = [16, 32], strides = [1, 1]} : vector<64x64xf32> to vector<16x32xf32>
    %cst_437 = arith.constant dense<0.000000e+00> : vector<16x1024xf32>
    %475 = tpu.matmul %474, %471, %cst_437 {dimension_numbers = #tpu.dot_dimension_numbers<[1], [0], [0], [1], [0, 0, 1, 1], [], []>} : vector<16x32xf32>, vector<32x1024xf32>, vector<16x1024xf32> -> vector<16x1024xf32>
    %476 = arith.addf %466, %475 : vector<16x1024xf32>
    %477 = vector.extract_strided_slice %441 {offsets = [0, 128], sizes = [32, 1024], strides = [1, 1]} : vector<32x1280xf32> to vector<32x1024xf32>
    %c4_438 = arith.constant 4 : index
    %c4_439 = arith.constant 4 : index
    %c0_440 = arith.constant 0 : index
    %c0_441 = arith.constant 0 : index
    %478 = vector.load %arg2[%c4_438, %c4_439, %c0_440, %c0_441] : memref<6x10x64x64xf32, #tpu.memory_space<vmem>>, vector<1x1x64x64xf32>
    %479 = vector.shape_cast %478 : vector<1x1x64x64xf32> to vector<64x64xf32>
    %480 = vector.extract_strided_slice %479 {offsets = [0, 0], sizes = [16, 32], strides = [1, 1]} : vector<64x64xf32> to vector<16x32xf32>
    %cst_442 = arith.constant dense<0.000000e+00> : vector<16x1024xf32>
    %481 = tpu.matmul %480, %477, %cst_442 {dimension_numbers = #tpu.dot_dimension_numbers<[1], [0], [0], [1], [0, 0, 1, 1], [], []>} : vector<16x32xf32>, vector<32x1024xf32>, vector<16x1024xf32> -> vector<16x1024xf32>
    %482 = arith.addf %476, %481 : vector<16x1024xf32>
    %483 = vector.extract_strided_slice %441 {offsets = [0, 129], sizes = [32, 1024], strides = [1, 1]} : vector<32x1280xf32> to vector<32x1024xf32>
    %cst_443 = arith.constant 0.000000e+00 : f32
    %484 = vector.shape_cast %13 : vector<1x1024xi1> to vector<1x1024xi1>
    %485 = vector.broadcast %484 : vector<1x1024xi1> to vector<32x1024xi1>
    %486 = vector.broadcast %cst_443 : f32 to vector<32x1024xf32>
    %487 = arith.select %485, %483, %486 : vector<32x1024xi1>, vector<32x1024xf32>
    %c4_444 = arith.constant 4 : index
    %c5_445 = arith.constant 5 : index
    %c0_446 = arith.constant 0 : index
    %c0_447 = arith.constant 0 : index
    %488 = vector.load %arg2[%c4_444, %c5_445, %c0_446, %c0_447] : memref<6x10x64x64xf32, #tpu.memory_space<vmem>>, vector<1x1x64x64xf32>
    %489 = vector.shape_cast %488 : vector<1x1x64x64xf32> to vector<64x64xf32>
    %490 = vector.extract_strided_slice %489 {offsets = [0, 0], sizes = [16, 32], strides = [1, 1]} : vector<64x64xf32> to vector<16x32xf32>
    %cst_448 = arith.constant dense<0.000000e+00> : vector<16x1024xf32>
    %491 = tpu.matmul %490, %487, %cst_448 {dimension_numbers = #tpu.dot_dimension_numbers<[1], [0], [0], [1], [0, 0, 1, 1], [], []>} : vector<16x32xf32>, vector<32x1024xf32>, vector<16x1024xf32> -> vector<16x1024xf32>
    %492 = arith.addf %482, %491 : vector<16x1024xf32>
    %493 = vector.extract_strided_slice %441 {offsets = [0, 159], sizes = [32, 1024], strides = [1, 1]} : vector<32x1280xf32> to vector<32x1024xf32>
    %cst_449 = arith.constant 0.000000e+00 : f32
    %494 = vector.shape_cast %11 : vector<1x1024xi1> to vector<1x1024xi1>
    %495 = vector.broadcast %494 : vector<1x1024xi1> to vector<32x1024xi1>
    %496 = vector.broadcast %cst_449 : f32 to vector<32x1024xf32>
    %497 = arith.select %495, %493, %496 : vector<32x1024xi1>, vector<32x1024xf32>
    %c4_450 = arith.constant 4 : index
    %c6_451 = arith.constant 6 : index
    %c0_452 = arith.constant 0 : index
    %c0_453 = arith.constant 0 : index
    %498 = vector.load %arg2[%c4_450, %c6_451, %c0_452, %c0_453] : memref<6x10x64x64xf32, #tpu.memory_space<vmem>>, vector<1x1x64x64xf32>
    %499 = vector.shape_cast %498 : vector<1x1x64x64xf32> to vector<64x64xf32>
    %500 = vector.extract_strided_slice %499 {offsets = [0, 0], sizes = [16, 32], strides = [1, 1]} : vector<64x64xf32> to vector<16x32xf32>
    %cst_454 = arith.constant dense<0.000000e+00> : vector<16x1024xf32>
    %501 = tpu.matmul %500, %497, %cst_454 {dimension_numbers = #tpu.dot_dimension_numbers<[1], [0], [0], [1], [0, 0, 1, 1], [], []>} : vector<16x32xf32>, vector<32x1024xf32>, vector<16x1024xf32> -> vector<16x1024xf32>
    %502 = arith.addf %492, %501 : vector<16x1024xf32>
    %503 = vector.extract_strided_slice %441 {offsets = [0, 160], sizes = [32, 1024], strides = [1, 1]} : vector<32x1280xf32> to vector<32x1024xf32>
    %c4_455 = arith.constant 4 : index
    %c7_456 = arith.constant 7 : index
    %c0_457 = arith.constant 0 : index
    %c0_458 = arith.constant 0 : index
    %504 = vector.load %arg2[%c4_455, %c7_456, %c0_457, %c0_458] : memref<6x10x64x64xf32, #tpu.memory_space<vmem>>, vector<1x1x64x64xf32>
    %505 = vector.shape_cast %504 : vector<1x1x64x64xf32> to vector<64x64xf32>
    %506 = vector.extract_strided_slice %505 {offsets = [0, 0], sizes = [16, 32], strides = [1, 1]} : vector<64x64xf32> to vector<16x32xf32>
    %cst_459 = arith.constant dense<0.000000e+00> : vector<16x1024xf32>
    %507 = tpu.matmul %506, %503, %cst_459 {dimension_numbers = #tpu.dot_dimension_numbers<[1], [0], [0], [1], [0, 0, 1, 1], [], []>} : vector<16x32xf32>, vector<32x1024xf32>, vector<16x1024xf32> -> vector<16x1024xf32>
    %508 = arith.addf %502, %507 : vector<16x1024xf32>
    %509 = vector.extract_strided_slice %441 {offsets = [0, 161], sizes = [32, 1024], strides = [1, 1]} : vector<32x1280xf32> to vector<32x1024xf32>
    %cst_460 = arith.constant 0.000000e+00 : f32
    %510 = vector.shape_cast %13 : vector<1x1024xi1> to vector<1x1024xi1>
    %511 = vector.broadcast %510 : vector<1x1024xi1> to vector<32x1024xi1>
    %512 = vector.broadcast %cst_460 : f32 to vector<32x1024xf32>
    %513 = arith.select %511, %509, %512 : vector<32x1024xi1>, vector<32x1024xf32>
    %c4_461 = arith.constant 4 : index
    %c8_462 = arith.constant 8 : index
    %c0_463 = arith.constant 0 : index
    %c0_464 = arith.constant 0 : index
    %514 = vector.load %arg2[%c4_461, %c8_462, %c0_463, %c0_464] : memref<6x10x64x64xf32, #tpu.memory_space<vmem>>, vector<1x1x64x64xf32>
    %515 = vector.shape_cast %514 : vector<1x1x64x64xf32> to vector<64x64xf32>
    %516 = vector.extract_strided_slice %515 {offsets = [0, 0], sizes = [16, 32], strides = [1, 1]} : vector<64x64xf32> to vector<16x32xf32>
    %cst_465 = arith.constant dense<0.000000e+00> : vector<16x1024xf32>
    %517 = tpu.matmul %516, %513, %cst_465 {dimension_numbers = #tpu.dot_dimension_numbers<[1], [0], [0], [1], [0, 0, 1, 1], [], []>} : vector<16x32xf32>, vector<32x1024xf32>, vector<16x1024xf32> -> vector<16x1024xf32>
    %518 = arith.addf %508, %517 : vector<16x1024xf32>
    %c4_466 = arith.constant 4 : index
    %c9_467 = arith.constant 9 : index
    %c0_468 = arith.constant 0 : index
    %c0_469 = arith.constant 0 : index
    %519 = vector.load %arg2[%c4_466, %c9_467, %c0_468, %c0_469] : memref<6x10x64x64xf32, #tpu.memory_space<vmem>>, vector<1x1x64x64xf32>
    %520 = vector.shape_cast %519 : vector<1x1x64x64xf32> to vector<64x64xf32>
    %521 = vector.extract_strided_slice %520 {offsets = [0, 0], sizes = [16, 1], strides = [1, 1]} : vector<64x64xf32> to vector<16x1xf32>
    %522 = vector.broadcast %521 : vector<16x1xf32> to vector<16x1024xf32>
    %523 = arith.addf %518, %522 : vector<16x1024xf32>
    %cst_470 = arith.constant 0.000000e+00 : f32
    %524 = vector.broadcast %cst_470 : f32 to vector<16x1024xf32>
    %525 = arith.maximumf %523, %524 : vector<16x1024xf32>
    %c2_471 = arith.constant 2 : index
    %c0_472 = arith.constant 0 : index
    %c0_473 = arith.constant 0 : index
    %c0_474 = arith.constant 0 : index
    %526 = vector.load %arg3[%c2_471, %c0_472, %c0_473, %c0_474] : memref<3x5x32x64xf32, #tpu.memory_space<vmem>>, vector<1x1x32x64xf32>
    %527 = vector.shape_cast %526 : vector<1x1x32x64xf32> to vector<32x64xf32>
    %528 = vector.extract_strided_slice %527 {offsets = [0, 0], sizes = [4, 16], strides = [1, 1]} : vector<32x64xf32> to vector<4x16xf32>
    %c2_475 = arith.constant 2 : index
    %c4_476 = arith.constant 4 : index
    %c0_477 = arith.constant 0 : index
    %c0_478 = arith.constant 0 : index
    %529 = vector.load %arg3[%c2_475, %c4_476, %c0_477, %c0_478] : memref<3x5x32x64xf32, #tpu.memory_space<vmem>>, vector<1x1x32x64xf32>
    %530 = vector.shape_cast %529 : vector<1x1x32x64xf32> to vector<32x64xf32>
    %531 = vector.extract_strided_slice %530 {offsets = [0, 0], sizes = [4, 1], strides = [1, 1]} : vector<32x64xf32> to vector<4x1xf32>
    %cst_479 = arith.constant dense<0.000000e+00> : vector<4x1024xf32>
    %532 = tpu.matmul %528, %525, %cst_479 {dimension_numbers = #tpu.dot_dimension_numbers<[1], [0], [0], [1], [0, 0, 1, 1], [], []>} : vector<4x16xf32>, vector<16x1024xf32>, vector<4x1024xf32> -> vector<4x1024xf32>
    %533 = vector.broadcast %531 : vector<4x1xf32> to vector<4x1024xf32>
    %534 = arith.addf %532, %533 : vector<4x1024xf32>
    %535 = arith.negf %534 : vector<4x1024xf32>
    %536 = math.exp %535 : vector<4x1024xf32>
    %cst_480 = arith.constant 1.000000e+00 : f32
    %537 = vector.broadcast %cst_480 : f32 to vector<4x1024xf32>
    %538 = arith.addf %537, %536 : vector<4x1024xf32>
    %539 = arith.divf %537, %538 : vector<4x1024xf32>
    %c0_481 = arith.constant 0 : index
    %c0_482 = arith.constant 0 : index
    %c0_483 = arith.constant 0 : index
    %540 = vector.load %arg6[%c0_481, %c0_482, %c0_483] : memref<1x4x1024xf32, #tpu.memory_space<vmem>>, vector<1x4x1024xf32>
    %541 = vector.shape_cast %540 : vector<1x4x1024xf32> to vector<4x1024xf32>
    %542 = vector.shape_cast %539 : vector<4x1024xf32> to vector<1x4x1024xf32>
    tpu.vector_store %arg6[%c0_481, %c0_482, %c0_483], %542 {strides = array<i32>} : memref<1x4x1024xf32, #tpu.memory_space<vmem>>, vector<1x4x1024xf32>,
    return
  }
  func.func @transform_0(%arg0: i32) -> (i32, i32, i32) {
    %c0_i32 = arith.constant 0 : i32
    %c0_i32_0 = arith.constant 0 : i32
    %c0_i32_1 = arith.constant 0 : i32
    return %arg0, %c0_i32, %c0_i32_0 : i32, i32, i32
  }
  func.func @transform_1(%arg0: i32) -> (i32, i32, i32, i32) {
    %c0_i32 = arith.constant 0 : i32
    %c0_i32_0 = arith.constant 0 : i32
    %c0_i32_1 = arith.constant 0 : i32
    %c0_i32_2 = arith.constant 0 : i32
    %c0_i32_3 = arith.constant 0 : i32
    return %c0_i32, %c0_i32_0, %c0_i32_1, %c0_i32_2 : i32, i32, i32, i32
  }
  func.func @transform_2(%arg0: i32) -> (i32, i32, i32, i32) {
    %c0_i32 = arith.constant 0 : i32
    %c0_i32_0 = arith.constant 0 : i32
    %c0_i32_1 = arith.constant 0 : i32
    %c0_i32_2 = arith.constant 0 : i32
    %c0_i32_3 = arith.constant 0 : i32
    return %c0_i32, %c0_i32_0, %c0_i32_1, %c0_i32_2 : i32, i32, i32, i32
  }
  func.func @transform_3(%arg0: i32) -> (i32, i32, i32) {
    %c0_i32 = arith.constant 0 : i32
    %c0_i32_0 = arith.constant 0 : i32
    %c0_i32_1 = arith.constant 0 : i32
    %c0_i32_2 = arith.constant 0 : i32
    return %c0_i32, %c0_i32_0, %c0_i32_1 : i32, i32, i32
  }
  func.func @transform_4(%arg0: i32) -> (i32, i32, i32) {
    %c0_i32 = arith.constant 0 : i32
    %c0_i32_0 = arith.constant 0 : i32
    %c0_i32_1 = arith.constant 0 : i32
    %c0_i32_2 = arith.constant 0 : i32
    return %c0_i32, %c0_i32_0, %c0_i32_1 : i32, i32, i32
  }
  func.func @transform_5(%arg0: i32) -> (i32, i32, i32) {
    %c0_i32 = arith.constant 0 : i32
    %c0_i32_0 = arith.constant 0 : i32
    %c0_i32_1 = arith.constant 0 : i32
    return %arg0, %c0_i32, %c0_i32_0 : i32, i32, i32
  }
}

</mosaic_0001>

<bundles_post_ra>
// kernel: unet_forward.1
= control target key start
LH: loop header
LB: loop body
LE: loop exit
PB: predicated region body
PF: predicated region fallthrough
CT: control target
= control target key end

     0   :  { %s22992_s18 = smov 0   ;;  %s29157_s0 = inlined_call_operand.vmem [shape: f32[2,1,64], index: 0, kind: input, shape index: {}]   ;;  %s29158_s1 = inlined_call_operand.vmem [shape: f32[6,10,64,64], index: 1, kind: input, shape index: {}]   ;;  %s29159_s2 = inlined_call_operand.vmem [shape: f32[3,5,32,64], index: 2, kind: input, shape index: {}]   ;;  %s29160_s3 = inlined_call_operand.vmem [shape: bf16[5,64,256], index: 3, kind: input, shape index: {}]   ;;  %s29161_s4 = inlined_call_operand.vmem [shape: bf16[5,256,1024], index: 4, kind: input, shape index: {}]   ;;  %s29162_s5 = inlined_call_operand.vmem [shape: f32[2,4,1024], index: 5, kind: output, shape index: {}]  }
   0x1 LB: > { %s16960_s19 = sadd.s32 4294967295, %s22942_s18   ;;  %p16964_p0 = scmp.ge.s32.totalorder %s22942_s18, 1  ;;  %s22942_s18 = sphi %s22992_s18, %s15_s18  }
   0x2   : > { %p185_p1 = scmp.lt.s32.totalorder %s22942_s18, 3 }
   0x4   : > { %p186_p2 = pnand %p16964_p0, %p185_p1 }
   0x6   : > { %189 = sbr.rel (%p186_p2) target bundleno = 4873 (0x1309), region = 40 }
   0xd   : > { %v16967_v0 = vld [vmem:[%s29158_s1 + $0xc80] sm:$0xff]  ;;  %v16968_v1 = vld [vmem:[%s29158_s1 + $0xc88] sm:$0xff]  ;;  %v22944_v3 = vmov 0.0|0.0   ;;  %v16969_v6 = vld [vmem:[%s29158_s1 + $0xc90] sm:$0xff]  ;;  %vm22945_vm0 = vmmov 0   ;;  %v29164_v11 = vmov 0.0  }
   0xe   : > { %v16976_v2 = vld [vmem:[%s29158_s1 + $0xcc0] sm:$0xff]  ;;  %20304 = vmatprep.subr.bf16.mxu0 %v22944_v3  ;;  %20316 = vmatprep.subr.bf16.mxu1 %v22944_v3  ;;  %v23011_v4 = vpack.c.bf16 %v16968_v1, %v16967_v0  ;;  %v16977_v5 = vld [vmem:[%s29158_s1 + $0xcc8] sm:$0xff]  ;;  %v16970_v7 = vld [vmem:[%s29158_s1 + $0xc98] sm:$0xff]  ;;  %v22947_v13 = vmov 0   ;;  %p211_p3 = scmp.lt.s32.totalorder %s16960_s19, 1  ;;  %vm269_vm1 = vcmask 523264  }
   0xf   : > { %v23022_v8 = vpack.c.bf16 %v16977_v5, %v16976_v2  ;;  %v16978_v9 = vld [vmem:[%s29158_s1 + $0xcd0] sm:$0xff]  ;;  %v16979_v10 = vld [vmem:[%s29158_s1 + $0xcd8] sm:$0xff]  ;;  %19422 = vmatprep.mubr.msk.f32.mxu0 %vm22945_vm0, %v29164_v11  ;;  %19441 = vmatprep.mubr.msk.f32.mxu1 %vm22945_vm0, %v29164_v11  ;;  %v23035_v12 = vpack.c.bf16 %v16970_v7, %v16969_v6  ;;  %v16971_v15 = vld [vmem:[%s29158_s1 + $0xca0] sm:$0xff]  ;;  %vm29221_vm2 = vcmask 130048   ;;  %vm29232_vm3 = vcmask 261120   ;;  %s22948_s13 = smov 16  }
  0x10   : > { %20306 = vmatpush3.bf16.msra.mxu0 %v23011_v4  ;;  %21882 = vset.pattern.permute.xlu0 %v22947_v13  ;;  %v23040_v14 = vpack.c.bf16 %v16979_v10, %v16978_v9  ;;  %v16972_v16 = vld [vmem:[%s29158_s1 + $0xca8] sm:$0xff]  ;;  %v16980_v17 = vld [vmem:[%s29158_s1 + $0xce0] sm:$0xff]  ;;  %v16973_v21 = vld [vmem:[%s29158_s1 + $0xcb0] sm:$0xff]  ;;  %s29562_s19 = smov (!%p211_p3, %s16960_s19), 1  ;;  %s22949_s14 = smov 17   ;;  %vm6040_vm4 = vcmask 138240  }
  0x11   : > { %20318 = vmatpush3.bf16.msra.mxu1 %v23022_v8  ;;  %20307 = vmatprep.subr.bf16.mxu0 %v22944_v3  ;;  %v16981_v18 = vld [vmem:[%s29158_s1 + $0xce8] sm:$0xff]  ;;  %v23059_v19 = vpack.c.bf16 %v16972_v16, %v16971_v15  ;;  %v16974_v22 = vld [vmem:[%s29158_s1 + $0xcb8] sm:$0xff]  ;;  %v16982_v23 = vld [vmem:[%s29158_s1 + $0xcf0] sm:$0xff]  ;;  %s213_s6 = scalar_lea.vmem %s29157_s0, %s29562_s19  ;;  %s22950_s15 = smov 15   ;;  %vm6405_vm9 = vcmask 121856   ;;  %vm29225_vm14 = vcmask 7168  }
  0x12   : > { %20319 = vmatprep.subr.bf16.mxu1 %v22944_v3  ;;  %21883 = vset.pattern.permute.xlu1 %v22947_v13  ;;  %v23063_v20 = vpack.c.bf16 %v16981_v18, %v16980_v17  ;;  %v16983_v24 = vld [vmem:[%s29158_s1 + $0xcf8] sm:$0xff]  ;;  %v23083_v25 = vpack.c.bf16 %v16974_v22, %v16973_v21  ;;  %v16987_v27 = vld [vmem:[%s29158_s1 + $0xd00] sm:$0xff]  ;;  %v16988_v28 = vld [vmem:[%s29158_s1 + $0xd08] sm:$0xff]  ;;  %s22951_s16 = smov 1   ;;  %s22952_s17 = smov 127   ;;  %vm29222_vm15 = vcmask 1039360  }
  0x13   : > { %v23087_v26 = vpack.c.bf16 %v16983_v24, %v16982_v23  ;;  %v16998_v29 = vld [vmem:[%s29158_s1 + $0xd40] sm:$0xff]  ;;  %v16999_v30 = vld [vmem:[%s29158_s1 + $0xd48] sm:$0xff]  ;;  %v23109_v32 = vpack.c.bf16 %v16988_v28, %v16987_v27  ;;  %v16989_v34 = vld [vmem:[%s29158_s1 + $0xd10] sm:$0xff]  ;;  %s22953_s20 = smov 113   ;;  %s22954_s21 = smov 112  }
  0x14   : > { %20309 = vmatpush3.bf16.msra.mxu0 %v23035_v12  ;;  %v23107_v31 = vld [vmem:[%s213_s6] sm:$0x1]  ;;  %v23113_v33 = vpack.c.bf16 %v16999_v30, %v16998_v29  ;;  %v16990_v35 = vld [vmem:[%s29158_s1 + $0xd18] sm:$0xff]  ;;  %v17000_v36 = vld [vmem:[%s29158_s1 + $0xd50] sm:$0xff]  ;;  %s22955_s22 = smov 111   ;;  %s22956_s10 = smov 32  }
  0x15   : > { %20321 = vmatpush3.bf16.msra.mxu1 %v23040_v14  ;;  %20310 = vmatprep.subr.bf16.mxu0 %v22944_v3  ;;  %v17001_v37 = vld [vmem:[%s29158_s1 + $0xd58] sm:$0xff]  ;;  %v23133_v38 = vpack.c.bf16 %v16990_v35, %v16989_v34  ;;  %v16991_v40 = vld [vmem:[%s29158_s1 + $0xd20] sm:$0xff]  ;;  %v16992_v41 = vld [vmem:[%s29158_s1 + $0xd28] sm:$0xff]  ;;  %s22957_s11 = smov 33   ;;  %s22958_s12 = smov 31  }
  0x16   : > { %20322 = vmatprep.subr.bf16.mxu1 %v22944_v3  ;;  %v23137_v39 = vpack.c.bf16 %v17001_v37, %v17000_v36  ;;  %v17002_v42 = vld [vmem:[%s29158_s1 + $0xd60] sm:$0xff]  ;;  %v17003_v43 = vld [vmem:[%s29158_s1 + $0xd68] sm:$0xff]  ;;  %v23163_v46 = vpack.c.bf16 %v16992_v41, %v16991_v40  ;;  %v16993_v48 = vld [vmem:[%s29158_s1 + $0xd30] sm:$0xff]  ;;  %s22960_s24 = smov 96   ;;  %s22961_s6 = smov 95  }
  0x17   : > { %v343_v44 = vld [vmem:[%s29158_s1] sm:$0xff]  ;;  %v344_v45 = vld [vmem:[%s29158_s1 + $0x8] sm:$0xff]  ;;  %v23167_v47 = vpack.c.bf16 %v17003_v43, %v17002_v42  ;;  %v16994_v49 = vld [vmem:[%s29158_s1 + $0xd38] sm:$0xff] }
  0x18   : > { %20312 = vmatpush3.bf16.msra.mxu0 %v23059_v19  ;;  %347 = vperm.xlu0 %21882, %v343_v44   ;;  %v16985_v50 = vld [vmem:[%s29158_s1 + $0x40] sm:$0xff]  ;;  %v17004_v51 = vld [vmem:[%s29158_s1 + $0xd70] sm:$0xff]  ;;  %v17005_v52 = vld [vmem:[%s29158_s1 + $0xd78] sm:$0xff]  ;;  %v23189_v54 = vpack.c.bf16 %v16994_v49, %v16993_v48 }
  0x19   : > { %20324 = vmatpush3.bf16.msra.mxu1 %v23063_v20  ;;  %20313 = vmatprep.subr.bf16.mxu0 %v22944_v3  ;;  %v16986_v53 = vld [vmem:[%s29158_s1 + $0x48] sm:$0xff]  ;;  %v23193_v55 = vpack.c.bf16 %v17005_v52, %v17004_v51  ;;  %v17009_v56 = vld [vmem:[%s29158_s1 + $0xd80] sm:$0xff]  ;;  %v17011_v0 = vld [vmem:[%s29158_s1 + $0xd90] sm:$0xff] }
  0x1a   : > { %20325 = vmatprep.subr.bf16.mxu1 %v22944_v3  ;;  %352 = vperm.xlu1 %21883, %v344_v45   ;;  %v17010_v57 = vld [vmem:[%s29158_s1 + $0xd88] sm:$0xff]  ;;  %v16996_v58 = vld [vmem:[%s29158_s1 + $0x80] sm:$0xff]  ;;  %v17012_v1 = vld [vmem:[%s29158_s1 + $0xd98] sm:$0xff] }
  0x1b   : > { %v17020_v59 = vld [vmem:[%s29158_s1 + $0xdc0] sm:$0xff]  ;;  %v17021_v60 = vld [vmem:[%s29158_s1 + $0xdc8] sm:$0xff]  ;;  %v23215_v62 = vpack.c.bf16 %v17010_v57, %v17009_v56  ;;  %v17022_v2 = vld [vmem:[%s29158_s1 + $0xdd0] sm:$0xff]  ;;  %v23245_v9 = vpack.c.bf16 %v17012_v1, %v17011_v0 }
  0x1c   : > { %20315 = vmatpush3.bf16.msra.mxu0 %v23083_v25  ;;  %445 = vperm.xlu0 %21882, %v16985_v50   ;;  %v16997_v61 = vld [vmem:[%s29158_s1 + $0x88] sm:$0xff]  ;;  %v23219_v63 = vpack.c.bf16 %v17021_v60, %v17020_v59  ;;  %v17023_v5 = vld [vmem:[%s29158_s1 + $0xdd8] sm:$0xff]  ;;  %v17013_v6 = vld [vmem:[%s29158_s1 + $0xda0] sm:$0xff] }
  0x1d   : > { %20327 = vmatpush3.bf16.msra.mxu1 %v23087_v26  ;;  %20328 = vmatprep.subr.bf16.mxu0 %v22944_v3  ;;  %v17014_v7 = vld [vmem:[%s29158_s1 + $0xda8] sm:$0xff]  ;;  %v17024_v10 = vld [vmem:[%s29158_s1 + $0xde0] sm:$0xff]  ;;  %v23258_v17 = vpack.c.bf16 %v17023_v5, %v17022_v2  ;;  %v17015_v22 = vld [vmem:[%s29158_s1 + $0xdb0] sm:$0xff] }
  0x1e   : > { %20340 = vmatprep.subr.bf16.mxu1 %v22944_v3  ;;  %450 = vperm.xlu1 %21883, %v16986_v53   ;;  %v17025_v15 = vld [vmem:[%s29158_s1 + $0xde8] sm:$0xff]  ;;  %v17007_v16 = vld [vmem:[%s29158_s1 + $0xc0] sm:$0xff]  ;;  %v17016_v23 = vld [vmem:[%s29158_s1 + $0xdb8] sm:$0xff]  ;;  %v23281_v27 = vpack.c.bf16 %v17014_v7, %v17013_v6 }
  0x1f   : > { %19423 = vmatmul.mubr.msk.f32.vlgmr.msra.gmra.mrb[0].mxu0 %vm269_vm1, %v23107_v31  ;;  %v17008_v18 = vld [vmem:[%s29158_s1 + $0xc8] sm:$0xff]  ;;  %v17018_v21 = vld [vmem:[%s29158_s1 + $0x100] sm:$0xff]  ;;  %v17026_v28 = vld [vmem:[%s29158_s1 + $0xdf0] sm:$0xff]  ;;  %v23291_v30 = vpack.c.bf16 %v17025_v15, %v17024_v10  ;;  %v23307_v40 = vpack.c.bf16 %v17016_v23, %v17015_v22 }
  0x20   : > { %19442 = vmatmul.mubr.msk.f32.vlgmr.msra.gmra.mrb[0].mxu1 %vm269_vm1, %v23107_v31  ;;  %20330 = vmatpush3.bf16.msra.mxu0 %v23109_v32  ;;  %v17019_v24 = vld [vmem:[%s29158_s1 + $0x108] sm:$0xff]  ;;  %v17027_v29 = vld [vmem:[%s29158_s1 + $0xdf8] sm:$0xff]  ;;  %v17029_v34 = vld [vmem:[%s29158_s1 + $0x140] sm:$0xff] }
  0x21   : > { %20342 = vmatpush3.bf16.msra.mxu1 %v23113_v33  ;;  %20331 = vmatprep.subr.bf16.mxu0 %v22944_v3  ;;  %v17031_v35 = vld [vmem:[%s29158_s1 + $0xe00] sm:$0xff]  ;;  %v17032_v36 = vld [vmem:[%s29158_s1 + $0xe08] sm:$0xff]  ;;  %v23317_v43 = vpack.c.bf16 %v17027_v29, %v17026_v28  ;;  %v17033_v45 = vld [vmem:[%s29158_s1 + $0xe10] sm:$0xff] }
  0x22   : > { %20343 = vmatprep.subr.bf16.mxu1 %v22944_v3  ;;  %19460 = vmatprep.mubr.msk.f32.mxu0 %vm22945_vm0, %v29164_v11  ;;  %v17030_v37 = vld [vmem:[%s29158_s1 + $0x148] sm:$0xff]  ;;  %v17042_v41 = vld [vmem:[%s29158_s1 + $0xe40] sm:$0xff]  ;;  %v17034_v48 = vld [vmem:[%s29158_s1 + $0xe18] sm:$0xff]  ;;  %v23330_v49 = vpack.c.bf16 %v17032_v36, %v17031_v35 }
  0x23   : > { %19479 = vmatprep.mubr.msk.f32.mxu1 %vm22945_vm0, %v29164_v11  ;;  %545 = vperm.xlu0 %21882, %v16996_v58   ;;  %v17043_v42 = vld [vmem:[%s29158_s1 + $0xe48] sm:$0xff]  ;;  %v17040_v44 = vld [vmem:[%s29158_s1 + $0x180] sm:$0xff]  ;;  %v17044_v50 = vld [vmem:[%s29158_s1 + $0xe50] sm:$0xff]  ;;  %v23348_v53 = vpack.c.bf16 %v17034_v48, %v17033_v45 }
  0x24   : > { %20333 = vmatpush3.bf16.msra.mxu0 %v23133_v38  ;;  %550 = vperm.xlu1 %21883, %v16997_v61   ;;  %v23337_v51 = vpack.c.bf16 %v17043_v42, %v17042_v41  ;;  %v17045_v52 = vld [vmem:[%s29158_s1 + $0xe58] sm:$0xff]  ;;  %v17041_v56 = vld [vmem:[%s29158_s1 + $0x188] sm:$0xff]  ;;  %v17035_v58 = vld [vmem:[%s29158_s1 + $0xe20] sm:$0xff] }
  0x25   : > { %20345 = vmatpush3.bf16.msra.mxu1 %v23137_v39  ;;  %20334 = vmatprep.subr.bf16.mxu0 %v22944_v3  ;;  %v23355_v57 = vpack.c.bf16 %v17045_v52, %v17044_v50  ;;  %v17036_v59 = vld [vmem:[%s29158_s1 + $0xe28] sm:$0xff]  ;;  %v17051_v60 = vld [vmem:[%s29158_s1 + $0x1c0] sm:$0xff]  ;;  %v17037_v6 = vld [vmem:[%s29158_s1 + $0xe30] sm:$0xff] }
  0x26   : > { %20346 = vmatprep.subr.bf16.mxu1 %v22944_v3  ;;  %v17046_v61 = vld [vmem:[%s29158_s1 + $0xe60] sm:$0xff]  ;;  %v17047_v0 = vld [vmem:[%s29158_s1 + $0xe68] sm:$0xff]  ;;  %v23378_v1 = vpack.c.bf16 %v17036_v59, %v17035_v58  ;;  %v17038_v7 = vld [vmem:[%s29158_s1 + $0xe38] sm:$0xff] }
  0x27   : > { %645 = vperm.xlu0 %21882, %v17007_v16   ;;  %v17052_v2 = vld [vmem:[%s29158_s1 + $0x1c8] sm:$0xff]  ;;  %v23385_v5 = vpack.c.bf16 %v17047_v0, %v17046_v61  ;;  %v17062_v10 = vld [vmem:[%s29158_s1 + $0x200] sm:$0xff]  ;;  %v17048_v15 = vld [vmem:[%s29158_s1 + $0xe70] sm:$0xff] }
  0x28   : > { %20336 = vmatpush3.bf16.msra.mxu0 %v23163_v46  ;;  %650 = vperm.xlu1 %21883, %v17008_v18   ;;  %v17049_v16 = vld [vmem:[%s29158_s1 + $0xe78] sm:$0xff]  ;;  %v23404_v18 = vpack.c.bf16 %v17038_v7, %v17037_v6  ;;  %v17053_v23 = vld [vmem:[%s29158_s1 + $0xe80] sm:$0xff]  ;;  %v17055_v35 = vld [vmem:[%s29158_s1 + $0xe90] sm:$0xff] }
  0x29   : > { %20348 = vmatpush3.bf16.msra.mxu1 %v23167_v47  ;;  %20337 = vmatprep.subr.bf16.mxu0 %v22944_v3  ;;  %v23411_v22 = vpack.c.bf16 %v17049_v16, %v17048_v15  ;;  %v17064_v28 = vld [vmem:[%s29158_s1 + $0x240] sm:$0xff]  ;;  %v17056_v36 = vld [vmem:[%s29158_s1 + $0xe98] sm:$0xff]  ;;  %v17157_v42 = vld [vmem:[%s29158_s1 + $0x4c8] sm:$0xff] }
  0x2a   : > { %20349 = vmatprep.subr.bf16.mxu1 %v22944_v3  ;;  %v23446_v41 = vpack.c.bf16 %v17056_v36, %v17055_v35  ;;  %v17058_v45 = vld [vmem:[%s29158_s1 + $0xea8] sm:$0xff]  ;;  %v17158_v48 = vld [vmem:[%s29158_s1 + $0x4d0] sm:$0xff]  ;;  %v17159_v52 = vld [vmem:[%s29158_s1 + $0x4d8] sm:$0xff] }
  0x2b   : > { %745 = vperm.xlu0 %21882, %v17018_v21   ;;  %v17063_v21 = vld [vmem:[%s29158_s1 + $0x208] sm:$0xff]  ;;  %v17060_v58 = vld [vmem:[%s29158_s1 + $0xeb8] sm:$0xff]  ;;  %v17340_v59 = vld [vmem:[%s29158_s1 + $0x740] sm:$0xff] }
  0x2c   : > { %20339 = vmatpush3.bf16.msra.mxu0 %v23189_v54  ;;  %750 = vperm.xlu1 %21883, %v17019_v24   ;;  %v17054_v24 = vld [vmem:[%s29158_s1 + $0xe88] sm:$0xff]  ;;  %v17342_v0 = vld [vmem:[%s29158_s1 + $0x750] sm:$0xff] }
  0x2d   : > { %20351 = vmatpush3.bf16.msra.mxu1 %v23193_v55  ;;  %20352 = vmatprep.subr.bf16.mxu0 %v22944_v3  ;;  %v23424_v29 = vpack.c.bf16 %v17054_v24, %v17053_v23  ;;  %v17341_v61 = vld [vmem:[%s29158_s1 + $0x748] sm:$0xff]  ;;  %v17346_v7 = vld [vmem:[%s29158_s1 + $0x770] sm:$0xff]  ;;  %v29163_v23 = vlaneseq }
  0x2e   : > { %20364 = vmatprep.subr.bf16.mxu1 %v22944_v3  ;;  %v17345_v6 = vld [vmem:[%s29158_s1 + $0x768] sm:$0xff]  ;;  %v17442_v16 = vld [vmem:[%s29159_s2 + $0x90] sm:$0xff] }
  0x2f   : > { %19461 = vmatmul.mubr.msk.f32.vlgmr.msra.gmra.mrb[2].mxu0 %vm269_vm1, %v23107_v31  ;;  %845 = vperm.xlu0 %21882, %v17029_v34   ;;  %v17065_v34 = vld [vmem:[%s29158_s1 + $0x248] sm:$0xff]  ;;  %v356_v24 = vshrl.u32 %v29163_v23, 7 }
  0x30   : > { %19480 = vmatmul.mubr.msk.f32.vlgmr.msra.gmra.mrb[2].mxu1 %vm269_vm1, %v23107_v31  ;;  %20354 = vmatpush3.bf16.msra.mxu0 %v23215_v62  ;;  %v17441_v15 = vld [vmem:[%s29159_s2 + $0x88] sm:$0xff] }
  0x31   : > { %20366 = vmatpush3.bf16.msra.mxu1 %v23219_v63  ;;  %20355 = vmatprep.subr.bf16.mxu0 %v22944_v3  ;;  %v23535_v35 = vsub.s32 0, %v356_v24 }
  0x32   : > { %20367 = vmatprep.subr.bf16.mxu1 %v22944_v3  ;;  %19498 = vmatprep.mubr.msk.f32.mxu0 %vm22945_vm0, %v29164_v11 }
  0x33   : > { %19517 = vmatprep.mubr.msk.f32.mxu1 %vm22945_vm0, %v29164_v11  ;;  %850 = vperm.xlu1 %21883, %v17030_v37   ;;  %v17156_v37 = vld [vmem:[%s29158_s1 + $0x4c0] sm:$0xff] }
  0x34   : > { %20357 = vmatpush3.bf16.msra.mxu0 %v23245_v9  ;;  %945 = vperm.xlu0 %21882, %v17040_v44   ;;  %v17057_v44 = vld [vmem:[%s29158_s1 + $0xea0] sm:$0xff] }
  0x35   : > { %20369 = vmatpush3.bf16.msra.mxu1 %v23258_v17  ;;  %20358 = vmatprep.subr.bf16.mxu0 %v22944_v3  ;;  %v23466_v50 = vpack.c.bf16 %v17058_v45, %v17057_v44 }
  0x36   : > { %20370 = vmatprep.subr.bf16.mxu1 %v22944_v3 }
  0x37   : > { %950 = vperm.xlu1 %21883, %v17041_v56   ;;  %v17059_v56 = vld [vmem:[%s29158_s1 + $0xeb0] sm:$0xff] }
  0x38   : > { %20360 = vmatpush3.bf16.msra.mxu0 %v23281_v27  ;;  %1045 = vperm.xlu0 %21882, %v17051_v60   ;;  %v23484_v60 = vpack.c.bf16 %v17060_v58, %v17059_v56 }
  0x39   : > { %20372 = vmatpush3.bf16.msra.mxu1 %v23291_v30  ;;  %20361 = vmatprep.subr.bf16.mxu0 %v22944_v3 }
  0x3a   : > { %20373 = vmatprep.subr.bf16.mxu1 %v22944_v3 }
  0x3b   : > { %1050 = vperm.xlu1 %21883, %v17052_v2   ;;  %v17343_v2 = vld [vmem:[%s29158_s1 + $0x758] sm:$0xff] }
  0x3c   : > { %20363 = vmatpush3.bf16.msra.mxu0 %v23307_v40  ;;  %1145 = vperm.xlu0 %21882, %v17062_v10   ;;  %v17440_v10 = vld [vmem:[%s29159_s2 + $0x80] sm:$0xff] }
  0x3d   : > { %20375 = vmatpush3.bf16.msra.mxu1 %v23317_v43  ;;  %20376 = vmatprep.subr.bf16.mxu0 %v22944_v3 }
  0x3e   : > { %20388 = vmatprep.subr.bf16.mxu1 %v22944_v3 }
  0x3f   : > { %19499 = vmatmul.mubr.msk.f32.vlgmr.msra.gmra.mrb[4].mxu0 %vm269_vm1, %v23107_v31  ;;  %1150 = vperm.xlu1 %21883, %v17063_v21   ;;  %v17443_v21 = vld [vmem:[%s29159_s2 + $0x98] sm:$0xff] }
  0x40   : > { %19518 = vmatmul.mubr.msk.f32.vlgmr.msra.gmra.mrb[4].mxu1 %vm269_vm1, %v23107_v31  ;;  %20378 = vmatpush3.bf16.msra.mxu0 %v23330_v49 }
  0x41   : > { %20390 = vmatpush3.bf16.msra.mxu1 %v23337_v51  ;;  %20379 = vmatprep.subr.bf16.mxu0 %v22944_v3 }
  0x42   : > { %20391 = vmatprep.subr.bf16.mxu1 %v22944_v3  ;;  %19536 = vmatprep.mubr.msk.f32.mxu0 %vm22945_vm0, %v29164_v11 }
  0x43   : > { %19555 = vmatprep.mubr.msk.f32.mxu1 %vm22945_vm0, %v29164_v11  ;;  %1166 = vperm.xlu0 %21882, %v17064_v28  }
  0x44   : > { %20381 = vmatpush3.bf16.msra.mxu0 %v23348_v53  ;;  %1171 = vperm.xlu1 %21883, %v17065_v34  }
  0x45   : > { %20393 = vmatpush3.bf16.msra.mxu1 %v23355_v57  ;;  %20382 = vmatprep.subr.bf16.mxu0 %v22944_v3 }
  0x46   : > { %20394 = vmatprep.subr.bf16.mxu1 %v22944_v3 }
  0x47   : > { %2813 = vperm.xlu0 %21882, %v17156_v37  }
  0x48   : > { %20384 = vmatpush3.bf16.msra.mxu0 %v23378_v1  ;;  %2818 = vperm.xlu1 %21883, %v17157_v42  }
  0x49   : > { %20396 = vmatpush3.bf16.msra.mxu1 %v23385_v5  ;;  %20385 = vmatprep.subr.bf16.mxu0 %v22944_v3 }
  0x4a   : > { %20397 = vmatprep.subr.bf16.mxu1 %v22944_v3 }
  0x4b   : > { %2823 = vperm.xlu0 %21882, %v17158_v48  }
  0x4c   : > { %20387 = vmatpush3.bf16.msra.mxu0 %v23404_v18  ;;  %2828 = vperm.xlu1 %21883, %v17159_v52  }
  0x4d   : > { %20399 = vmatpush3.bf16.msra.mxu1 %v23411_v22  ;;  %20400 = vmatprep.subr.bf16.mxu0 %v22944_v3 }
  0x4e   : > { %20413 = vmatprep.subr.bf16.mxu1 %v23011_v4 }
  0x4f   : > { %19537 = vmatmul.mubr.msk.f32.vlgmr.msra.gmra.mrb[6].mxu0 %vm269_vm1, %v23107_v31  ;;  %4926 = vperm.xlu0 %21882, %v17340_v59  }
  0x50   : > { %19556 = vmatmul.mubr.msk.f32.vlgmr.msra.gmra.mrb[6].mxu1 %vm269_vm1, %v23107_v31  ;;  %20402 = vmatpush3.bf16.msra.mxu0 %v23424_v29 }
  0x51   : > { %20403 = vmatprep.subr.bf16.mxu0 %v22944_v3  ;;  %19574 = vmatprep.mubr.msk.f32.mxu0 %vm22945_vm0, %v29164_v11  ;;  %vm7110_vm0 = vcmask 924672  }
  0x52   : > { %20415 = vmatpush3.bf16.msra.mxu1 %v23011_v4  ;;  %4931 = vperm.xlu1 %21883, %v17341_v61  }
  0x53   : > { %20417 = vmatprep.subr.bf16.mxu1 %v23035_v12  ;;  %4936 = vperm.xlu0 %21882, %v17342_v0  }
  0x54   : > { %20405 = vmatpush3.bf16.msra.mxu0 %v23446_v41 }
  0x55   : > { %20406 = vmatprep.subr.bf16.mxu0 %v22944_v3 }
  0x56   : > { %20419 = vmatpush3.bf16.msra.mxu1 %v23035_v12  ;;  %4941 = vperm.xlu1 %21883, %v17343_v2  }
  0x57   : > { %20421 = vmatprep.subr.bf16.mxu1 %v23059_v19 }
  0x58   : > { %20408 = vmatpush3.bf16.msra.mxu0 %v23466_v50 }
  0x59   : > { %20409 = vmatprep.subr.bf16.mxu0 %v22944_v3  ;;  %v17344_v3 = vld [vmem:[%s29158_s1 + $0x760] sm:$0xff] }
  0x5a   : > { %20423 = vmatpush3.bf16.msra.mxu1 %v23059_v19  ;;  %4946 = vperm.xlu0 %21882, %v17344_v3  }
  0x5b   : > { %20425 = vmatprep.subr.bf16.mxu1 %v23083_v25  ;;  %4951 = vperm.xlu1 %21883, %v17345_v6  }
  0x5c   : > { %20411 = vmatpush3.bf16.msra.mxu0 %v23484_v60 }
  0x5d   : > { %20429 = vmatprep.subr.bf16.mxu0 %v23022_v8 }
  0x5e   : > { %20427 = vmatpush3.bf16.msra.mxu1 %v23083_v25  ;;  %4956 = vperm.xlu0 %21882, %v17346_v7  }
  0x5f   : > { %19575 = vmatmul.mubr.msk.f32.vlgmr.msra.gmra.mrb[8].mxu0 %vm269_vm1, %v23107_v31  ;;  %v17347_v31 = vld [vmem:[%s29158_s1 + $0x778] sm:$0xff] }
  0x60   : > { %20431 = vmatpush3.bf16.msra.mxu0 %v23022_v8  ;;  %4961 = vperm.xlu1 %21883, %v17347_v31  }
  0x61   : > { %20433 = vmatprep.subr.bf16.mxu0 %v23040_v14 }
  0x62   : > { %5849 = vperm.xlu0 %21882, %v17440_v10  }
  0x64   : > { %20435 = vmatpush3.bf16.msra.mxu0 %v23040_v14  ;;  %5854 = vperm.xlu1 %21883, %v17441_v15  }
  0x65   : > { %20437 = vmatprep.subr.bf16.mxu0 %v23063_v20 }
  0x66   : > { %5859 = vperm.xlu0 %21882, %v17442_v16  }
  0x68   : > { %20439 = vmatpush3.bf16.msra.mxu0 %v23063_v20  ;;  %5864 = vperm.xlu1 %21883, %v17443_v21  }
  0x69   : > { %20441 = vmatprep.subr.bf16.mxu0 %v23087_v26 }
  0x6c   : > { %20443 = vmatpush3.bf16.msra.mxu0 %v23087_v26 }
  0x97   : > { %v348_v28 = vpop.permute.xlu0 %347 }
  0x99   : > { %v353_v34 = vpop.permute.xlu1 %352 }
  0x9b   : > { %v446_v52 = vpop.permute.xlu0 %445 }
  0x9d   : > { %v451_v56 = vpop.permute.xlu1 %450 }
  0xa2   : > { %v546_v6 = vpop.permute.xlu0 %545 }
  0xa3   : > { %v551_v7 = vpop.permute.xlu1 %550 }
  0xf2   : > { %v339_v36 = vpop.f32.mrb[0].mxu0 }
  0xf3   : > { %v358_v37 = vrot.slane %v339_v36, %v23535_v35  ;;  %v19424_v42 = vpop.f32.mrb[1].mxu0  ;;  %v436_v44 = vpop.f32.mrb[0].mxu1 }
  0xf4   : > { %v456_v45 = vrot.slane %v436_v44, %v23535_v35  ;;  %v19443_v48 = vpop.f32.mrb[1].mxu1  ;;  %v646_v36 = vpop.permute.xlu0 %645 }
  0xf5   : > { %v359_v58 = vmul.f32 %v358_v37, %v348_v28  ;;  %v360_v59 = vmul.f32 %v358_v37, %v353_v34  ;;  %v651_v42 = vpop.permute.xlu1 %650 }
  0xf6   : > { %v457_v61 = vmul.f32 %v456_v45, %v446_v52  ;;  %v458_v0 = vmul.f32 %v456_v45, %v451_v56 }
  0xf8   : > { %v459_v2 = vadd.f32 %v457_v61, %v359_v58  ;;  %v460_v3 = vadd.f32 %v458_v0, %v360_v59  ;;  %v746_v59 = vpop.permute.xlu0 %745 }
  0xf9   : > { %v751_v58 = vpop.permute.xlu1 %750 }
  0xfd   : > { %v851_v23 = vpop.permute.xlu1 %850 }
 0x102   : > { %v536_v31 = vpop.f32.mrb[2].mxu0 }
 0x103   : > { %v556_v10 = vrot.slane %v536_v31, %v23535_v35  ;;  %v19462_v15 = vpop.f32.mrb[3].mxu0  ;;  %v636_v16 = vpop.f32.mrb[2].mxu1 }
 0x104   : > { %v656_v21 = vrot.slane %v636_v16, %v23535_v35  ;;  %v19481_v24 = vpop.f32.mrb[3].mxu1 }
 0x105   : > { %v557_v44 = vmul.f32 %v556_v10, %v546_v6  ;;  %v558_v48 = vmul.f32 %v556_v10, %v551_v7  ;;  %v846_v7 = vpop.permute.xlu0 %845 }
 0x106   : > { %v657_v28 = vmul.f32 %v656_v21, %v646_v36  ;;  %v658_v34 = vmul.f32 %v656_v21, %v651_v42 }
 0x107   : > { %v559_v37 = vadd.f32 %v557_v44, %v459_v2  ;;  %v560_v45 = vadd.f32 %v558_v48, %v460_v3  ;;  %v951_v48 = vpop.permute.xlu1 %950 }
 0x109   : > { %v659_v52 = vadd.f32 %v657_v28, %v559_v37  ;;  %v660_v56 = vadd.f32 %v658_v34, %v560_v45  ;;  %v946_v44 = vpop.permute.xlu0 %945 }
 0x112   : > { %v736_v61 = vpop.f32.mrb[4].mxu0 }
 0x113   : > { %v756_v0 = vrot.slane %v736_v61, %v23535_v35  ;;  %v836_v31 = vpop.f32.mrb[4].mxu1  ;;  %v19500_v15 = vpop.f32.mrb[5].mxu0 }
 0x114   : > { %v856_v16 = vrot.slane %v836_v31, %v23535_v35  ;;  %v19519_v24 = vpop.f32.mrb[5].mxu1 }
 0x115   : > { %v757_v11 = vmul.f32 %v756_v0, %v746_v59  ;;  %v758_v6 = vmul.f32 %v756_v0, %v751_v58  ;;  %v1046_v58 = vpop.permute.xlu0 %1045  ;;  %v1051_v0 = vpop.permute.xlu1 %1050 }
 0x116   : > { %v858_v10 = vmul.f32 %v856_v16, %v851_v23  ;;  %v857_v3 = vmul.f32 %v856_v16, %v846_v7 }
 0x117   : > { %v759_v21 = vadd.f32 %v757_v11, %v659_v52  ;;  %v760_v2 = vadd.f32 %v758_v6, %v660_v56 }
 0x119   : > { %v859_v36 = vadd.f32 %v857_v3, %v759_v21  ;;  %v860_v42 = vadd.f32 %v858_v10, %v760_v2  ;;  %v1146_v6 = vpop.permute.xlu0 %1145  ;;  %v1151_v7 = vpop.permute.xlu1 %1150 }
 0x122   : > { %v936_v28 = vpop.f32.mrb[6].mxu0 }
 0x123   : > { %v956_v34 = vrot.slane %v936_v28, %v23535_v35  ;;  %v1036_v37 = vpop.f32.mrb[6].mxu1  ;;  %v19538_v45 = vpop.f32.mrb[7].mxu0 }
 0x124   : > { %v1056_v61 = vrot.slane %v1036_v37, %v23535_v35  ;;  %v19557_v31 = vpop.f32.mrb[7].mxu1 }
 0x125   : > { %v957_v15 = vmul.f32 %v956_v34, %v946_v44  ;;  %v958_v59 = vmul.f32 %v956_v34, %v951_v48  ;;  %v1167_v44 = vpop.permute.xlu0 %1166  ;;  %v1172_v48 = vpop.permute.xlu1 %1171 }
 0x126   : > { %v1057_v52 = vmul.f32 %v1056_v61, %v1046_v58  ;;  %v1058_v56 = vmul.f32 %v1056_v61, %v1051_v0  ;;  %v17068_v61 = vld [vmem:[%s29158_s1 + $0x280] sm:$0xff] }
 0x127   : > { %v959_v23 = vadd.f32 %v957_v15, %v859_v36  ;;  %v960_v11 = vadd.f32 %v958_v59, %v860_v42 }
 0x129   : > { %v1059_v16 = vadd.f32 %v1057_v52, %v959_v23  ;;  %v1060_v24 = vadd.f32 %v1058_v56, %v960_v11  ;;  %v17075_v52 = vld [vmem:[%s29158_s1 + $0x2c8] sm:$0xff] }
 0x12a   : > { %v17069_v56 = vld [vmem:[%s29158_s1 + $0x288] sm:$0xff] }
 0x132   : > { %v1136_v10 = vpop.f32.mrb[8].mxu0 }
 0x133   : > { %v1156_v21 = vrot.slane %v1136_v10, %v23535_v35  ;;  %v19576_v2 = vpop.f32.mrb[9].mxu0  ;;  %v17074_v35 = vld [vmem:[%s29158_s1 + $0x2c0] sm:$0xff] }
 0x134   : > { %v17088_v10 = vld [vmem:[%s29158_s1 + $0x300] sm:$0xff] }
 0x135   : > { %v1157_v3 = vmul.f32 %v1156_v21, %v1146_v6  ;;  %v1158_v28 = vmul.f32 %v1156_v21, %v1151_v7  ;;  %v17077_v6 = vld [vmem:[%s29158_s1 + $0x2d8] sm:$0xff] }
 0x136   : > { %v17071_v7 = vld [vmem:[%s29158_s1 + $0x298] sm:$0xff] }
 0x137   : > { %v1159_v37 = vadd.f32 %v1157_v3, %v1059_v16  ;;  %v1160_v45 = vadd.f32 %v1158_v28, %v1060_v24  ;;  %v17076_v16 = vld [vmem:[%s29158_s1 + $0x2d0] sm:$0xff] }
 0x138   : > { %v17070_v24 = vld [vmem:[%s29158_s1 + $0x290] sm:$0xff] }
 0x139   : > { %v1174_v34 = vadd.f32 %v1167_v44, %v1159_v37  ;;  %v1175_v31 = vadd.f32 %v1172_v48, %v1160_v45  ;;  %v17089_v44 = vld [vmem:[%s29158_s1 + $0x308] sm:$0xff]  ;;  %v17090_v48 = vld [vmem:[%s29158_s1 + $0x310] sm:$0xff] }
 0x13b   : > { %v23546_v36 = vmax.f32 %v1174_v34, 0.0  ;;  %v23548_v42 = vmax.f32 %v1175_v31, 0.0  ;;  %v17091_v34 = vld [vmem:[%s29158_s1 + $0x318] sm:$0xff]  ;;  %v17098_v31 = vld [vmem:[%s29158_s1 + $0x340] sm:$0xff] }
 0x13d   : > { %19593 = vmatprep.mubr.msk.f32.mxu1 %vm269_vm1, %v23546_v36  ;;  %19612 = vmatprep.mubr.msk.f32.mxu0 %vm269_vm1, %v23546_v36 }
 0x13e   : > { %19594 = vmatmul.mubr.msk.f32.vlgmr.msra.gmra.mrb[8].mxu1 %vm269_vm1, %v23548_v42  ;;  %19613 = vmatmul.mubr.msk.f32.vlgmr.msra.gmra.mrb[10].mxu0 %vm269_vm1, %v23548_v42 }
 0x13f   : > { %19619 = vmatprep.mubr.msk.f32.mxu0 %vm29221_vm2, %v17074_v35  ;;  %19629 = vmatprep.mubr.msk.f32.mxu1 %vm29221_vm2, %v17068_v61  ;;  %v17099_v35 = vld [vmem:[%s29158_s1 + $0x348] sm:$0xff]  ;;  %v17100_v61 = vld [vmem:[%s29158_s1 + $0x350] sm:$0xff] }
 0x211   : > { %v19595_v15 = vpop.f32.mrb[8].mxu1  ;;  %v19614_v59 = vpop.f32.mrb[10].mxu0 }
 0x212   : > { %v1250_v58 = vpop.f32.mrb[9].mxu1  ;;  %v1330_v0 = vpop.f32.mrb[11].mxu0 }
 0x213   : > { %v20448_v23 = vpack.c.bf16 %v19595_v15, %v1250_v58  ;;  %v20444_v11 = vpack.c.bf16 %v19614_v59, %v1330_v0  ;;  %v17101_v59 = vld [vmem:[%s29158_s1 + $0x358] sm:$0xff]  ;;  %v17108_v0 = vld [vmem:[%s29158_s1 + $0x380] sm:$0xff] }
 0x215   : > { %20445 = vmatprep.subr.bf16.mxu0 %v20444_v11  ;;  %20449 = vmatprep.subr.bf16.mxu1 %v20448_v23 }
 0x216   : > { %20447 = vmatpush3.bf16.msra.mxu0 %v20444_v11  ;;  %20451 = vmatpush3.bf16.msra.mxu1 %v20448_v23  ;;  %v17109_v11 = vld [vmem:[%s29158_s1 + $0x388] sm:$0xff] }
 0x217   : > { %20453 = vmatprep.subr.bf16.mxu1 %v23109_v32  ;;  %20473 = vmatprep.subr.bf16.mxu0 %v23113_v33 }
 0x219   : > { %19620 = vmatmul.mubr.msk.f32.vlgmr.msra.gmra.mrb[12].mxu0 %vm29221_vm2, %v17075_v52  ;;  %19630 = vmatmul.mubr.msk.f32.vlgmr.msra.gmra.mrb[10].mxu1 %vm29221_vm2, %v17069_v56  ;;  %v17110_v52 = vld [vmem:[%s29158_s1 + $0x390] sm:$0xff]  ;;  %v17111_v56 = vld [vmem:[%s29158_s1 + $0x398] sm:$0xff] }
 0x21a   : > { %20455 = vmatpush3.bf16.msra.mxu1 %v23109_v32  ;;  %20475 = vmatpush3.bf16.msra.mxu0 %v23113_v33 }
 0x21b   : > { %19622 = vmatprep.mubr.msk.f32.mxu0 %vm29221_vm2, %v17076_v16  ;;  %19632 = vmatprep.mubr.msk.f32.mxu1 %vm29221_vm2, %v17070_v24  ;;  %v17118_v16 = vld [vmem:[%s29158_s1 + $0x3c0] sm:$0xff] }
 0x21c   : > { %20457 = vmatprep.subr.bf16.mxu1 %v23133_v38  ;;  %20477 = vmatprep.subr.bf16.mxu0 %v23137_v39 }
 0x21d   : > { %19623 = vmatmul.mubr.msk.f32.gmra.mrb[14].mxu0 %vm29221_vm2, %v17077_v6  ;;  %19633 = vmatmul.mubr.msk.f32.gmra.mrb[12].mxu1 %vm29221_vm2, %v17071_v7 }
 0x21e   : > { %20459 = vmatpush3.bf16.msra.mxu1 %v23133_v38  ;;  %19651 = vmatprep.mubr.msk.f32.mxu1 %vm269_vm1, %v23546_v36 }
 0x21f   : > { %20479 = vmatpush3.bf16.msra.mxu0 %v23137_v39  ;;  %19680 = vmatprep.mubr.msk.f32.mxu0 %vm269_vm1, %v23546_v36 }
 0x220   : > { %20461 = vmatprep.subr.bf16.mxu1 %v23163_v46  ;;  %20481 = vmatprep.subr.bf16.mxu0 %v23167_v47 }
 0x222   : > { %20463 = vmatpush3.bf16.msra.mxu1 %v23163_v46 }
 0x223   : > { %20483 = vmatpush3.bf16.msra.mxu0 %v23167_v47  ;;  %20465 = vmatprep.subr.bf16.mxu1 %v23189_v54 }
 0x224   : > { %20485 = vmatprep.subr.bf16.mxu0 %v23193_v55 }
 0x226   : > { %20467 = vmatpush3.bf16.msra.mxu1 %v23189_v54 }
 0x227   : > { %20487 = vmatpush3.bf16.msra.mxu0 %v23193_v55 }
 0x228   : > { %20493 = vmatprep.subr.bf16.mxu0 %v23215_v62 }
 0x229   : > { %19652 = vmatmul.mubr.msk.f32.vlgmr.msra.gmra.mrb[14].mxu1 %vm269_vm1, %v23548_v42 }
 0x22a   : > { %19681 = vmatmul.mubr.msk.f32.vlgmr.msra.gmra.mrb[16].mxu0 %vm269_vm1, %v23548_v42  ;;  %19658 = vmatprep.mubr.msk.f32.mxu1 %vm29221_vm2, %v17088_v10  ;;  %v17119_v10 = vld [vmem:[%s29158_s1 + $0x3c8] sm:$0xff] }
 0x22b   : > { %20495 = vmatpush3.bf16.msra.mxu0 %v23215_v62  ;;  %19709 = vmatprep.mubr.msk.f32.mxu0 %vm269_vm1, %v23546_v36 }
 0x22c   : > { %20497 = vmatprep.subr.bf16.mxu0 %v23245_v9 }
 0x22f   : > { %20499 = vmatpush3.bf16.msra.mxu0 %v23245_v9 }
 0x230   : > { %20501 = vmatprep.subr.bf16.mxu0 %v23281_v27 }
 0x233   : > { %20503 = vmatpush3.bf16.msra.mxu0 %v23281_v27 }
 0x234   : > { %20505 = vmatprep.subr.bf16.mxu0 %v23307_v40 }
 0x237   : > { %20507 = vmatpush3.bf16.msra.mxu0 %v23307_v40 }
 0x238   : > { %20513 = vmatprep.subr.bf16.mxu0 %v23219_v63 }
 0x23a   : > { %19710 = vmatmul.mubr.msk.f32.vlgmr.msra.gmra.mrb[18].mxu0 %vm269_vm1, %v23548_v42 }
 0x23b   : > { %20515 = vmatpush3.bf16.msra.mxu0 %v23219_v63  ;;  %19738 = vmatprep.mubr.msk.f32.mxu0 %vm269_vm1, %v23546_v36 }
 0x23c   : > { %20517 = vmatprep.subr.bf16.mxu0 %v23258_v17 }
 0x23f   : > { %20519 = vmatpush3.bf16.msra.mxu0 %v23258_v17 }
 0x240   : > { %20521 = vmatprep.subr.bf16.mxu0 %v23291_v30 }
 0x243   : > { %20523 = vmatpush3.bf16.msra.mxu0 %v23291_v30 }
 0x244   : > { %20525 = vmatprep.subr.bf16.mxu0 %v23317_v43 }
 0x247   : > { %20527 = vmatpush3.bf16.msra.mxu0 %v23317_v43 }
 0x248   : > { %20553 = vmatprep.subr.bf16.mxu0 %v23337_v51 }
 0x24a   : > { %19739 = vmatmul.mubr.msk.f32.vlgmr.msra.gmra.mrb[20].mxu0 %vm269_vm1, %v23548_v42 }
 0x24b   : > { %20555 = vmatpush3.bf16.msra.mxu0 %v23337_v51  ;;  %19796 = vmatprep.mubr.msk.f32.mxu0 %vm269_vm1, %v23546_v36 }
 0x24c   : > { %20557 = vmatprep.subr.bf16.mxu0 %v23355_v57 }
 0x24f   : > { %20559 = vmatpush3.bf16.msra.mxu0 %v23355_v57 }
 0x250   : > { %20561 = vmatprep.subr.bf16.mxu0 %v23385_v5 }
 0x253   : > { %20563 = vmatpush3.bf16.msra.mxu0 %v23385_v5 }
 0x254   : > { %20565 = vmatprep.subr.bf16.mxu0 %v23411_v22 }
 0x257   : > { %20567 = vmatpush3.bf16.msra.mxu0 %v23411_v22 }
 0x258   : > { %20573 = vmatprep.subr.bf16.mxu0 %v23424_v29 }
 0x25a   : > { %19797 = vmatmul.mubr.msk.f32.vlgmr.msra.gmra.mrb[22].mxu0 %vm269_vm1, %v23548_v42 }
 0x25b   : > { %20575 = vmatpush3.bf16.msra.mxu0 %v23424_v29  ;;  %19825 = vmatprep.mubr.msk.f32.mxu0 %vm269_vm1, %v23546_v36 }
 0x25c   : > { %20577 = vmatprep.subr.bf16.mxu0 %v23446_v41 }
 0x25f   : > { %20579 = vmatpush3.bf16.msra.mxu0 %v23446_v41 }
 0x260   : > { %20581 = vmatprep.subr.bf16.mxu0 %v23466_v50 }
 0x263   : > { %20583 = vmatpush3.bf16.msra.mxu0 %v23466_v50 }
 0x264   : > { %20585 = vmatprep.subr.bf16.mxu0 %v23484_v60 }
 0x267   : > { %20587 = vmatpush3.bf16.msra.mxu0 %v23484_v60 }
 0x268   : > { %20609 = vmatprep.subr.bf16.mxu0 %v23022_v8 }
 0x26a   : > { %19826 = vmatmul.mubr.msk.f32.vlgmr.msra.gmra.mrb[24].mxu0 %vm269_vm1, %v23548_v42 }
 0x26b   : > { %20611 = vmatpush3.bf16.msra.mxu0 %v23022_v8 }
 0x26c   : > { %20613 = vmatprep.subr.bf16.mxu0 %v23040_v14 }
 0x26f   : > { %20615 = vmatpush3.bf16.msra.mxu0 %v23040_v14 }
 0x270   : > { %20617 = vmatprep.subr.bf16.mxu0 %v23063_v20 }
 0x273   : > { %20619 = vmatpush3.bf16.msra.mxu0 %v23063_v20 }
 0x274   : > { %20621 = vmatprep.subr.bf16.mxu0 %v23087_v26 }
 0x277   : > { %20623 = vmatpush3.bf16.msra.mxu0 %v23087_v26 }
 0x278   : > { %20641 = vmatprep.subr.bf16.mxu0 %v23109_v32 }
 0x2ec   : > { %v23675_v8 = vpop.f32.mrb[12].mxu0 }
 0x2ed   : > { %v23677_v21 = vpop.f32.mrb[13].mxu0 }
 0x2f0   : > { %v23679_v14 = vpop.f32.mrb[14].mxu0 }
 0x2f1   : > { %v23681_v2 = vpop.f32.mrb[15].mxu0 }
 0x2fc   : > { %v19653_v20 = vpop.f32.mrb[14].mxu1 }
 0x2fd   : > { %v19682_v3 = vpop.f32.mrb[16].mxu0  ;;  %v1605_v28 = vpop.f32.mrb[15].mxu1 }
 0x2fe   : > { %v20468_v26 = vpack.c.bf16 %v19653_v20, %v1605_v28  ;;  %v1786_v37 = vpop.f32.mrb[17].mxu0  ;;  %v17120_v20 = vld [vmem:[%s29158_s1 + $0x3d0] sm:$0xff] }
 0x2ff   : > { %v20488_v45 = vpack.c.bf16 %v19682_v3, %v1786_v37  ;;  %v17121_v3 = vld [vmem:[%s29158_s1 + $0x3d8] sm:$0xff] }
 0x300   : > { %20469 = vmatprep.subr.bf16.mxu1 %v20468_v26 }
 0x301   : > { %20471 = vmatpush3.bf16.msra.mxu1 %v20468_v26 }
 0x302   : > { %20489 = vmatprep.subr.bf16.mxu1 %v20488_v45 }
 0x304   : > { %19659 = vmatmul.mubr.msk.f32.vlgmr.msra.gmra.mrb[10].mxu1 %vm29221_vm2, %v17089_v44 }
 0x305   : > { %20491 = vmatpush3.bf16.msra.mxu1 %v20488_v45  ;;  %19661 = vmatprep.mubr.msk.f32.mxu1 %vm29221_vm2, %v17090_v48 }
 0x308   : > { %19662 = vmatmul.mubr.msk.f32.gmra.mrb[12].mxu1 %vm29221_vm2, %v17091_v34  ;;  %v17128_v34 = vld [vmem:[%s29158_s1 + $0x400] sm:$0xff] }
 0x309   : > { %19687 = vmatprep.mubr.msk.f32.mxu1 %vm29221_vm2, %v17098_v31 }
 0x30c   : > { %19688 = vmatmul.mubr.msk.f32.vlgmr.msra.gmra.mrb[10].mxu1 %vm29221_vm2, %v17099_v35 }
 0x30d   : > { %v19711_v15 = vpop.f32.mrb[18].mxu0  ;;  %19690 = vmatprep.mubr.msk.f32.mxu1 %vm29221_vm2, %v17100_v61 }
 0x30e   : > { %v1967_v58 = vpop.f32.mrb[19].mxu0 }
 0x30f   : > { %v20508_v23 = vpack.c.bf16 %v19711_v15, %v1967_v58  ;;  %v17129_v15 = vld [vmem:[%s29158_s1 + $0x408] sm:$0xff]  ;;  %v17131_v58 = vld [vmem:[%s29158_s1 + $0x418] sm:$0xff] }
 0x310   : > { %19691 = vmatmul.mubr.msk.f32.gmra.mrb[12].mxu1 %vm29221_vm2, %v17101_v59  ;;  %v17130_v59 = vld [vmem:[%s29158_s1 + $0x410] sm:$0xff] }
 0x311   : > { %20509 = vmatprep.subr.bf16.mxu1 %v20508_v23  ;;  %19716 = vmatprep.mubr.msk.f32.mxu1 %vm29221_vm2, %v17108_v0  ;;  %v17138_v0 = vld [vmem:[%s29158_s1 + $0x440] sm:$0xff] }
 0x312   : > { %20511 = vmatpush3.bf16.msra.mxu1 %v20508_v23  ;;  %v17139_v23 = vld [vmem:[%s29158_s1 + $0x448] sm:$0xff] }
 0x315   : > { %19717 = vmatmul.mubr.msk.f32.vlgmr.msra.gmra.mrb[10].mxu1 %vm29221_vm2, %v17109_v11  ;;  %v17140_v11 = vld [vmem:[%s29158_s1 + $0x450] sm:$0xff] }
 0x316   : > { %19719 = vmatprep.mubr.msk.f32.mxu1 %vm29221_vm2, %v17110_v52  ;;  %v17141_v52 = vld [vmem:[%s29158_s1 + $0x458] sm:$0xff] }
 0x319   : > { %19720 = vmatmul.mubr.msk.f32.gmra.mrb[12].mxu1 %vm29221_vm2, %v17111_v56  ;;  %v17148_v56 = vld [vmem:[%s29158_s1 + $0x480] sm:$0xff] }
 0x31a   : > { %19745 = vmatprep.mubr.msk.f32.mxu1 %vm29221_vm2, %v17118_v16  ;;  %v17149_v16 = vld [vmem:[%s29158_s1 + $0x488] sm:$0xff] }
 0x31d   : > { %v19740_v24 = vpop.f32.mrb[20].mxu0 }
 0x31e   : > { %v2148_v6 = vpop.f32.mrb[21].mxu0 }
 0x31f   : > { %v20528_v7 = vpack.c.bf16 %v19740_v24, %v2148_v6  ;;  %v17150_v24 = vld [vmem:[%s29158_s1 + $0x490] sm:$0xff]  ;;  %v17151_v6 = vld [vmem:[%s29158_s1 + $0x498] sm:$0xff] }
 0x321   : > { %20529 = vmatprep.subr.bf16.mxu1 %v20528_v7 }
 0x322   : > { %20531 = vmatpush3.bf16.msra.mxu1 %v20528_v7  ;;  %v2819_v7 = vpop.permute.xlu1 %2818 }
 0x323   : > { %20533 = vmatprep.subr.bf16.mxu1 %v23330_v49 }
 0x325   : > { %19746 = vmatmul.mubr.msk.f32.vlgmr.msra.gmra.mrb[10].mxu1 %vm29221_vm2, %v17119_v10 }
 0x326   : > { %20535 = vmatpush3.bf16.msra.mxu1 %v23330_v49  ;;  %19748 = vmatprep.mubr.msk.f32.mxu1 %vm29221_vm2, %v17120_v20  ;;  %v2814_v20 = vpop.permute.xlu0 %2813 }
 0x327   : > { %20537 = vmatprep.subr.bf16.mxu1 %v23348_v53 }
 0x329   : > { %19749 = vmatmul.mubr.msk.f32.gmra.mrb[12].mxu1 %vm29221_vm2, %v17121_v3 }
 0x32a   : > { %20539 = vmatpush3.bf16.msra.mxu1 %v23348_v53  ;;  %19767 = vmatprep.mubr.msk.f32.mxu1 %vm269_vm1, %v23546_v36 }
 0x32b   : > { %20541 = vmatprep.subr.bf16.mxu1 %v23378_v1 }
 0x32d   : > { %v19798_v28 = vpop.f32.mrb[22].mxu0 }
 0x32e   : > { %20543 = vmatpush3.bf16.msra.mxu1 %v23378_v1  ;;  %v2510_v26 = vpop.f32.mrb[23].mxu0 }
 0x32f   : > { %v20568_v37 = vpack.c.bf16 %v19798_v28, %v2510_v26  ;;  %20545 = vmatprep.subr.bf16.mxu1 %v23404_v18 }
 0x332   : > { %20547 = vmatpush3.bf16.msra.mxu1 %v23404_v18 }
 0x335   : > { %19768 = vmatmul.mubr.msk.f32.vlgmr.msra.gmra.mrb[16].mxu1 %vm269_vm1, %v23548_v42 }
 0x336   : > { %19774 = vmatprep.mubr.msk.f32.mxu1 %vm29221_vm2, %v17128_v34 }
 0x33d   : > { %v19827_v45 = vpop.f32.mrb[24].mxu0 }
 0x33e   : > { %v2691_v44 = vpop.f32.mrb[25].mxu0 }
 0x33f   : > { %v20588_v48 = vpack.c.bf16 %v19827_v45, %v2691_v44 }
 0x408   : > { %v19769_v31 = vpop.f32.mrb[16].mxu1 }
 0x409   : > { %v2329_v35 = vpop.f32.mrb[17].mxu1 }
 0x40a   : > { %v20548_v61 = vpack.c.bf16 %v19769_v31, %v2329_v35 }
 0x40c   : > { %20549 = vmatprep.subr.bf16.mxu1 %v20548_v61 }
 0x40d   : > { %20551 = vmatpush3.bf16.msra.mxu1 %v20548_v61 }
 0x40e   : > { %20569 = vmatprep.subr.bf16.mxu1 %v20568_v37 }
 0x410   : > { %19775 = vmatmul.mubr.msk.f32.vlgmr.msra.gmra.mrb[10].mxu1 %vm29221_vm2, %v17129_v15  ;;  %v17168_v15 = vld [vmem:[%s29158_s1 + $0x520] sm:$0xff] }
 0x411   : > { %20571 = vmatpush3.bf16.msra.mxu1 %v20568_v37  ;;  %19777 = vmatprep.mubr.msk.f32.mxu1 %vm29221_vm2, %v17130_v59 }
 0x412   : > { %20589 = vmatprep.subr.bf16.mxu1 %v20588_v48 }
 0x414   : > { %19778 = vmatmul.mubr.msk.f32.gmra.mrb[12].mxu1 %vm29221_vm2, %v17131_v58 }
 0x415   : > { %19803 = vmatprep.mubr.msk.f32.mxu1 %vm29221_vm2, %v17138_v0  ;;  %v17169_v0 = vld [vmem:[%s29158_s1 + $0x528] sm:$0xff] }
 0x418   : > { %19804 = vmatmul.mubr.msk.f32.vlgmr.msra.gmra.mrb[10].mxu1 %vm29221_vm2, %v17139_v23 }
 0x419   : > { %20591 = vmatpush3.bf16.msra.mxu1 %v20588_v48  ;;  %19806 = vmatprep.mubr.msk.f32.mxu1 %vm29221_vm2, %v17140_v11  ;;  %v2829_v48 = vpop.permute.xlu1 %2828  ;;  %v17170_v11 = vld [vmem:[%s29158_s1 + $0x530] sm:$0xff] }
 0x41a   : > { %20593 = vmatprep.subr.bf16.mxu1 %v23011_v4 }
 0x41c   : > { %19807 = vmatmul.mubr.msk.f32.gmra.mrb[12].mxu1 %vm29221_vm2, %v17141_v52 }
 0x41d   : > { %19832 = vmatprep.mubr.msk.f32.mxu1 %vm29221_vm2, %v17148_v56 }
 0x420   : > { %19833 = vmatmul.mubr.msk.f32.vlgmr.msra.gmra.mrb[10].mxu1 %vm29221_vm2, %v17149_v16  ;;  %v17171_v16 = vld [vmem:[%s29158_s1 + $0x538] sm:$0xff] }
 0x421   : > { %19835 = vmatprep.mubr.msk.f32.mxu1 %vm29221_vm2, %v17150_v24  ;;  %20595 = vmatpush3.bf16.msra.mxu1 %v23011_v4 }
 0x422   : > { %20597 = vmatprep.subr.bf16.mxu1 %v23035_v12 }
 0x424   : > { %19836 = vmatmul.mubr.msk.f32.gmra.mrb[12].mxu1 %vm29221_vm2, %v17151_v6  ;;  %v17204_v6 = vld [vmem:[%s29158_s1 + $0x580] sm:$0xff] }
 0x425   : > { %20599 = vmatpush3.bf16.msra.mxu1 %v23035_v12 }
 0x426   : > { %20601 = vmatprep.subr.bf16.mxu1 %v23059_v19 }
 0x429   : > { %20603 = vmatpush3.bf16.msra.mxu1 %v23059_v19 }
 0x42a   : > { %20605 = vmatprep.subr.bf16.mxu1 %v23083_v25 }
 0x42d   : > { %20607 = vmatpush3.bf16.msra.mxu1 %v23083_v25  ;;  %v2824_v25 = vpop.permute.xlu0 %2823 }
 0x4f3   : > { %v19834_v10 = vpop.f32.mrb[10].mxu1 }
 0x4f4   : > { %v21496_v3 = vadd.f32 %v19834_v10, %v23675_v8  ;;  %v2783_v4 = vpop.f32.mrb[11].mxu1  ;;  %v17206_v10 = vld [vmem:[%s29158_s1 + $0x590] sm:$0xff] }
 0x4f5   : > { %v21497_v28 = vadd.f32 %v2783_v4, %v23677_v21 }
 0x4f6   : > { %v2832_v26 = vadd.f32 %v21496_v3, %v2819_v7  ;;  %v17205_v7 = vld [vmem:[%s29158_s1 + $0x588] sm:$0xff]  ;;  %v17208_v3 = vld [vmem:[%s29158_s1 + $0x5a0] sm:$0xff] }
 0x4f7   : > { %v2831_v37 = vadd.f32 %v21497_v28, %v2814_v20  ;;  %v19837_v45 = vpop.f32.mrb[12].mxu1  ;;  %v17207_v20 = vld [vmem:[%s29158_s1 + $0x598] sm:$0xff] }
 0x4f8   : > { %v21498_v12 = vadd.f32 %v19837_v45, %v23679_v14  ;;  %v2793_v44 = vpop.f32.mrb[13].mxu1  ;;  %v23817_v31 = vmax.f32 %v2832_v26, 0.0  ;;  %v17166_v14 = vld [vmem:[%s29158_s1 + $0x510] sm:$0xff]  ;;  %v17209_v26 = vld [vmem:[%s29158_s1 + $0x5a8] sm:$0xff] }
 0x4f9   : > { %v23814_v19 = vmax.f32 %v2831_v37, 0.0  ;;  %v21499_v34 = vadd.f32 %v2793_v44, %v23681_v2  ;;  %v17167_v2 = vld [vmem:[%s29158_s1 + $0x518] sm:$0xff]  ;;  %v17210_v45 = vld [vmem:[%s29158_s1 + $0x5b0] sm:$0xff] }
 0x4fa   : > { %v2834_v35 = vadd.f32 %v21498_v12, %v2829_v48  ;;  %v17211_v48 = vld [vmem:[%s29158_s1 + $0x5b8] sm:$0xff] }
 0x4fb   : > { %v2833_v61 = vadd.f32 %v21499_v34, %v2824_v25  ;;  %19854 = vmatprep.mubr.msk.f32.mxu1 %vm269_vm1, %v23814_v19  ;;  %19876 = vmatprep.mubr.msk.f32.mxu0 %vm269_vm1, %v23814_v19  ;;  %v17224_v25 = vld [vmem:[%s29158_s1 + $0x5c0] sm:$0xff] }
 0x4fc   : > { %19855 = vmatmul.mubr.msk.f32.vlgmr.msra.gmra.mrb[18].mxu1 %vm269_vm1, %v23817_v31  ;;  %19877 = vmatmul.mubr.msk.f32.vlgmr.msra.gmra.mrb[26].mxu0 %vm269_vm1, %v23817_v31  ;;  %v23830_v21 = vmax.f32 %v2834_v35, 0.0  ;;  %v17225_v35 = vld [vmem:[%s29158_s1 + $0x5c8] sm:$0xff] }
 0x4fd   : > { %v23827_v8 = vmax.f32 %v2833_v61, 0.0  ;;  %20643 = vmatpush3.bf16.msra.mxu0 %v23109_v32  ;;  %v17176_v32 = vld [vmem:[%s29158_s1 + $0x540] sm:$0xff]  ;;  %v17226_v61 = vld [vmem:[%s29158_s1 + $0x5d0] sm:$0xff] }
 0x4fe   : > { %20645 = vmatprep.subr.bf16.mxu0 %v23133_v38 }
 0x4ff   : > { %19857 = vmatprep.mubr.msk.f32.mxu1 %vm269_vm1, %v23827_v8  ;;  %19879 = vmatprep.mubr.msk.f32.mxu0 %vm269_vm1, %v23827_v8 }
 0x500   : > { %19858 = vmatmul.mubr.msk.f32.gmra.mrb[20].mxu1 %vm269_vm1, %v23830_v21  ;;  %19880 = vmatmul.mubr.msk.f32.gmra.mrb[28].mxu0 %vm269_vm1, %v23830_v21 }
 0x501   : > { %20647 = vmatpush3.bf16.msra.mxu0 %v23133_v38  ;;  %19938 = vmatprep.mubr.msk.f32.mxu0 %vm269_vm1, %v23814_v19 }
 0x502   : > { %20649 = vmatprep.subr.bf16.mxu0 %v23163_v46  ;;  %19890 = vmatprep.mubr.msk.f32.mxu1 %vm29232_vm3, %v17176_v32  ;;  %v17227_v32 = vld [vmem:[%s29158_s1 + $0x5d8] sm:$0xff] }
 0x505   : > { %20651 = vmatpush3.bf16.msra.mxu0 %v23163_v46 }
 0x506   : > { %20653 = vmatprep.subr.bf16.mxu0 %v23189_v54 }
 0x509   : > { %20655 = vmatpush3.bf16.msra.mxu0 %v23189_v54 }
 0x50a   : > { %20665 = vmatprep.subr.bf16.mxu0 %v23113_v33 }
 0x50c   : > { %19939 = vmatmul.mubr.msk.f32.vlgmr.msra.gmra.mrb[30].mxu0 %vm269_vm1, %v23817_v31 }
 0x50d   : > { %19941 = vmatprep.mubr.msk.f32.mxu0 %vm269_vm1, %v23827_v8  ;;  %20667 = vmatpush3.bf16.msra.mxu0 %v23113_v33 }
 0x50e   : > { %20669 = vmatprep.subr.bf16.mxu0 %v23137_v39 }
 0x510   : > { %19942 = vmatmul.mubr.msk.f32.gmra.mrb[32].mxu0 %vm269_vm1, %v23830_v21 }
 0x511   : > { %20671 = vmatpush3.bf16.msra.mxu0 %v23137_v39  ;;  %19980 = vmatprep.mubr.msk.f32.mxu0 %vm269_vm1, %v23814_v19 }
 0x512   : > { %20673 = vmatprep.subr.bf16.mxu0 %v23167_v47 }
 0x515   : > { %20675 = vmatpush3.bf16.msra.mxu0 %v23167_v47 }
 0x516   : > { %20677 = vmatprep.subr.bf16.mxu0 %v23193_v55 }
 0x519   : > { %20679 = vmatpush3.bf16.msra.mxu0 %v23193_v55 }
 0x51a   : > { %20689 = vmatprep.subr.bf16.mxu0 %v23215_v62 }
 0x51c   : > { %19981 = vmatmul.mubr.msk.f32.vlgmr.msra.gmra.mrb[34].mxu0 %vm269_vm1, %v23817_v31 }
 0x51d   : > { %19983 = vmatprep.mubr.msk.f32.mxu0 %vm269_vm1, %v23827_v8  ;;  %20691 = vmatpush3.bf16.msra.mxu0 %v23215_v62 }
 0x51e   : > { %20693 = vmatprep.subr.bf16.mxu0 %v23245_v9 }
 0x520   : > { %19984 = vmatmul.mubr.msk.f32.gmra.mrb[36].mxu0 %vm269_vm1, %v23830_v21 }
 0x521   : > { %20695 = vmatpush3.bf16.msra.mxu0 %v23245_v9  ;;  %20022 = vmatprep.mubr.msk.f32.mxu0 %vm269_vm1, %v23814_v19 }
 0x522   : > { %20697 = vmatprep.subr.bf16.mxu0 %v23281_v27 }
 0x525   : > { %20699 = vmatpush3.bf16.msra.mxu0 %v23281_v27 }
 0x526   : > { %20701 = vmatprep.subr.bf16.mxu0 %v23307_v40 }
 0x529   : > { %20703 = vmatpush3.bf16.msra.mxu0 %v23307_v40  ;;  %v17178_v40 = vld [vmem:[%s29158_s1 + $0x550] sm:$0xff] }
 0x52a   : > { %20713 = vmatprep.subr.bf16.mxu0 %v23219_v63 }
 0x52c   : > { %20023 = vmatmul.mubr.msk.f32.vlgmr.msra.gmra.mrb[38].mxu0 %vm269_vm1, %v23817_v31 }
 0x52d   : > { %20025 = vmatprep.mubr.msk.f32.mxu0 %vm269_vm1, %v23827_v8  ;;  %20715 = vmatpush3.bf16.msra.mxu0 %v23219_v63 }
 0x52e   : > { %20717 = vmatprep.subr.bf16.mxu0 %v23258_v17 }
 0x530   : > { %20026 = vmatmul.mubr.msk.f32.gmra.mrb[40].mxu0 %vm269_vm1, %v23830_v21 }
 0x531   : > { %20719 = vmatpush3.bf16.msra.mxu0 %v23258_v17  ;;  %20064 = vmatprep.mubr.msk.f32.mxu0 %vm269_vm1, %v23814_v19 }
 0x532   : > { %20721 = vmatprep.subr.bf16.mxu0 %v23291_v30 }
 0x535   : > { %20723 = vmatpush3.bf16.msra.mxu0 %v23291_v30  ;;  %v17177_v30 = vld [vmem:[%s29158_s1 + $0x548] sm:$0xff] }
 0x536   : > { %20725 = vmatprep.subr.bf16.mxu0 %v23317_v43 }
 0x539   : > { %20727 = vmatpush3.bf16.msra.mxu0 %v23317_v43  ;;  %v17179_v43 = vld [vmem:[%s29158_s1 + $0x558] sm:$0xff] }
 0x53a   : > { %20737 = vmatprep.subr.bf16.mxu0 %v23330_v49 }
 0x53c   : > { %20065 = vmatmul.mubr.msk.f32.vlgmr.msra.gmra.mrb[42].mxu0 %vm269_vm1, %v23817_v31 }
 0x53d   : > { %20067 = vmatprep.mubr.msk.f32.mxu0 %vm269_vm1, %v23827_v8  ;;  %20739 = vmatpush3.bf16.msra.mxu0 %v23330_v49  ;;  %v17180_v49 = vld [vmem:[%s29158_s1 + $0x560] sm:$0xff] }
 0x53e   : > { %20741 = vmatprep.subr.bf16.mxu0 %v23348_v53 }
 0x540   : > { %20068 = vmatmul.mubr.msk.f32.gmra.mrb[44].mxu0 %vm269_vm1, %v23830_v21 }
 0x541   : > { %20743 = vmatpush3.bf16.msra.mxu0 %v23348_v53  ;;  %20106 = vmatprep.mubr.msk.f32.mxu0 %vm269_vm1, %v23814_v19 }
 0x542   : > { %20745 = vmatprep.subr.bf16.mxu0 %v23378_v1 }
 0x545   : > { %20747 = vmatpush3.bf16.msra.mxu0 %v23378_v1 }
 0x546   : > { %20749 = vmatprep.subr.bf16.mxu0 %v23404_v18 }
 0x549   : > { %20751 = vmatpush3.bf16.msra.mxu0 %v23404_v18 }
 0x54a   : > { %20761 = vmatprep.subr.bf16.mxu0 %v23337_v51 }
 0x54c   : > { %20107 = vmatmul.mubr.msk.f32.vlgmr.msra.gmra.mrb[46].mxu0 %vm269_vm1, %v23817_v31 }
 0x54d   : > { %20109 = vmatprep.mubr.msk.f32.mxu0 %vm269_vm1, %v23827_v8  ;;  %20763 = vmatpush3.bf16.msra.mxu0 %v23337_v51 }
 0x54e   : > { %20765 = vmatprep.subr.bf16.mxu0 %v23355_v57 }
 0x550   : > { %20110 = vmatmul.mubr.msk.f32.gmra.mrb[48].mxu0 %vm269_vm1, %v23830_v21 }
 0x551   : > { %20767 = vmatpush3.bf16.msra.mxu0 %v23355_v57  ;;  %20148 = vmatprep.mubr.msk.f32.mxu0 %vm269_vm1, %v23814_v19  ;;  %v17181_v57 = vld [vmem:[%s29158_s1 + $0x568] sm:$0xff] }
 0x552   : > { %20769 = vmatprep.subr.bf16.mxu0 %v23385_v5 }
 0x555   : > { %20771 = vmatpush3.bf16.msra.mxu0 %v23385_v5  ;;  %v17182_v5 = vld [vmem:[%s29158_s1 + $0x570] sm:$0xff] }
 0x556   : > { %20773 = vmatprep.subr.bf16.mxu0 %v23411_v22 }
 0x559   : > { %20775 = vmatpush3.bf16.msra.mxu0 %v23411_v22 }
 0x55a   : > { %20785 = vmatprep.subr.bf16.mxu0 %v23424_v29 }
 0x55c   : > { %20149 = vmatmul.mubr.msk.f32.vlgmr.msra.gmra.mrb[50].mxu0 %vm269_vm1, %v23817_v31 }
 0x55d   : > { %20151 = vmatprep.mubr.msk.f32.mxu0 %vm269_vm1, %v23827_v8  ;;  %20787 = vmatpush3.bf16.msra.mxu0 %v23424_v29  ;;  %v17183_v29 = vld [vmem:[%s29158_s1 + $0x578] sm:$0xff] }
 0x55e   : > { %20789 = vmatprep.subr.bf16.mxu0 %v23446_v41 }
 0x560   : > { %20152 = vmatmul.mubr.msk.f32.gmra.mrb[52].mxu0 %vm269_vm1, %v23830_v21 }
 0x561   : > { %20791 = vmatpush3.bf16.msra.mxu0 %v23446_v41  ;;  %20190 = vmatprep.mubr.msk.f32.mxu0 %vm269_vm1, %v23814_v19 }
 0x562   : > { %20793 = vmatprep.subr.bf16.mxu0 %v23466_v50 }
 0x565   : > { %20795 = vmatpush3.bf16.msra.mxu0 %v23466_v50  ;;  %v17164_v50 = vld [vmem:[%s29158_s1 + $0x500] sm:$0xff] }
 0x566   : > { %20797 = vmatprep.subr.bf16.mxu0 %v23484_v60 }
 0x569   : > { %20799 = vmatpush3.bf16.msra.mxu0 %v23484_v60  ;;  %v17165_v60 = vld [vmem:[%s29158_s1 + $0x508] sm:$0xff] }
 0x56c   : > { %20191 = vmatmul.mubr.msk.f32.vlgmr.msra.gmra.mrb[54].mxu0 %vm269_vm1, %v23817_v31 }
 0x56d   : > { %20193 = vmatprep.mubr.msk.f32.mxu0 %vm269_vm1, %v23827_v8 }
 0x570   : > { %20194 = vmatmul.mubr.msk.f32.gmra.mrb[56].mxu0 %vm269_vm1, %v23830_v21 }
 0x5cf   : > { %v19856_v33 = vpop.f32.mrb[18].mxu1  ;;  %v19878_v38 = vpop.f32.mrb[26].mxu0 }
 0x5d0   : > { %v2917_v39 = vpop.f32.mrb[19].mxu1  ;;  %v3011_v46 = vpop.f32.mrb[27].mxu0 }
 0x5d1   : > { %v20632_v47 = vpack.c.bf16 %v19856_v33, %v2917_v39  ;;  %v20624_v54 = vpack.c.bf16 %v19878_v38, %v3011_v46  ;;  %v17228_v33 = vld [vmem:[%s29158_s1 + $0x5e0] sm:$0xff]  ;;  %v17229_v46 = vld [vmem:[%s29158_s1 + $0x5e8] sm:$0xff] }
 0x5d3   : > { %v19859_v55 = vpop.f32.mrb[20].mxu1  ;;  %v19881_v62 = vpop.f32.mrb[28].mxu0  ;;  %20625 = vmatprep.subr.bf16.mxu1 %v20624_v54 }
 0x5d4   : > { %v2927_v63 = vpop.f32.mrb[21].mxu1  ;;  %v3021_v9 = vpop.f32.mrb[29].mxu0  ;;  %20627 = vmatpush3.bf16.msra.mxu1 %v20624_v54  ;;  %v17230_v54 = vld [vmem:[%s29158_s1 + $0x5f0] sm:$0xff] }
 0x5d5   : > { %v20636_v17 = vpack.c.bf16 %v19859_v55, %v2927_v63  ;;  %v20628_v27 = vpack.c.bf16 %v19881_v62, %v3021_v9  ;;  %v17231_v63 = vld [vmem:[%s29158_s1 + $0x5f8] sm:$0xff] }
 0x5d7   : > { %20629 = vmatprep.subr.bf16.mxu1 %v20628_v27 }
 0x5d8   : > { %20631 = vmatpush3.bf16.msra.mxu1 %v20628_v27  ;;  %v17245_v27 = vld [vmem:[%s29158_s1 + $0x608] sm:$0xff] }
 0x5d9   : > { %20633 = vmatprep.subr.bf16.mxu1 %v20632_v47 }
 0x5db   : > { %19891 = vmatmul.mubr.msk.f32.vlgmr.msra.gmra.mrb[22].mxu1 %vm29232_vm3, %v17177_v30  ;;  %v17246_v30 = vld [vmem:[%s29158_s1 + $0x610] sm:$0xff] }
 0x5dc   : > { %20635 = vmatpush3.bf16.msra.mxu1 %v20632_v47  ;;  %19893 = vmatprep.mubr.msk.f32.mxu1 %vm29232_vm3, %v17178_v40  ;;  %v17247_v40 = vld [vmem:[%s29158_s1 + $0x618] sm:$0xff] }
 0x5dd   : > { %20637 = vmatprep.subr.bf16.mxu1 %v20636_v17 }
 0x5df   : > { %v19940_v51 = vpop.f32.mrb[30].mxu0  ;;  %19894 = vmatmul.mubr.msk.f32.gmra.mrb[24].mxu1 %vm29232_vm3, %v17179_v43  ;;  %v17248_v43 = vld [vmem:[%s29158_s1 + $0x620] sm:$0xff] }
 0x5e0   : > { %v3364_v53 = vpop.f32.mrb[31].mxu0  ;;  %20639 = vmatpush3.bf16.msra.mxu1 %v20636_v17  ;;  %19896 = vmatprep.mubr.msk.f32.mxu1 %vm29232_vm3, %v17180_v49  ;;  %v17244_v17 = vld [vmem:[%s29158_s1 + $0x600] sm:$0xff] }
 0x5e1   : > { %v20656_v1 = vpack.c.bf16 %v19940_v51, %v3364_v53  ;;  %v17249_v53 = vld [vmem:[%s29158_s1 + $0x628] sm:$0xff] }
 0x5e3   : > { %v19943_v18 = vpop.f32.mrb[32].mxu0  ;;  %20657 = vmatprep.subr.bf16.mxu1 %v20656_v1  ;;  %19897 = vmatmul.mubr.msk.f32.gmra.mrb[26].mxu1 %vm29232_vm3, %v17181_v57 }
 0x5e4   : > { %v3374_v22 = vpop.f32.mrb[33].mxu0  ;;  %19899 = vmatprep.mubr.msk.f32.mxu1 %vm29232_vm3, %v17182_v5 }
 0x5e5   : > { %v20660_v41 = vpack.c.bf16 %v19943_v18, %v3374_v22  ;;  %v17251_v22 = vld [vmem:[%s29158_s1 + $0x638] sm:$0xff] }
 0x5e7   : > { %19900 = vmatmul.mubr.msk.f32.gmra.mrb[28].mxu1 %vm29232_vm3, %v17183_v29 }
 0x5e8   : > { %19910 = vmatprep.mubr.msk.f32.mxu1 %vm29232_vm3, %v17164_v50  ;;  %v17265_v50 = vld [vmem:[%s29158_s1 + $0x648] sm:$0xff] }
 0x5eb   : > { %19911 = vmatmul.mubr.msk.f32.vlgmr.msra.gmra.mrb[22].mxu1 %vm29232_vm3, %v17165_v60  ;;  %v17266_v60 = vld [vmem:[%s29158_s1 + $0x650] sm:$0xff] }
 0x5ec   : > { %20659 = vmatpush3.bf16.msra.mxu1 %v20656_v1  ;;  %19913 = vmatprep.mubr.msk.f32.mxu1 %vm29232_vm3, %v17166_v14  ;;  %v17250_v1 = vld [vmem:[%s29158_s1 + $0x630] sm:$0xff]  ;;  %v17267_v14 = vld [vmem:[%s29158_s1 + $0x658] sm:$0xff] }
 0x5ed   : > { %20661 = vmatprep.subr.bf16.mxu1 %v20660_v41 }
 0x5ef   : > { %v19982_v59 = vpop.f32.mrb[34].mxu0  ;;  %19914 = vmatmul.mubr.msk.f32.gmra.mrb[24].mxu1 %vm29232_vm3, %v17167_v2  ;;  %v17268_v2 = vld [vmem:[%s29158_s1 + $0x660] sm:$0xff] }
 0x5f0   : > { %20663 = vmatpush3.bf16.msra.mxu1 %v20660_v41  ;;  %v3595_v58 = vpop.f32.mrb[35].mxu0  ;;  %19916 = vmatprep.mubr.msk.f32.mxu1 %vm29232_vm3, %v17168_v15  ;;  %v17264_v41 = vld [vmem:[%s29158_s1 + $0x640] sm:$0xff] }
 0x5f1   : > { %v20680_v23 = vpack.c.bf16 %v19982_v59, %v3595_v58  ;;  %v17269_v58 = vld [vmem:[%s29158_s1 + $0x668] sm:$0xff] }
 0x5f3   : > { %v19985_v52 = vpop.f32.mrb[36].mxu0  ;;  %20681 = vmatprep.subr.bf16.mxu1 %v20680_v23  ;;  %19917 = vmatmul.mubr.msk.f32.gmra.mrb[26].mxu1 %vm29232_vm3, %v17169_v0 }
 0x5f4   : > { %v3605_v56 = vpop.f32.mrb[37].mxu0  ;;  %19919 = vmatprep.mubr.msk.f32.mxu1 %vm29232_vm3, %v17170_v11 }
 0x5f5   : > { %v20684_v24 = vpack.c.bf16 %v19985_v52, %v3605_v56  ;;  %v17271_v56 = vld [vmem:[%s29158_s1 + $0x678] sm:$0xff] }
 0x5f7   : > { %19920 = vmatmul.mubr.msk.f32.gmra.mrb[28].mxu1 %vm29232_vm3, %v17171_v16 }
 0x5f8   : > { %19952 = vmatprep.mubr.msk.f32.mxu1 %vm29232_vm3, %v17204_v6  ;;  %v17285_v6 = vld [vmem:[%s29158_s1 + $0x688] sm:$0xff] }
 0x5fb   : > { %19953 = vmatmul.mubr.msk.f32.vlgmr.msra.gmra.mrb[22].mxu1 %vm29232_vm3, %v17205_v7  ;;  %v17286_v7 = vld [vmem:[%s29158_s1 + $0x690] sm:$0xff] }
 0x5fc   : > { %20683 = vmatpush3.bf16.msra.mxu1 %v20680_v23  ;;  %19955 = vmatprep.mubr.msk.f32.mxu1 %vm29232_vm3, %v17206_v10  ;;  %v17270_v23 = vld [vmem:[%s29158_s1 + $0x670] sm:$0xff]  ;;  %v17287_v10 = vld [vmem:[%s29158_s1 + $0x698] sm:$0xff] }
 0x5fd   : > { %20685 = vmatprep.subr.bf16.mxu1 %v20684_v24 }
 0x5ff   : > { %v20024_v4 = vpop.f32.mrb[38].mxu0  ;;  %19956 = vmatmul.mubr.msk.f32.gmra.mrb[24].mxu1 %vm29232_vm3, %v17207_v20  ;;  %v17288_v20 = vld [vmem:[%s29158_s1 + $0x6a0] sm:$0xff] }
 0x600   : > { %20687 = vmatpush3.bf16.msra.mxu1 %v20684_v24  ;;  %v3826_v28 = vpop.f32.mrb[39].mxu0  ;;  %19958 = vmatprep.mubr.msk.f32.mxu1 %vm29232_vm3, %v17208_v3  ;;  %v17284_v24 = vld [vmem:[%s29158_s1 + $0x680] sm:$0xff] }
 0x601   : > { %v20704_v37 = vpack.c.bf16 %v20024_v4, %v3826_v28  ;;  %v17289_v28 = vld [vmem:[%s29158_s1 + $0x6a8] sm:$0xff] }
 0x603   : > { %v20027_v12 = vpop.f32.mrb[40].mxu0  ;;  %20705 = vmatprep.subr.bf16.mxu1 %v20704_v37  ;;  %19959 = vmatmul.mubr.msk.f32.gmra.mrb[26].mxu1 %vm29232_vm3, %v17209_v26 }
 0x604   : > { %v3836_v44 = vpop.f32.mrb[41].mxu0  ;;  %19961 = vmatprep.mubr.msk.f32.mxu1 %vm29232_vm3, %v17210_v45 }
 0x605   : > { %v20708_v34 = vpack.c.bf16 %v20027_v12, %v3836_v44  ;;  %v17291_v44 = vld [vmem:[%s29158_s1 + $0x6b8] sm:$0xff] }
 0x607   : > { %19962 = vmatmul.mubr.msk.f32.gmra.mrb[28].mxu1 %vm29232_vm3, %v17211_v48 }
 0x608   : > { %19994 = vmatprep.mubr.msk.f32.mxu1 %vm29232_vm3, %v17224_v25  ;;  %v17305_v25 = vld [vmem:[%s29158_s1 + $0x6c8] sm:$0xff] }
 0x60b   : > { %19995 = vmatmul.mubr.msk.f32.vlgmr.msra.gmra.mrb[22].mxu1 %vm29232_vm3, %v17225_v35  ;;  %v17306_v35 = vld [vmem:[%s29158_s1 + $0x6d0] sm:$0xff] }
 0x60c   : > { %20707 = vmatpush3.bf16.msra.mxu1 %v20704_v37  ;;  %19997 = vmatprep.mubr.msk.f32.mxu1 %vm29232_vm3, %v17226_v61  ;;  %v17290_v37 = vld [vmem:[%s29158_s1 + $0x6b0] sm:$0xff]  ;;  %v17307_v61 = vld [vmem:[%s29158_s1 + $0x6d8] sm:$0xff] }
 0x60d   : > { %20709 = vmatprep.subr.bf16.mxu1 %v20708_v34 }
 0x60f   : > { %v20066_v38 = vpop.f32.mrb[42].mxu0  ;;  %19998 = vmatmul.mubr.msk.f32.gmra.mrb[24].mxu1 %vm29232_vm3, %v17227_v32  ;;  %v17308_v32 = vld [vmem:[%s29158_s1 + $0x6e0] sm:$0xff] }
 0x610   : > { %20711 = vmatpush3.bf16.msra.mxu1 %v20708_v34  ;;  %v4057_v39 = vpop.f32.mrb[43].mxu0  ;;  %20000 = vmatprep.mubr.msk.f32.mxu1 %vm29232_vm3, %v17228_v33  ;;  %v17304_v34 = vld [vmem:[%s29158_s1 + $0x6c0] sm:$0xff]  ;;  %v17309_v33 = vld [vmem:[%s29158_s1 + $0x6e8] sm:$0xff] }
 0x611   : > { %v20728_v47 = vpack.c.bf16 %v20066_v38, %v4057_v39  ;;  %v17310_v38 = vld [vmem:[%s29158_s1 + $0x6f0] sm:$0xff]  ;;  %v17311_v39 = vld [vmem:[%s29158_s1 + $0x6f8] sm:$0xff] }
 0x613   : > { %v20069_v55 = vpop.f32.mrb[44].mxu0  ;;  %20729 = vmatprep.subr.bf16.mxu1 %v20728_v47  ;;  %20001 = vmatmul.mubr.msk.f32.gmra.mrb[26].mxu1 %vm29232_vm3, %v17229_v46  ;;  %v17324_v46 = vld [vmem:[%s29158_s1 + $0x700] sm:$0xff] }
 0x614   : > { %v4067_v62 = vpop.f32.mrb[45].mxu0  ;;  %20003 = vmatprep.mubr.msk.f32.mxu1 %vm29232_vm3, %v17230_v54  ;;  %v17326_v54 = vld [vmem:[%s29158_s1 + $0x710] sm:$0xff] }
 0x615   : > { %v20732_v9 = vpack.c.bf16 %v20069_v55, %v4067_v62  ;;  %v17327_v55 = vld [vmem:[%s29158_s1 + $0x718] sm:$0xff]  ;;  %v17328_v62 = vld [vmem:[%s29158_s1 + $0x720] sm:$0xff] }
 0x617   : > { %20004 = vmatmul.mubr.msk.f32.gmra.mrb[28].mxu1 %vm29232_vm3, %v17231_v63  ;;  %v17329_v63 = vld [vmem:[%s29158_s1 + $0x728] sm:$0xff] }
 0x618   : > { %20036 = vmatprep.mubr.msk.f32.mxu1 %vm29232_vm3, %v17244_v17  ;;  %v17331_v17 = vld [vmem:[%s29158_s1 + $0x738] sm:$0xff] }
 0x61b   : > { %20037 = vmatmul.mubr.msk.f32.vlgmr.msra.gmra.mrb[22].mxu1 %vm29232_vm3, %v17245_v27  ;;  %v4980_v27 = vld [vmem:[%s29159_s2] sm:$0xff] }
 0x61c   : > { %20731 = vmatpush3.bf16.msra.mxu1 %v20728_v47  ;;  %20039 = vmatprep.mubr.msk.f32.mxu1 %vm29232_vm3, %v17246_v30  ;;  %v17325_v47 = vld [vmem:[%s29158_s1 + $0x708] sm:$0xff]  ;;  %v4932_v30 = vpop.permute.xlu1 %4931 }
 0x61d   : > { %20733 = vmatprep.subr.bf16.mxu1 %v20732_v9  ;;  %20232 = vmatprep.mubr.msk.f32.mxu0 %vm269_vm1, %v4980_v27  ;;  %v22850_v27 = vld [vmem:[%s29160_s3 + $0x120] ss:$8 sps:$4 sm:$0xff]  }
 0x61f   : > { %v20108_v49 = vpop.f32.mrb[46].mxu0  ;;  %20040 = vmatmul.mubr.msk.f32.gmra.mrb[24].mxu1 %vm29232_vm3, %v17247_v40  ;;  %v4927_v40 = vpop.permute.xlu0 %4926 }
 0x620   : > { %20735 = vmatpush3.bf16.msra.mxu1 %v20732_v9  ;;  %v4288_v51 = vpop.f32.mrb[47].mxu0  ;;  %20042 = vmatprep.mubr.msk.f32.mxu1 %vm29232_vm3, %v17248_v43  ;;  %v17330_v9 = vld [vmem:[%s29158_s1 + $0x730] sm:$0xff]  ;;  %v4942_v43 = vpop.permute.xlu1 %4941 }
 0x621   : > { %v20752_v57 = vpack.c.bf16 %v20108_v49, %v4288_v51 }
 0x623   : > { %v20111_v5 = vpop.f32.mrb[48].mxu0  ;;  %20753 = vmatprep.subr.bf16.mxu1 %v20752_v57  ;;  %20043 = vmatmul.mubr.msk.f32.gmra.mrb[26].mxu1 %vm29232_vm3, %v17249_v53  ;;  %v4937_v51 = vpop.permute.xlu0 %4936 }
 0x624   : > { %v4298_v18 = vpop.f32.mrb[49].mxu0  ;;  %20045 = vmatprep.mubr.msk.f32.mxu1 %vm29232_vm3, %v17250_v1 }
 0x625   : > { %v20756_v29 = vpack.c.bf16 %v20111_v5, %v4298_v18 }
 0x627   : > { %20046 = vmatmul.mubr.msk.f32.gmra.mrb[28].mxu1 %vm29232_vm3, %v17251_v22 }
 0x628   : > { %20078 = vmatprep.mubr.msk.f32.mxu1 %vm29232_vm3, %v17264_v41 }
 0x62b   : > { %20079 = vmatmul.mubr.msk.f32.vlgmr.msra.gmra.mrb[22].mxu1 %vm29232_vm3, %v17265_v50  ;;  %v4952_v50 = vpop.permute.xlu1 %4951 }
 0x62c   : > { %20755 = vmatpush3.bf16.msra.mxu1 %v20752_v57  ;;  %20081 = vmatprep.mubr.msk.f32.mxu1 %vm29232_vm3, %v17266_v60 }
 0x62d   : > { %20757 = vmatprep.subr.bf16.mxu1 %v20756_v29 }
 0x62f   : > { %v20150_v15 = vpop.f32.mrb[50].mxu0  ;;  %20082 = vmatmul.mubr.msk.f32.gmra.mrb[24].mxu1 %vm29232_vm3, %v17267_v14 }
 0x630   : > { %20759 = vmatpush3.bf16.msra.mxu1 %v20756_v29  ;;  %v4519_v59 = vpop.f32.mrb[51].mxu0  ;;  %20084 = vmatprep.mubr.msk.f32.mxu1 %vm29232_vm3, %v17268_v2  ;;  %v4947_v2 = vpop.permute.xlu0 %4946 }
 0x631   : > { %v20776_v0 = vpack.c.bf16 %v20150_v15, %v4519_v59 }
 0x633   : > { %v20153_v11 = vpop.f32.mrb[52].mxu0  ;;  %20777 = vmatprep.subr.bf16.mxu1 %v20776_v0  ;;  %20085 = vmatmul.mubr.msk.f32.gmra.mrb[26].mxu1 %vm29232_vm3, %v17269_v58 }
 0x634   : > { %v4529_v52 = vpop.f32.mrb[53].mxu0  ;;  %20087 = vmatprep.mubr.msk.f32.mxu1 %vm29232_vm3, %v17270_v23 }
 0x635   : > { %v20780_v16 = vpack.c.bf16 %v20153_v11, %v4529_v52 }
 0x637   : > { %20088 = vmatmul.mubr.msk.f32.gmra.mrb[28].mxu1 %vm29232_vm3, %v17271_v56 }
 0x638   : > { %20120 = vmatprep.mubr.msk.f32.mxu1 %vm29232_vm3, %v17284_v24 }
 0x63b   : > { %20121 = vmatmul.mubr.msk.f32.vlgmr.msra.gmra.mrb[22].mxu1 %vm29232_vm3, %v17285_v6 }
 0x63c   : > { %20779 = vmatpush3.bf16.msra.mxu1 %v20776_v0  ;;  %20123 = vmatprep.mubr.msk.f32.mxu1 %vm29232_vm3, %v17286_v7  ;;  %v4957_v7 = vpop.permute.xlu0 %4956 }
 0x63d   : > { %20781 = vmatprep.subr.bf16.mxu1 %v20780_v16 }
 0x63f   : > { %v20192_v3 = vpop.f32.mrb[54].mxu0  ;;  %20124 = vmatmul.mubr.msk.f32.gmra.mrb[24].mxu1 %vm29232_vm3, %v17287_v10 }
 0x640   : > { %20783 = vmatpush3.bf16.msra.mxu1 %v20780_v16  ;;  %v4750_v4 = vpop.f32.mrb[55].mxu0  ;;  %20126 = vmatprep.mubr.msk.f32.mxu1 %vm29232_vm3, %v17288_v20  ;;  %v4962_v16 = vpop.permute.xlu1 %4961 }
 0x641   : > { %v20800_v26 = vpack.c.bf16 %v20192_v3, %v4750_v4 }
 0x643   : > { %v20195_v45 = vpop.f32.mrb[56].mxu0  ;;  %20801 = vmatprep.subr.bf16.mxu1 %v20800_v26  ;;  %20127 = vmatmul.mubr.msk.f32.gmra.mrb[26].mxu1 %vm29232_vm3, %v17289_v28 }
 0x644   : > { %v4760_v12 = vpop.f32.mrb[57].mxu0  ;;  %20129 = vmatprep.mubr.msk.f32.mxu1 %vm29232_vm3, %v17290_v37 }
 0x645   : > { %v20804_v48 = vpack.c.bf16 %v20195_v45, %v4760_v12  ;;  %v4981_v45 = vld [vmem:[%s29159_s2 + $0x8] sm:$0xff]  ;;  %v4982_v12 = vld [vmem:[%s29159_s2 + $0x10] sm:$0xff] }
 0x647   : > { %20130 = vmatmul.mubr.msk.f32.gmra.mrb[28].mxu1 %vm29232_vm3, %v17291_v44  ;;  %v4983_v44 = vld [vmem:[%s29159_s2 + $0x18] sm:$0xff] }
 0x648   : > { %20162 = vmatprep.mubr.msk.f32.mxu1 %vm29232_vm3, %v17304_v34  ;;  %v17353_v34 = vld [vmem:[%s29159_s2 + $0x28] sm:$0xff] }
 0x64b   : > { %20163 = vmatmul.mubr.msk.f32.vlgmr.msra.gmra.mrb[22].mxu1 %vm29232_vm3, %v17305_v25  ;;  %v17354_v25 = vld [vmem:[%s29159_s2 + $0x30] sm:$0xff] }
 0x64c   : > { %20803 = vmatpush3.bf16.msra.mxu1 %v20800_v26  ;;  %20165 = vmatprep.mubr.msk.f32.mxu1 %vm29232_vm3, %v17306_v35  ;;  %v17355_v35 = vld [vmem:[%s29159_s2 + $0x38] sm:$0xff] }
 0x64d   : > { %20805 = vmatprep.subr.bf16.mxu1 %v20804_v48 }
 0x64f   : > { %20166 = vmatmul.mubr.msk.f32.gmra.mrb[24].mxu1 %vm29232_vm3, %v17307_v61  ;;  %v17388_v61 = vld [vmem:[%s29159_s2 + $0x40] sm:$0xff] }
 0x650   : > { %20807 = vmatpush3.bf16.msra.mxu1 %v20804_v48  ;;  %20168 = vmatprep.mubr.msk.f32.mxu1 %vm29232_vm3, %v17308_v32  ;;  %v17352_v48 = vld [vmem:[%s29159_s2 + $0x20] sm:$0xff]  ;;  %v17389_v32 = vld [vmem:[%s29159_s2 + $0x48] sm:$0xff] }
 0x653   : > { %20169 = vmatmul.mubr.msk.f32.gmra.mrb[26].mxu1 %vm29232_vm3, %v17309_v33  ;;  %v17390_v33 = vld [vmem:[%s29159_s2 + $0x50] sm:$0xff] }
 0x654   : > { %20171 = vmatprep.mubr.msk.f32.mxu1 %vm29232_vm3, %v17310_v38  ;;  %v17391_v38 = vld [vmem:[%s29159_s2 + $0x58] sm:$0xff] }
 0x657   : > { %20172 = vmatmul.mubr.msk.f32.gmra.mrb[28].mxu1 %vm29232_vm3, %v17311_v39  ;;  %v17414_v39 = vld [vmem:[%s29159_s2 + $0x60] sm:$0xff] }
 0x658   : > { %20204 = vmatprep.mubr.msk.f32.mxu1 %vm29232_vm3, %v17324_v46  ;;  %v22846_v46 = vld [vmem:[%s29160_s3 + $0x104] ss:$8 sps:$4 sm:$0xff]  }
 0x65b   : > { %20205 = vmatmul.mubr.msk.f32.vlgmr.msra.gmra.mrb[22].mxu1 %vm29232_vm3, %v17325_v47  ;;  %v22844_v47 = vld [vmem:[%s29160_s3 + $0x100] ss:$8 sps:$4 sm:$0xff]  }
 0x65c   : > { %20207 = vmatprep.mubr.msk.f32.mxu1 %vm29232_vm3, %v17326_v54  ;;  %v17415_v54 = vld [vmem:[%s29159_s2 + $0x68] sm:$0xff] }
 0x65f   : > { %20208 = vmatmul.mubr.msk.f32.gmra.mrb[24].mxu1 %vm29232_vm3, %v17327_v55  ;;  %v22849_v55 = vld [vmem:[%s29160_s3 + $0x114] ss:$8 sps:$4 sm:$0xff]  }
 0x660   : > { %20210 = vmatprep.mubr.msk.f32.mxu1 %vm29232_vm3, %v17328_v62  ;;  %v17416_v62 = vld [vmem:[%s29159_s2 + $0x70] sm:$0xff] }
 0x663   : > { %20211 = vmatmul.mubr.msk.f32.gmra.mrb[26].mxu1 %vm29232_vm3, %v17329_v63  ;;  %v22847_v63 = vld [vmem:[%s29160_s3 + $0x110] ss:$8 sps:$4 sm:$0xff]  }
 0x664   : > { %20213 = vmatprep.mubr.msk.f32.mxu1 %vm29232_vm3, %v17330_v9  ;;  %v17417_v9 = vld [vmem:[%s29159_s2 + $0x78] sm:$0xff] }
 0x667   : > { %20214 = vmatmul.mubr.msk.f32.gmra.mrb[28].mxu1 %vm29232_vm3, %v17331_v17  ;;  %v22852_v17 = vld [vmem:[%s29160_s3 + $0x124] ss:$8 sps:$4 sm:$0xff]  }
 0x668   : > { %5282 = vmatprep.mubr.bf16.mxu1 %v22947_v13 }
 0x72e   : > { %v20206_v49 = vpop.f32.mrb[22].mxu1 }
 0x72f   : > { %v4965_v53 = vadd.f32 %v20206_v49, %v4932_v30  ;;  %v4868_v57 = vpop.f32.mrb[23].mxu1  ;;  %v22855_v30 = vld [vmem:[%s29160_s3 + $0x134] ss:$8 sps:$4 sm:$0xff]   ;;  %v5876_v49 = vpack.c.bf16 %v23830_v21, %v23827_v8  ;;  %v22864_v8 = vld [vmem:[%s29160_s3 + $0x64] ss:$8 sps:$4 sm:$0xff]  }
 0x730   : > { %v4964_v1 = vadd.f32 %v4927_v40, %v4868_v57  ;;  %v22853_v40 = vld [vmem:[%s29160_s3 + $0x130] ss:$8 sps:$4 sm:$0xff]   ;;  %v22858_v57 = vld [vmem:[%s29160_s3 + $0x44] ss:$8 sps:$4 sm:$0xff]   ;;  %v22862_v21 = vld [vmem:[%s29160_s3 + $0x60] ss:$8 sps:$4 sm:$0xff]  }
 0x731   : > { %v4973_v5 = vmax.f32 %v4965_v53, 0.0  ;;  %v22856_v53 = vld [vmem:[%s29160_s3 + $0x40] ss:$8 sps:$4 sm:$0xff]   ;;  %5250 = vmatprep.subr.bf16.mxu1 %v22858_v57 }
 0x732   : > { %v4972_v18 = vmax.f32 %v4964_v1, 0.0  ;;  %v20209_v22 = vpop.f32.mrb[24].mxu1  ;;  %5251 = vmatpush1.bf16.msra.mxu1 %v22856_v53  ;;  %v22867_v1 = vld [vmem:[%s29160_s3 + $0x74] ss:$8 sps:$4 sm:$0xff]  }
 0x733   : > { %v4967_v29 = vadd.f32 %v20209_v22, %v4942_v43  ;;  %v4878_v41 = vpop.f32.mrb[25].mxu1  ;;  %v5875_v43 = vpack.c.bf16 %v23817_v31, %v23814_v19  ;;  %v22861_v19 = vld [vmem:[%s29160_s3 + $0x54] ss:$8 sps:$4 sm:$0xff]   ;;  %v22859_v31 = vld [vmem:[%s29160_s3 + $0x50] ss:$8 sps:$4 sm:$0xff]  }
 0x734   : > { %v24243_v60 = vpack.c.bf16 %v4973_v5, %v4972_v18  ;;  %v4966_v14 = vadd.f32 %v4937_v51, %v4878_v41  ;;  %v29248_v51 = vmov 0.0   ;;  %5252 = vmatprep.subr.bf16.mxu1 %v22861_v19  ;;  %v22865_v5 = vld [vmem:[%s29160_s3 + $0x70] ss:$8 sps:$4 sm:$0xff]   ;;  %v22870_v18 = vld [vmem:[%s29160_s3 + $0x4] ss:$8 sps:$4 sm:$0xff]  }
 0x735   : > { %v4975_v15 = vmax.f32 %v4967_v29, 0.0 }
 0x736   : > { %v4974_v59 = vmax.f32 %v4966_v14, 0.0  ;;  %v20212_v58 = vpop.f32.mrb[26].mxu1  ;;  %20809 = vmatprep.subr.bf16.mxu0 %v24243_v60  ;;  %5253 = vmatpush1.bf16.msra.mxu1 %v22859_v31 }
 0x737   : > { %v4969_v0 = vadd.f32 %v20212_v58, %v4952_v50  ;;  %v4888_v23 = vpop.f32.mrb[27].mxu1  ;;  %20811 = vmatpush3.bf16.msra.mxu0 %v24243_v60  ;;  %5254 = vmatprep.subr.bf16.mxu1 %v22864_v8 }
 0x738   : > { %v20812_v11 = vpack.c.bf16 %v4975_v15, %v4974_v59  ;;  %v4968_v52 = vadd.f32 %v4947_v2, %v4888_v23  ;;  %v22868_v59 = vld [vmem:[%s29160_s3] ss:$8 sps:$4 sm:$0xff]  }
 0x739   : > { %v4977_v56 = vmax.f32 %v4969_v0, 0.0  ;;  %v22873_v0 = vld [vmem:[%s29160_s3 + $0x14] ss:$8 sps:$4 sm:$0xff]  }
 0x73a   : > { %v4976_v24 = vmax.f32 %v4968_v52, 0.0  ;;  %v20215_v6 = vpop.f32.mrb[28].mxu1  ;;  %20813 = vmatprep.subr.bf16.mxu0 %v20812_v11  ;;  %5255 = vmatpush1.bf16.msra.mxu1 %v22862_v21  ;;  %v22871_v52 = vld [vmem:[%s29160_s3 + $0x10] ss:$8 sps:$4 sm:$0xff]  }
 0x73b   : > { %v4971_v10 = vadd.f32 %v20215_v6, %v4962_v16  ;;  %v4898_v20 = vpop.f32.mrb[29].mxu1  ;;  %20815 = vmatpush3.bf16.msra.mxu0 %v20812_v11  ;;  %5256 = vmatprep.subr.bf16.mxu1 %v22867_v1  ;;  %v22876_v16 = vld [vmem:[%s29160_s3 + $0x24] ss:$8 sps:$4 sm:$0xff]   ;;  %v22879_v6 = vld [vmem:[%s29160_s3 + $0x34] ss:$8 sps:$4 sm:$0xff]  }
 0x73c   : > { %v20816_v3 = vpack.c.bf16 %v4977_v56, %v4976_v24  ;;  %v4970_v4 = vadd.f32 %v4957_v7, %v4898_v20  ;;  %v22874_v24 = vld [vmem:[%s29160_s3 + $0x20] ss:$8 sps:$4 sm:$0xff]   ;;  %v22877_v7 = vld [vmem:[%s29160_s3 + $0x30] ss:$8 sps:$4 sm:$0xff]  }
 0x73d   : > { %v4979_v28 = vmax.f32 %v4971_v10, 0.0  ;;  %v22882_v10 = vld [vmem:[%s29160_s3 + $0x84] ss:$8 sps:$4 sm:$0xff]  }
 0x73e   : > { %v4978_v26 = vmax.f32 %v4970_v4, 0.0  ;;  %20817 = vmatprep.subr.bf16.mxu0 %v20816_v3  ;;  %5257 = vmatpush1.bf16.msra.mxu1 %v22865_v5 }
 0x73f   : > { %20819 = vmatpush3.bf16.msra.mxu0 %v20816_v3  ;;  %5349 = vmatprep.subr.bf16.mxu1 %v22870_v18 }
 0x740   : > { %v20820_v37 = vpack.c.bf16 %v4979_v28, %v4978_v26  ;;  %v22885_v28 = vld [vmem:[%s29160_s3 + $0x94] ss:$8 sps:$4 sm:$0xff]  }
 0x742   : > { %20821 = vmatprep.subr.bf16.mxu0 %v20820_v37 }
 0x743   : > { %20823 = vmatpush3.bf16.msra.mxu0 %v20820_v37 }
 0x744   : > { %20825 = vmatprep.subr.bf16.mxu0 %v24243_v60 }
 0x746   : > { %20233 = vmatmul.mubr.msk.f32.vlgmr.msra.gmra.mrb[58].mxu0 %vm269_vm1, %v4981_v45  ;;  %v22883_v45 = vld [vmem:[%s29160_s3 + $0x90] ss:$8 sps:$4 sm:$0xff]  }
 0x747   : > { %20827 = vmatpush3.bf16.msra.mxu0 %v24243_v60  ;;  %20235 = vmatprep.mubr.msk.f32.mxu0 %vm269_vm1, %v4982_v12 }
 0x748   : > { %20829 = vmatprep.subr.bf16.mxu0 %v20812_v11 }
 0x74a   : > { %20236 = vmatmul.mubr.msk.f32.gmra.mrb[60].mxu0 %vm269_vm1, %v4983_v44  ;;  %v22888_v44 = vld [vmem:[%s29160_s3 + $0xa4] ss:$8 sps:$4 sm:$0xff]  }
 0x74b   : > { %20831 = vmatpush3.bf16.msra.mxu0 %v20812_v11  ;;  %20254 = vmatprep.mubr.msk.f32.mxu0 %vm269_vm1, %v17352_v48 }
 0x74c   : > { %20833 = vmatprep.subr.bf16.mxu0 %v20816_v3 }
 0x74f   : > { %20835 = vmatpush3.bf16.msra.mxu0 %v20816_v3 }
 0x750   : > { %20837 = vmatprep.subr.bf16.mxu0 %v20820_v37 }
 0x753   : > { %20839 = vmatpush3.bf16.msra.mxu0 %v20820_v37 }
 0x754   : > { %20841 = vmatprep.subr.bf16.mxu0 %v24243_v60 }
 0x756   : > { %20255 = vmatmul.mubr.msk.f32.vlgmr.msra.gmra.mrb[62].mxu0 %vm269_vm1, %v17353_v34  ;;  %v22886_v34 = vld [vmem:[%s29160_s3 + $0xa0] ss:$8 sps:$4 sm:$0xff]  }
 0x757   : > { %20843 = vmatpush3.bf16.msra.mxu0 %v24243_v60  ;;  %20257 = vmatprep.mubr.msk.f32.mxu0 %vm269_vm1, %v17354_v25  ;;  %v22891_v25 = vld [vmem:[%s29160_s3 + $0xb4] ss:$8 sps:$4 sm:$0xff]  }
 0x758   : > { %20845 = vmatprep.subr.bf16.mxu0 %v20812_v11 }
 0x75a   : > { %20258 = vmatmul.mubr.msk.f32.gmra.mrb[64].mxu0 %vm269_vm1, %v17355_v35  ;;  %v22889_v35 = vld [vmem:[%s29160_s3 + $0xb0] ss:$8 sps:$4 sm:$0xff]  }
 0x75b   : > { %20847 = vmatpush3.bf16.msra.mxu0 %v20812_v11  ;;  %20276 = vmatprep.mubr.msk.f32.mxu0 %vm269_vm1, %v17388_v61  ;;  %v22894_v61 = vld [vmem:[%s29160_s3 + $0xc4] ss:$8 sps:$4 sm:$0xff]  }
 0x75c   : > { %20849 = vmatprep.subr.bf16.mxu0 %v20816_v3 }
 0x75f   : > { %20851 = vmatpush3.bf16.msra.mxu0 %v20816_v3 }
 0x760   : > { %20853 = vmatprep.subr.bf16.mxu0 %v20820_v37 }
 0x763   : > { %20855 = vmatpush3.bf16.msra.mxu0 %v20820_v37 }
 0x764   : > { %20857 = vmatprep.subr.bf16.mxu0 %v24243_v60 }
 0x766   : > { %20277 = vmatmul.mubr.msk.f32.vlgmr.msra.gmra.mrb[66].mxu0 %vm269_vm1, %v17389_v32 }
 0x767   : > { %20859 = vmatpush3.bf16.msra.mxu0 %v24243_v60  ;;  %20279 = vmatprep.mubr.msk.f32.mxu0 %vm269_vm1, %v17390_v33  ;;  %v22892_v33 = vld [vmem:[%s29160_s3 + $0xc0] ss:$8 sps:$4 sm:$0xff]  }
 0x768   : > { %20861 = vmatprep.subr.bf16.mxu0 %v20812_v11 }
 0x76a   : > { %20280 = vmatmul.mubr.msk.f32.gmra.mrb[68].mxu0 %vm269_vm1, %v17391_v38 }
 0x76b   : > { %20863 = vmatpush3.bf16.msra.mxu0 %v20812_v11  ;;  %20298 = vmatprep.mubr.msk.f32.mxu0 %vm269_vm1, %v17414_v39  ;;  %v22897_v39 = vld [vmem:[%s29160_s3 + $0xd4] ss:$8 sps:$4 sm:$0xff]  }
 0x76c   : > { %20865 = vmatprep.subr.bf16.mxu0 %v20816_v3 }
 0x76f   : > { %20867 = vmatpush3.bf16.msra.mxu0 %v20816_v3  ;;  %v22880_v3 = vld [vmem:[%s29160_s3 + $0x80] ss:$8 sps:$4 sm:$0xff]  }
 0x770   : > { %20869 = vmatprep.subr.bf16.mxu0 %v20820_v37 }
 0x773   : > { %20871 = vmatpush3.bf16.msra.mxu0 %v20820_v37 }
 0x774   : > { %5932 = vmatprep.subr.bf16.mxu0 %v22846_v46 }
 0x776   : > { %20299 = vmatmul.mubr.msk.f32.vlgmr.msra.gmra.mrb[70].mxu0 %vm269_vm1, %v17415_v54  ;;  %v22895_v54 = vld [vmem:[%s29160_s3 + $0xd0] ss:$8 sps:$4 sm:$0xff]  }
 0x777   : > { %5933 = vmatpush1.bf16.msra.mxu0 %v22844_v47  ;;  %20301 = vmatprep.mubr.msk.f32.mxu0 %vm269_vm1, %v17416_v62  ;;  %v22900_v62 = vld [vmem:[%s29160_s3 + $0xe4] ss:$8 sps:$4 sm:$0xff]  }
 0x778   : > { %5934 = vmatprep.subr.bf16.mxu0 %v22849_v55 }
 0x77a   : > { %20302 = vmatmul.mubr.msk.f32.gmra.mrb[72].mxu0 %vm269_vm1, %v17417_v9  ;;  %v22898_v9 = vld [vmem:[%s29160_s3 + $0xe0] ss:$8 sps:$4 sm:$0xff]  }
 0x77b   : > { %5935 = vmatpush1.bf16.msra.mxu0 %v22847_v63  ;;  %5964 = vmatprep.mubr.bf16.mxu0 %v22947_v13 }
 0x77c   : > { %5936 = vmatprep.subr.bf16.mxu0 %v22852_v17  ;;  %v22903_v17 = vld [vmem:[%s29160_s3 + $0xf4] ss:$8 sps:$4 sm:$0xff]  }
 0x77f   : > { %5937 = vmatpush1.bf16.msra.mxu0 %v22850_v27  ;;  %v22901_v27 = vld [vmem:[%s29160_s3 + $0xf0] ss:$8 sps:$4 sm:$0xff]  }
 0x780   : > { %5938 = vmatprep.subr.bf16.mxu0 %v22855_v30 }
 0x783   : > { %5939 = vmatpush1.bf16.msra.mxu0 %v22853_v40 }
 0x786   : > { %17460 = vmatmul.mubr.msk.bf16.vlgmr.msra.gmra.mrb[76].mxu0 %vm269_vm1, %v5875_v43 }
 0x787   : > { %5974 = vmatprep.mubr.bf16.mxu0 %v22947_v13 }
 0x78e   : > { %17461 = vmatmul.mubr.msk.bf16.gmra.mrb[80].mxu0 %vm269_vm1, %v5876_v49 }
 0x78f   : > { %6241 = vmatprep.mubr.f32.mxu0 %v29248_v51 }
 0x819   : > { %v20234_v22 = vpop.f32.mrb[58].mxu0 }
 0x81a   : > { %v5062_v29 = vpop.f32.mrb[59].mxu0 }
 0x81b   : > { %v5081_v41 = vpack.c.bf16 %v20234_v22, %v5062_v29 }
 0x81d   : > { %v20237_v50 = vpop.f32.mrb[60].mxu0 }
 0x81e   : > { %v5072_v60 = vpop.f32.mrb[61].mxu0 }
 0x81f   : > { %v5082_v14 = vpack.c.bf16 %v20237_v50, %v5072_v60 }
 0x829   : > { %v20256_v2 = vpop.f32.mrb[62].mxu0 }
 0x82a   : > { %v5174_v15 = vpop.f32.mrb[63].mxu0 }
 0x82b   : > { %v5193_v58 = vpack.c.bf16 %v20256_v2, %v5174_v15 }
 0x82d   : > { %17376 = vmatmul.mubr.msk.bf16.vlgmr.msra.gmra.mrb[32].mxu1 %vm269_vm1, %v5193_v58  ;;  %v20259_v23 = vpop.f32.mrb[64].mxu0  ;;  %v5855_v58 = vpop.permute.xlu1 %5854 }
 0x82e   : > { %5350 = vmatpush1.bf16.msra.mxu1 %v22868_v59  ;;  %v5184_v11 = vpop.f32.mrb[65].mxu0  ;;  %5292 = vmatprep.mubr.bf16.mxu1 %v22947_v13 }
 0x82f   : > { %v5194_v56 = vpack.c.bf16 %v20259_v23, %v5184_v11  ;;  %5351 = vmatprep.subr.bf16.mxu1 %v22873_v0 }
 0x832   : > { %5352 = vmatpush1.bf16.msra.mxu1 %v22871_v52 }
 0x833   : > { %5353 = vmatprep.subr.bf16.mxu1 %v22876_v16 }
 0x835   : > { %17377 = vmatmul.mubr.msk.bf16.gmra.mrb[36].mxu1 %vm269_vm1, %v5194_v56 }
 0x836   : > { %5354 = vmatpush1.bf16.msra.mxu1 %v22874_v24  ;;  %5381 = vmatprep.mubr.bf16.mxu1 %v22947_v13 }
 0x837   : > { %5355 = vmatprep.subr.bf16.mxu1 %v22879_v6 }
 0x839   : > { %v20278_v20 = vpop.f32.mrb[66].mxu0 }
 0x83a   : > { %5356 = vmatpush1.bf16.msra.mxu1 %v22877_v7  ;;  %v5485_v4 = vpop.f32.mrb[67].mxu0 }
 0x83b   : > { %5561 = vmatprep.subr.bf16.mxu1 %v22882_v10  ;;  %v5504_v26 = vpack.c.bf16 %v20278_v20, %v5485_v4 }
 0x83d   : > { %17386 = vmatmul.mubr.msk.bf16.vlgmr.msra.gmra.mrb[32].mxu1 %vm269_vm1, %v5081_v41  ;;  %v20281_v37 = vpop.f32.mrb[68].mxu0 }
 0x83e   : > { %5562 = vmatpush1.bf16.msra.mxu1 %v22880_v3  ;;  %5391 = vmatprep.mubr.bf16.mxu1 %v22947_v13  ;;  %v5495_v12 = vpop.f32.mrb[69].mxu0 }
 0x83f   : > { %5563 = vmatprep.subr.bf16.mxu1 %v22885_v28  ;;  %v5505_v48 = vpack.c.bf16 %v20281_v37, %v5495_v12 }
 0x842   : > { %5564 = vmatpush1.bf16.msra.mxu1 %v22883_v45 }
 0x843   : > { %5565 = vmatprep.subr.bf16.mxu1 %v22888_v44 }
 0x845   : > { %17387 = vmatmul.mubr.msk.bf16.gmra.mrb[36].mxu1 %vm269_vm1, %v5082_v14  ;;  %v5850_v14 = vpop.permute.xlu0 %5849 }
 0x846   : > { %5566 = vmatpush1.bf16.msra.mxu1 %v22886_v34  ;;  %5593 = vmatprep.mubr.bf16.mxu1 %v22947_v13 }
 0x847   : > { %5567 = vmatprep.subr.bf16.mxu1 %v22891_v25 }
 0x849   : > { %v20300_v32 = vpop.f32.mrb[70].mxu0  ;;  %v5860_v7 = vpop.permute.xlu0 %5859 }
 0x84a   : > { %5568 = vmatpush1.bf16.msra.mxu1 %v22889_v35  ;;  %v5705_v38 = vpop.f32.mrb[71].mxu0 }
 0x84b   : > { %5781 = vmatprep.subr.bf16.mxu1 %v22894_v61  ;;  %v5724_v46 = vpack.c.bf16 %v20300_v32, %v5705_v38 }
 0x84d   : > { %17412 = vmatmul.mubr.msk.bf16.vlgmr.msra.gmra.mrb[32].mxu1 %vm269_vm1, %v5504_v26  ;;  %v20303_v47 = vpop.f32.mrb[72].mxu0  ;;  %v5865_v26 = vpop.permute.xlu1 %5864 }
 0x84e   : > { %5782 = vmatpush1.bf16.msra.mxu1 %v22892_v33  ;;  %5603 = vmatprep.mubr.bf16.mxu1 %v22947_v13  ;;  %v5715_v55 = vpop.f32.mrb[73].mxu0 }
 0x84f   : > { %5783 = vmatprep.subr.bf16.mxu1 %v22897_v39  ;;  %v5725_v63 = vpack.c.bf16 %v20303_v47, %v5715_v55 }
 0x852   : > { %5784 = vmatpush1.bf16.msra.mxu1 %v22895_v54 }
 0x853   : > { %5785 = vmatprep.subr.bf16.mxu1 %v22900_v62 }
 0x855   : > { %17413 = vmatmul.mubr.msk.bf16.gmra.mrb[36].mxu1 %vm269_vm1, %v5505_v48 }
 0x856   : > { %5786 = vmatpush1.bf16.msra.mxu1 %v22898_v9  ;;  %5813 = vmatprep.mubr.bf16.mxu1 %v22947_v13 }
 0x857   : > { %5787 = vmatprep.subr.bf16.mxu1 %v22903_v17 }
 0x859   : > { %v24454_v30 = vpop.f32.mrb[76].mxu0 }
 0x85a   : > { %5788 = vmatpush1.bf16.msra.mxu1 %v22901_v27  ;;  %v24456_v40 = vpop.f32.mrb[77].mxu0 }
 0x85b   : > { %v24458_v43 = vpop.f32.mrb[78].mxu0 }
 0x85c   : > { %v24460_v49 = vpop.f32.mrb[79].mxu0  ;;  %v24464_v53 = vpack.i.bf16 %v24458_v43, %v24456_v40  ;;  %v20970_v31 = vpack.c.bf16 %v24458_v43, %v24454_v30 }
 0x85d   : > { %17438 = vmatmul.mubr.msk.bf16.vlgmr.msra.gmra.mrb[32].mxu1 %vm269_vm1, %v5724_v46  ;;  %v24469_v57 = vpack.i.bf16 %v24454_v30, %v24460_v49  ;;  %v20968_v19 = vpack.c.bf16 %v24460_v49, %v24456_v40 }
 0x85e   : > { %21885 = vrot.lane.b32.xlu1 %v24464_v53, %s22948_s13  ;;  %5823 = vmatprep.mubr.bf16.mxu1 %v22947_v13 }
 0x861   : > { %v24478_v8 = vpop.f32.mrb[80].mxu0 }
 0x862   : > { %v24480_v21 = vpop.f32.mrb[81].mxu0  ;;  %v24484_v1 = vpack.i.bf16 %v24478_v8, %v24460_v49 }
 0x863   : > { %v24486_v5 = vpop.f32.mrb[82].mxu0  ;;  %v24490_v18 = vpack.i.bf16 %v24480_v21, %v24458_v43 }
 0x864   : > { %21890 = vrot.lane.b32.xlu0 %v24484_v1, %s22948_s13  ;;  %v24494_v22 = vpop.f32.mrb[83].mxu0  ;;  %v24498_v29 = vpack.i.bf16 %v24486_v5, %v24480_v21  ;;  %v20974_v60 = vpack.c.bf16 %v24486_v5, %v24478_v8 }
 0x865   : > { %17439 = vmatmul.mubr.msk.bf16.gmra.mrb[36].mxu1 %vm269_vm1, %v5725_v63  ;;  %v24503_v41 = vpack.i.bf16 %v24478_v8, %v24494_v22  ;;  %v20972_v50 = vpack.c.bf16 %v24494_v22, %v24480_v21  ;;  %v17542_v21 = vld [vmem:[%s29158_s1 + $0x880] sm:$0xff] }
 0x866   : > { %21895 = vrot.lane.b32.xlu1 %v24498_v29, %s22948_s13  ;;  %7765 = vmatprep.mubr.f32.mxu1 %v29248_v51 }
 0x8d0   : > { %v24618_v47 = vpop.permute.xlu1 %21885 }
 0x8d6   : > { %v24621_v54 = vpop.permute.xlu0 %21890 }
 0x8d8   : > { %v24624_v55 = vpop.permute.xlu1 %21895 }
 0x930   : > { %v5815_v2 = vpop.f32.mrb[32].mxu1 }
 0x931   : > { %v24512_v15 = vadd.f32 %v5850_v14, %v5815_v2  ;;  %v5817_v59 = vpop.f32.mrb[33].mxu1 }
 0x932   : > { %v24514_v0 = vadd.f32 %v5850_v14, %v5817_v59  ;;  %v5819_v23 = vpop.f32.mrb[34].mxu1 }
 0x933   : > { %v24516_v11 = vadd.f32 %v5855_v58, %v5819_v23  ;;  %v5821_v52 = vpop.f32.mrb[35].mxu1 }
 0x934   : > { %v24518_v56 = vadd.f32 %v5855_v58, %v5821_v52  ;;  %v21899_v16 = vpack.i.bf16 %v24514_v0, %v24512_v15  ;;  %v22044_v46 = vpack.i.bf16 %v29248_v51, %v24514_v0  ;;  %v29249_v58 = vlaneseq }
 0x935   : > { %v20962_v3 = vpack.c.bf16 %v24516_v11, %v24512_v15 }
 0x936   : > { %21900 = vrot.lane.b32.xlu0 %v21899_v16, %s22948_s13  ;;  %v21904_v24 = vpack.i.bf16 %v24518_v56, %v24516_v11  ;;  %v24527_v6 = vpack.i.bf16 %v24512_v15, %v24518_v56  ;;  %v20960_v20 = vpack.c.bf16 %v24518_v56, %v24514_v0  ;;  %v24634_v23 = vand.u32 127, %v29249_v58 }
 0x938   : > { %21905 = vrot.lane.b32.xlu1 %v21904_v24, %s22948_s13  ;;  %v5825_v10 = vpop.f32.mrb[36].mxu1  ;;  %29250 = vst [vmem:[#allocation2_spill] sm:$0xff] %v24634_v23 }
 0x939   : > { %v24534_v4 = vadd.f32 %v5860_v7, %v5825_v10  ;;  %v5827_v28 = vpop.f32.mrb[37].mxu1 }
 0x93a   : > { %v24536_v37 = vadd.f32 %v5860_v7, %v5827_v28  ;;  %v5829_v45 = vpop.f32.mrb[38].mxu1 }
 0x93b   : > { %v24538_v12 = vadd.f32 %v5865_v26, %v5829_v45  ;;  %v5831_v44 = vpop.f32.mrb[39].mxu1  ;;  %v21909_v48 = vpack.i.bf16 %v24534_v4, %v29248_v51  ;;  %v21892_v45 = vunpack.i.l.bf16 %v24621_v54 }
 0x93c   : > { %v24542_v34 = vadd.f32 %v5865_v26, %v5831_v44  ;;  %v24546_v25 = vpack.i.bf16 %v24536_v37, %v24516_v11  ;;  %v17520_v11 = vld [vmem:[%s29158_s1 + $0x850] sm:$0xff] }
 0x93d   : > { %21910 = vrot.lane.b32.xlu0 %v21909_v48, %s22948_s13  ;;  %v21914_v35 = vpack.i.bf16 %v24538_v12, %v24536_v37  ;;  %v24560_v33 = vpack.i.bf16 %v24456_v40, %v24538_v12  ;;  %v20966_v39 = vpack.c.bf16 %v24538_v12, %v24534_v4  ;;  %v17521_v40 = vld [vmem:[%s29158_s1 + $0x858] sm:$0xff] }
 0x93e   : > { %v21919_v61 = vpack.i.bf16 %v24454_v30, %v24542_v34  ;;  %v24556_v32 = vpack.i.bf16 %v24534_v4, %v24542_v34  ;;  %v20964_v38 = vpack.c.bf16 %v24542_v34, %v24536_v37 }
 0x93f   : > { %21915 = vrot.lane.b32.xlu1 %v21914_v35, %s22948_s13 }
 0x941   : > { %21920 = vrot.lane.b32.xlu0 %v21919_v61, %s22948_s13 }
 0x943   : > { %21925 = vrot.lane.b32.xlu1 %v21899_v16, %s22949_s14 }
 0x945   : > { %6131 = vrot.lane.b32.xlu0 %v24494_v22, %s22948_s13 }
 0x947   : > { %21935 = vrot.lane.b32.xlu1 %v21909_v48, %s22949_s14 }
 0x949   : > { %21930 = vrot.lane.b32.xlu0 %v21904_v24, %s22949_s14 }
 0x94b   : > { %21950 = vrot.lane.b32.xlu1 %v24484_v1, %s22949_s14 }
 0x94d   : > { %21940 = vrot.lane.b32.xlu0 %v21914_v35, %s22949_s14 }
 0x94f   : > { %21960 = vrot.lane.b32.xlu1 %v21919_v61, %s22949_s14 }
 0x951   : > { %21945 = vrot.lane.b32.xlu0 %v24464_v53, %s22949_s14 }
 0x953   : > { %6038 = vrot.lane.b32.xlu1 %v24494_v22, %s22949_s14 }
 0x955   : > { %21955 = vrot.lane.b32.xlu0 %v24498_v29, %s22949_s14  ;;  %s18916_s14 = sshll.u32 %s29562_s19, 5 }
 0x957   : > { %21970 = vrot.lane.b32.xlu1 %v21904_v24, %s22950_s15 }
 0x959   : > { %21965 = vrot.lane.b32.xlu0 %v21899_v16, %s22950_s15 }
 0x95b   : > { %21980 = vrot.lane.b32.xlu1 %v21914_v35, %s22950_s15 }
 0x95d   : > { %21975 = vrot.lane.b32.xlu0 %v21909_v48, %s22950_s15 }
 0x95f   : > { %21985 = vrot.lane.b32.xlu1 %v24464_v53, %s22950_s15 }
 0x961   : > { %21990 = vrot.lane.b32.xlu0 %v21919_v61, %s22950_s15 }
 0x963   : > { %22000 = vrot.lane.b32.xlu1 %v24498_v29, %s22950_s15 }
 0x965   : > { %21995 = vrot.lane.b32.xlu0 %v24484_v1, %s22950_s15 }
 0x967   : > { %22005 = vrot.lane.b32.xlu1 %v21899_v16, %s22951_s16 }
 0x969   : > { %6403 = vrot.lane.b32.xlu0 %v24494_v22, %s22950_s15 }
 0x96b   : > { %22015 = vrot.lane.b32.xlu1 %v21909_v48, %s22951_s16 }
 0x96d   : > { %22010 = vrot.lane.b32.xlu0 %v21904_v24, %s22951_s16 }
 0x96f   : > { %22030 = vrot.lane.b32.xlu1 %v21919_v61, %s22951_s16  ;;  %v21887_v61 = vunpack.i.l.bf16 %v24618_v47 }
 0x971   : > { %22020 = vrot.lane.b32.xlu0 %v21914_v35, %s22951_s16 }
 0x973   : > { %22035 = vrot.lane.b32.xlu1 %v24484_v1, %s22951_s16 }
 0x975   : > { %22025 = vrot.lane.b32.xlu0 %v24464_v53, %s22951_s16 }
 0x977   : > { %6600 = vrot.lane.b32.xlu1 %v24494_v22, %s22951_s16 }
 0x979   : > { %22040 = vrot.lane.b32.xlu0 %v24498_v29, %s22951_s16 }
 0x97b   : > { %22050 = vrot.lane.b32.xlu1 %v24527_v6, %s22952_s17 }
 0x97d   : > { %22045 = vrot.lane.b32.xlu0 %v22044_v46, %s22952_s17 }
 0x97f   : > { %22065 = vrot.lane.b32.xlu1 %v24469_v57, %s22952_s17 }
 0x981   : > { %22055 = vrot.lane.b32.xlu0 %v24546_v25, %s22952_s17 }
 0x983   : > { %22075 = vrot.lane.b32.xlu1 %v24556_v32, %s22952_s17 }
 0x985   : > { %22060 = vrot.lane.b32.xlu0 %v24560_v33, %s22952_s17 }
 0x987   : > { %22080 = vrot.lane.b32.xlu1 %v24503_v41, %s22952_s17 }
 0x989   : > { %22070 = vrot.lane.b32.xlu0 %v24490_v18, %s22952_s17 }
 0x98b   : > { %22085 = vrot.lane.b32.xlu1 %v22044_v46, %s22953_s20 }
 0x98d   : > { %6909 = vrot.lane.b32.xlu0 %v24486_v5, %s22952_s17 }
 0x98f   : > { %22095 = vrot.lane.b32.xlu1 %v24546_v25, %s22953_s20 }
 0x991   : > { %22090 = vrot.lane.b32.xlu0 %v24527_v6, %s22953_s20 }
 0x993   : > { %22100 = vrot.lane.b32.xlu1 %v24560_v33, %s22953_s20 }
 0x995   : > { %22105 = vrot.lane.b32.xlu0 %v24469_v57, %s22953_s20 }
 0x997   : > { %22110 = vrot.lane.b32.xlu1 %v24490_v18, %s22953_s20 }
 0x999   : > { %22115 = vrot.lane.b32.xlu0 %v24556_v32, %s22953_s20 }
 0x99b   : > { %7106 = vrot.lane.b32.xlu1 %v24486_v5, %s22953_s20 }
 0x99d   : > { %22120 = vrot.lane.b32.xlu0 %v24503_v41, %s22953_s20 }
 0x99f   : > { %22130 = vrot.lane.b32.xlu1 %v24527_v6, %s22954_s21 }
 0x9a1   : > { %22125 = vrot.lane.b32.xlu0 %v22044_v46, %s22954_s21 }
 0x9a3   : > { %22145 = vrot.lane.b32.xlu1 %v24556_v32, %s22954_s21 }
 0x9a5   : > { %22135 = vrot.lane.b32.xlu0 %v24546_v25, %s22954_s21 }
 0x9a7   : > { %22150 = vrot.lane.b32.xlu1 %v24469_v57, %s22954_s21 }
 0x9a8   : > { %v21901_v62 = vpop.permute.xlu0 %21900 }
 0x9a9   : > { %v21903_v63 = vunpack.i.h.bf16 %v21901_v62  ;;  %v21902_v9 = vunpack.i.l.bf16 %v21901_v62  ;;  %22140 = vrot.lane.b32.xlu0 %v24560_v33, %s22954_s21 }
 0x9aa   : > { %v21906_v17 = vpop.permute.xlu1 %21905 }
 0x9ab   : > { %v21908_v27 = vunpack.i.h.bf16 %v21906_v17  ;;  %v21907_v53 = vunpack.i.l.bf16 %v21906_v17  ;;  %22160 = vrot.lane.b32.xlu1 %v24503_v41, %s22954_s21  ;;  %v6134_v1 = vsel %vm29221_vm2, %v21902_v9, %v21903_v63  ;;  %v24649_v63 = vadd.s32 128, %v24634_v23 }
 0x9ad   : > { %22155 = vrot.lane.b32.xlu0 %v24490_v18, %s22954_s21  ;;  %v6136_v29 = vsel %vm29221_vm2, %v21907_v53, %v21908_v27  ;;  %29251 = vst [vmem:[#allocation3_spill] sm:$0xff] %v24649_v63 }
 0x9ae   : > { %v20872_v14 = vpack.c.bf16 %v6136_v29, %v6134_v1 }
 0x9af   : > { %v21911_v2 = vpop.permute.xlu0 %21910  ;;  %22165 = vrot.lane.b32.xlu1 %v22044_v46, %s22955_s22 }
 0x9b0   : > { %v21912_v59 = vunpack.i.l.bf16 %v21911_v2  ;;  %20873 = vmatprep.subr.bf16.mxu0 %v20872_v14  ;;  %v21913_v10 = vunpack.i.h.bf16 %v21911_v2  ;;  %v21893_v14 = vunpack.i.h.bf16 %v24621_v54 }
 0x9b1   : > { %v21916_v52 = vpop.permute.xlu1 %21915  ;;  %7308 = vrot.lane.b32.xlu0 %v24486_v5, %s22954_s21 }
 0x9b2   : > { %v21918_v16 = vunpack.i.h.bf16 %v21916_v52  ;;  %v21917_v24 = vunpack.i.l.bf16 %v21916_v52  ;;  %v6133_v7 = vsel %vm29221_vm2, %v21912_v59, %v21902_v9  ;;  %v6135_v26 = vsel %vm29221_vm2, %v21912_v59, %v21907_v53 }
 0x9b3   : > { %22175 = vrot.lane.b32.xlu1 %v24546_v25, %s22955_s22  ;;  %v21921_v28 = vpop.permute.xlu0 %21920  ;;  %v20874_v35 = vpack.c.bf16 %v6135_v26, %v6133_v7  ;;  %v21888_v25 = vunpack.i.h.bf16 %v24618_v47  ;;  %v21897_v9 = vunpack.i.l.bf16 %v24624_v55  ;;  %v6137_v53 = vsel %vm29221_vm2, %v21912_v59, %v21913_v10 }
 0x9b4   : > { %v21923_v44 = vunpack.i.h.bf16 %v21921_v28  ;;  %v21922_v48 = vunpack.i.l.bf16 %v21921_v28  ;;  %v6139_v46 = vsel %vm29221_vm2, %v21912_v59, %v21918_v16  ;;  %v6138_v17 = vsel %vm29221_vm2, %v21913_v10, %v21917_v24 }
 0x9b5   : > { %v24644_v62 = vpop.permute.xlu1 %21925  ;;  %22170 = vrot.lane.b32.xlu0 %v24527_v6, %s22955_s22  ;;  %20875 = vmatpush1.bf16.msra.mxu0 %v20874_v35  ;;  %v21898_v47 = vunpack.i.h.bf16 %v24624_v55  ;;  %v20878_v2 = vpack.c.bf16 %v6139_v46, %v6137_v53  ;;  %v6144_v58 = vsel %vm29221_vm2, %v21888_v25, %v21892_v45  ;;  %v6146_v7 = vsel %vm29221_vm2, %v21893_v14, %v21897_v9 }
 0x9b6   : > { %v6140_v27 = vsel %vm29221_vm2, %v21918_v16, %v21922_v48  ;;  %v6142_v6 = vsel %vm29221_vm2, %v21923_v44, %v21887_v61  ;;  %v6141_v52 = vsel %vm29221_vm2, %v21912_v59, %v21923_v44  ;;  %v224_v16 = vand.u32 15, %v24649_v63 }
 0x9b7   : > { %22180 = vrot.lane.b32.xlu1 %v24560_v33, %s22955_s22  ;;  %v6132_v1 = vpop.permute.xlu0 %6131  ;;  %v20876_v29 = vpack.c.bf16 %v6140_v27, %v6138_v17  ;;  %v20880_v33 = vpack.c.bf16 %v6144_v58, %v6142_v6  ;;  %v21928_v55 = vunpack.i.h.bf16 %v24644_v62  ;;  %v6143_v28 = vsel %vm29221_vm2, %v21912_v59, %v21888_v25 }
 0x9b8   : > { %v6148_v54 = vsel %vm29221_vm2, %v21898_v47, %v6132_v1  ;;  %v21927_v26 = vunpack.i.l.bf16 %v24644_v62  ;;  %v20882_v48 = vpack.c.bf16 %v6143_v28, %v6141_v52  ;;  %v6145_v46 = vsel %vm29221_vm2, %v21912_v59, %v21893_v14  ;;  %v17631_v1 = vld [vmem:[%s29158_s1 + $0x9c8] sm:$0xff] }
 0x9b9   : > { %v24663_v24 = vpop.permute.xlu1 %21935  ;;  %22185 = vrot.lane.b32.xlu0 %v24556_v32, %s22955_s22  ;;  %20877 = vmatprep.subr.bf16.mxu0 %v20876_v29  ;;  %v223_v32 = vand.u32 15, %v24634_v23  ;;  %v20884_v35 = vpack.c.bf16 %v6148_v54, %v6146_v7  ;;  %vm226_vm5 = vcmp.ge.s32.totalorder %v224_v16, 1  ;;  %v17466_v7 = vld [vmem:[%s29158_s1 + $0x7c0] sm:$0xff]  ;;  %vm228_vm10 = vcmp.le.s32.totalorder %v224_v16, 14 }
 0x9ba   : > { %20879 = vmatpush1.bf16.msra.mxu0 %v20878_v2  ;;  %v24685_v25 = vunpack.i.l.bf16 %v24663_v24  ;;  %vm24702_vm7 = vmpackc.low %vm226_vm5, %vm226_vm5  ;;  %v21938_v6 = vunpack.i.h.bf16 %v24663_v24  ;;  %v17574_v29 = vld [vmem:[%s29158_s1 + $0x900] sm:$0xff]  ;;  %vm7488_vm5 = vcmask 908288  }
 0x9bb   : > { %22195 = vrot.lane.b32.xlu1 %v24490_v18, %s22955_s22  ;;  %v21931_v10 = vpop.permute.xlu0 %21930  ;;  %20881 = vmatprep.subr.bf16.mxu0 %v20880_v33  ;;  %v6147_v18 = vsel %vm29221_vm2, %v21912_v59, %v21898_v47  ;;  %vm24692_vm6 = vcmp.ge.s32.totalorder %v223_v32, 1  ;;  %v6042_v59 = vsel %vm6040_vm4, %v21927_v26, %v21928_v55  ;;  %v17630_v33 = vld [vmem:[%s29158_s1 + $0x9c0] sm:$0xff]  ;;  %vm24791_vm11 = vmpackc.low %vm228_vm10, %vm228_vm10  ;;  %vm227_vm12 = vcmp.le.s32.totalorder %v223_v32, 14 }
 0x9bc   : > { %v21933_v45 = vunpack.i.h.bf16 %v21931_v10  ;;  %v21932_v44 = vunpack.i.l.bf16 %v21931_v10  ;;  %v20886_v53 = vpack.c.bf16 %v6147_v18, %v6145_v46  ;;  %v6041_v58 = vsel %vm6040_vm4, %v24685_v25, %v21927_v26  ;;  %vm24724_vm8 = vmpackc.low %vm24692_vm6, %vm24692_vm6 }
 0x9bd   : > { %v24676_v61 = vpop.permute.xlu1 %21950  ;;  %22190 = vrot.lane.b32.xlu0 %v24469_v57, %s22955_s22  ;;  %v17632_v57 = vld [vmem:[%s29158_s1 + $0x9d0] sm:$0xff]  ;;  %vm24810_vm13 = vmpackc.low %vm227_vm12, %vm227_vm12 }
 0x9be   : > { %v6044_v62 = vsel %vm6040_vm4, %v21932_v44, %v21933_v45  ;;  %20883 = vmatpush1.bf16.msra.mxu0 %v20882_v48  ;;  %v6043_v17 = vsel %vm6040_vm4, %v24685_v25, %v21932_v44  ;;  %v21952_v54 = vunpack.i.l.bf16 %v24676_v61  ;;  %v17633_v48 = vld [vmem:[%s29158_s1 + $0x9d8] sm:$0xff] }
 0x9bf   : > { %7484 = vrot.lane.b32.xlu1 %v24486_v5, %s22955_s22  ;;  %v21941_v9 = vpop.permute.xlu0 %21940  ;;  %20885 = vmatprep.subr.bf16.mxu0 %v20884_v35  ;;  %v20888_v2 = vpack.c.bf16 %v6044_v62, %v6042_v59  ;;  %v20891_v24 = vpack.c.bf16 %v6043_v17, %v6041_v58  ;;  %v17467_v59 = vld [vmem:[%s29158_s1 + $0x7c8] sm:$0xff]  ;;  %v6045_v17 = vsel %vm6040_vm4, %v24685_v25, %v21938_v6 }
 0x9c0   : > { %v21942_v27 = vunpack.i.l.bf16 %v21941_v9  ;;  %v21943_v14 = vunpack.i.h.bf16 %v21941_v9  ;;  %v18547_v58 = vld [vmem:[%s29159_s2 + $0x128] sm:$0xff] }
 0x9c1   : > { %v21961_v47 = vpop.permute.xlu1 %21960  ;;  %22200 = vrot.lane.b32.xlu0 %v24503_v41, %s22955_s22 }
 0x9c2   : > { %v21962_v52 = vunpack.i.l.bf16 %v21961_v47  ;;  %20887 = vmatpush1.bf16.msra.mxu0 %v20886_v53  ;;  %v6046_v55 = vsel %vm6040_vm4, %v21938_v6, %v21942_v27  ;;  %v21963_v28 = vunpack.i.h.bf16 %v21961_v47  ;;  %v6047_v35 = vsel %vm6040_vm4, %v24685_v25, %v21943_v14 }
 0x9c3   : > { %7663 = vperm.xlu1 %21883, %v17631_v1   ;;  %v21946_v41 = vpop.permute.xlu0 %21945  ;;  %20890 = vmatprep.subr.msk.bf16.mxu0 %vm24702_vm7, %v20888_v2  ;;  %v21953_v27 = vunpack.i.h.bf16 %v24676_v61  ;;  %v20897_v1 = vpack.c.bf16 %v6047_v35, %v6045_v17 }
 0x9c4   : > { %v6048_v26 = vsel %vm6040_vm4, %v21943_v14, %v21962_v52  ;;  %v21948_v45 = vunpack.i.h.bf16 %v21946_v41  ;;  %v21947_v44 = vunpack.i.l.bf16 %v21946_v41  ;;  %v6049_v6 = vsel %vm6040_vm4, %v24685_v25, %v21963_v28 }
 0x9c5   : > { %v6039_v46 = vpop.permute.xlu1 %6038  ;;  %7658 = vperm.xlu0 %21882, %v17630_v33   ;;  %17470 = vmatmul.mubr.msk.f32.vlgmr.msra.gmra.mrb[74].mxu0 %vm269_vm1, %v17466_v7  ;;  %v20894_v18 = vpack.c.bf16 %v6048_v26, %v6046_v55 }
 0x9c6   : > { %v6052_v62 = vsel %vm6040_vm4, %v21948_v45, %v21952_v54  ;;  %v6050_v9 = vsel %vm6040_vm4, %v21963_v28, %v21947_v44  ;;  %20893 = vmatpush1.bf16.msk.msra.mxu0 %vm24724_vm8, %v20891_v24  ;;  %6247 = vmatprep.mubr.f32.mxu0 %v29248_v51  ;;  %v6051_v14 = vsel %vm6040_vm4, %v24685_v25, %v21948_v45  ;;  %v18546_v24 = vld [vmem:[%s29159_s2 + $0x120] sm:$0xff]  ;;  %v17468_v54 = vld [vmem:[%s29158_s1 + $0x7d0] sm:$0xff] }
 0x9c7   : > { %7673 = vperm.xlu1 %21883, %v17633_v48   ;;  %v21956_v53 = vpop.permute.xlu0 %21955  ;;  %20896 = vmatprep.subr.msk.bf16.mxu0 %vm24702_vm7, %v20894_v18  ;;  %v20900_v61 = vpack.c.bf16 %v6052_v62, %v6050_v9  ;;  %v20903_v55 = vpack.c.bf16 %v6051_v14, %v6049_v6  ;;  %v17469_v62 = vld [vmem:[%s29158_s1 + $0x7d8] sm:$0xff]  ;;  %v6053_v9 = vsel %vm6040_vm4, %v24685_v25, %v21953_v27 }
 0x9c8   : > { %v21958_v47 = vunpack.i.h.bf16 %v21956_v53  ;;  %v21957_v2 = vunpack.i.l.bf16 %v21956_v53  ;;  %v17607_v53 = vld [vmem:[%s29158_s1 + $0x988] sm:$0xff] }
 0x9c9   : > { %v21971_v52 = vpop.permute.xlu1 %21970  ;;  %7668 = vperm.xlu0 %21882, %v17632_v57   ;;  %17471 = vmatmul.mubr.msk.f32.gmra.mrb[84].mxu0 %vm269_vm1, %v17467_v59 }
 0x9ca   : > { %v6056_v33 = vsel %vm6040_vm4, %v21958_v47, %v6039_v46  ;;  %v6054_v7 = vsel %vm6040_vm4, %v21953_v27, %v21957_v2  ;;  %20899 = vmatpush1.bf16.msk.msra.mxu0 %vm24724_vm8, %v20897_v1  ;;  %6253 = vmatprep.mubr.f32.mxu0 %v29248_v51  ;;  %v21973_v28 = vunpack.i.h.bf16 %v21971_v52  ;;  %v21972_v26 = vunpack.i.l.bf16 %v21971_v52  ;;  %v17462_v27 = vld [vmem:[%s29158_s1 + $0x780] sm:$0xff]  ;;  %v17608_v52 = vld [vmem:[%s29158_s1 + $0x990] sm:$0xff] }
 0x9cb   : > { %11849 = vperm.xlu1 %21883, %v18547_v58   ;;  %v21966_v41 = vpop.permute.xlu0 %21965  ;;  %20902 = vmatprep.subr.msk.bf16.mxu0 %vm24702_vm7, %v20900_v61  ;;  %v6055_v48 = vsel %vm6040_vm4, %v24685_v25, %v21958_v47  ;;  %v20906_v46 = vpack.c.bf16 %v6056_v33, %v6054_v7  ;;  %vm7312_vm4 = vcmask 916480  }
 0x9cc   : > { %v21968_v45 = vunpack.i.h.bf16 %v21966_v41  ;;  %v21967_v44 = vunpack.i.l.bf16 %v21966_v41  ;;  %v20909_v59 = vpack.c.bf16 %v6055_v48, %v6053_v9  ;;  %v6409_v16 = vsel %vm6405_vm9, %v21972_v26, %v21973_v28 }
 0x9cd   : > { %v21981_v35 = vpop.permute.xlu1 %21980  ;;  %11844 = vperm.xlu0 %21882, %v18546_v24   ;;  %17472 = vmatmul.mubr.msk.f32.gmra.mrb[86].mxu0 %vm269_vm1, %v17468_v54 }
 0x9ce   : > { %v6407_v18 = vsel %vm6405_vm9, %v21967_v44, %v21968_v45  ;;  %20905 = vmatpush1.bf16.msk.msra.mxu0 %vm24724_vm8, %v20903_v55  ;;  %6259 = vmatprep.mubr.f32.mxu0 %v29248_v51  ;;  %v21983_v47 = vunpack.i.h.bf16 %v21981_v35  ;;  %v21982_v61 = vunpack.i.l.bf16 %v21981_v35 }
 0x9cf   : > { %v21976_v57 = vpop.permute.xlu0 %21975  ;;  %20908 = vmatprep.subr.msk.bf16.mxu0 %vm24702_vm7, %v20906_v46  ;;  %v20912_v25 = vpack.c.bf16 %v6409_v16, %v6407_v18 }
 0x9d0   : > { %v24789_v17 = vunpack.i.l.bf16 %v21976_v57  ;;  %v21978_v1 = vunpack.i.h.bf16 %v21976_v57 }
 0x9d1   : > { %v21986_v14 = vpop.permute.xlu1 %21985  ;;  %17473 = vmatmul.mubr.msk.f32.gmra.mrb[88].mxu0 %vm269_vm1, %v17469_v62 }
 0x9d2   : > { %20911 = vmatpush1.bf16.msk.msra.mxu0 %vm24724_vm8, %v20909_v59  ;;  %6342 = vmatprep.mubr.f32.mxu0 %v29248_v51  ;;  %v6406_v32 = vsel %vm6405_vm9, %v24789_v17, %v21967_v44  ;;  %v6408_v58 = vsel %vm6405_vm9, %v24789_v17, %v21972_v26  ;;  %v6410_v7 = vsel %vm6405_vm9, %v24789_v17, %v21978_v1  ;;  %v17463_v26 = vld [vmem:[%s29158_s1 + $0x788] sm:$0xff]  ;;  %v21988_v45 = vunpack.i.h.bf16 %v21986_v14 }
 0x9d3   : > { %v21991_v2 = vpop.permute.xlu0 %21990  ;;  %20914 = vmatprep.subr.msk.bf16.mxu0 %vm24791_vm11, %v20912_v25  ;;  %v20915_v33 = vpack.c.bf16 %v6408_v58, %v6406_v32  ;;  %v6412_v24 = vsel %vm6405_vm9, %v24789_v17, %v21983_v47  ;;  %v6411_v41 = vsel %vm6405_vm9, %v21978_v1, %v21982_v61  ;;  %v21987_v46 = vunpack.i.l.bf16 %v21986_v14  ;;  %v17464_v14 = vld [vmem:[%s29158_s1 + $0x790] sm:$0xff] }
 0x9d4   : > { %v21992_v6 = vunpack.i.l.bf16 %v21991_v2  ;;  %v21993_v54 = vunpack.i.h.bf16 %v21991_v2  ;;  %v20921_v35 = vpack.c.bf16 %v6412_v24, %v6410_v7 }
 0x9d5   : > { %v22001_v55 = vpop.permute.xlu1 %22000  ;;  %17490 = vmatmul.mubr.msk.f32.vlgmr.msra.gmra.mrb[74].mxu0 %vm269_vm1, %v17462_v27  ;;  %v6416_v27 = vsel %vm6405_vm9, %v24789_v17, %v21988_v45 }
 0x9d6   : > { %v6413_v28 = vsel %vm6405_vm9, %v21983_v47, %v21992_v6  ;;  %20917 = vmatpush1.bf16.msk.msra.mxu0 %vm24810_vm13, %v20915_v33  ;;  %6348 = vmatprep.mubr.f32.mxu0 %v29248_v51  ;;  %v6414_v9 = vsel %vm6405_vm9, %v24789_v17, %v21993_v54  ;;  %v6415_v59 = vsel %vm6405_vm9, %v21993_v54, %v21987_v46  ;;  %v22003_v16 = vunpack.i.h.bf16 %v22001_v55 }
 0x9d7   : > { %v21996_v44 = vpop.permute.xlu0 %21995  ;;  %v20918_v48 = vpack.c.bf16 %v6413_v28, %v6411_v41  ;;  %v22002_v1 = vunpack.i.l.bf16 %v22001_v55  ;;  %v20927_v32 = vpack.c.bf16 %v6416_v27, %v6414_v9  ;;  %v17465_v41 = vld [vmem:[%s29158_s1 + $0x798] sm:$0xff] }
 0x9d8   : > { %v21998_v18 = vunpack.i.h.bf16 %v21996_v44  ;;  %v21997_v62 = vunpack.i.l.bf16 %v21996_v44  ;;  %v6420_v28 = vsel %vm6405_vm9, %v24789_v17, %v22003_v16 }
 0x9d9   : > { %v22006_v57 = vpop.permute.xlu1 %22005  ;;  %17491 = vmatmul.mubr.msk.f32.gmra.mrb[84].mxu0 %vm269_vm1, %v17463_v26  ;;  %20920 = vmatprep.subr.msk.bf16.mxu0 %vm24791_vm11, %v20918_v48 }
 0x9da   : > { %v6417_v25 = vsel %vm6405_vm9, %v21988_v45, %v21997_v62  ;;  %20923 = vmatpush1.bf16.msk.msra.mxu0 %vm24810_vm13, %v20921_v35  ;;  %6354 = vmatprep.mubr.f32.mxu0 %v29248_v51  ;;  %v6419_v58 = vsel %vm6405_vm9, %v21998_v18, %v22002_v1  ;;  %v6418_v6 = vsel %vm6405_vm9, %v24789_v17, %v21998_v18  ;;  %v22008_v33 = vunpack.i.h.bf16 %v22006_v57 }
 0x9db   : > { %v6404_v47 = vpop.permute.xlu0 %6403  ;;  %v20924_v2 = vpack.c.bf16 %v6417_v25, %v6415_v59  ;;  %v22007_v7 = vunpack.i.l.bf16 %v22006_v57  ;;  %v20933_v45 = vpack.c.bf16 %v6420_v28, %v6418_v6  ;;  %v17494_v57 = vld [vmem:[%s29158_s1 + $0x800] sm:$0xff] }
 0x9dc   : > { %v6421_v61 = vsel %vm6405_vm9, %v22003_v16, %v6404_v47 }
 0x9dd   : > { %v20930_v24 = vpack.c.bf16 %v6421_v61, %v6419_v58  ;;  %v22016_v54 = vpop.permute.xlu1 %22015  ;;  %17492 = vmatmul.mubr.msk.f32.gmra.mrb[86].mxu0 %vm269_vm1, %v17464_v14  ;;  %20926 = vmatprep.subr.msk.bf16.mxu0 %vm24791_vm11, %v20924_v2  ;;  %v6604_v35 = vsel %vm29225_vm14, %v22007_v7, %v22008_v33  ;;  %v17495_v33 = vld [vmem:[%s29158_s1 + $0x808] sm:$0xff] }
 0x9de   : > { %v24849_v55 = vunpack.i.l.bf16 %v22016_v54  ;;  %20929 = vmatpush1.bf16.msk.msra.mxu0 %vm24810_vm13, %v20927_v32  ;;  %6360 = vmatprep.mubr.f32.mxu0 %v29248_v51  ;;  %v22018_v46 = vunpack.i.h.bf16 %v22016_v54 }
 0x9df   : > { %v22011_v26 = vpop.permute.xlu0 %22010  ;;  %20932 = vmatprep.subr.msk.bf16.mxu0 %vm24791_vm11, %v20930_v24 }
 0x9e0   : > { %29262 = vst [vmem:[#allocation4_spill] sm:$0xff] %v24849_v55  ;;  %v22013_v44 = vunpack.i.h.bf16 %v22011_v26  ;;  %v22012_v48 = vunpack.i.l.bf16 %v22011_v26  ;;  %v6603_v62 = vsel %vm29225_vm14, %v24849_v55, %v22007_v7  ;;  %v6607_v47 = vsel %vm29225_vm14, %v24849_v55, %v22018_v46 }
 0x9e1   : > { %v22031_v18 = vpop.permute.xlu1 %22030  ;;  %17493 = vmatmul.mubr.msk.f32.gmra.mrb[88].mxu0 %vm269_vm1, %v17465_v41 }
 0x9e2   : > { %v6605_v9 = vsel %vm29225_vm14, %v24849_v55, %v22012_v48  ;;  %v6606_v17 = vsel %vm29225_vm14, %v22012_v48, %v22013_v44  ;;  %20935 = vmatpush1.bf16.msk.msra.mxu0 %vm24810_vm13, %v20933_v45  ;;  %6535 = vmatprep.mubr.f32.mxu0 %v29248_v51  ;;  %v22032_v25 = vunpack.i.l.bf16 %v22031_v18  ;;  %v22033_v2 = vunpack.i.h.bf16 %v22031_v18 }
 0x9e3   : > { %v20939_v59 = vpack.c.bf16 %v6605_v9, %v6603_v62  ;;  %v22021_v16 = vpop.permute.xlu0 %22020  ;;  %v20936_v1 = vpack.c.bf16 %v6606_v17, %v6604_v35  ;;  %v17496_v62 = vld [vmem:[%s29158_s1 + $0x810] sm:$0xff] }
 0x9e4   : > { %v22023_v14 = vunpack.i.h.bf16 %v22021_v16  ;;  %v22022_v27 = vunpack.i.l.bf16 %v22021_v16  ;;  %v6611_v45 = vsel %vm29225_vm14, %v24849_v55, %v22033_v2 }
 0x9e5   : > { %v22036_v32 = vpop.permute.xlu1 %22035  ;;  %17514 = vmatmul.mubr.msk.f32.vlgmr.msra.gmra.mrb[74].mxu0 %vm269_vm1, %v17494_v57  ;;  %20938 = vmatprep.subr.msk.bf16.mxu0 %vm24702_vm7, %v20936_v1 }
 0x9e6   : > { %v6609_v58 = vsel %vm29225_vm14, %v24849_v55, %v22023_v14  ;;  %v6610_v61 = vsel %vm29225_vm14, %v22023_v14, %v22032_v25  ;;  %v6608_v6 = vsel %vm29225_vm14, %v22018_v46, %v22022_v27  ;;  %20941 = vmatpush1.bf16.msk.msra.mxu0 %vm24724_vm8, %v20939_v59  ;;  %6541 = vmatprep.mubr.f32.mxu0 %v29248_v51  ;;  %v22037_v41 = vunpack.i.l.bf16 %v22036_v32 }
 0x9e7   : > { %v20945_v7 = vpack.c.bf16 %v6609_v58, %v6607_v47  ;;  %v22026_v24 = vpop.permute.xlu0 %22025  ;;  %v20942_v54 = vpack.c.bf16 %v6610_v61, %v6608_v6  ;;  %v22038_v44 = vunpack.i.h.bf16 %v22036_v32 }
 0x9e8   : > { %v22028_v28 = vunpack.i.h.bf16 %v22026_v24  ;;  %v22027_v26 = vunpack.i.l.bf16 %v22026_v24 }
 0x9e9   : > { %v6601_v48 = vpop.permute.xlu1 %6600  ;;  %17515 = vmatmul.mubr.msk.f32.gmra.mrb[84].mxu0 %vm269_vm1, %v17495_v33  ;;  %20944 = vmatprep.subr.msk.bf16.mxu0 %vm24702_vm7, %v20942_v54  ;;  %v6615_v1 = vsel %vm29225_vm14, %v24849_v55, %v22038_v44  ;;  %v17518_v33 = vld [vmem:[%s29158_s1 + $0x840] sm:$0xff]  ;;  %v17519_v54 = vld [vmem:[%s29158_s1 + $0x848] sm:$0xff] }
 0x9ea   : > { %v6613_v35 = vsel %vm29225_vm14, %v24849_v55, %v22028_v28  ;;  %v6614_v46 = vsel %vm29225_vm14, %v22028_v28, %v22037_v41  ;;  %v6612_v18 = vsel %vm29225_vm14, %v22033_v2, %v22027_v26  ;;  %20947 = vmatpush1.bf16.msk.msra.mxu0 %vm24724_vm8, %v20945_v7  ;;  %6547 = vmatprep.mubr.f32.mxu0 %v29248_v51  ;;  %v17497_v2 = vld [vmem:[%s29158_s1 + $0x818] sm:$0xff] }
 0x9eb   : > { %v20951_v9 = vpack.c.bf16 %v6613_v35, %v6611_v45  ;;  %v22041_v17 = vpop.permute.xlu0 %22040  ;;  %v20948_v57 = vpack.c.bf16 %v6614_v46, %v6612_v18 }
 0x9ec   : > { %v22043_v59 = vunpack.i.h.bf16 %v22041_v17  ;;  %v22042_v16 = vunpack.i.l.bf16 %v22041_v17  ;;  %v17543_v17 = vld [vmem:[%s29158_s1 + $0x888] sm:$0xff] }
 0x9ed   : > { %v24906_v25 = vpop.permute.xlu1 %22050  ;;  %17516 = vmatmul.mubr.msk.f32.gmra.mrb[86].mxu0 %vm269_vm1, %v17496_v62  ;;  %20950 = vmatprep.subr.msk.bf16.mxu0 %vm24702_vm7, %v20948_v57 }
 0x9ee   : > { %v6617_v14 = vsel %vm29225_vm14, %v24849_v55, %v22043_v59  ;;  %v6618_v27 = vsel %vm29225_vm14, %v22043_v59, %v6601_v48  ;;  %v6616_v47 = vsel %vm29225_vm14, %v22038_v44, %v22042_v16  ;;  %20953 = vmatpush1.bf16.msk.msra.mxu0 %vm24724_vm8, %v20951_v9  ;;  %6553 = vmatprep.mubr.f32.mxu0 %v29248_v51 }
 0x9ef   : > { %v20957_v32 = vpack.c.bf16 %v6617_v14, %v6615_v1  ;;  %v22046_v58 = vpop.permute.xlu0 %22045  ;;  %v20954_v61 = vpack.c.bf16 %v6618_v27, %v6616_v47 }
 0x9f0   : > { %v24951_v56 = vunpack.i.h.bf16 %v22046_v58  ;;  %v22047_v15 = vunpack.i.l.bf16 %v22046_v58 }
 0x9f1   : > { %v24921_v6 = vpop.permute.xlu1 %22065  ;;  %17517 = vmatmul.mubr.msk.f32.gmra.mrb[88].mxu0 %vm269_vm1, %v17497_v2  ;;  %20956 = vmatprep.subr.msk.bf16.mxu0 %vm24702_vm7, %v20954_v61  ;;  %v17544_v61 = vld [vmem:[%s29158_s1 + $0x890] sm:$0xff] }
 0x9f2   : > { %20959 = vmatpush1.bf16.msk.msra.mxu0 %vm24724_vm8, %v20957_v32  ;;  %6732 = vmatprep.mubr.f32.mxu0 %v29248_v51  ;;  %29263 = vst [vmem:[#allocation5_spill] sm:$0xff] %v24951_v56  ;;  %v6915_v4 = vsel %vm29222_vm15, %v22047_v15, %v24951_v56  ;;  %v22067_v48 = vunpack.i.l.bf16 %v24921_v6  ;;  %v22068_v14 = vunpack.i.h.bf16 %v24921_v6 }
 0x9f3   : > { %v22056_v7 = vpop.permute.xlu0 %22055  ;;  %20961 = vmatprep.subr.bf16.mxu0 %v20960_v20 }
 0x9f4   : > { %v22057_v37 = vunpack.i.l.bf16 %v22056_v7  ;;  %v6925_v16 = vsel %vm29222_vm15, %v22067_v48, %v24951_v56 }
 0x9f5   : > { %v22076_v24 = vpop.permute.xlu1 %22075  ;;  %17538 = vmatmul.mubr.msk.f32.vlgmr.msra.gmra.mrb[74].mxu0 %vm269_vm1, %v17518_v33 }
 0x9f6   : > { %20963 = vmatpush1.bf16.msra.mxu0 %v20962_v3  ;;  %6738 = vmatprep.mubr.f32.mxu0 %v29248_v51  ;;  %v22052_v3 = vunpack.i.l.bf16 %v24906_v25  ;;  %v22077_v12 = vunpack.i.l.bf16 %v22076_v24 }
 0x9f7   : > { %v24943_v41 = vpop.permute.xlu0 %22060  ;;  %20965 = vmatprep.subr.bf16.mxu0 %v20964_v38  ;;  %v22058_v38 = vunpack.i.h.bf16 %v22056_v7 }
 0x9f8   : > { %v6917_v49 = vsel %vm29222_vm15, %v22052_v3, %v24951_v56  ;;  %v6916_v30 = vsel %vm29222_vm15, %v22057_v37, %v22052_v3  ;;  %v22062_v43 = vunpack.i.l.bf16 %v24943_v41  ;;  %v6921_v26 = vsel %vm29222_vm15, %v22077_v12, %v24951_v56 }
 0x9f9   : > { %v24948_v0 = vpop.permute.xlu1 %22080  ;;  %17539 = vmatmul.mubr.msk.f32.gmra.mrb[84].mxu0 %vm269_vm1, %v17519_v54  ;;  %v20976_v28 = vpack.c.bf16 %v6917_v49, %v6915_v4  ;;  %v22063_v45 = vunpack.i.h.bf16 %v24943_v41  ;;  %v6919_v35 = vsel %vm29222_vm15, %v22058_v38, %v24951_v56 }
 0x9fa   : > { %20967 = vmatpush1.bf16.msra.mxu0 %v20966_v39  ;;  %6744 = vmatprep.mubr.f32.mxu0 %v29248_v51  ;;  %v22053_v39 = vunpack.i.h.bf16 %v24906_v25  ;;  %v6920_v5 = vsel %vm29222_vm15, %v22062_v43, %v22077_v12  ;;  %v20982_v18 = vpack.c.bf16 %v6921_v26, %v6919_v35  ;;  %v22082_v25 = vunpack.i.l.bf16 %v24948_v0 }
 0x9fb   : > { %v24960_v20 = vpop.permute.xlu0 %22070  ;;  %20969 = vmatprep.subr.bf16.mxu0 %v20968_v19  ;;  %v6923_v62 = vsel %vm29222_vm15, %v22063_v45, %v24951_v56  ;;  %v6922_v6 = vsel %vm29222_vm15, %v22068_v14, %v22063_v45 }
 0x9fc   : > { %v6914_v22 = vsel %vm29222_vm15, %v22053_v39, %v22047_v15  ;;  %v22073_v9 = vunpack.i.h.bf16 %v24960_v20  ;;  %v20988_v2 = vpack.c.bf16 %v6925_v16, %v6923_v62  ;;  %v6929_v7 = vsel %vm29222_vm15, %v22082_v25, %v24951_v56 }
 0x9fd   : > { %v24966_v34 = vpop.permute.xlu1 %22085  ;;  %17540 = vmatmul.mubr.msk.f32.gmra.mrb[86].mxu0 %vm269_vm1, %v17520_v11  ;;  %v20979_v8 = vpack.c.bf16 %v6916_v30, %v6914_v22  ;;  %v22083_v15 = vunpack.i.h.bf16 %v24948_v0  ;;  %v17545_v0 = vld [vmem:[%s29158_s1 + $0x898] sm:$0xff] }
 0x9fe   : > { %20971 = vmatpush1.bf16.msra.mxu0 %v20970_v31  ;;  %6750 = vmatprep.mubr.f32.mxu0 %v29248_v51  ;;  %v6927_v32 = vsel %vm29222_vm15, %v22073_v9, %v24951_v56  ;;  %v25046_v54 = vunpack.i.h.bf16 %v24966_v34  ;;  %v22087_v41 = vunpack.i.l.bf16 %v24966_v34 }
 0x9ff   : > { %v6910_v19 = vpop.permute.xlu0 %6909  ;;  %20973 = vmatprep.subr.bf16.mxu0 %v20972_v50  ;;  %v22078_v50 = vunpack.i.h.bf16 %v22076_v24  ;;  %v20994_v37 = vpack.c.bf16 %v6929_v7, %v6927_v32  ;;  %v6926_v34 = vsel %vm29222_vm15, %v22083_v15, %v22073_v9 }
 0xa00   : > { %v6928_v11 = vsel %vm29222_vm15, %v6910_v19, %v22082_v25  ;;  %v7112_v19 = vsel %vm7110_vm0, %v22087_v41, %v25046_v54 }
 0xa01   : > { %v24986_v31 = vpop.permute.xlu1 %22095  ;;  %17541 = vmatmul.mubr.msk.f32.gmra.mrb[88].mxu0 %vm269_vm1, %v17521_v40  ;;  %v6918_v57 = vsel %vm29222_vm15, %v22078_v50, %v22058_v38  ;;  %v20997_v38 = vpack.c.bf16 %v6928_v11, %v6926_v34 }
 0xa02   : > { %20975 = vmatpush1.bf16.msra.mxu0 %v20974_v60  ;;  %6846 = vmatprep.mubr.f32.mxu0 %v29248_v51  ;;  %v22072_v60 = vunpack.i.l.bf16 %v24960_v20  ;;  %v20985_v1 = vpack.c.bf16 %v6920_v5, %v6918_v57  ;;  %v22097_v40 = vunpack.i.l.bf16 %v24986_v31  ;;  %v22098_v39 = vunpack.i.h.bf16 %v24986_v31  ;;  %v17550_v31 = vld [vmem:[%s29158_s1 + $0x8c0] sm:$0xff] }
 0xa03   : > { %v22091_v44 = vpop.permute.xlu0 %22090  ;;  %20978 = vmatprep.subr.msk.bf16.mxu0 %vm24791_vm11, %v20976_v28 }
 0xa04   : > { %v6924_v27 = vsel %vm29222_vm15, %v22072_v60, %v22067_v48  ;;  %v22092_v58 = vunpack.i.l.bf16 %v22091_v44  ;;  %v22093_v20 = vunpack.i.h.bf16 %v22091_v44  ;;  %v7116_v48 = vsel %vm7110_vm0, %v22098_v39, %v25046_v54 }
 0xa05   : > { %v25007_v46 = vpop.permute.xlu1 %22100  ;;  %17546 = vmatmul.mubr.msk.f32.vlgmr.msra.gmra.mrb[74].mxu0 %vm269_vm1, %v17542_v21  ;;  %v20991_v24 = vpack.c.bf16 %v6924_v27, %v6922_v6 }
 0xa06   : > { %20981 = vmatpush1.bf16.msk.msra.mxu0 %vm24810_vm13, %v20979_v8  ;;  %6852 = vmatprep.mubr.f32.mxu0 %v29248_v51  ;;  %v7114_v4 = vsel %vm7110_vm0, %v22092_v58, %v25046_v54  ;;  %v7111_v30 = vsel %vm7110_vm0, %v22093_v20, %v22087_v41  ;;  %v7113_v43 = vsel %vm7110_vm0, %v22097_v40, %v22092_v58  ;;  %v22102_v50 = vunpack.i.l.bf16 %v25007_v46 }
 0xa07   : > { %v25020_v59 = vpop.permute.xlu0 %22105  ;;  %20984 = vmatprep.subr.msk.bf16.mxu0 %vm24791_vm11, %v20982_v18  ;;  %v21000_v45 = vpack.c.bf16 %v7114_v4, %v7112_v19  ;;  %v21003_v35 = vpack.c.bf16 %v7113_v43, %v7111_v30  ;;  %v22103_v8 = vunpack.i.h.bf16 %v25007_v46  ;;  %v17551_v46 = vld [vmem:[%s29158_s1 + $0x8c8] sm:$0xff] }
 0xa08   : > { %v22107_v21 = vunpack.i.l.bf16 %v25020_v59  ;;  %v22108_v16 = vunpack.i.h.bf16 %v25020_v59 }
 0xa09   : > { %v25029_v47 = vpop.permute.xlu1 %22110  ;;  %17547 = vmatmul.mubr.msk.f32.gmra.mrb[84].mxu0 %vm269_vm1, %v17543_v17  ;;  %v7120_v25 = vsel %vm7110_vm0, %v22103_v8, %v25046_v54 }
 0xa0a   : > { %20987 = vmatpush1.bf16.msk.msra.mxu0 %vm24810_vm13, %v20985_v1  ;;  %6858 = vmatprep.mubr.f32.mxu0 %v29248_v51  ;;  %v22112_v5 = vunpack.i.l.bf16 %v25029_v47  ;;  %v7122_v17 = vsel %vm7110_vm0, %v22107_v21, %v25046_v54  ;;  %v22113_v14 = vunpack.i.h.bf16 %v25029_v47  ;;  %v17552_v47 = vld [vmem:[%s29158_s1 + $0x8d0] sm:$0xff]  ;;  %v7119_v7 = vsel %vm7110_vm0, %v22108_v16, %v22103_v8 }
 0xa0b   : > { %v22116_v33 = vpop.permute.xlu0 %22115  ;;  %20990 = vmatprep.subr.msk.bf16.mxu0 %vm24791_vm11, %v20988_v2 }
 0xa0c   : > { %v22117_v12 = vunpack.i.l.bf16 %v22116_v33  ;;  %v22118_v28 = vunpack.i.h.bf16 %v22116_v33  ;;  %v7121_v2 = vsel %vm7110_vm0, %v22112_v5, %v22107_v21  ;;  %v7124_v41 = vsel %vm7110_vm0, %v22113_v14, %v25046_v54 }
 0xa0d   : > { %v25051_v3 = vpop.permute.xlu1 %7106  ;;  %17548 = vmatmul.mubr.msk.f32.gmra.mrb[86].mxu0 %vm269_vm1, %v17544_v61  ;;  %v21012_v61 = vpack.c.bf16 %v7122_v17, %v7120_v25  ;;  %v21015_v15 = vpack.c.bf16 %v7121_v2, %v7119_v7 }
 0xa0e   : > { %20993 = vmatpush1.bf16.msk.msra.mxu0 %vm24810_vm13, %v20991_v24  ;;  %6864 = vmatprep.mubr.f32.mxu0 %v29248_v51  ;;  %v7118_v22 = vsel %vm7110_vm0, %v22117_v12, %v25046_v54  ;;  %v7115_v60 = vsel %vm7110_vm0, %v22118_v28, %v22098_v39  ;;  %v7117_v18 = vsel %vm7110_vm0, %v22102_v50, %v22117_v12 }
 0xa0f   : > { %v22121_v49 = vpop.permute.xlu0 %22120  ;;  %20996 = vmatprep.subr.msk.bf16.mxu0 %vm24791_vm11, %v20994_v37  ;;  %v21006_v9 = vpack.c.bf16 %v7118_v22, %v7116_v48  ;;  %v21009_v27 = vpack.c.bf16 %v7117_v18, %v7115_v60  ;;  %v17575_v18 = vld [vmem:[%s29158_s1 + $0x908] sm:$0xff] }
 0xa10   : > { %v22122_v57 = vunpack.i.l.bf16 %v22121_v49  ;;  %v22123_v32 = vunpack.i.h.bf16 %v22121_v49 }
 0xa11   : > { %v25071_v26 = vpop.permute.xlu1 %22130  ;;  %17549 = vmatmul.mubr.msk.f32.gmra.mrb[88].mxu0 %vm269_vm1, %v17545_v0 }
 0xa12   : > { %20999 = vmatpush1.bf16.msk.msra.mxu0 %vm24810_vm13, %v20997_v38  ;;  %7043 = vmatprep.mubr.f32.mxu0 %v29248_v51  ;;  %v7126_v59 = vsel %vm7110_vm0, %v22122_v57, %v25046_v54  ;;  %v22132_v11 = vunpack.i.l.bf16 %v25071_v26  ;;  %v7123_v20 = vsel %vm7110_vm0, %v22123_v32, %v22113_v14  ;;  %v7125_v37 = vsel %vm7110_vm0, %v25051_v3, %v22122_v57  ;;  %v17553_v54 = vld [vmem:[%s29158_s1 + $0x8d8] sm:$0xff]  ;;  %v17576_v32 = vld [vmem:[%s29158_s1 + $0x910] sm:$0xff] }
 0xa13   : > { %v25084_v44 = vpop.permute.xlu0 %22125  ;;  %21002 = vmatprep.subr.msk.bf16.mxu0 %vm24702_vm7, %v21000_v45  ;;  %v21018_v0 = vpack.c.bf16 %v7126_v59, %v7124_v41  ;;  %v21021_v19 = vpack.c.bf16 %v7125_v37, %v7123_v20  ;;  %v22133_v39 = vunpack.i.h.bf16 %v25071_v26 }
 0xa14   : > { %v25120_v6 = vunpack.i.h.bf16 %v25084_v44  ;;  %v22127_v33 = vunpack.i.l.bf16 %v25084_v44 }
 0xa15   : > { %v25094_v62 = vpop.permute.xlu1 %22145  ;;  %17570 = vmatmul.mubr.msk.f32.vlgmr.msra.gmra.mrb[74].mxu0 %vm269_vm1, %v17550_v31 }
 0xa16   : > { %21005 = vmatpush1.bf16.msk.msra.mxu0 %vm24724_vm8, %v21003_v35  ;;  %7049 = vmatprep.mubr.f32.mxu0 %v29248_v51  ;;  %v7314_v3 = vsel %vm7312_vm4, %v22127_v33, %v25120_v6  ;;  %v7316_v40 = vsel %vm7312_vm4, %v22132_v11, %v25120_v6  ;;  %v22147_v38 = vunpack.i.l.bf16 %v25094_v62  ;;  %v7313_v22 = vsel %vm7312_vm4, %v22133_v39, %v22127_v33 }
 0xa17   : > { %v25106_v1 = vpop.permute.xlu0 %22135  ;;  %21008 = vmatprep.subr.msk.bf16.mxu0 %vm24702_vm7, %v21006_v9  ;;  %v21024_v28 = vpack.c.bf16 %v7316_v40, %v7314_v3  ;;  %v22148_v48 = vunpack.i.h.bf16 %v25094_v62 }
 0xa18   : > { %v22137_v4 = vunpack.i.l.bf16 %v25106_v1  ;;  %v22138_v34 = vunpack.i.h.bf16 %v25106_v1  ;;  %v7320_v10 = vsel %vm7312_vm4, %v22147_v38, %v25120_v6 }
 0xa19   : > { %v25114_v58 = vpop.permute.xlu1 %22150  ;;  %17571 = vmatmul.mubr.msk.f32.gmra.mrb[84].mxu0 %vm269_vm1, %v17551_v46 }
 0xa1a   : > { %21011 = vmatpush1.bf16.msk.msra.mxu0 %vm24724_vm8, %v21009_v27  ;;  %7055 = vmatprep.mubr.f32.mxu0 %v29248_v51  ;;  %v7315_v30 = vsel %vm7312_vm4, %v22137_v4, %v22132_v11  ;;  %v7318_v26 = vsel %vm7312_vm4, %v22138_v34, %v25120_v6  ;;  %v22152_v50 = vunpack.i.l.bf16 %v25114_v58  ;;  %v7317_v62 = vsel %vm7312_vm4, %v22148_v48, %v22138_v34 }
 0xa1b   : > { %v25130_v24 = vpop.permute.xlu0 %22140  ;;  %21014 = vmatprep.subr.msk.bf16.mxu0 %vm24702_vm7, %v21012_v61  ;;  %v21026_v44 = vpack.c.bf16 %v7315_v30, %v7313_v22  ;;  %v21028_v5 = vpack.c.bf16 %v7320_v10, %v7318_v26  ;;  %v22153_v25 = vunpack.i.h.bf16 %v25114_v58 }
 0xa1c   : > { %v22142_v43 = vunpack.i.l.bf16 %v25130_v24  ;;  %v22143_v45 = vunpack.i.h.bf16 %v25130_v24  ;;  %v7324_v1 = vsel %vm7312_vm4, %v22152_v50, %v25120_v6 }
 0xa1d   : > { %v25141_v12 = vpop.permute.xlu1 %22160  ;;  %17572 = vmatmul.mubr.msk.f32.gmra.mrb[86].mxu0 %vm269_vm1, %v17552_v47 }
 0xa1e   : > { %21017 = vmatpush1.bf16.msk.msra.mxu0 %vm24724_vm8, %v21015_v15  ;;  %7061 = vmatprep.mubr.f32.mxu0 %v29248_v51  ;;  %v7319_v35 = vsel %vm7312_vm4, %v22142_v43, %v22147_v38  ;;  %v7322_v9 = vsel %vm7312_vm4, %v22143_v45, %v25120_v6  ;;  %v22162_v57 = vunpack.i.l.bf16 %v25141_v12  ;;  %v7321_v59 = vsel %vm7312_vm4, %v22153_v25, %v22143_v45  ;;  %v17598_v45 = vld [vmem:[%s29158_s1 + $0x940] sm:$0xff] }
 0xa1f   : > { %v25155_v49 = vpop.permute.xlu0 %22155  ;;  %21020 = vmatprep.subr.msk.bf16.mxu0 %vm24702_vm7, %v21018_v0  ;;  %v21030_v16 = vpack.c.bf16 %v7319_v35, %v7317_v62  ;;  %v21032_v27 = vpack.c.bf16 %v7324_v1, %v7322_v9  ;;  %v22163_v41 = vunpack.i.h.bf16 %v25141_v12 }
 0xa20   : > { %v22157_v8 = vunpack.i.l.bf16 %v25155_v49  ;;  %v22158_v60 = vunpack.i.h.bf16 %v25155_v49  ;;  %v7328_v24 = vsel %vm7312_vm4, %v22162_v57, %v25120_v6 }
 0xa21   : > { %17573 = vmatmul.mubr.msk.f32.gmra.mrb[88].mxu0 %vm269_vm1, %v17553_v54  ;;  %v25165_v21 = vpop.permute.xlu1 %22165 }
 0xa22   : > { %21023 = vmatpush1.bf16.msk.msra.mxu0 %vm24724_vm8, %v21021_v19  ;;  %7240 = vmatprep.mubr.f32.mxu0 %v29248_v51  ;;  %v7323_v14 = vsel %vm7312_vm4, %v22157_v8, %v22152_v50  ;;  %v7326_v61 = vsel %vm7312_vm4, %v22158_v60, %v25120_v6  ;;  %v25205_v33 = vunpack.i.h.bf16 %v25165_v21  ;;  %v22167_v47 = vunpack.i.l.bf16 %v25165_v21  ;;  %v17577_v6 = vld [vmem:[%s29158_s1 + $0x918] sm:$0xff] }
 0xa23   : > { %v7309_v31 = vpop.permute.xlu0 %7308  ;;  %21025 = vmatprep.subr.bf16.mxu0 %v21024_v28  ;;  %v21034_v7 = vpack.c.bf16 %v7323_v14, %v7321_v59  ;;  %v21036_v20 = vpack.c.bf16 %v7328_v24, %v7326_v61  ;;  %v7325_v12 = vsel %vm7312_vm4, %v22163_v41, %v22158_v60  ;;  %v17599_v60 = vld [vmem:[%s29158_s1 + $0x948] sm:$0xff]  ;;  %v17600_v14 = vld [vmem:[%s29158_s1 + $0x950] sm:$0xff]  ;;  %v17609_v24 = vld [vmem:[%s29158_s1 + $0x998] sm:$0xff] }
 0xa24   : > { %v7327_v15 = vsel %vm7312_vm4, %v7309_v31, %v22162_v57  ;;  %v7490_v3 = vsel %vm7488_vm5, %v22167_v47, %v25205_v33  ;;  %v17644_v41 = vld [vmem:[%s29161_s4 + $0x410] sm:$0xff] }
 0xa25   : > { %17594 = vmatmul.mubr.msk.f32.vlgmr.msra.gmra.mrb[74].mxu0 %vm269_vm1, %v17574_v29  ;;  %v22176_v46 = vpop.permute.xlu1 %22175  ;;  %v21038_v40 = vpack.c.bf16 %v7327_v15, %v7325_v12  ;;  %v17648_v15 = vld [vmem:[%s29161_s4 + $0x430] sm:$0xff] }
 0xa26   : > { %21027 = vmatpush1.bf16.msra.mxu0 %v21026_v44  ;;  %7246 = vmatprep.mubr.f32.mxu0 %v29248_v51  ;;  %v22177_v34 = vunpack.i.l.bf16 %v22176_v46  ;;  %v22178_v49 = vunpack.i.h.bf16 %v22176_v46  ;;  %v17664_v12 = vld [vmem:[%s29161_s4 + $0x4b0] sm:$0xff] }
 0xa27   : > { %v22171_v17 = vpop.permute.xlu0 %22170  ;;  %21029 = vmatprep.subr.bf16.mxu0 %v21028_v5 }
 0xa28   : > { %v22172_v2 = vunpack.i.l.bf16 %v22171_v17  ;;  %v22173_v11 = vunpack.i.h.bf16 %v22171_v17  ;;  %v7494_v26 = vsel %vm7488_vm5, %v22178_v49, %v25205_v33 }
 0xa29   : > { %17595 = vmatmul.mubr.msk.f32.gmra.mrb[84].mxu0 %vm269_vm1, %v17575_v18  ;;  %v22181_v4 = vpop.permute.xlu1 %22180 }
 0xa2a   : > { %21031 = vmatpush1.bf16.msra.mxu0 %v21030_v16  ;;  %7252 = vmatprep.mubr.f32.mxu0 %v29248_v51  ;;  %v7492_v37 = vsel %vm7488_vm5, %v22172_v2, %v25205_v33  ;;  %v7489_v19 = vsel %vm7488_vm5, %v22173_v11, %v22167_v47  ;;  %v7491_v38 = vsel %vm7488_vm5, %v22177_v34, %v22172_v2  ;;  %v22182_v21 = vunpack.i.l.bf16 %v22181_v4  ;;  %v17601_v47 = vld [vmem:[%s29158_s1 + $0x958] sm:$0xff] }
 0xa2b   : > { %v22186_v58 = vpop.permute.xlu0 %22185  ;;  %21033 = vmatprep.subr.bf16.mxu0 %v21032_v27  ;;  %v21040_v30 = vpack.c.bf16 %v7492_v37, %v7490_v3  ;;  %v21043_v22 = vpack.c.bf16 %v7491_v38, %v7489_v19  ;;  %v22183_v31 = vunpack.i.h.bf16 %v22181_v4  ;;  %v17774_v11 = vcombine.low %v17644_v41, %v17648_v15  ;;  %v17652_v37 = vld [vmem:[%s29161_s4 + $0x450] sm:$0xff] }
 0xa2c   : > { %v22187_v0 = vunpack.i.l.bf16 %v22186_v58  ;;  %v22188_v39 = vunpack.i.h.bf16 %v22186_v58  ;;  %v17656_v4 = vld [vmem:[%s29161_s4 + $0x470] sm:$0xff] }
 0xa2d   : > { %17596 = vmatmul.mubr.msk.f32.gmra.mrb[86].mxu0 %vm269_vm1, %v17576_v32  ;;  %v22196_v50 = vpop.permute.xlu1 %22195  ;;  %v7498_v9 = vsel %vm7488_vm5, %v22183_v31, %v25205_v33  ;;  %v17782_v34 = vcombine.low %v17652_v37, %v17656_v4  ;;  %v17668_v3 = vld [vmem:[%s29161_s4 + $0x4d0] sm:$0xff] }
 0xa2e   : > { %21035 = vmatpush1.bf16.msra.mxu0 %v21034_v7  ;;  %7258 = vmatprep.mubr.f32.mxu0 %v29248_v51  ;;  %v7496_v43 = vsel %vm7488_vm5, %v22187_v0, %v25205_v33  ;;  %v7493_v44 = vsel %vm7488_vm5, %v22188_v39, %v22178_v49  ;;  %v7495_v10 = vsel %vm7488_vm5, %v22182_v21, %v22187_v0  ;;  %v22197_v18 = vunpack.i.l.bf16 %v22196_v50  ;;  %v17606_v7 = vld [vmem:[%s29158_s1 + $0x980] sm:$0xff]  ;;  %v17676_v38 = vld [vmem:[%s29161_s4 + $0x510] sm:$0xff] }
 0xa2f   : > { %v22191_v54 = vpop.permute.xlu0 %22190  ;;  %21037 = vmatprep.subr.bf16.mxu0 %v21036_v20  ;;  %v21046_v35 = vpack.c.bf16 %v7496_v43, %v7494_v26  ;;  %v21049_v62 = vpack.c.bf16 %v7495_v10, %v7493_v44  ;;  %v22198_v17 = vunpack.i.h.bf16 %v22196_v50  ;;  %v17775_v20 = vcombine.high %v17644_v41, %v17648_v15  ;;  %v17680_v39 = vld [vmem:[%s29161_s4 + $0x530] sm:$0xff] }
 0xa30   : > { %v22192_v28 = vunpack.i.l.bf16 %v22191_v54  ;;  %v22193_v48 = vunpack.i.h.bf16 %v22191_v54  ;;  %v17783_v0 = vcombine.high %v17652_v37, %v17656_v4  ;;  %v17807_v43 = vcombine.high %v17676_v38, %v17680_v39  ;;  %v17692_v26 = vld [vmem:[%s29161_s4 + $0x590] sm:$0xff] }
 0xa31   : > { %17597 = vmatmul.mubr.msk.f32.gmra.mrb[88].mxu0 %vm269_vm1, %v17577_v6  ;;  %v7502_v27 = vsel %vm7488_vm5, %v22198_v17, %v25205_v33  ;;  %v7485_v32 = vpop.permute.xlu1 %7484  ;;  %v17660_v6 = vld [vmem:[%s29161_s4 + $0x490] sm:$0xff]  ;;  %v17806_v21 = vcombine.low %v17676_v38, %v17680_v39 }
 0xa32   : > { %21039 = vmatpush1.bf16.msra.mxu0 %v21038_v40  ;;  %7421 = vmatprep.mubr.f32.mxu0 %v29248_v51  ;;  %v7500_v8 = vsel %vm7488_vm5, %v22192_v28, %v25205_v33  ;;  %v7497_v57 = vsel %vm7488_vm5, %v22193_v48, %v22183_v31  ;;  %v7499_v46 = vsel %vm7488_vm5, %v22197_v18, %v22192_v28  ;;  %v17672_v40 = vld [vmem:[%s29161_s4 + $0x4f0] sm:$0xff] }
 0xa33   : > { %v22201_v29 = vpop.permute.xlu0 %22200  ;;  %21042 = vmatprep.subr.msk.bf16.mxu0 %vm24791_vm11, %v21040_v30  ;;  %v21052_v1 = vpack.c.bf16 %v7500_v8, %v7498_v9  ;;  %v21055_v2 = vpack.c.bf16 %v7499_v46, %v7497_v57  ;;  %v17791_v54 = vcombine.high %v17660_v6, %v17664_v12  ;;  %v17790_v49 = vcombine.low %v17660_v6, %v17664_v12  ;;  %v17684_v28 = vld [vmem:[%s29161_s4 + $0x550] sm:$0xff] }
 0xa34   : > { %v22202_v5 = vunpack.i.l.bf16 %v22201_v29  ;;  %v22203_v16 = vunpack.i.h.bf16 %v22201_v29  ;;  %v17799_v19 = vcombine.high %v17668_v3, %v17672_v40  ;;  %v17798_v30 = vcombine.low %v17668_v3, %v17672_v40  ;;  %v17700_v44 = vld [vmem:[%s29161_s4 + $0x5d0] sm:$0xff] }
 0xa35   : > { %17602 = vmatmul.mubr.msk.f32.vlgmr.msra.gmra.mrb[74].mxu0 %vm269_vm1, %v17598_v45  ;;  %v17688_v45 = vld [vmem:[%s29161_s4 + $0x570] sm:$0xff] }
 0xa36   : > { %21045 = vmatpush1.bf16.msk.msra.mxu0 %vm24810_vm13, %v21043_v22  ;;  %7427 = vmatprep.mubr.f32.mxu0 %v29248_v51  ;;  %v7504_v25 = vsel %vm7488_vm5, %v22202_v5, %v25205_v33  ;;  %v7501_v61 = vsel %vm7488_vm5, %v22203_v16, %v22198_v17  ;;  %v7503_v59 = vsel %vm7488_vm5, %v7485_v32, %v22202_v5  ;;  %v17696_v22 = vld [vmem:[%s29161_s4 + $0x5b0] sm:$0xff] }
 0xa37   : > { %21048 = vmatprep.subr.msk.bf16.mxu0 %vm24791_vm11, %v21046_v35  ;;  %v21058_v58 = vpack.c.bf16 %v7504_v25, %v7502_v27  ;;  %v21061_v33 = vpack.c.bf16 %v7503_v59, %v7501_v61  ;;  %v17815_v29 = vcombine.high %v17684_v28, %v17688_v45  ;;  %v17814_v31 = vcombine.low %v17684_v28, %v17688_v45  ;;  %v17704_v10 = vld [vmem:[%s29161_s4 + $0x5f0] sm:$0xff] }
 0xa38   : > { %v17823_v50 = vcombine.high %v17692_v26, %v17696_v22  ;;  %v17822_v48 = vcombine.low %v17692_v26, %v17696_v22  ;;  %v17831_v35 = vcombine.high %v17700_v44, %v17704_v10  ;;  %v17708_v8 = vld [vmem:[%s29161_s4 + $0x610] sm:$0xff] }
 0xa39   : > { %17603 = vmatmul.mubr.msk.f32.gmra.mrb[84].mxu0 %vm269_vm1, %v17599_v60  ;;  %v17712_v5 = vld [vmem:[%s29161_s4 + $0x630] sm:$0xff]  ;;  %v17830_v60 = vcombine.low %v17700_v44, %v17704_v10  ;;  %v17634_v10 = vld [vmem:[%s29159_s2 + $0xa0] sm:$0xff] }
 0xa3a   : > { %21051 = vmatpush1.bf16.msk.msra.mxu0 %vm24810_vm13, %v21049_v62  ;;  %7433 = vmatprep.mubr.f32.mxu0 %v29248_v51  ;;  %v17839_v18 = vcombine.high %v17708_v8, %v17712_v5  ;;  %v17716_v9 = vld [vmem:[%s29161_s4 + $0x650] sm:$0xff]  ;;  %v17838_v17 = vcombine.low %v17708_v8, %v17712_v5  ;;  %v17635_v8 = vld [vmem:[%s29159_s2 + $0xa8] sm:$0xff] }
 0xa3b   : > { %21054 = vmatprep.subr.msk.bf16.mxu0 %vm24791_vm11, %v21052_v1  ;;  %v17720_v62 = vld [vmem:[%s29161_s4 + $0x670] sm:$0xff] }
 0xa3c   : > { %v17847_v57 = vcombine.high %v17716_v9, %v17720_v62  ;;  %v17724_v46 = vld [vmem:[%s29161_s4 + $0x690] sm:$0xff]  ;;  %v17846_v1 = vcombine.low %v17716_v9, %v17720_v62  ;;  %v17638_v9 = vld [vmem:[%s29159_s2 + $0xc0] sm:$0xff] }
 0xa3d   : > { %17604 = vmatmul.mubr.msk.f32.gmra.mrb[86].mxu0 %vm269_vm1, %v17600_v14  ;;  %v17728_v16 = vld [vmem:[%s29161_s4 + $0x6b0] sm:$0xff] }
 0xa3e   : > { %21057 = vmatpush1.bf16.msk.msra.mxu0 %vm24810_vm13, %v21055_v2  ;;  %7439 = vmatprep.mubr.f32.mxu0 %v29248_v51  ;;  %v17855_v25 = vcombine.high %v17724_v46, %v17728_v16  ;;  %v17732_v14 = vld [vmem:[%s29161_s4 + $0x6d0] sm:$0xff]  ;;  %v17854_v2 = vcombine.low %v17724_v46, %v17728_v16  ;;  %v17662_v46 = vld [vmem:[%s29161_s4 + $0x4a0] sm:$0xff]  ;;  %v17639_v16 = vld [vmem:[%s29159_s2 + $0xc8] sm:$0xff] }
 0xa3f   : > { %21060 = vmatprep.subr.msk.bf16.mxu0 %vm24791_vm11, %v21058_v58  ;;  %v17736_v27 = vld [vmem:[%s29161_s4 + $0x6f0] sm:$0xff] }
 0xa40   : > { %v17863_v32 = vcombine.high %v17732_v14, %v17736_v27  ;;  %v17740_v61 = vld [vmem:[%s29161_s4 + $0x710] sm:$0xff]  ;;  %v17862_v58 = vcombine.low %v17732_v14, %v17736_v27  ;;  %v17666_v14 = vld [vmem:[%s29161_s4 + $0x4c0] sm:$0xff] }
 0xa41   : > { %17605 = vmatmul.mubr.msk.f32.gmra.mrb[88].mxu0 %vm269_vm1, %v17601_v47  ;;  %v17744_v59 = vld [vmem:[%s29161_s4 + $0x730] sm:$0xff]  ;;  %v17670_v27 = vld [vmem:[%s29161_s4 + $0x4e0] sm:$0xff] }
 0xa42   : > { %21063 = vmatpush1.bf16.msk.msra.mxu0 %vm24810_vm13, %v21061_v33  ;;  %7618 = vmatprep.mubr.f32.mxu0 %v29248_v51  ;;  %v17871_v47 = vcombine.high %v17740_v61, %v17744_v59  ;;  %v17870_v33 = vcombine.low %v17740_v61, %v17744_v59  ;;  %v7664_v41 = vpop.permute.xlu1 %7663  ;;  %v17674_v61 = vld [vmem:[%s29161_s4 + $0x500] sm:$0xff] }
 0xa43   : > { %8851 = vmatprep.subr.bf16.mxu0 %v17775_v20  ;;  %v17678_v59 = vld [vmem:[%s29161_s4 + $0x520] sm:$0xff] }
 0xa45   : > { %17626 = vmatmul.mubr.msk.f32.vlgmr.msra.gmra.mrb[74].mxu0 %vm269_vm1, %v17606_v7 }
 0xa46   : > { %7624 = vmatprep.mubr.f32.mxu0 %v29248_v51  ;;  %8852 = vmatpush1.bf16.msra.mxu0 %v17774_v11  ;;  %v7674_v39 = vpop.permute.xlu1 %7673 }
 0xa47   : > { %8853 = vmatprep.subr.bf16.mxu0 %v17783_v0 }
 0xa49   : > { %17627 = vmatmul.mubr.msk.f32.gmra.mrb[84].mxu0 %vm269_vm1, %v17607_v53 }
 0xa4a   : > { %7630 = vmatprep.mubr.f32.mxu0 %v29248_v51  ;;  %8854 = vmatpush1.bf16.msra.mxu0 %v17782_v34 }
 0xa4b   : > { %8855 = vmatprep.subr.bf16.mxu0 %v17791_v54 }
 0xa4d   : > { %17628 = vmatmul.mubr.msk.f32.gmra.mrb[86].mxu0 %vm269_vm1, %v17608_v52  ;;  %v7659_v52 = vpop.permute.xlu0 %7658 }
 0xa4e   : > { %7636 = vmatprep.mubr.f32.mxu0 %v29248_v51  ;;  %8856 = vmatpush1.bf16.msra.mxu0 %v17790_v49 }
 0xa4f   : > { %8857 = vmatprep.subr.bf16.mxu0 %v17799_v19 }
 0xa51   : > { %17629 = vmatmul.mubr.msk.f32.gmra.mrb[88].mxu0 %vm269_vm1, %v17609_v24  ;;  %v7669_v49 = vpop.permute.xlu0 %7668 }
 0xa52   : > { %8858 = vmatpush1.bf16.msra.mxu0 %v17798_v30 }
 0xa53   : > { %8859 = vmatprep.subr.bf16.mxu0 %v17807_v43 }
 0xa56   : > { %8860 = vmatpush1.bf16.msra.mxu0 %v17806_v21 }
 0xa57   : > { %8861 = vmatprep.subr.bf16.mxu0 %v17815_v29 }
 0xa5a   : > { %8862 = vmatpush1.bf16.msra.mxu0 %v17814_v31 }
 0xa5b   : > { %8863 = vmatprep.subr.bf16.mxu0 %v17823_v50 }
 0xa5e   : > { %8864 = vmatpush1.bf16.msra.mxu0 %v17822_v48  ;;  %v17642_v48 = vld [vmem:[%s29161_s4 + $0x400] sm:$0xff] }
 0xa5f   : > { %8865 = vmatprep.subr.bf16.mxu0 %v17831_v35  ;;  %v17646_v35 = vld [vmem:[%s29161_s4 + $0x420] sm:$0xff] }
 0xa60   : > { %v17771_v5 = vcombine.high %v17642_v48, %v17646_v35  ;;  %v17770_v62 = vcombine.low %v17642_v48, %v17646_v35 }
 0xa62   : > { %8866 = vmatpush1.bf16.msra.mxu0 %v17830_v60  ;;  %v17650_v60 = vld [vmem:[%s29161_s4 + $0x440] sm:$0xff] }
 0xa63   : > { %8867 = vmatprep.subr.bf16.mxu0 %v17839_v18  ;;  %v17654_v18 = vld [vmem:[%s29161_s4 + $0x460] sm:$0xff] }
 0xa66   : > { %8868 = vmatpush1.bf16.msra.mxu0 %v17838_v17  ;;  %v17779_v17 = vcombine.high %v17650_v60, %v17654_v18 }
 0xa67   : > { %8869 = vmatprep.subr.bf16.mxu0 %v17847_v57  ;;  %v17658_v57 = vld [vmem:[%s29161_s4 + $0x480] sm:$0xff] }
 0xa6a   : > { %8870 = vmatpush1.bf16.msra.mxu0 %v17846_v1  ;;  %v17778_v1 = vcombine.low %v17650_v60, %v17654_v18  ;;  %v17750_v60 = vld [vmem:[%s29161_s4 + $0x760] sm:$0xff]  ;;  %v17748_v18 = vld [vmem:[%s29161_s4 + $0x750] sm:$0xff] }
 0xa6b   : > { %8871 = vmatprep.subr.bf16.mxu0 %v17855_v25  ;;  %v17787_v25 = vcombine.high %v17658_v57, %v17662_v46 }
 0xa6e   : > { %8872 = vmatpush1.bf16.msra.mxu0 %v17854_v2  ;;  %v17786_v2 = vcombine.low %v17658_v57, %v17662_v46  ;;  %v17754_v57 = vld [vmem:[%s29161_s4 + $0x780] sm:$0xff] }
 0xa6f   : > { %8873 = vmatprep.subr.bf16.mxu0 %v17863_v32  ;;  %v17795_v32 = vcombine.high %v17666_v14, %v17670_v27  ;;  %v17758_v46 = vld [vmem:[%s29161_s4 + $0x7a0] sm:$0xff] }
 0xa72   : > { %8874 = vmatpush1.bf16.msra.mxu0 %v17862_v58  ;;  %v17794_v58 = vcombine.low %v17666_v14, %v17670_v27  ;;  %v17756_v14 = vld [vmem:[%s29161_s4 + $0x790] sm:$0xff] }
 0xa73   : > { %8875 = vmatprep.subr.bf16.mxu0 %v17871_v47  ;;  %v17803_v47 = vcombine.high %v17674_v61, %v17678_v59  ;;  %v17760_v27 = vld [vmem:[%s29161_s4 + $0x7b0] sm:$0xff] }
 0xa76   : > { %8876 = vmatpush1.bf16.msra.mxu0 %v17870_v33  ;;  %v17682_v33 = vld [vmem:[%s29161_s4 + $0x540] sm:$0xff] }
 0xb18   : > { %v7620_v7 = vpop.f32.mrb[74].mxu0 }
 0xb19   : > { %v7622_v53 = vpop.f32.mrb[75].mxu0  ;;  %v7676_v24 = vadd.f32 %v7659_v52, %v7620_v7  ;;  %v17686_v7 = vld [vmem:[%s29161_s4 + $0x560] sm:$0xff] }
 0xb1a   : > { %v7677_v15 = vadd.f32 %v7659_v52, %v7622_v53  ;;  %v17802_v53 = vcombine.low %v17674_v61, %v17678_v59  ;;  %v17811_v52 = vcombine.high %v17682_v33, %v17686_v7  ;;  %v17886_v61 = vcombine.low %v17756_v14, %v17760_v27  ;;  %v17762_v59 = vld [vmem:[%s29161_s4 + $0x7c0] sm:$0xff] }
 0xb1b   : > { %v7684_v0 = vmax.f32 %v7676_v24, 0.0  ;;  %v17690_v24 = vld [vmem:[%s29161_s4 + $0x580] sm:$0xff] }
 0xb1c   : > { %v7626_v11 = vpop.f32.mrb[84].mxu0  ;;  %v7685_v12 = vmax.f32 %v7677_v15, 0.0  ;;  %v17810_v15 = vcombine.low %v17682_v33, %v17686_v7 }
 0xb1d   : > { %v7678_v20 = vadd.f32 %v7664_v41, %v7626_v11  ;;  %v7628_v37 = vpop.f32.mrb[85].mxu0 }
 0xb1e   : > { %v7679_v4 = vadd.f32 %v7664_v41, %v7628_v37  ;;  %v17694_v41 = vld [vmem:[%s29161_s4 + $0x5a0] sm:$0xff] }
 0xb1f   : > { %v7686_v6 = vmax.f32 %v7678_v20, 0.0  ;;  %v17819_v11 = vcombine.high %v17690_v24, %v17694_v41  ;;  %v17698_v20 = vld [vmem:[%s29161_s4 + $0x5c0] sm:$0xff] }
 0xb20   : > { %v7687_v34 = vmax.f32 %v7679_v4, 0.0  ;;  %v7632_v54 = vpop.f32.mrb[86].mxu0  ;;  %v17702_v37 = vld [vmem:[%s29161_s4 + $0x5e0] sm:$0xff]  ;;  %v17818_v4 = vcombine.low %v17690_v24, %v17694_v41  ;;  %v17643_v41 = vld [vmem:[%s29161_s4 + $0x408] sm:$0xff] }
 0xb21   : > { %v25377_v3 = vpack.c.bf16 %v7686_v6, %v7684_v0  ;;  %v7634_v40 = vpop.f32.mrb[87].mxu0  ;;  %v7680_v38 = vadd.f32 %v7669_v49, %v7632_v54  ;;  %v17827_v0 = vcombine.high %v17698_v20, %v17702_v37  ;;  %v17706_v6 = vld [vmem:[%s29161_s4 + $0x600] sm:$0xff] }
 0xb22   : > { %v25379_v19 = vpack.c.bf16 %v7687_v34, %v7685_v12  ;;  %v7681_v30 = vadd.f32 %v7669_v49, %v7634_v40  ;;  %v17710_v12 = vld [vmem:[%s29161_s4 + $0x620] sm:$0xff]  ;;  %v17826_v34 = vcombine.low %v17698_v20, %v17702_v37 }
 0xb23   : > { %v7688_v29 = vmax.f32 %v7680_v38, 0.0  ;;  %v17835_v54 = vcombine.high %v17706_v6, %v17710_v12  ;;  %v17714_v40 = vld [vmem:[%s29161_s4 + $0x640] sm:$0xff]  ;;  %v17834_v38 = vcombine.low %v17706_v6, %v17710_v12 }
 0xb24   : > { %v7638_v43 = vpop.f32.mrb[88].mxu0  ;;  %21065 = vmatprep.subr.bf16.mxu1 %v25379_v19  ;;  %v7689_v22 = vmax.f32 %v7681_v30, 0.0  ;;  %v17718_v49 = vld [vmem:[%s29161_s4 + $0x660] sm:$0xff] }
 0xb25   : > { %v7682_v28 = vadd.f32 %v7674_v39, %v7638_v43  ;;  %v7640_v45 = vpop.f32.mrb[89].mxu0  ;;  %21067 = vmatpush1.bf16.msra.mxu1 %v25377_v3  ;;  %v17722_v30 = vld [vmem:[%s29161_s4 + $0x680] sm:$0xff] }
 0xb26   : > { %v7683_v21 = vadd.f32 %v7674_v39, %v7640_v45  ;;  %v17843_v39 = vcombine.high %v17714_v40, %v17718_v49  ;;  %v17726_v43 = vld [vmem:[%s29161_s4 + $0x6a0] sm:$0xff] }
 0xb27   : > { %v7690_v26 = vmax.f32 %v7682_v28, 0.0  ;;  %v17842_v28 = vcombine.low %v17714_v40, %v17718_v49  ;;  %v17851_v45 = vcombine.high %v17722_v30, %v17726_v43 }
 0xb28   : > { %v7691_v31 = vmax.f32 %v7683_v21, 0.0  ;;  %v17730_v21 = vld [vmem:[%s29161_s4 + $0x6c0] sm:$0xff] }
 0xb29   : > { %v25383_v50 = vpack.c.bf16 %v7690_v26, %v7688_v29  ;;  %v17734_v29 = vld [vmem:[%s29161_s4 + $0x6e0] sm:$0xff]  ;;  %v17850_v26 = vcombine.low %v17722_v30, %v17726_v43 }
 0xb2a   : > { %v25385_v44 = vpack.c.bf16 %v7691_v31, %v7689_v22  ;;  %v17859_v22 = vcombine.high %v17730_v21, %v17734_v29  ;;  %v17738_v31 = vld [vmem:[%s29161_s4 + $0x700] sm:$0xff]  ;;  %v17858_v48 = vcombine.low %v17730_v21, %v17734_v29  ;;  %v17655_v29 = vld [vmem:[%s29161_s4 + $0x468] sm:$0xff] }
 0xb2c   : > { %21069 = vmatprep.subr.bf16.mxu1 %v25385_v44 }
 0xb2d   : > { %21071 = vmatpush1.bf16.msra.mxu1 %v25383_v50 }
 0xb2e   : > { %21073 = vmatprep.subr.bf16.mxu1 %v25379_v19 }
 0xb30   : > { %17636 = vmatmul.mubr.msk.f32.vlgmr.msra.gmra.mrb[30].mxu1 %vm29232_vm3, %v17634_v10  ;;  %v17742_v10 = vld [vmem:[%s29161_s4 + $0x720] sm:$0xff] }
 0xb31   : > { %21075 = vmatpush1.bf16.msra.mxu1 %v25377_v3  ;;  %7771 = vmatprep.mubr.f32.mxu1 %v29248_v51  ;;  %v17867_v35 = vcombine.high %v17738_v31, %v17742_v10 }
 0xb32   : > { %21077 = vmatprep.subr.bf16.mxu1 %v25385_v44 }
 0xb34   : > { %17637 = vmatmul.mubr.msk.f32.gmra.mrb[40].mxu1 %vm29232_vm3, %v17635_v8  ;;  %v17866_v8 = vcombine.low %v17738_v31, %v17742_v10  ;;  %v17659_v10 = vld [vmem:[%s29161_s4 + $0x488] sm:$0xff] }
 0xb35   : > { %21079 = vmatpush1.bf16.msra.mxu1 %v25383_v50  ;;  %7981 = vmatprep.mubr.f32.mxu1 %v29248_v51 }
 0xb36   : > { %8765 = vmatprep.subr.bf16.mxu1 %v17771_v5  ;;  %v17746_v5 = vld [vmem:[%s29161_s4 + $0x740] sm:$0xff] }
 0xb38   : > { %17640 = vmatmul.mubr.msk.f32.vlgmr.msra.gmra.mrb[42].mxu1 %vm29232_vm3, %v17638_v9  ;;  %v17874_v9 = vcombine.low %v17746_v5, %v17750_v60 }
 0xb39   : > { %7987 = vmatprep.mubr.f32.mxu1 %v29248_v51  ;;  %8766 = vmatpush1.bf16.msra.mxu1 %v17770_v62  ;;  %v17875_v62 = vcombine.high %v17746_v5, %v17750_v60  ;;  %v7798_v5 = vld [vmem:[%s29161_s4 + $0x90] sm:$0xff] }
 0xb3a   : > { %8767 = vmatprep.subr.bf16.mxu1 %v17779_v17  ;;  %v17752_v17 = vld [vmem:[%s29161_s4 + $0x770] sm:$0xff] }
 0xb3b   : > { %v7802_v60 = vld [vmem:[%s29161_s4 + $0xb0] sm:$0xff] }
 0xb3c   : > { %17641 = vmatmul.mubr.msk.f32.gmra.mrb[44].mxu1 %vm29232_vm3, %v17639_v16  ;;  %v17878_v16 = vcombine.low %v17748_v18, %v17752_v17 }
 0xb3d   : > { %8768 = vmatpush1.bf16.msra.mxu1 %v17778_v1  ;;  %v17879_v1 = vcombine.high %v17748_v18, %v17752_v17  ;;  %v17919_v17 = vcombine.high %v7798_v5, %v7802_v60 }
 0xb3e   : > { %8769 = vmatprep.subr.bf16.mxu1 %v17787_v25  ;;  %v17883_v25 = vcombine.high %v17754_v57, %v17758_v46 }
 0xb3f   : > { %8877 = vmatprep.subr.bf16.mxu0 %v17879_v1  ;;  %v7810_v1 = vld [vmem:[%s29161_s4 + $0xf0] sm:$0xff] }
 0xb40   : > { %8878 = vmatpush1.bf16.msra.mxu0 %v17878_v16  ;;  %v7806_v16 = vld [vmem:[%s29161_s4 + $0xd0] sm:$0xff] }
 0xb41   : > { %8770 = vmatpush1.bf16.msra.mxu1 %v17786_v2  ;;  %v17887_v2 = vcombine.high %v17756_v14, %v17760_v27  ;;  %v17918_v14 = vcombine.low %v7798_v5, %v7802_v60  ;;  %v7846_v5 = vld [vmem:[%s29161_s4 + $0x210] sm:$0xff] }
 0xb42   : > { %8771 = vmatprep.subr.bf16.mxu1 %v17795_v32  ;;  %v17882_v32 = vcombine.low %v17754_v57, %v17758_v46  ;;  %v17667_v57 = vld [vmem:[%s29161_s4 + $0x4c8] sm:$0xff]  ;;  %v7850_v60 = vld [vmem:[%s29161_s4 + $0x230] sm:$0xff] }
 0xb43   : > { %8879 = vmatprep.subr.bf16.mxu0 %v17887_v2  ;;  %v17671_v46 = vld [vmem:[%s29161_s4 + $0x4e8] sm:$0xff]  ;;  %v17927_v2 = vcombine.high %v7806_v16, %v7810_v1 }
 0xb44   : > { %8880 = vmatpush1.bf16.msra.mxu0 %v17886_v61  ;;  %v17797_v27 = vcombine.high %v17667_v57, %v17671_v46  ;;  %v17679_v61 = vld [vmem:[%s29161_s4 + $0x528] sm:$0xff] }
 0xb45   : > { %8772 = vmatpush1.bf16.msra.mxu1 %v17794_v58  ;;  %v17766_v58 = vld [vmem:[%s29161_s4 + $0x7e0] sm:$0xff] }
 0xb46   : > { %8773 = vmatprep.subr.bf16.mxu1 %v17803_v47  ;;  %v17764_v47 = vld [vmem:[%s29161_s4 + $0x7d0] sm:$0xff]  ;;  %v17890_v33 = vcombine.low %v17762_v59, %v17766_v58  ;;  %v17891_v7 = vcombine.high %v17762_v59, %v17766_v58 }
 0xb47   : > { %v7814_v59 = vld [vmem:[%s29161_s4 + $0x110] sm:$0xff] }
 0xb48   : > { %v7818_v58 = vld [vmem:[%s29161_s4 + $0x130] sm:$0xff] }
 0xb49   : > { %8774 = vmatpush1.bf16.msra.mxu1 %v17802_v53  ;;  %v17768_v53 = vld [vmem:[%s29161_s4 + $0x7f0] sm:$0xff] }
 0xb4a   : > { %8775 = vmatprep.subr.bf16.mxu1 %v17811_v52  ;;  %v17894_v52 = vcombine.low %v17764_v47, %v17768_v53  ;;  %v17895_v24 = vcombine.high %v17764_v47, %v17768_v53  ;;  %v17796_v47 = vcombine.low %v17667_v57, %v17671_v46  ;;  %v17935_v53 = vcombine.high %v7814_v59, %v7818_v58  ;;  %v17715_v57 = vld [vmem:[%s29161_s4 + $0x648] sm:$0xff] }
 0xb4b   : > { %v17719_v46 = vld [vmem:[%s29161_s4 + $0x668] sm:$0xff] }
 0xb4c   : > { %8881 = vmatprep.subr.bf16.mxu0 %v17895_v24  ;;  %v17687_v24 = vld [vmem:[%s29161_s4 + $0x568] sm:$0xff] }
 0xb4d   : > { %8776 = vmatpush1.bf16.msra.mxu1 %v17810_v15  ;;  %v17647_v15 = vld [vmem:[%s29161_s4 + $0x428] sm:$0xff]  ;;  %8882 = vmatpush1.bf16.msra.mxu0 %v17894_v52 }
 0xb4e   : > { %8777 = vmatprep.subr.bf16.mxu1 %v17819_v11  ;;  %v7782_v11 = vld [vmem:[%s29161_s4 + $0x10] sm:$0xff]  ;;  %v17772_v20 = vcombine.low %v17643_v41, %v17647_v15  ;;  %v17773_v37 = vcombine.high %v17643_v41, %v17647_v15  ;;  %v17683_v52 = vld [vmem:[%s29161_s4 + $0x548] sm:$0xff] }
 0xb4f   : > { %v7822_v41 = vld [vmem:[%s29161_s4 + $0x150] sm:$0xff] }
 0xb50   : > { %v7826_v15 = vld [vmem:[%s29161_s4 + $0x170] sm:$0xff] }
 0xb51   : > { %8778 = vmatpush1.bf16.msra.mxu1 %v17818_v4  ;;  %v7786_v4 = vld [vmem:[%s29161_s4 + $0x30] sm:$0xff] }
 0xb52   : > { %8779 = vmatprep.subr.bf16.mxu1 %v17827_v0  ;;  %v17902_v0 = vcombine.low %v7782_v11, %v7786_v4  ;;  %v17903_v6 = vcombine.high %v7782_v11, %v7786_v4  ;;  %v17943_v4 = vcombine.high %v7822_v41, %v7826_v15 }
 0xb54   : > { %9663 = vmatprep.subr.bf16.mxu0 %v17903_v6  ;;  %v17695_v6 = vld [vmem:[%s29161_s4 + $0x5a8] sm:$0xff] }
 0xb55   : > { %8780 = vmatpush1.bf16.msra.mxu1 %v17826_v34 }
 0xb56   : > { %8781 = vmatprep.subr.bf16.mxu1 %v17835_v54 }
 0xb59   : > { %8782 = vmatpush1.bf16.msra.mxu1 %v17834_v38 }
 0xb5a   : > { %8783 = vmatprep.subr.bf16.mxu1 %v17843_v39 }
 0xb5d   : > { %8784 = vmatpush1.bf16.msra.mxu1 %v17842_v28  ;;  %v17651_v28 = vld [vmem:[%s29161_s4 + $0x448] sm:$0xff] }
 0xb5e   : > { %8785 = vmatprep.subr.bf16.mxu1 %v17851_v45  ;;  %v17780_v18 = vcombine.low %v17651_v28, %v17655_v29 }
 0xb61   : > { %8786 = vmatpush1.bf16.msra.mxu1 %v17850_v26  ;;  %v7790_v26 = vld [vmem:[%s29161_s4 + $0x50] sm:$0xff] }
 0xb62   : > { %8787 = vmatprep.subr.bf16.mxu1 %v17859_v22  ;;  %v7794_v22 = vld [vmem:[%s29161_s4 + $0x70] sm:$0xff] }
 0xb65   : > { %8788 = vmatpush1.bf16.msra.mxu1 %v17858_v48  ;;  %v17781_v48 = vcombine.high %v17651_v28, %v17655_v29  ;;  %v17703_v28 = vld [vmem:[%s29161_s4 + $0x5e8] sm:$0xff]  ;;  %v7842_v29 = vld [vmem:[%s29161_s4 + $0x1f0] sm:$0xff] }
 0xb66   : > { %8789 = vmatprep.subr.bf16.mxu1 %v17867_v35  ;;  %v17911_v35 = vcombine.high %v7790_v26, %v7794_v22 }
 0xb69   : > { %8790 = vmatpush1.bf16.msra.mxu1 %v17866_v8  ;;  %v17663_v8 = vld [vmem:[%s29161_s4 + $0x4a8] sm:$0xff] }
 0xb6a   : > { %8791 = vmatprep.subr.bf16.mxu1 %v17875_v62  ;;  %v17789_v62 = vcombine.high %v17659_v10, %v17663_v8 }
 0xb6d   : > { %8792 = vmatpush1.bf16.msra.mxu1 %v17874_v9  ;;  %v17910_v9 = vcombine.low %v7790_v26, %v7794_v22 }
 0xb6e   : > { %8793 = vmatprep.subr.bf16.mxu1 %v17883_v25  ;;  %v17788_v25 = vcombine.low %v17659_v10, %v17663_v8  ;;  %v17711_v8 = vld [vmem:[%s29161_s4 + $0x628] sm:$0xff] }
 0xb71   : > { %8794 = vmatpush1.bf16.msra.mxu1 %v17882_v32  ;;  %v17675_v32 = vld [vmem:[%s29161_s4 + $0x508] sm:$0xff] }
 0xb72   : > { %8795 = vmatprep.subr.bf16.mxu1 %v17891_v7  ;;  %v17805_v7 = vcombine.high %v17675_v32, %v17679_v61  ;;  %v17804_v11 = vcombine.low %v17675_v32, %v17679_v61  ;;  %v17723_v32 = vld [vmem:[%s29161_s4 + $0x688] sm:$0xff] }
 0xb73   : > { %v17727_v61 = vld [vmem:[%s29161_s4 + $0x6a8] sm:$0xff] }
 0xb75   : > { %8796 = vmatpush1.bf16.msra.mxu1 %v17890_v33  ;;  %v17926_v33 = vcombine.low %v7806_v16, %v7810_v1  ;;  %v7854_v16 = vld [vmem:[%s29161_s4 + $0x250] sm:$0xff] }
 0xb76   : > { %8808 = vmatprep.subr.bf16.mxu1 %v17773_v37  ;;  %v17813_v37 = vcombine.high %v17683_v52, %v17687_v24  ;;  %v7858_v1 = vld [vmem:[%s29161_s4 + $0x270] sm:$0xff] }
 0xc03   : > { %v7767_v12 = vpop.f32.mrb[30].mxu1 }
 0xc04   : > { %v7769_v34 = vpop.f32.mrb[31].mxu1 }
 0xc07   : > { %v7773_v54 = vpop.f32.mrb[40].mxu1 }
 0xc08   : > { %v25538_v40 = vpack.c.bf16 %v7773_v54, %v7767_v12  ;;  %v7775_v49 = vpop.f32.mrb[41].mxu1  ;;  %v7830_v12 = vld [vmem:[%s29161_s4 + $0x190] sm:$0xff]  ;;  %v17812_v54 = vcombine.low %v17683_v52, %v17687_v24  ;;  %v17731_v52 = vld [vmem:[%s29161_s4 + $0x6c8] sm:$0xff] }
 0xc09   : > { %v25540_v38 = vpack.c.bf16 %v7775_v49, %v7769_v34  ;;  %v7834_v34 = vld [vmem:[%s29161_s4 + $0x1b0] sm:$0xff]  ;;  %v17942_v49 = vcombine.low %v7822_v41, %v7826_v15  ;;  %v17735_v24 = vld [vmem:[%s29161_s4 + $0x6e8] sm:$0xff] }
 0xc0a   : > { %v17950_v22 = vcombine.low %v7830_v12, %v7834_v34  ;;  %v7870_v41 = vld [vmem:[%s29161_s4 + $0x2d0] sm:$0xff] }
 0xc0b   : > { %v7983_v39 = vpop.f32.mrb[42].mxu1  ;;  %v7874_v15 = vld [vmem:[%s29161_s4 + $0x2f0] sm:$0xff] }
 0xc0c   : > { %v7985_v30 = vpop.f32.mrb[43].mxu1 }
 0xc0f   : > { %v7989_v43 = vpop.f32.mrb[44].mxu1 }
 0xc10   : > { %v25545_v45 = vpack.c.bf16 %v7989_v43, %v7983_v39  ;;  %v7991_v21 = vpop.f32.mrb[45].mxu1  ;;  %v17699_v43 = vld [vmem:[%s29161_s4 + $0x5c8] sm:$0xff] }
 0xc11   : > { %v25556_v31 = vpack.c.bf16 %v7991_v21, %v7985_v30  ;;  %v17951_v30 = vcombine.high %v7830_v12, %v7834_v34  ;;  %v7838_v21 = vld [vmem:[%s29161_s4 + $0x1d0] sm:$0xff]  ;;  %v17829_v10 = vcombine.high %v17699_v43, %v17703_v28 }
 0xc12   : > { %v7878_v12 = vld [vmem:[%s29161_s4 + $0x310] sm:$0xff] }
 0xc13   : > { %8797 = vmatprep.mubr.bf16.mxu1 %v25556_v31  ;;  %8883 = vmatprep.mubr.bf16.mxu0 %v25556_v31  ;;  %v7882_v34 = vld [vmem:[%s29161_s4 + $0x330] sm:$0xff] }
 0xc14   : > { %8798 = vmatmul.mubr.bf16.vlgmr.msra.gmra.mrb[48].mxu1 %v25545_v45  ;;  %8884 = vmatmul.mubr.bf16.vlgmr.msra.gmra.mrb[92].mxu0 %v25545_v45 }
 0xc15   : > { %8809 = vmatpush1.bf16.msra.mxu1 %v17772_v20  ;;  %9664 = vmatpush1.bf16.msra.mxu0 %v17902_v0  ;;  %v17934_v20 = vcombine.low %v7814_v59, %v7818_v58  ;;  %v17691_v0 = vld [vmem:[%s29161_s4 + $0x588] sm:$0xff]  ;;  %v7862_v59 = vld [vmem:[%s29161_s4 + $0x290] sm:$0xff] }
 0xc16   : > { %8840 = vmatprep.mubr.bf16.mxu1 %v25556_v31  ;;  %9695 = vmatprep.mubr.bf16.mxu0 %v25540_v38  ;;  %v17821_v39 = vcombine.high %v17691_v0, %v17695_v6  ;;  %v17820_v26 = vcombine.low %v17691_v0, %v17695_v6  ;;  %v7866_v58 = vld [vmem:[%s29161_s4 + $0x2b0] sm:$0xff]  ;;  %v17739_v0 = vld [vmem:[%s29161_s4 + $0x708] sm:$0xff] }
 0xc17   : > { %8810 = vmatprep.subr.bf16.mxu1 %v17781_v48  ;;  %9665 = vmatprep.subr.bf16.mxu0 %v17911_v35  ;;  %v17959_v48 = vcombine.high %v7838_v21, %v7842_v29  ;;  %v17707_v35 = vld [vmem:[%s29161_s4 + $0x608] sm:$0xff] }
 0xc18   : > { %v17743_v6 = vld [vmem:[%s29161_s4 + $0x728] sm:$0xff] }
 0xc19   : > { %8811 = vmatpush1.bf16.msra.mxu1 %v17780_v18  ;;  %9666 = vmatpush1.bf16.msra.mxu0 %v17910_v9  ;;  %v17828_v18 = vcombine.low %v17699_v43, %v17703_v28  ;;  %v17958_v9 = vcombine.low %v7838_v21, %v7842_v29  ;;  %v17747_v43 = vld [vmem:[%s29161_s4 + $0x748] sm:$0xff]  ;;  %v7886_v21 = vld [vmem:[%s29161_s4 + $0x350] sm:$0xff] }
 0xc1a   : > { %8812 = vmatprep.subr.bf16.mxu1 %v17789_v62  ;;  %9667 = vmatprep.subr.bf16.mxu0 %v17919_v17  ;;  %v17837_v62 = vcombine.high %v17707_v35, %v17711_v8  ;;  %v17967_v17 = vcombine.high %v7846_v5, %v7850_v60  ;;  %v17751_v28 = vld [vmem:[%s29161_s4 + $0x768] sm:$0xff]  ;;  %v7890_v29 = vld [vmem:[%s29161_s4 + $0x370] sm:$0xff] }
 0xc1d   : > { %8813 = vmatpush1.bf16.msra.mxu1 %v17788_v25  ;;  %9668 = vmatpush1.bf16.msra.mxu0 %v17918_v14  ;;  %v17836_v25 = vcombine.low %v17707_v35, %v17711_v8  ;;  %v17966_v14 = vcombine.low %v7846_v5, %v7850_v60  ;;  %v17755_v35 = vld [vmem:[%s29161_s4 + $0x788] sm:$0xff]  ;;  %v7894_v5 = vld [vmem:[%s29161_s4 + $0x390] sm:$0xff] }
 0xc1e   : > { %8814 = vmatprep.subr.bf16.mxu1 %v17797_v27  ;;  %9669 = vmatprep.subr.bf16.mxu0 %v17927_v2  ;;  %v17845_v27 = vcombine.high %v17715_v57, %v17719_v46  ;;  %v17975_v2 = vcombine.high %v7854_v16, %v7858_v1  ;;  %v17759_v8 = vld [vmem:[%s29161_s4 + $0x7a8] sm:$0xff]  ;;  %v7898_v60 = vld [vmem:[%s29161_s4 + $0x3b0] sm:$0xff] }
 0xc21   : > { %8815 = vmatpush1.bf16.msra.mxu1 %v17796_v47  ;;  %9670 = vmatpush1.bf16.msra.mxu0 %v17926_v33  ;;  %v17844_v47 = vcombine.low %v17715_v57, %v17719_v46  ;;  %v17974_v33 = vcombine.low %v7854_v16, %v7858_v1  ;;  %v17763_v57 = vld [vmem:[%s29161_s4 + $0x7c8] sm:$0xff]  ;;  %v7902_v16 = vld [vmem:[%s29161_s4 + $0x3d0] sm:$0xff] }
 0xc22   : > { %8816 = vmatprep.subr.bf16.mxu1 %v17805_v7  ;;  %9671 = vmatprep.subr.bf16.mxu0 %v17935_v53  ;;  %v17853_v7 = vcombine.high %v17723_v32, %v17727_v61  ;;  %v17983_v53 = vcombine.high %v7862_v59, %v7866_v58  ;;  %v17767_v46 = vld [vmem:[%s29161_s4 + $0x7e8] sm:$0xff]  ;;  %v7906_v1 = vld [vmem:[%s29161_s4 + $0x3f0] sm:$0xff] }
 0xc25   : > { %8817 = vmatpush1.bf16.msra.mxu1 %v17804_v11  ;;  %9672 = vmatpush1.bf16.msra.mxu0 %v17934_v20  ;;  %v17852_v11 = vcombine.low %v17723_v32, %v17727_v61  ;;  %v17982_v20 = vcombine.low %v7862_v59, %v7866_v58  ;;  %v17645_v32 = vld [vmem:[%s29161_s4 + $0x418] sm:$0xff]  ;;  %v17892_v59 = vcombine.low %v17763_v57, %v17767_v46 }
 0xc26   : > { %8818 = vmatprep.subr.bf16.mxu1 %v17813_v37  ;;  %9673 = vmatprep.subr.bf16.mxu0 %v17943_v4  ;;  %v17861_v37 = vcombine.high %v17731_v52, %v17735_v24  ;;  %v17991_v4 = vcombine.high %v7870_v41, %v7874_v15  ;;  %v17649_v61 = vld [vmem:[%s29161_s4 + $0x438] sm:$0xff]  ;;  %v18022_v58 = vcombine.low %v7902_v16, %v7906_v1 }
 0xc29   : > { %8819 = vmatpush1.bf16.msra.mxu1 %v17812_v54  ;;  %9674 = vmatpush1.bf16.msra.mxu0 %v17942_v49  ;;  %v17860_v54 = vcombine.low %v17731_v52, %v17735_v24  ;;  %v17990_v49 = vcombine.low %v7870_v41, %v7874_v15  ;;  %v17661_v24 = vld [vmem:[%s29161_s4 + $0x498] sm:$0xff]  ;;  %v18032_v15 = vld [vmem:[%s29161_s4 + $0x810] sm:$0xff] }
 0xc2a   : > { %8820 = vmatprep.subr.bf16.mxu1 %v17821_v39  ;;  %9675 = vmatprep.subr.bf16.mxu0 %v17951_v30  ;;  %v17869_v39 = vcombine.high %v17739_v0, %v17743_v6  ;;  %v17999_v30 = vcombine.high %v7878_v12, %v7882_v34  ;;  %v17665_v41 = vld [vmem:[%s29161_s4 + $0x4b8] sm:$0xff] }
 0xc2d   : > { %8821 = vmatpush1.bf16.msra.mxu1 %v17820_v26  ;;  %9676 = vmatpush1.bf16.msra.mxu0 %v17950_v22  ;;  %v17868_v26 = vcombine.low %v17739_v0, %v17743_v6  ;;  %v17998_v22 = vcombine.low %v7878_v12, %v7882_v34  ;;  %v17669_v0 = vld [vmem:[%s29161_s4 + $0x4d8] sm:$0xff]  ;;  %v18044_v12 = vld [vmem:[%s29161_s4 + $0x870] sm:$0xff]  ;;  %v17792_v34 = vcombine.low %v17661_v24, %v17665_v41 }
 0xc2e   : > { %8822 = vmatprep.subr.bf16.mxu1 %v17829_v10  ;;  %9677 = vmatprep.subr.bf16.mxu0 %v17959_v48  ;;  %v17877_v10 = vcombine.high %v17747_v43, %v17751_v28  ;;  %v18007_v48 = vcombine.high %v7886_v21, %v7890_v29  ;;  %v17673_v6 = vld [vmem:[%s29161_s4 + $0x4f8] sm:$0xff] }
 0xc31   : > { %8823 = vmatpush1.bf16.msra.mxu1 %v17828_v18  ;;  %9678 = vmatpush1.bf16.msra.mxu0 %v17958_v9  ;;  %v17876_v18 = vcombine.low %v17747_v43, %v17751_v28  ;;  %v18006_v9 = vcombine.low %v7886_v21, %v7890_v29  ;;  %v17677_v43 = vld [vmem:[%s29161_s4 + $0x518] sm:$0xff]  ;;  %v18048_v21 = vld [vmem:[%s29161_s4 + $0x890] sm:$0xff] }
 0xc32   : > { %8824 = vmatprep.subr.bf16.mxu1 %v17837_v62  ;;  %9679 = vmatprep.subr.bf16.mxu0 %v17967_v17  ;;  %v17885_v62 = vcombine.high %v17755_v35, %v17759_v8  ;;  %v18015_v17 = vcombine.high %v7894_v5, %v7898_v60  ;;  %v17681_v28 = vld [vmem:[%s29161_s4 + $0x538] sm:$0xff]  ;;  %v18052_v29 = vld [vmem:[%s29161_s4 + $0x8b0] sm:$0xff] }
 0xc35   : > { %8825 = vmatpush1.bf16.msra.mxu1 %v17836_v25  ;;  %9680 = vmatpush1.bf16.msra.mxu0 %v17966_v14  ;;  %v17884_v25 = vcombine.low %v17755_v35, %v17759_v8  ;;  %v18014_v14 = vcombine.low %v7894_v5, %v7898_v60  ;;  %v18179_v35 = vcombine.high %v18048_v21, %v18052_v29  ;;  %v17685_v8 = vld [vmem:[%s29161_s4 + $0x558] sm:$0xff]  ;;  %v18056_v60 = vld [vmem:[%s29161_s4 + $0x8d0] sm:$0xff] }
 0xc36   : > { %8826 = vmatprep.subr.bf16.mxu1 %v17845_v27  ;;  %9681 = vmatprep.subr.bf16.mxu0 %v17975_v2  ;;  %v17893_v27 = vcombine.high %v17763_v57, %v17767_v46  ;;  %v18023_v2 = vcombine.high %v7902_v16, %v7906_v1  ;;  %v17689_v5 = vld [vmem:[%s29161_s4 + $0x578] sm:$0xff]  ;;  %v18064_v1 = vld [vmem:[%s29161_s4 + $0x910] sm:$0xff] }
 0xc37   : > { %v17693_v46 = vld [vmem:[%s29161_s4 + $0x598] sm:$0xff] }
 0xc38   : > { %v17697_v16 = vld [vmem:[%s29161_s4 + $0x5b8] sm:$0xff] }
 0xc39   : > { %8827 = vmatpush1.bf16.msra.mxu1 %v17844_v47  ;;  %9682 = vmatpush1.bf16.msra.mxu0 %v17974_v33  ;;  %v17777_v47 = vcombine.high %v17645_v32, %v17649_v61  ;;  %v17653_v33 = vld [vmem:[%s29161_s4 + $0x458] sm:$0xff] }
 0xc3a   : > { %8828 = vmatprep.subr.bf16.mxu1 %v17853_v7  ;;  %9683 = vmatprep.subr.bf16.mxu0 %v17983_v53  ;;  %v17657_v7 = vld [vmem:[%s29161_s4 + $0x478] sm:$0xff]  ;;  %v17776_v53 = vcombine.low %v17645_v32, %v17649_v61 }
 0xc3b   : > { %v17785_v52 = vcombine.high %v17653_v33, %v17657_v7  ;;  %v17701_v61 = vld [vmem:[%s29161_s4 + $0x5d8] sm:$0xff] }
 0xc3d   : > { %8829 = vmatpush1.bf16.msra.mxu1 %v17852_v11  ;;  %9684 = vmatpush1.bf16.msra.mxu0 %v17982_v20  ;;  %v18036_v11 = vld [vmem:[%s29161_s4 + $0x830] sm:$0xff]  ;;  %v17784_v20 = vcombine.low %v17653_v33, %v17657_v7  ;;  %v17824_v33 = vcombine.low %v17693_v46, %v17697_v16 }
 0xc3e   : > { %8830 = vmatprep.subr.bf16.mxu1 %v17861_v37  ;;  %9685 = vmatprep.subr.bf16.mxu0 %v17991_v4  ;;  %v17793_v37 = vcombine.high %v17661_v24, %v17665_v41  ;;  %v18163_v4 = vcombine.high %v18032_v15, %v18036_v11  ;;  %v17709_v24 = vld [vmem:[%s29161_s4 + $0x618] sm:$0xff] }
 0xc3f   : > { %v17713_v41 = vld [vmem:[%s29161_s4 + $0x638] sm:$0xff] }
 0xc41   : > { %8831 = vmatpush1.bf16.msra.mxu1 %v17860_v54  ;;  %9686 = vmatpush1.bf16.msra.mxu0 %v17990_v49  ;;  %v18026_v54 = vld [vmem:[%s29159_s2 + $0xe0] sm:$0xff]  ;;  %v18162_v49 = vcombine.low %v18032_v15, %v18036_v11  ;;  %v18080_v15 = vld [vmem:[%s29161_s4 + $0x990] sm:$0xff] }
 0xc42   : > { %8832 = vmatprep.subr.bf16.mxu1 %v17869_v39  ;;  %9687 = vmatprep.subr.bf16.mxu0 %v17999_v30  ;;  %v17801_v39 = vcombine.high %v17669_v0, %v17673_v6  ;;  %v18084_v11 = vld [vmem:[%s29161_s4 + $0x9b0] sm:$0xff] }
 0xc45   : > { %8833 = vmatpush1.bf16.msra.mxu1 %v17868_v26  ;;  %9688 = vmatpush1.bf16.msra.mxu0 %v17998_v22  ;;  %v17800_v26 = vcombine.low %v17669_v0, %v17673_v6  ;;  %v18027_v22 = vld [vmem:[%s29159_s2 + $0xe8] sm:$0xff]  ;;  %v18211_v0 = vcombine.high %v18080_v15, %v18084_v11  ;;  %v17717_v6 = vld [vmem:[%s29161_s4 + $0x658] sm:$0xff] }
 0xc46   : > { %8834 = vmatprep.subr.bf16.mxu1 %v17877_v10  ;;  %9689 = vmatprep.subr.bf16.mxu0 %v18007_v48  ;;  %v17809_v48 = vcombine.high %v17677_v43, %v17681_v28 }
 0xc49   : > { %8835 = vmatpush1.bf16.msra.mxu1 %v17876_v18  ;;  %9690 = vmatpush1.bf16.msra.mxu0 %v18006_v9  ;;  %v18060_v18 = vld [vmem:[%s29161_s4 + $0x8f0] sm:$0xff]  ;;  %v17808_v9 = vcombine.low %v17677_v43, %v17681_v28  ;;  %v17725_v43 = vld [vmem:[%s29161_s4 + $0x698] sm:$0xff] }
 0xc4a   : > { %8836 = vmatprep.subr.bf16.mxu1 %v17885_v62  ;;  %9691 = vmatprep.subr.bf16.mxu0 %v18015_v17  ;;  %v18178_v62 = vcombine.low %v18048_v21, %v18052_v29  ;;  %v17817_v17 = vcombine.high %v17685_v8, %v17689_v5  ;;  %v18187_v57 = vcombine.high %v18056_v60, %v18060_v18  ;;  %v17729_v28 = vld [vmem:[%s29161_s4 + $0x6b8] sm:$0xff]  ;;  %v18096_v21 = vld [vmem:[%s29161_s4 + $0xa10] sm:$0xff] }
 0xc4b   : > { %v18100_v29 = vld [vmem:[%s29161_s4 + $0xa30] sm:$0xff] }
 0xc4d   : > { %8837 = vmatpush1.bf16.msra.mxu1 %v17884_v25  ;;  %9692 = vmatpush1.bf16.msra.mxu0 %v18014_v14  ;;  %v18068_v25 = vld [vmem:[%s29161_s4 + $0x930] sm:$0xff]  ;;  %v17816_v14 = vcombine.low %v17685_v8, %v17689_v5  ;;  %v17737_v8 = vld [vmem:[%s29161_s4 + $0x6f8] sm:$0xff] }
 0xc4e   : > { %8838 = vmatprep.subr.bf16.mxu1 %v17893_v27  ;;  %9693 = vmatprep.subr.bf16.mxu0 %v18023_v2  ;;  %v18186_v27 = vcombine.low %v18056_v60, %v18060_v18  ;;  %v17825_v2 = vcombine.high %v17693_v46, %v17697_v16  ;;  %v18195_v32 = vcombine.high %v18064_v1, %v18068_v25  ;;  %v18104_v5 = vld [vmem:[%s29161_s4 + $0xa50] sm:$0xff]  ;;  %v17745_v46 = vld [vmem:[%s29161_s4 + $0x738] sm:$0xff] }
 0xc4f   : > { %v18194_v7 = vcombine.low %v18064_v1, %v18068_v25  ;;  %v18108_v60 = vld [vmem:[%s29161_s4 + $0xa70] sm:$0xff]  ;;  %v17856_v18 = vcombine.low %v17725_v43, %v17729_v28 }
 0xc50   : > { %v18112_v16 = vld [vmem:[%s29161_s4 + $0xa90] sm:$0xff] }
 0xc51   : > { %8839 = vmatpush1.bf16.msra.mxu1 %v17892_v59  ;;  %9694 = vmatpush1.bf16.msra.mxu0 %v18022_v58  ;;  %v17705_v59 = vld [vmem:[%s29161_s4 + $0x5f8] sm:$0xff]  ;;  %v18072_v58 = vld [vmem:[%s29161_s4 + $0x950] sm:$0xff] }
 0xc52   : > { %21081 = vmatprep.subr.bf16.mxu0 %v25379_v19  ;;  %8894 = vmatprep.subr.bf16.mxu1 %v17777_v47  ;;  %v18076_v47 = vld [vmem:[%s29161_s4 + $0x970] sm:$0xff] }
 0xc53   : > { %v18116_v1 = vld [vmem:[%s29161_s4 + $0xab0] sm:$0xff] }
 0xc54   : > { %8841 = vmatmul.mubr.bf16.vlgmr.msra.gmra.mrb[52].mxu1 %v25545_v45  ;;  %9696 = vmatmul.mubr.bf16.vlgmr.msra.gmra.mrb[92].mxu0 %v25538_v40 }
 0xc55   : > { %8895 = vmatpush1.bf16.msra.mxu1 %v17776_v53  ;;  %8926 = vmatprep.mubr.bf16.mxu1 %v25556_v31  ;;  %v18040_v31 = vld [vmem:[%s29161_s4 + $0x850] sm:$0xff]  ;;  %v17833_v53 = vcombine.high %v17701_v61, %v17705_v59 }
 0xc56   : > { %21083 = vmatpush1.bf16.msra.mxu0 %v25377_v3  ;;  %8896 = vmatprep.subr.bf16.mxu1 %v17785_v52  ;;  %v18171_v30 = vcombine.high %v18040_v31, %v18044_v12  ;;  %v18170_v10 = vcombine.low %v18040_v31, %v18044_v12  ;;  %v18203_v52 = vcombine.high %v18072_v58, %v18076_v47  ;;  %v17721_v31 = vld [vmem:[%s29161_s4 + $0x678] sm:$0xff]  ;;  %v18088_v12 = vld [vmem:[%s29161_s4 + $0x9d0] sm:$0xff] }
 0xc57   : > { %21085 = vmatprep.subr.bf16.mxu0 %v25385_v44  ;;  %9822 = vmatprep.mubr.f32.mxu0 %v29248_v51 }
 0xc59   : > { %8897 = vmatpush1.bf16.msra.mxu1 %v17784_v20  ;;  %v17832_v20 = vcombine.low %v17701_v61, %v17705_v59  ;;  %v17753_v61 = vld [vmem:[%s29161_s4 + $0x778] sm:$0xff]  ;;  %v18120_v59 = vld [vmem:[%s29161_s4 + $0xad0] sm:$0xff] }
 0xc5a   : > { %21087 = vmatpush1.bf16.msra.mxu0 %v25383_v50  ;;  %8898 = vmatprep.subr.bf16.mxu1 %v17793_v37  ;;  %v18202_v37 = vcombine.low %v18072_v58, %v18076_v47  ;;  %v18124_v58 = vld [vmem:[%s29161_s4 + $0xaf0] sm:$0xff] }
 0xc5b   : > { %10692 = vmatprep.subr.bf16.mxu0 %v18163_v4  ;;  %v17841_v4 = vcombine.high %v17709_v24, %v17713_v41 }
 0xc5d   : > { %18028 = vmatmul.mubr.msk.f32.vlgmr.msra.gmra.mrb[90].mxu0 %vm29232_vm3, %v18026_v54  ;;  %8899 = vmatpush1.bf16.msra.mxu1 %v17792_v34  ;;  %v18092_v34 = vld [vmem:[%s29161_s4 + $0x9f0] sm:$0xff]  ;;  %v17840_v54 = vcombine.low %v17709_v24, %v17713_v41  ;;  %v17761_v24 = vld [vmem:[%s29161_s4 + $0x7b8] sm:$0xff] }
 0xc5e   : > { %10693 = vmatpush1.bf16.msra.mxu0 %v18162_v49  ;;  %9828 = vmatprep.mubr.f32.mxu0 %v29248_v51  ;;  %v18210_v49 = vcombine.low %v18080_v15, %v18084_v11  ;;  %v18128_v41 = vld [vmem:[%s29161_s4 + $0xb10] sm:$0xff] }
 0xc5f   : > { %8900 = vmatprep.subr.bf16.mxu1 %v17801_v39  ;;  %10694 = vmatprep.subr.bf16.mxu0 %v18171_v30  ;;  %v17849_v39 = vcombine.high %v17717_v6, %v17721_v31  ;;  %v18219_v30 = vcombine.high %v18088_v12, %v18092_v34  ;;  %v18132_v15 = vld [vmem:[%s29161_s4 + $0xb30] sm:$0xff] }
 0xc61   : > { %18029 = vmatmul.mubr.msk.f32.gmra.mrb[96].mxu0 %vm29232_vm3, %v18027_v22  ;;  %8901 = vmatpush1.bf16.msra.mxu1 %v17800_v26  ;;  %v17848_v26 = vcombine.low %v17717_v6, %v17721_v31  ;;  %v18218_v22 = vcombine.low %v18088_v12, %v18092_v34  ;;  %v17769_v6 = vld [vmem:[%s29161_s4 + $0x7f8] sm:$0xff]  ;;  %v18136_v31 = vld [vmem:[%s29161_s4 + $0xb50] sm:$0xff] }
 0xc62   : > { %10695 = vmatpush1.bf16.msra.mxu0 %v18170_v10  ;;  %8902 = vmatprep.subr.bf16.mxu1 %v17809_v48  ;;  %v17857_v10 = vcombine.high %v17725_v43, %v17729_v28  ;;  %v18227_v48 = vcombine.high %v18096_v21, %v18100_v29  ;;  %v18140_v12 = vld [vmem:[%s29161_s4 + $0xb70] sm:$0xff]  ;;  %v7784_v43 = vld [vmem:[%s29161_s4 + $0x20] sm:$0xff] }
 0xc63   : > { %10696 = vmatprep.subr.bf16.mxu0 %v18179_v35  ;;  %v17733_v35 = vld [vmem:[%s29161_s4 + $0x6d8] sm:$0xff]  ;;  %v18144_v28 = vld [vmem:[%s29161_s4 + $0xb90] sm:$0xff] }
 0xc64   : > { %v17864_v25 = vcombine.low %v17733_v35, %v17737_v8 }
 0xc65   : > { %8903 = vmatpush1.bf16.msra.mxu1 %v17808_v9  ;;  %v18226_v9 = vcombine.low %v18096_v21, %v18100_v29  ;;  %v18148_v21 = vld [vmem:[%s29161_s4 + $0xbb0] sm:$0xff] }
 0xc66   : > { %10697 = vmatpush1.bf16.msra.mxu0 %v18178_v62  ;;  %8904 = vmatprep.subr.bf16.mxu1 %v17817_v17  ;;  %v17865_v62 = vcombine.high %v17733_v35, %v17737_v8  ;;  %v18235_v17 = vcombine.high %v18104_v5, %v18108_v60  ;;  %v7792_v35 = vld [vmem:[%s29161_s4 + $0x60] sm:$0xff]  ;;  %v18152_v8 = vld [vmem:[%s29161_s4 + $0xbd0] sm:$0xff] }
 0xc67   : > { %10698 = vmatprep.subr.bf16.mxu0 %v18187_v57  ;;  %v17741_v57 = vld [vmem:[%s29161_s4 + $0x718] sm:$0xff] }
 0xc68   : > { %v17872_v47 = vcombine.low %v17741_v57, %v17745_v46 }
 0xc69   : > { %8905 = vmatpush1.bf16.msra.mxu1 %v17816_v14  ;;  %v18234_v14 = vcombine.low %v18104_v5, %v18108_v60  ;;  %v18156_v5 = vld [vmem:[%s29161_s4 + $0xbf0] sm:$0xff] }
 0xc6a   : > { %10699 = vmatpush1.bf16.msra.mxu0 %v18186_v27  ;;  %8906 = vmatprep.subr.bf16.mxu1 %v17825_v2  ;;  %v17873_v27 = vcombine.high %v17741_v57, %v17745_v46  ;;  %v18243_v2 = vcombine.high %v18112_v16, %v18116_v1  ;;  %v7800_v57 = vld [vmem:[%s29161_s4 + $0xa0] sm:$0xff] }
 0xc6b   : > { %10700 = vmatprep.subr.bf16.mxu0 %v18195_v32  ;;  %v17749_v32 = vld [vmem:[%s29161_s4 + $0x758] sm:$0xff] }
 0xc6c   : > { %v17880_v11 = vcombine.low %v17749_v32, %v17753_v61 }
 0xc6d   : > { %8907 = vmatpush1.bf16.msra.mxu1 %v17824_v33  ;;  %v18242_v33 = vcombine.low %v18112_v16, %v18116_v1  ;;  %v18282_v16 = vcombine.low %v18152_v8, %v18156_v5 }
 0xc6e   : > { %10701 = vmatpush1.bf16.msra.mxu0 %v18194_v7  ;;  %8908 = vmatprep.subr.bf16.mxu1 %v17833_v53  ;;  %v17881_v7 = vcombine.high %v17749_v32, %v17753_v61  ;;  %v18251_v53 = vcombine.high %v18120_v59, %v18124_v58  ;;  %v7816_v32 = vld [vmem:[%s29161_s4 + $0x120] sm:$0xff] }
 0xc6f   : > { %10702 = vmatprep.subr.bf16.mxu0 %v18203_v52  ;;  %v17757_v52 = vld [vmem:[%s29161_s4 + $0x798] sm:$0xff] }
 0xc70   : > { %v17888_v34 = vcombine.low %v17757_v52, %v17761_v24 }
 0xc71   : > { %8909 = vmatpush1.bf16.msra.mxu1 %v17832_v20  ;;  %v18250_v20 = vcombine.low %v18120_v59, %v18124_v58  ;;  %v7820_v58 = vld [vmem:[%s29161_s4 + $0x140] sm:$0xff] }
 0xc72   : > { %10703 = vmatpush1.bf16.msra.mxu0 %v18202_v37  ;;  %8910 = vmatprep.subr.bf16.mxu1 %v17841_v4  ;;  %v17889_v37 = vcombine.high %v17757_v52, %v17761_v24  ;;  %v18259_v4 = vcombine.high %v18128_v41, %v18132_v15 }
 0xc73   : > { %10704 = vmatprep.subr.bf16.mxu0 %v18211_v0  ;;  %v17765_v0 = vld [vmem:[%s29161_s4 + $0x7d8] sm:$0xff] }
 0xc74   : > { %v17896_v29 = vcombine.low %v17765_v0, %v17769_v6 }
 0xc75   : > { %8911 = vmatpush1.bf16.msra.mxu1 %v17840_v54  ;;  %v18258_v54 = vcombine.low %v18128_v41, %v18132_v15  ;;  %v7836_v41 = vld [vmem:[%s29161_s4 + $0x1c0] sm:$0xff] }
 0xc76   : > { %10705 = vmatpush1.bf16.msra.mxu0 %v18210_v49  ;;  %8912 = vmatprep.subr.bf16.mxu1 %v17849_v39  ;;  %v17897_v49 = vcombine.high %v17765_v0, %v17769_v6  ;;  %v18267_v39 = vcombine.high %v18136_v31, %v18140_v12  ;;  %v7840_v15 = vld [vmem:[%s29161_s4 + $0x1e0] sm:$0xff] }
 0xc77   : > { %10706 = vmatprep.subr.bf16.mxu0 %v18219_v30  ;;  %v7780_v30 = vld [vmem:[%s29161_s4] sm:$0xff]  ;;  %v17954_v0 = vcombine.low %v7836_v41, %v7840_v15 }
 0xc78   : > { %v17898_v60 = vcombine.low %v7780_v30, %v7784_v43 }
 0xc79   : > { %8913 = vmatpush1.bf16.msra.mxu1 %v17848_v26  ;;  %v18266_v26 = vcombine.low %v18136_v31, %v18140_v12  ;;  %v7852_v31 = vld [vmem:[%s29161_s4 + $0x240] sm:$0xff] }
 0xc7a   : > { %10707 = vmatpush1.bf16.msra.mxu0 %v18218_v22  ;;  %8914 = vmatprep.subr.bf16.mxu1 %v17857_v10  ;;  %v17899_v22 = vcombine.high %v7780_v30, %v7784_v43  ;;  %v18275_v10 = vcombine.high %v18144_v28, %v18148_v21  ;;  %v7856_v12 = vld [vmem:[%s29161_s4 + $0x260] sm:$0xff] }
 0xc7b   : > { %10708 = vmatprep.subr.bf16.mxu0 %v18227_v48  ;;  %v7788_v48 = vld [vmem:[%s29161_s4 + $0x40] sm:$0xff]  ;;  %v17970_v30 = vcombine.low %v7852_v31, %v7856_v12 }
 0xc7c   : > { %v17906_v46 = vcombine.low %v7788_v48, %v7792_v35 }
 0xc7d   : > { %8915 = vmatpush1.bf16.msra.mxu1 %v17856_v18  ;;  %v18274_v18 = vcombine.low %v18144_v28, %v18148_v21  ;;  %v7868_v28 = vld [vmem:[%s29161_s4 + $0x2c0] sm:$0xff] }
 0xc7e   : > { %10709 = vmatpush1.bf16.msra.mxu0 %v18226_v9  ;;  %8916 = vmatprep.subr.bf16.mxu1 %v17865_v62  ;;  %v17907_v9 = vcombine.high %v7788_v48, %v7792_v35  ;;  %v18283_v62 = vcombine.high %v18152_v8, %v18156_v5  ;;  %v7872_v21 = vld [vmem:[%s29161_s4 + $0x2e0] sm:$0xff] }
 0xc7f   : > { %10710 = vmatprep.subr.bf16.mxu0 %v18235_v17  ;;  %v7796_v17 = vld [vmem:[%s29161_s4 + $0x80] sm:$0xff]  ;;  %v17986_v48 = vcombine.low %v7868_v28, %v7872_v21 }
 0xc80   : > { %v17915_v1 = vcombine.high %v7796_v17, %v7800_v57  ;;  %v7884_v8 = vld [vmem:[%s29161_s4 + $0x340] sm:$0xff] }
 0xc81   : > { %8917 = vmatpush1.bf16.msra.mxu1 %v17864_v25  ;;  %v7804_v25 = vld [vmem:[%s29161_s4 + $0xc0] sm:$0xff] }
 0xc82   : > { %10711 = vmatpush1.bf16.msra.mxu0 %v18234_v14  ;;  %8918 = vmatprep.subr.bf16.mxu1 %v17873_v27  ;;  %v7808_v14 = vld [vmem:[%s29161_s4 + $0xe0] sm:$0xff]  ;;  %v17914_v27 = vcombine.low %v7796_v17, %v7800_v57 }
 0xc83   : > { %10712 = vmatprep.subr.bf16.mxu0 %v18243_v2  ;;  %v7812_v2 = vld [vmem:[%s29161_s4 + $0x100] sm:$0xff]  ;;  %v17922_v61 = vcombine.low %v7804_v25, %v7808_v14 }
 0xc84   : > { %v17931_v59 = vcombine.high %v7812_v2, %v7816_v32  ;;  %v7888_v5 = vld [vmem:[%s29161_s4 + $0x360] sm:$0xff] }
 0xc85   : > { %8919 = vmatpush1.bf16.msra.mxu1 %v17872_v47  ;;  %v17930_v47 = vcombine.low %v7812_v2, %v7816_v32  ;;  %v18002_v17 = vcombine.low %v7884_v8, %v7888_v5  ;;  %v7789_v32 = vld [vmem:[%s29161_s4 + $0x48] sm:$0xff] }
 0xc86   : > { %10713 = vmatpush1.bf16.msra.mxu0 %v18242_v33  ;;  %8920 = vmatprep.subr.bf16.mxu1 %v17881_v7  ;;  %v7828_v7 = vld [vmem:[%s29161_s4 + $0x180] sm:$0xff] }
 0xc87   : > { %10714 = vmatprep.subr.bf16.mxu0 %v18251_v53  ;;  %v7832_v53 = vld [vmem:[%s29161_s4 + $0x1a0] sm:$0xff] }
 0xc88   : > { %v17947_v24 = vcombine.high %v7828_v7, %v7832_v53 }
 0xc89   : > { %8921 = vmatpush1.bf16.msra.mxu1 %v17880_v11  ;;  %v17946_v11 = vcombine.low %v7828_v7, %v7832_v53  ;;  %v7805_v53 = vld [vmem:[%s29161_s4 + $0xc8] sm:$0xff] }
 0xc8a   : > { %10715 = vmatpush1.bf16.msra.mxu0 %v18250_v20  ;;  %8922 = vmatprep.subr.bf16.mxu1 %v17889_v37  ;;  %v17955_v20 = vcombine.high %v7836_v41, %v7840_v15  ;;  %v7844_v37 = vld [vmem:[%s29161_s4 + $0x200] sm:$0xff]  ;;  %v7813_v15 = vld [vmem:[%s29161_s4 + $0x108] sm:$0xff] }
 0xc8b   : > { %10716 = vmatprep.subr.bf16.mxu0 %v18259_v4  ;;  %v7848_v4 = vld [vmem:[%s29161_s4 + $0x220] sm:$0xff] }
 0xc8c   : > { %v17963_v6 = vcombine.high %v7844_v37, %v7848_v4 }
 0xc8d   : > { %8923 = vmatpush1.bf16.msra.mxu1 %v17888_v34  ;;  %v17962_v34 = vcombine.low %v7844_v37, %v7848_v4  ;;  %v7821_v4 = vld [vmem:[%s29161_s4 + $0x148] sm:$0xff] }
 0xc8e   : > { %10717 = vmatpush1.bf16.msra.mxu0 %v18258_v54  ;;  %8924 = vmatprep.subr.bf16.mxu1 %v17897_v49  ;;  %v17971_v54 = vcombine.high %v7852_v31, %v7856_v12  ;;  %v7860_v49 = vld [vmem:[%s29161_s4 + $0x280] sm:$0xff]  ;;  %v7829_v12 = vld [vmem:[%s29161_s4 + $0x188] sm:$0xff] }
 0xc8f   : > { %10718 = vmatprep.subr.bf16.mxu0 %v18267_v39  ;;  %v7864_v39 = vld [vmem:[%s29161_s4 + $0x2a0] sm:$0xff] }
 0xc90   : > { %v17979_v43 = vcombine.high %v7860_v49, %v7864_v39 }
 0xc91   : > { %8925 = vmatpush1.bf16.msra.mxu1 %v17896_v29  ;;  %v17978_v29 = vcombine.low %v7860_v49, %v7864_v39  ;;  %v7837_v39 = vld [vmem:[%s29161_s4 + $0x1c8] sm:$0xff] }
 0xc92   : > { %10719 = vmatpush1.bf16.msra.mxu0 %v18266_v26  ;;  %9577 = vmatprep.subr.bf16.mxu1 %v17899_v22  ;;  %v17987_v26 = vcombine.high %v7868_v28, %v7872_v21  ;;  %v7876_v22 = vld [vmem:[%s29161_s4 + $0x300] sm:$0xff]  ;;  %v7845_v21 = vld [vmem:[%s29161_s4 + $0x208] sm:$0xff] }
 0xc93   : > { %10720 = vmatprep.subr.bf16.mxu0 %v18275_v10  ;;  %v7880_v10 = vld [vmem:[%s29161_s4 + $0x320] sm:$0xff] }
 0xc94   : > { %8927 = vmatmul.mubr.bf16.vlgmr.msra.gmra.mrb[56].mxu1 %v25545_v45  ;;  %v17923_v45 = vcombine.high %v7804_v25, %v7808_v14  ;;  %v17995_v35 = vcombine.high %v7876_v22, %v7880_v10  ;;  %v7781_v14 = vld [vmem:[%s29161_s4 + $0x8] sm:$0xff] }
 0xc95   : > { %9578 = vmatpush1.bf16.msra.mxu1 %v17898_v60  ;;  %9609 = vmatprep.mubr.bf16.mxu1 %v25540_v38  ;;  %v17994_v60 = vcombine.low %v7876_v22, %v7880_v10  ;;  %v7853_v10 = vld [vmem:[%s29161_s4 + $0x248] sm:$0xff] }
 0xc96   : > { %10721 = vmatpush1.bf16.msra.mxu0 %v18274_v18  ;;  %9579 = vmatprep.subr.bf16.mxu1 %v17907_v9  ;;  %v18003_v18 = vcombine.high %v7884_v8, %v7888_v5  ;;  %v7892_v9 = vld [vmem:[%s29161_s4 + $0x380] sm:$0xff]  ;;  %v7861_v5 = vld [vmem:[%s29161_s4 + $0x288] sm:$0xff] }
 0xc97   : > { %10722 = vmatprep.subr.bf16.mxu0 %v18283_v62  ;;  %v7896_v62 = vld [vmem:[%s29161_s4 + $0x3a0] sm:$0xff] }
 0xc98   : > { %v18011_v57 = vcombine.high %v7892_v9, %v7896_v62 }
 0xc99   : > { %9580 = vmatpush1.bf16.msra.mxu1 %v17906_v46  ;;  %v7900_v46 = vld [vmem:[%s29161_s4 + $0x3c0] sm:$0xff] }
 0xc9a   : > { %10723 = vmatpush1.bf16.msra.mxu0 %v18282_v16  ;;  %9581 = vmatprep.subr.bf16.mxu1 %v17915_v1  ;;  %v7904_v16 = vld [vmem:[%s29161_s4 + $0x3e0] sm:$0xff]  ;;  %v18010_v1 = vcombine.low %v7892_v9, %v7896_v62  ;;  %v7869_v62 = vld [vmem:[%s29161_s4 + $0x2c8] sm:$0xff] }
 0xc9b   : > { %21089 = vmatprep.subr.bf16.mxu0 %v25379_v19  ;;  %v7824_v19 = vld [vmem:[%s29161_s4 + $0x160] sm:$0xff]  ;;  %v18019_v25 = vcombine.high %v7900_v46, %v7904_v16 }
 0xc9c   : > { %v17939_v33 = vcombine.high %v7820_v58, %v7824_v19  ;;  %v17938_v52 = vcombine.low %v7820_v58, %v7824_v19  ;;  %v7797_v19 = vld [vmem:[%s29161_s4 + $0x88] sm:$0xff] }
 0xc9d   : > { %9582 = vmatpush1.bf16.msra.mxu1 %v17914_v27  ;;  %v7785_v27 = vld [vmem:[%s29161_s4 + $0x28] sm:$0xff] }
 0xc9e   : > { %9583 = vmatprep.subr.bf16.mxu1 %v17923_v45  ;;  %v18018_v45 = vcombine.low %v7900_v46, %v7904_v16  ;;  %v17901_v2 = vcombine.high %v7781_v14, %v7785_v27  ;;  %v7877_v16 = vld [vmem:[%s29161_s4 + $0x308] sm:$0xff] }
 0xca1   : > { %9584 = vmatpush1.bf16.msra.mxu1 %v17922_v61  ;;  %v7793_v61 = vld [vmem:[%s29161_s4 + $0x68] sm:$0xff] }
 0xca2   : > { %9585 = vmatprep.subr.bf16.mxu1 %v17931_v59  ;;  %v17900_v59 = vcombine.low %v7781_v14, %v7785_v27  ;;  %v17909_v58 = vcombine.high %v7789_v32, %v7793_v61  ;;  %v7885_v27 = vld [vmem:[%s29161_s4 + $0x348] sm:$0xff] }
 0xca5   : > { %9586 = vmatpush1.bf16.msra.mxu1 %v17930_v47  ;;  %v7801_v47 = vld [vmem:[%s29161_s4 + $0xa8] sm:$0xff] }
 0xca6   : > { %9587 = vmatprep.subr.bf16.mxu1 %v17939_v33  ;;  %v17908_v33 = vcombine.low %v7789_v32, %v7793_v61  ;;  %v17917_v7 = vcombine.high %v7797_v19, %v7801_v47  ;;  %v7893_v61 = vld [vmem:[%s29161_s4 + $0x388] sm:$0xff] }
 0xca9   : > { %9588 = vmatpush1.bf16.msra.mxu1 %v17938_v52  ;;  %v7809_v52 = vld [vmem:[%s29161_s4 + $0xe8] sm:$0xff] }
 0xcaa   : > { %9589 = vmatprep.subr.bf16.mxu1 %v17947_v24  ;;  %v17916_v24 = vcombine.low %v7797_v19, %v7801_v47  ;;  %v17925_v41 = vcombine.high %v7805_v53, %v7809_v52  ;;  %v7901_v47 = vld [vmem:[%s29161_s4 + $0x3c8] sm:$0xff] }
 0xcad   : > { %9590 = vmatpush1.bf16.msra.mxu1 %v17946_v11  ;;  %v7817_v11 = vld [vmem:[%s29161_s4 + $0x128] sm:$0xff] }
 0xcae   : > { %9591 = vmatprep.subr.bf16.mxu1 %v17955_v20  ;;  %v17924_v20 = vcombine.low %v7805_v53, %v7809_v52  ;;  %v17933_v37 = vcombine.high %v7813_v15, %v7817_v11  ;;  %v7783_v52 = vld [vmem:[%s29161_s4 + $0x18] sm:$0xff] }
 0xcb1   : > { %9592 = vmatpush1.bf16.msra.mxu1 %v17954_v0  ;;  %v7825_v0 = vld [vmem:[%s29161_s4 + $0x168] sm:$0xff] }
 0xcb2   : > { %9593 = vmatprep.subr.bf16.mxu1 %v17963_v6  ;;  %v17932_v6 = vcombine.low %v7813_v15, %v7817_v11  ;;  %v17941_v31 = vcombine.high %v7821_v4, %v7825_v0  ;;  %v7791_v11 = vld [vmem:[%s29161_s4 + $0x58] sm:$0xff] }
 0xcb5   : > { %9594 = vmatpush1.bf16.msra.mxu1 %v17962_v34  ;;  %v7833_v34 = vld [vmem:[%s29161_s4 + $0x1a8] sm:$0xff] }
 0xcb6   : > { %9595 = vmatprep.subr.bf16.mxu1 %v17971_v54  ;;  %v17940_v54 = vcombine.low %v7821_v4, %v7825_v0  ;;  %v17949_v49 = vcombine.high %v7829_v12, %v7833_v34  ;;  %v7799_v0 = vld [vmem:[%s29161_s4 + $0x98] sm:$0xff] }
 0xcb9   : > { %9596 = vmatpush1.bf16.msra.mxu1 %v17970_v30  ;;  %v7841_v30 = vld [vmem:[%s29161_s4 + $0x1e8] sm:$0xff] }
 0xcba   : > { %9597 = vmatprep.subr.bf16.mxu1 %v17979_v43  ;;  %v17948_v43 = vcombine.low %v7829_v12, %v7833_v34  ;;  %v17957_v28 = vcombine.high %v7837_v39, %v7841_v30  ;;  %v7807_v34 = vld [vmem:[%s29161_s4 + $0xd8] sm:$0xff] }
 0xcbd   : > { %9598 = vmatpush1.bf16.msra.mxu1 %v17978_v29  ;;  %v7849_v29 = vld [vmem:[%s29161_s4 + $0x228] sm:$0xff] }
 0xcbe   : > { %9599 = vmatprep.subr.bf16.mxu1 %v17987_v26  ;;  %v17956_v26 = vcombine.low %v7837_v39, %v7841_v30  ;;  %v17965_v22 = vcombine.high %v7845_v21, %v7849_v29  ;;  %v7815_v30 = vld [vmem:[%s29161_s4 + $0x118] sm:$0xff] }
 0xcc1   : > { %9600 = vmatpush1.bf16.msra.mxu1 %v17986_v48  ;;  %v7857_v48 = vld [vmem:[%s29161_s4 + $0x268] sm:$0xff] }
 0xcc2   : > { %9601 = vmatprep.subr.bf16.mxu1 %v17995_v35  ;;  %v17964_v35 = vcombine.low %v7845_v21, %v7849_v29  ;;  %v17973_v8 = vcombine.high %v7853_v10, %v7857_v48  ;;  %v7823_v21 = vld [vmem:[%s29161_s4 + $0x158] sm:$0xff] }
 0xcc3   : > { %v7827_v29 = vld [vmem:[%s29161_s4 + $0x178] sm:$0xff] }
 0xcc5   : > { %9602 = vmatpush1.bf16.msra.mxu1 %v17994_v60  ;;  %v7865_v60 = vld [vmem:[%s29161_s4 + $0x2a8] sm:$0xff] }
 0xcc6   : > { %9603 = vmatprep.subr.bf16.mxu1 %v18003_v18  ;;  %v17972_v18 = vcombine.low %v7853_v10, %v7857_v48  ;;  %v17981_v9 = vcombine.high %v7861_v5, %v7865_v60  ;;  %v7831_v10 = vld [vmem:[%s29161_s4 + $0x198] sm:$0xff] }
 0xcc7   : > { %v7835_v48 = vld [vmem:[%s29161_s4 + $0x1b8] sm:$0xff] }
 0xcc9   : > { %9604 = vmatpush1.bf16.msra.mxu1 %v18002_v17  ;;  %v7873_v17 = vld [vmem:[%s29161_s4 + $0x2e8] sm:$0xff] }
 0xcca   : > { %9605 = vmatprep.subr.bf16.mxu1 %v18011_v57  ;;  %v17980_v57 = vcombine.low %v7861_v5, %v7865_v60  ;;  %v17989_v46 = vcombine.high %v7869_v62, %v7873_v17  ;;  %v7839_v5 = vld [vmem:[%s29161_s4 + $0x1d8] sm:$0xff] }
 0xccb   : > { %v7843_v60 = vld [vmem:[%s29161_s4 + $0x1f8] sm:$0xff] }
 0xccd   : > { %9606 = vmatpush1.bf16.msra.mxu1 %v18010_v1  ;;  %v7881_v1 = vld [vmem:[%s29161_s4 + $0x328] sm:$0xff] }
 0xcce   : > { %9607 = vmatprep.subr.bf16.mxu1 %v18019_v25  ;;  %v17988_v25 = vcombine.low %v7869_v62, %v7873_v17  ;;  %v17997_v14 = vcombine.high %v7877_v16, %v7881_v1  ;;  %v7847_v62 = vld [vmem:[%s29161_s4 + $0x218] sm:$0xff] }
 0xccf   : > { %v7851_v17 = vld [vmem:[%s29161_s4 + $0x238] sm:$0xff] }
 0xcd1   : > { %9608 = vmatpush1.bf16.msra.mxu1 %v18018_v45  ;;  %v7889_v45 = vld [vmem:[%s29161_s4 + $0x368] sm:$0xff] }
 0xcd2   : > { %9620 = vmatprep.subr.bf16.mxu1 %v17901_v2  ;;  %v17996_v2 = vcombine.low %v7877_v16, %v7881_v1  ;;  %v18005_v32 = vcombine.high %v7885_v27, %v7889_v45  ;;  %v7855_v16 = vld [vmem:[%s29161_s4 + $0x258] sm:$0xff] }
 0xcd3   : > { %v7859_v1 = vld [vmem:[%s29161_s4 + $0x278] sm:$0xff] }
 0xcd4   : > { %9610 = vmatmul.mubr.bf16.vlgmr.msra.gmra.mrb[48].mxu1 %v25538_v40 }
 0xcd5   : > { %9621 = vmatpush1.bf16.msra.mxu1 %v17900_v59  ;;  %9652 = vmatprep.mubr.bf16.mxu1 %v25540_v38  ;;  %v7897_v59 = vld [vmem:[%s29161_s4 + $0x3a8] sm:$0xff] }
 0xcd6   : > { %9622 = vmatprep.subr.bf16.mxu1 %v17909_v58  ;;  %v18004_v58 = vcombine.low %v7885_v27, %v7889_v45  ;;  %v18013_v19 = vcombine.high %v7893_v61, %v7897_v59  ;;  %v17968_v27 = vcombine.low %v7847_v62, %v7851_v17  ;;  %v17977_v45 = vcombine.high %v7855_v16, %v7859_v1 }
 0xcd9   : > { %9623 = vmatpush1.bf16.msra.mxu1 %v17908_v33  ;;  %v7905_v33 = vld [vmem:[%s29161_s4 + $0x3e8] sm:$0xff] }
 0xcda   : > { %9624 = vmatprep.subr.bf16.mxu1 %v17917_v7  ;;  %v18012_v7 = vcombine.low %v7893_v61, %v7897_v59  ;;  %v18021_v53 = vcombine.high %v7901_v47, %v7905_v33 }
 0xcdd   : > { %9625 = vmatpush1.bf16.msra.mxu1 %v17916_v24  ;;  %v7787_v24 = vld [vmem:[%s29161_s4 + $0x38] sm:$0xff] }
 0xcde   : > { %9626 = vmatprep.subr.bf16.mxu1 %v17925_v41  ;;  %v18020_v41 = vcombine.low %v7901_v47, %v7905_v33  ;;  %v17905_v15 = vcombine.high %v7783_v52, %v7787_v24 }
 0xce1   : > { %9627 = vmatpush1.bf16.msra.mxu1 %v17924_v20  ;;  %v7795_v20 = vld [vmem:[%s29161_s4 + $0x78] sm:$0xff] }
 0xce2   : > { %9628 = vmatprep.subr.bf16.mxu1 %v17933_v37  ;;  %v17904_v37 = vcombine.low %v7783_v52, %v7787_v24  ;;  %v17913_v4 = vcombine.high %v7791_v11, %v7795_v20 }
 0xce5   : > { %9629 = vmatpush1.bf16.msra.mxu1 %v17932_v6  ;;  %v7803_v6 = vld [vmem:[%s29161_s4 + $0xb8] sm:$0xff] }
 0xce6   : > { %9630 = vmatprep.subr.bf16.mxu1 %v17941_v31  ;;  %v17912_v31 = vcombine.low %v7791_v11, %v7795_v20  ;;  %v17921_v12 = vcombine.high %v7799_v0, %v7803_v6  ;;  %v7887_v20 = vld [vmem:[%s29161_s4 + $0x358] sm:$0xff] }
 0xce9   : > { %9631 = vmatpush1.bf16.msra.mxu1 %v17940_v54  ;;  %v7811_v54 = vld [vmem:[%s29161_s4 + $0xf8] sm:$0xff] }
 0xcea   : > { %9632 = vmatprep.subr.bf16.mxu1 %v17949_v49  ;;  %v17920_v49 = vcombine.low %v7799_v0, %v7803_v6  ;;  %v17929_v39 = vcombine.high %v7807_v34, %v7811_v54  ;;  %v7895_v6 = vld [vmem:[%s29161_s4 + $0x398] sm:$0xff] }
 0xced   : > { %9633 = vmatpush1.bf16.msra.mxu1 %v17948_v43  ;;  %v17928_v43 = vcombine.low %v7807_v34, %v7811_v54  ;;  %v7903_v54 = vld [vmem:[%s29161_s4 + $0x3d8] sm:$0xff] }
 0xcee   : > { %9634 = vmatprep.subr.bf16.mxu1 %v17957_v28 }
 0xcf1   : > { %9635 = vmatpush1.bf16.msra.mxu1 %v17956_v26 }
 0xcf2   : > { %9636 = vmatprep.subr.bf16.mxu1 %v17965_v22  ;;  %v17945_v22 = vcombine.high %v7823_v21, %v7827_v29 }
 0xcf5   : > { %9637 = vmatpush1.bf16.msra.mxu1 %v17964_v35  ;;  %v17944_v35 = vcombine.low %v7823_v21, %v7827_v29  ;;  %v18038_v29 = vld [vmem:[%s29161_s4 + $0x840] sm:$0xff] }
 0xcf6   : > { %9638 = vmatprep.subr.bf16.mxu1 %v17973_v8  ;;  %v17953_v8 = vcombine.high %v7831_v10, %v7835_v48 }
 0xcf9   : > { %9639 = vmatpush1.bf16.msra.mxu1 %v17972_v18  ;;  %v17952_v18 = vcombine.low %v7831_v10, %v7835_v48  ;;  %v18046_v48 = vld [vmem:[%s29161_s4 + $0x880] sm:$0xff] }
 0xcfa   : > { %9640 = vmatprep.subr.bf16.mxu1 %v17981_v9  ;;  %v17961_v9 = vcombine.high %v7839_v5, %v7843_v60 }
 0xcfd   : > { %9641 = vmatpush1.bf16.msra.mxu1 %v17980_v57  ;;  %v17960_v57 = vcombine.low %v7839_v5, %v7843_v60  ;;  %v18054_v60 = vld [vmem:[%s29161_s4 + $0x8c0] sm:$0xff] }
 0xcfe   : > { %9642 = vmatprep.subr.bf16.mxu1 %v17989_v46  ;;  %v17969_v46 = vcombine.high %v7847_v62, %v7851_v17  ;;  %v18296_v62 = vld [vmem:[%s29161_s4 + $0xc30] sm:$0xff] }
 0xd01   : > { %9643 = vmatpush1.bf16.msra.mxu1 %v17988_v25 }
 0xd02   : > { %9644 = vmatprep.subr.bf16.mxu1 %v17997_v14 }
 0xd05   : > { %9645 = vmatpush1.bf16.msra.mxu1 %v17996_v2  ;;  %v7863_v2 = vld [vmem:[%s29161_s4 + $0x298] sm:$0xff] }
 0xd06   : > { %9646 = vmatprep.subr.bf16.mxu1 %v18005_v32  ;;  %v7867_v32 = vld [vmem:[%s29161_s4 + $0x2b8] sm:$0xff] }
 0xd07   : > { %v17985_v33 = vcombine.high %v7863_v2, %v7867_v32  ;;  %v17984_v52 = vcombine.low %v7863_v2, %v7867_v32 }
 0xd09   : > { %9647 = vmatpush1.bf16.msra.mxu1 %v18004_v58 }
 0xd0a   : > { %9648 = vmatprep.subr.bf16.mxu1 %v18013_v19  ;;  %v17976_v19 = vcombine.low %v7855_v16, %v7859_v1  ;;  %v18062_v16 = vld [vmem:[%s29161_s4 + $0x900] sm:$0xff] }
 0xd0b   : > { %v18066_v1 = vld [vmem:[%s29161_s4 + $0x920] sm:$0xff] }
 0xd0d   : > { %9649 = vmatpush1.bf16.msra.mxu1 %v18012_v7  ;;  %v7871_v7 = vld [vmem:[%s29161_s4 + $0x2d8] sm:$0xff] }
 0xd0e   : > { %9650 = vmatprep.subr.bf16.mxu1 %v18021_v53  ;;  %v7875_v53 = vld [vmem:[%s29161_s4 + $0x2f8] sm:$0xff] }
 0xd0f   : > { %v17993_v24 = vcombine.high %v7871_v7, %v7875_v53  ;;  %v17992_v11 = vcombine.low %v7871_v7, %v7875_v53  ;;  %v18312_v7 = vld [vmem:[%s29161_s4 + $0xcb0] sm:$0xff] }
 0xd11   : > { %9651 = vmatpush1.bf16.msra.mxu1 %v18020_v41  ;;  %v7879_v41 = vld [vmem:[%s29161_s4 + $0x318] sm:$0xff] }
 0xd12   : > { %9706 = vmatprep.subr.bf16.mxu1 %v17905_v15  ;;  %v7883_v15 = vld [vmem:[%s29161_s4 + $0x338] sm:$0xff] }
 0xd14   : > { %9653 = vmatmul.mubr.bf16.vlgmr.msra.gmra.mrb[52].mxu1 %v25538_v40 }
 0xd15   : > { %9707 = vmatpush1.bf16.msra.mxu1 %v17904_v37  ;;  %9738 = vmatprep.mubr.bf16.mxu1 %v25540_v38  ;;  %v7819_v38 = vld [vmem:[%s29161_s4 + $0x138] sm:$0xff] }
 0xd16   : > { %9708 = vmatprep.subr.bf16.mxu1 %v17913_v4  ;;  %v17937_v28 = vcombine.high %v7815_v30, %v7819_v38  ;;  %v17936_v26 = vcombine.low %v7815_v30, %v7819_v38  ;;  %v7891_v37 = vld [vmem:[%s29161_s4 + $0x378] sm:$0xff]  ;;  %v18000_v4 = vcombine.low %v7879_v41, %v7883_v15  ;;  %v18030_v38 = vld [vmem:[%s29161_s4 + $0x800] sm:$0xff] }
 0xd17   : > { %v18009_v0 = vcombine.high %v7887_v20, %v7891_v37 }
 0xd19   : > { %9709 = vmatpush1.bf16.msra.mxu1 %v17912_v31  ;;  %v7899_v31 = vld [vmem:[%s29161_s4 + $0x3b8] sm:$0xff] }
 0xd1a   : > { %9710 = vmatprep.subr.bf16.mxu1 %v17921_v12  ;;  %v18008_v12 = vcombine.low %v7887_v20, %v7891_v37  ;;  %v18017_v34 = vcombine.high %v7895_v6, %v7899_v31 }
 0xd1d   : > { %9711 = vmatpush1.bf16.msra.mxu1 %v17920_v49  ;;  %v7907_v49 = vld [vmem:[%s29161_s4 + $0x3f8] sm:$0xff] }
 0xd1e   : > { %9712 = vmatprep.subr.bf16.mxu1 %v17929_v39  ;;  %v18016_v39 = vcombine.low %v7895_v6, %v7899_v31  ;;  %v18025_v30 = vcombine.high %v7903_v54, %v7907_v49  ;;  %v18324_v31 = vld [vmem:[%s29161_s4 + $0xd10] sm:$0xff] }
 0xd21   : > { %9713 = vmatpush1.bf16.msra.mxu1 %v17928_v43  ;;  %v18034_v43 = vld [vmem:[%s29161_s4 + $0x820] sm:$0xff] }
 0xd22   : > { %9714 = vmatprep.subr.bf16.mxu1 %v17937_v28  ;;  %v18024_v28 = vcombine.low %v7903_v54, %v7907_v49  ;;  %v18159_v21 = vcombine.high %v18030_v38, %v18034_v43 }
 0xd25   : > { %9715 = vmatpush1.bf16.msra.mxu1 %v17936_v26  ;;  %v18042_v26 = vld [vmem:[%s29161_s4 + $0x860] sm:$0xff] }
 0xd26   : > { %9716 = vmatprep.subr.bf16.mxu1 %v17945_v22  ;;  %v18158_v22 = vcombine.low %v18030_v38, %v18034_v43  ;;  %v18167_v10 = vcombine.high %v18038_v29, %v18042_v26  ;;  %v18332_v43 = vld [vmem:[%s29161_s4 + $0xd50] sm:$0xff] }
 0xd29   : > { %9717 = vmatpush1.bf16.msra.mxu1 %v17944_v35  ;;  %v18050_v35 = vld [vmem:[%s29161_s4 + $0x8a0] sm:$0xff] }
 0xd2a   : > { %9718 = vmatprep.subr.bf16.mxu1 %v17953_v8  ;;  %v18166_v8 = vcombine.low %v18038_v29, %v18042_v26  ;;  %v18175_v5 = vcombine.high %v18046_v48, %v18050_v35 }
 0xd2d   : > { %9719 = vmatpush1.bf16.msra.mxu1 %v17952_v18  ;;  %v18058_v18 = vld [vmem:[%s29161_s4 + $0x8e0] sm:$0xff] }
 0xd2e   : > { %9720 = vmatprep.subr.bf16.mxu1 %v17961_v9  ;;  %v18174_v9 = vcombine.low %v18046_v48, %v18050_v35  ;;  %v18183_v17 = vcombine.high %v18054_v60, %v18058_v18  ;;  %v18340_v35 = vld [vmem:[%s29161_s4 + $0xd90] sm:$0xff] }
 0xd30   : > { %v9824_v25 = vpop.f32.mrb[90].mxu0 }
 0xd31   : > { %9721 = vmatpush1.bf16.msra.mxu1 %v17960_v57  ;;  %v9826_v14 = vpop.f32.mrb[91].mxu0 }
 0xd32   : > { %9722 = vmatprep.subr.bf16.mxu1 %v17969_v46 }
 0xd34   : > { %v9830_v61 = vpop.f32.mrb[96].mxu0 }
 0xd35   : > { %v26206_v59 = vpack.c.bf16 %v9830_v61, %v9824_v25  ;;  %v9832_v58 = vpop.f32.mrb[97].mxu0  ;;  %9723 = vmatpush1.bf16.msra.mxu1 %v17968_v27  ;;  %v18182_v25 = vcombine.low %v18054_v60, %v18058_v18  ;;  %v18304_v27 = vld [vmem:[%s29161_s4 + $0xc70] sm:$0xff]  ;;  %v18070_v61 = vld [vmem:[%s29161_s4 + $0x940] sm:$0xff] }
 0xd36   : > { %v26208_v47 = vpack.c.bf16 %v9832_v58, %v9826_v14  ;;  %9724 = vmatprep.subr.bf16.mxu1 %v17977_v45  ;;  %v18300_v14 = vld [vmem:[%s29161_s4 + $0xc50] sm:$0xff]  ;;  %v18191_v45 = vcombine.high %v18062_v16, %v18066_v1  ;;  %v18074_v58 = vld [vmem:[%s29161_s4 + $0x960] sm:$0xff] }
 0xd37   : > { %v18430_v2 = vcombine.low %v18300_v14, %v18304_v27  ;;  %v18431_v32 = vcombine.high %v18300_v14, %v18304_v27  ;;  %v18199_v53 = vcombine.high %v18070_v61, %v18074_v58  ;;  %v18122_v14 = vld [vmem:[%s29161_s4 + $0xae0] sm:$0xff] }
 0xd38   : > { %10724 = vmatprep.mubr.bf16.mxu0 %v26208_v47 }
 0xd39   : > { %10725 = vmatmul.mubr.bf16.vlgmr.msra.gmra.mrb[92].mxu0 %v26206_v59  ;;  %9725 = vmatpush1.bf16.msra.mxu1 %v17976_v19  ;;  %v18190_v19 = vcombine.low %v18062_v16, %v18066_v1 }
 0xd3a   : > { %21091 = vmatpush1.bf16.msra.mxu0 %v25377_v3  ;;  %9726 = vmatprep.subr.bf16.mxu1 %v17985_v33  ;;  %v18286_v3 = vld [vmem:[%s29159_s2 + $0x100] sm:$0xff]  ;;  %v18308_v33 = vld [vmem:[%s29161_s4 + $0xc90] sm:$0xff] }
 0xd3b   : > { %21093 = vmatprep.subr.bf16.mxu0 %v25385_v44  ;;  %10867 = vmatprep.mubr.f32.mxu0 %v29248_v51  ;;  %v18001_v44 = vcombine.high %v7879_v41, %v7883_v15  ;;  %v18078_v41 = vld [vmem:[%s29161_s4 + $0x980] sm:$0xff] }
 0xd3c   : > { %v18082_v15 = vld [vmem:[%s29161_s4 + $0x9a0] sm:$0xff] }
 0xd3d   : > { %9727 = vmatpush1.bf16.msra.mxu1 %v17984_v52  ;;  %v18438_v52 = vcombine.low %v18308_v33, %v18312_v7  ;;  %v18207_v20 = vcombine.high %v18078_v41, %v18082_v15  ;;  %v18206_v6 = vcombine.low %v18078_v41, %v18082_v15 }
 0xd3e   : > { %21095 = vmatpush1.bf16.msra.mxu0 %v25383_v50  ;;  %9728 = vmatprep.subr.bf16.mxu1 %v17993_v24  ;;  %v18287_v50 = vld [vmem:[%s29159_s2 + $0x108] sm:$0xff]  ;;  %v18439_v24 = vcombine.high %v18308_v33, %v18312_v7  ;;  %v18130_v33 = vld [vmem:[%s29161_s4 + $0xb20] sm:$0xff] }
 0xd41   : > { %18288 = vmatmul.mubr.msk.f32.vlgmr.msra.gmra.mrb[98].mxu0 %vm29232_vm3, %v18286_v3  ;;  %9729 = vmatpush1.bf16.msra.mxu1 %v17992_v11  ;;  %v18198_v11 = vcombine.low %v18070_v61, %v18074_v58  ;;  %v18316_v3 = vld [vmem:[%s29161_s4 + $0xcd0] sm:$0xff] }
 0xd42   : > { %10873 = vmatprep.mubr.f32.mxu0 %v29248_v51  ;;  %9730 = vmatprep.subr.bf16.mxu1 %v18001_v44  ;;  %v18320_v44 = vld [vmem:[%s29161_s4 + $0xcf0] sm:$0xff] }
 0xd43   : > { %v18446_v37 = vcombine.low %v18316_v3, %v18320_v44 }
 0xd45   : > { %18289 = vmatmul.mubr.msk.f32.gmra.mrb[100].mxu0 %vm29232_vm3, %v18287_v50  ;;  %9731 = vmatpush1.bf16.msra.mxu1 %v18000_v4  ;;  %v18447_v4 = vcombine.high %v18316_v3, %v18320_v44  ;;  %v18086_v50 = vld [vmem:[%s29161_s4 + $0x9c0] sm:$0xff] }
 0xd46   : > { %9732 = vmatprep.subr.bf16.mxu1 %v18009_v0  ;;  %v18090_v0 = vld [vmem:[%s29161_s4 + $0x9e0] sm:$0xff] }
 0xd47   : > { %v18214_v38 = vcombine.low %v18086_v50, %v18090_v0  ;;  %v18138_v3 = vld [vmem:[%s29161_s4 + $0xb60] sm:$0xff] }
 0xd49   : > { %9733 = vmatpush1.bf16.msra.mxu1 %v18008_v12  ;;  %v18328_v12 = vld [vmem:[%s29161_s4 + $0xd30] sm:$0xff] }
 0xd4a   : > { %9734 = vmatprep.subr.bf16.mxu1 %v18017_v34  ;;  %v18215_v34 = vcombine.high %v18086_v50, %v18090_v0  ;;  %v18454_v54 = vcombine.low %v18324_v31, %v18328_v12  ;;  %v18455_v49 = vcombine.high %v18324_v31, %v18328_v12  ;;  %v18146_v31 = vld [vmem:[%s29161_s4 + $0xba0] sm:$0xff] }
 0xd4d   : > { %9735 = vmatpush1.bf16.msra.mxu1 %v18016_v39  ;;  %v18094_v39 = vld [vmem:[%s29161_s4 + $0xa00] sm:$0xff] }
 0xd4e   : > { %9736 = vmatprep.subr.bf16.mxu1 %v18025_v30  ;;  %v18098_v30 = vld [vmem:[%s29161_s4 + $0xa20] sm:$0xff] }
 0xd4f   : > { %v18222_v48 = vcombine.low %v18094_v39, %v18098_v30 }
 0xd51   : > { %9737 = vmatpush1.bf16.msra.mxu1 %v18024_v28  ;;  %v18336_v28 = vld [vmem:[%s29161_s4 + $0xd70] sm:$0xff] }
 0xd52   : > { %10606 = vmatprep.subr.bf16.mxu1 %v18159_v21  ;;  %v18223_v21 = vcombine.high %v18094_v39, %v18098_v30  ;;  %v18462_v29 = vcombine.low %v18332_v43, %v18336_v28  ;;  %v18463_v26 = vcombine.high %v18332_v43, %v18336_v28  ;;  %v18154_v43 = vld [vmem:[%s29161_s4 + $0xbe0] sm:$0xff] }
 0xd54   : > { %9739 = vmatmul.mubr.bf16.vlgmr.msra.gmra.mrb[56].mxu1 %v25538_v40  ;;  %v18292_v40 = vld [vmem:[%s29161_s4 + $0xc10] sm:$0xff] }
 0xd55   : > { %10607 = vmatpush1.bf16.msra.mxu1 %v18158_v22  ;;  %10638 = vmatprep.mubr.bf16.mxu1 %v26208_v47  ;;  %v18422_v57 = vcombine.low %v18292_v40, %v18296_v62  ;;  %v18423_v46 = vcombine.high %v18292_v40, %v18296_v62  ;;  %v18102_v22 = vld [vmem:[%s29161_s4 + $0xa40] sm:$0xff] }
 0xd56   : > { %10608 = vmatprep.subr.bf16.mxu1 %v18167_v10  ;;  %v18106_v10 = vld [vmem:[%s29161_s4 + $0xa60] sm:$0xff] }
 0xd57   : > { %11737 = vmatprep.subr.bf16.mxu0 %v18423_v46  ;;  %v18114_v40 = vld [vmem:[%s29161_s4 + $0xaa0] sm:$0xff]  ;;  %v18230_v62 = vcombine.low %v18102_v22, %v18106_v10 }
 0xd58   : > { %11738 = vmatpush1.bf16.msra.mxu0 %v18422_v57  ;;  %v18352_v57 = vld [vmem:[%s29161_s4 + $0xdf0] sm:$0xff] }
 0xd59   : > { %10609 = vmatpush1.bf16.msra.mxu1 %v18166_v8  ;;  %11739 = vmatprep.subr.bf16.mxu0 %v18431_v32  ;;  %v18344_v8 = vld [vmem:[%s29161_s4 + $0xdb0] sm:$0xff] }
 0xd5a   : > { %10610 = vmatprep.subr.bf16.mxu1 %v18175_v5  ;;  %v18231_v5 = vcombine.high %v18102_v22, %v18106_v10  ;;  %v18470_v60 = vcombine.low %v18340_v35, %v18344_v8  ;;  %v18471_v18 = vcombine.high %v18340_v35, %v18344_v8  ;;  %v18035_v35 = vld [vmem:[%s29161_s4 + $0x828] sm:$0xff] }
 0xd5c   : > { %11740 = vmatpush1.bf16.msra.mxu0 %v18430_v2  ;;  %v18360_v2 = vld [vmem:[%s29161_s4 + $0xe30] sm:$0xff] }
 0xd5d   : > { %10611 = vmatpush1.bf16.msra.mxu1 %v18174_v9  ;;  %11741 = vmatprep.subr.bf16.mxu0 %v18439_v24  ;;  %v18110_v9 = vld [vmem:[%s29161_s4 + $0xa80] sm:$0xff] }
 0xd5e   : > { %10612 = vmatprep.subr.bf16.mxu1 %v18183_v17  ;;  %v18348_v17 = vld [vmem:[%s29161_s4 + $0xdd0] sm:$0xff]  ;;  %v18239_v46 = vcombine.high %v18110_v9, %v18114_v40  ;;  %v18238_v27 = vcombine.low %v18110_v9, %v18114_v40 }
 0xd5f   : > { %v18478_v16 = vcombine.low %v18348_v17, %v18352_v57  ;;  %v18479_v1 = vcombine.high %v18348_v17, %v18352_v57  ;;  %v18043_v17 = vld [vmem:[%s29161_s4 + $0x868] sm:$0xff] }
 0xd60   : > { %11742 = vmatpush1.bf16.msra.mxu0 %v18438_v52  ;;  %v18368_v52 = vld [vmem:[%s29161_s4 + $0xe70] sm:$0xff] }
 0xd61   : > { %10613 = vmatpush1.bf16.msra.mxu1 %v18182_v25  ;;  %11743 = vmatprep.subr.bf16.mxu0 %v18447_v4  ;;  %v18118_v25 = vld [vmem:[%s29161_s4 + $0xac0] sm:$0xff] }
 0xd62   : > { %10614 = vmatprep.subr.bf16.mxu1 %v18191_v45  ;;  %v18356_v45 = vld [vmem:[%s29161_s4 + $0xe10] sm:$0xff]  ;;  %v18247_v32 = vcombine.high %v18118_v25, %v18122_v14  ;;  %v18246_v7 = vcombine.low %v18118_v25, %v18122_v14 }
 0xd63   : > { %v18486_v61 = vcombine.low %v18356_v45, %v18360_v2  ;;  %v18487_v58 = vcombine.high %v18356_v45, %v18360_v2  ;;  %v18051_v45 = vld [vmem:[%s29161_s4 + $0x8a8] sm:$0xff] }
 0xd64   : > { %11744 = vmatpush1.bf16.msra.mxu0 %v18446_v37  ;;  %v18376_v37 = vld [vmem:[%s29161_s4 + $0xeb0] sm:$0xff] }
 0xd65   : > { %10615 = vmatpush1.bf16.msra.mxu1 %v18190_v19  ;;  %11745 = vmatprep.subr.bf16.mxu0 %v18455_v49  ;;  %v18126_v19 = vld [vmem:[%s29161_s4 + $0xb00] sm:$0xff] }
 0xd66   : > { %10616 = vmatprep.subr.bf16.mxu1 %v18199_v53  ;;  %v18364_v53 = vld [vmem:[%s29161_s4 + $0xe50] sm:$0xff]  ;;  %v18255_v24 = vcombine.high %v18126_v19, %v18130_v33  ;;  %v18254_v44 = vcombine.low %v18126_v19, %v18130_v33 }
 0xd67   : > { %v18494_v41 = vcombine.low %v18364_v53, %v18368_v52  ;;  %v18495_v15 = vcombine.high %v18364_v53, %v18368_v52  ;;  %v18412_v19 = vld [vmem:[%s29161_s4 + $0xfd0] sm:$0xff] }
 0xd68   : > { %11746 = vmatpush1.bf16.msra.mxu0 %v18454_v54  ;;  %v18384_v54 = vld [vmem:[%s29161_s4 + $0xef0] sm:$0xff] }
 0xd69   : > { %10617 = vmatpush1.bf16.msra.mxu1 %v18198_v11  ;;  %11747 = vmatprep.subr.bf16.mxu0 %v18463_v26  ;;  %v18134_v11 = vld [vmem:[%s29161_s4 + $0xb40] sm:$0xff]  ;;  %v18416_v33 = vld [vmem:[%s29161_s4 + $0xff0] sm:$0xff] }
 0xd6a   : > { %10618 = vmatprep.subr.bf16.mxu1 %v18207_v20  ;;  %v18372_v20 = vld [vmem:[%s29161_s4 + $0xe90] sm:$0xff]  ;;  %v18263_v4 = vcombine.high %v18134_v11, %v18138_v3  ;;  %v18262_v12 = vcombine.low %v18134_v11, %v18138_v3  ;;  %v18542_v53 = vcombine.low %v18412_v19, %v18416_v33  ;;  %v18543_v52 = vcombine.high %v18412_v19, %v18416_v33  ;;  %v26484_v11 = vld [vmem:[%s29161_s4 + $0x1000] sm:$0xff]  ;;  %v18151_v19 = vld [vmem:[%s29161_s4 + $0xbc8] sm:$0xff] }
 0xd6b   : > { %v18502_v50 = vcombine.low %v18372_v20, %v18376_v37  ;;  %v18503_v0 = vcombine.high %v18372_v20, %v18376_v37  ;;  %v26489_v3 = vld [vmem:[%s29161_s4 + $0x1020] sm:$0xff]  ;;  %v18155_v33 = vld [vmem:[%s29161_s4 + $0xbe8] sm:$0xff] }
 0xd6c   : > { %11748 = vmatpush1.bf16.msra.mxu0 %v18462_v29  ;;  %v18392_v29 = vld [vmem:[%s29161_s4 + $0xf30] sm:$0xff]  ;;  %v18580_v20 = vcombine.low %v26484_v11, %v26489_v3  ;;  %v18581_v37 = vcombine.high %v26484_v11, %v26489_v3  ;;  %v18572_v11 = vld [vmem:[%s29161_s4 + $0x10c0] sm:$0xff] }
 0xd6d   : > { %10619 = vmatpush1.bf16.msra.mxu1 %v18206_v6  ;;  %11749 = vmatprep.subr.bf16.mxu0 %v18471_v18  ;;  %v18142_v6 = vld [vmem:[%s29161_s4 + $0xb80] sm:$0xff] }
 0xd6e   : > { %10620 = vmatprep.subr.bf16.mxu1 %v18215_v34  ;;  %v18380_v34 = vld [vmem:[%s29161_s4 + $0xed0] sm:$0xff]  ;;  %v18271_v49 = vcombine.high %v18142_v6, %v18146_v31  ;;  %v18270_v28 = vcombine.low %v18142_v6, %v18146_v31  ;;  %v18576_v3 = vld [vmem:[%s29161_s4 + $0x10e0] sm:$0xff] }
 0xd6f   : > { %v18510_v39 = vcombine.low %v18380_v34, %v18384_v54  ;;  %v18511_v30 = vcombine.high %v18380_v34, %v18384_v54  ;;  %v18083_v34 = vld [vmem:[%s29161_s4 + $0x9a8] sm:$0xff] }
 0xd70   : > { %11750 = vmatpush1.bf16.msra.mxu0 %v18470_v60  ;;  %v18400_v60 = vld [vmem:[%s29161_s4 + $0xf70] sm:$0xff] }
 0xd71   : > { %10621 = vmatpush1.bf16.msra.mxu1 %v18214_v38  ;;  %11751 = vmatprep.subr.bf16.mxu0 %v18479_v1  ;;  %v18150_v38 = vld [vmem:[%s29161_s4 + $0xbc0] sm:$0xff] }
 0xd72   : > { %10622 = vmatprep.subr.bf16.mxu1 %v18223_v21  ;;  %v18388_v21 = vld [vmem:[%s29161_s4 + $0xf10] sm:$0xff]  ;;  %v18279_v26 = vcombine.high %v18150_v38, %v18154_v43  ;;  %v18278_v8 = vcombine.low %v18150_v38, %v18154_v43 }
 0xd73   : > { %v18518_v22 = vcombine.low %v18388_v21, %v18392_v29  ;;  %v18519_v10 = vcombine.high %v18388_v21, %v18392_v29  ;;  %v18099_v21 = vld [vmem:[%s29161_s4 + $0xa28] sm:$0xff] }
 0xd74   : > { %11752 = vmatpush1.bf16.msra.mxu0 %v18478_v16  ;;  %v18408_v16 = vld [vmem:[%s29161_s4 + $0xfb0] sm:$0xff] }
 0xd75   : > { %10623 = vmatpush1.bf16.msra.mxu1 %v18222_v48  ;;  %11753 = vmatprep.subr.bf16.mxu0 %v18487_v58  ;;  %v18031_v48 = vld [vmem:[%s29161_s4 + $0x808] sm:$0xff] }
 0xd76   : > { %10624 = vmatprep.subr.bf16.mxu1 %v18231_v5  ;;  %v18396_v5 = vld [vmem:[%s29161_s4 + $0xf50] sm:$0xff]  ;;  %v18161_v18 = vcombine.high %v18031_v48, %v18035_v35  ;;  %v18160_v57 = vcombine.low %v18031_v48, %v18035_v35  ;;  %v18059_v58 = vld [vmem:[%s29161_s4 + $0x8e8] sm:$0xff] }
 0xd77   : > { %v18526_v9 = vcombine.low %v18396_v5, %v18400_v60  ;;  %v18527_v40 = vcombine.high %v18396_v5, %v18400_v60  ;;  %v18115_v5 = vld [vmem:[%s29161_s4 + $0xaa8] sm:$0xff] }
 0xd78   : > { %11754 = vmatpush1.bf16.msra.mxu0 %v18486_v61  ;;  %v18055_v61 = vld [vmem:[%s29161_s4 + $0x8c8] sm:$0xff] }
 0xd79   : > { %10625 = vmatpush1.bf16.msra.mxu1 %v18230_v62  ;;  %11755 = vmatprep.subr.bf16.mxu0 %v18495_v15  ;;  %v18039_v62 = vld [vmem:[%s29161_s4 + $0x848] sm:$0xff] }
 0xd7a   : > { %10626 = vmatprep.subr.bf16.mxu1 %v18239_v46  ;;  %v18404_v46 = vld [vmem:[%s29161_s4 + $0xf90] sm:$0xff]  ;;  %v18169_v1 = vcombine.high %v18039_v62, %v18043_v17  ;;  %v18168_v2 = vcombine.low %v18039_v62, %v18043_v17  ;;  %v18067_v15 = vld [vmem:[%s29161_s4 + $0x928] sm:$0xff] }
 0xd7b   : > { %v18534_v25 = vcombine.low %v18404_v46, %v18408_v16  ;;  %v18535_v14 = vcombine.high %v18404_v46, %v18408_v16  ;;  %v18131_v46 = vld [vmem:[%s29161_s4 + $0xb28] sm:$0xff] }
 0xd7c   : > { %11756 = vmatpush1.bf16.msra.mxu0 %v18494_v41  ;;  %v18063_v41 = vld [vmem:[%s29161_s4 + $0x908] sm:$0xff] }
 0xd7d   : > { %10627 = vmatpush1.bf16.msra.mxu1 %v18238_v27  ;;  %11757 = vmatprep.subr.bf16.mxu0 %v18503_v0  ;;  %v18047_v27 = vld [vmem:[%s29161_s4 + $0x888] sm:$0xff]  ;;  %v18192_v6 = vcombine.low %v18063_v41, %v18067_v15 }
 0xd7e   : > { %10628 = vmatprep.subr.bf16.mxu1 %v18247_v32  ;;  %v18177_v32 = vcombine.high %v18047_v27, %v18051_v45  ;;  %v18075_v0 = vld [vmem:[%s29161_s4 + $0x968] sm:$0xff] }
 0xd80   : > { %11758 = vmatpush1.bf16.msra.mxu0 %v18502_v50  ;;  %v18071_v50 = vld [vmem:[%s29161_s4 + $0x948] sm:$0xff] }
 0xd81   : > { %10629 = vmatpush1.bf16.msra.mxu1 %v18246_v7  ;;  %11759 = vmatprep.subr.bf16.mxu0 %v18511_v30  ;;  %v18176_v7 = vcombine.low %v18047_v27, %v18051_v45  ;;  %v18201_v31 = vcombine.high %v18071_v50, %v18075_v0  ;;  %v18200_v54 = vcombine.low %v18071_v50, %v18075_v0  ;;  %v18091_v30 = vld [vmem:[%s29161_s4 + $0x9e8] sm:$0xff]  ;;  %v18049_v0 = vld [vmem:[%s29161_s4 + $0x898] sm:$0xff] }
 0xd82   : > { %10630 = vmatprep.subr.bf16.mxu1 %v18255_v24  ;;  %v18185_v24 = vcombine.high %v18055_v61, %v18059_v58 }
 0xd84   : > { %11760 = vmatpush1.bf16.msra.mxu0 %v18510_v39  ;;  %v18087_v39 = vld [vmem:[%s29161_s4 + $0x9c8] sm:$0xff] }
 0xd85   : > { %10631 = vmatpush1.bf16.msra.mxu1 %v18254_v44  ;;  %11761 = vmatprep.subr.bf16.mxu0 %v18519_v10  ;;  %v18184_v44 = vcombine.low %v18055_v61, %v18059_v58  ;;  %v18217_v43 = vcombine.high %v18087_v39, %v18091_v30  ;;  %v18216_v29 = vcombine.low %v18087_v39, %v18091_v30  ;;  %v18107_v10 = vld [vmem:[%s29161_s4 + $0xa68] sm:$0xff]  ;;  %v18065_v30 = vld [vmem:[%s29161_s4 + $0x918] sm:$0xff] }
 0xd86   : > { %10632 = vmatprep.subr.bf16.mxu1 %v18263_v4  ;;  %v18193_v4 = vcombine.high %v18063_v41, %v18067_v15  ;;  %v18280_v41 = vcombine.low %v18151_v19, %v18155_v33 }
 0xd88   : > { %11762 = vmatpush1.bf16.msra.mxu0 %v18518_v22  ;;  %v18103_v22 = vld [vmem:[%s29161_s4 + $0xa48] sm:$0xff] }
 0xd89   : > { %10633 = vmatpush1.bf16.msra.mxu1 %v18262_v12  ;;  %11763 = vmatprep.subr.bf16.mxu0 %v18527_v40  ;;  %v18079_v12 = vld [vmem:[%s29161_s4 + $0x988] sm:$0xff]  ;;  %v18233_v35 = vcombine.high %v18103_v22, %v18107_v10  ;;  %v18232_v60 = vcombine.low %v18103_v22, %v18107_v10  ;;  %v18081_v22 = vld [vmem:[%s29161_s4 + $0x998] sm:$0xff] }
 0xd8a   : > { %10634 = vmatprep.subr.bf16.mxu1 %v18271_v49  ;;  %v18209_v49 = vcombine.high %v18079_v12, %v18083_v34  ;;  %v18208_v38 = vcombine.low %v18079_v12, %v18083_v34  ;;  %v18123_v40 = vld [vmem:[%s29161_s4 + $0xae8] sm:$0xff]  ;;  %v18057_v34 = vld [vmem:[%s29161_s4 + $0x8d8] sm:$0xff] }
 0xd8b   : > { %v18085_v10 = vld [vmem:[%s29161_s4 + $0x9b8] sm:$0xff] }
 0xd8c   : > { %11764 = vmatpush1.bf16.msra.mxu0 %v18526_v9  ;;  %v18119_v9 = vld [vmem:[%s29161_s4 + $0xac8] sm:$0xff] }
 0xd8d   : > { %10635 = vmatpush1.bf16.msra.mxu1 %v18270_v28  ;;  %11765 = vmatprep.subr.bf16.mxu0 %v18535_v14  ;;  %v18095_v28 = vld [vmem:[%s29161_s4 + $0xa08] sm:$0xff]  ;;  %v18249_v17 = vcombine.high %v18119_v9, %v18123_v40  ;;  %v18248_v16 = vcombine.low %v18119_v9, %v18123_v40  ;;  %v18097_v9 = vld [vmem:[%s29161_s4 + $0xa18] sm:$0xff] }
 0xd8e   : > { %10636 = vmatprep.subr.bf16.mxu1 %v18279_v26  ;;  %v18225_v26 = vcombine.high %v18095_v28, %v18099_v21  ;;  %v18224_v48 = vcombine.low %v18095_v28, %v18099_v21  ;;  %v18139_v14 = vld [vmem:[%s29161_s4 + $0xb68] sm:$0xff]  ;;  %v18073_v28 = vld [vmem:[%s29161_s4 + $0x958] sm:$0xff] }
 0xd8f   : > { %v18077_v21 = vld [vmem:[%s29161_s4 + $0x978] sm:$0xff] }
 0xd90   : > { %11766 = vmatpush1.bf16.msra.mxu0 %v18534_v25  ;;  %v18135_v25 = vld [vmem:[%s29161_s4 + $0xb48] sm:$0xff]  ;;  %v18101_v40 = vld [vmem:[%s29161_s4 + $0xa38] sm:$0xff] }
 0xd91   : > { %10637 = vmatpush1.bf16.msra.mxu1 %v18278_v8  ;;  %11767 = vmatprep.subr.bf16.mxu0 %v18543_v52  ;;  %v18111_v8 = vld [vmem:[%s29161_s4 + $0xa88] sm:$0xff]  ;;  %v18265_v45 = vcombine.high %v18135_v25, %v18139_v14  ;;  %v18264_v61 = vcombine.low %v18135_v25, %v18139_v14  ;;  %v18033_v52 = vld [vmem:[%s29161_s4 + $0x818] sm:$0xff] }
 0xd92   : > { %10649 = vmatprep.subr.bf16.mxu1 %v18161_v18  ;;  %v18241_v18 = vcombine.high %v18111_v8, %v18115_v5  ;;  %v18240_v62 = vcombine.low %v18111_v8, %v18115_v5  ;;  %v18089_v8 = vld [vmem:[%s29161_s4 + $0x9d8] sm:$0xff] }
 0xd93   : > { %v18093_v5 = vld [vmem:[%s29161_s4 + $0x9f8] sm:$0xff] }
 0xd94   : > { %10639 = vmatmul.mubr.bf16.vlgmr.msra.gmra.mrb[48].mxu1 %v26206_v59  ;;  %11768 = vmatpush1.bf16.msra.mxu0 %v18542_v53  ;;  %v18281_v53 = vcombine.high %v18151_v19, %v18155_v33  ;;  %v18113_v25 = vld [vmem:[%s29161_s4 + $0xa98] sm:$0xff] }
 0xd95   : > { %10650 = vmatpush1.bf16.msra.mxu1 %v18160_v57  ;;  %10681 = vmatprep.mubr.bf16.mxu1 %v26208_v47  ;;  %v18127_v57 = vld [vmem:[%s29161_s4 + $0xb08] sm:$0xff]  ;;  %v18117_v14 = vld [vmem:[%s29161_s4 + $0xab8] sm:$0xff] }
 0xd96   : > { %10651 = vmatprep.subr.bf16.mxu1 %v18169_v1  ;;  %12065 = vmatprep.subr.bf16.mxu0 %v18581_v37  ;;  %v18257_v1 = vcombine.high %v18127_v57, %v18131_v46  ;;  %v18256_v27 = vcombine.low %v18127_v57, %v18131_v46  ;;  %v18045_v37 = vld [vmem:[%s29161_s4 + $0x878] sm:$0xff] }
 0xd97   : > { %v18105_v57 = vld [vmem:[%s29161_s4 + $0xa58] sm:$0xff] }
 0xd98   : > { %v18109_v46 = vld [vmem:[%s29161_s4 + $0xa78] sm:$0xff] }
 0xd99   : > { %10652 = vmatpush1.bf16.msra.mxu1 %v18168_v2  ;;  %v18143_v2 = vld [vmem:[%s29161_s4 + $0xb88] sm:$0xff]  ;;  %v18129_v19 = vld [vmem:[%s29161_s4 + $0xb18] sm:$0xff] }
 0xd9a   : > { %10653 = vmatprep.subr.bf16.mxu1 %v18177_v32  ;;  %v18147_v32 = vld [vmem:[%s29161_s4 + $0xba8] sm:$0xff]  ;;  %v18133_v33 = vld [vmem:[%s29161_s4 + $0xb38] sm:$0xff] }
 0xd9b   : > { %v18273_v58 = vcombine.high %v18143_v2, %v18147_v32 }
 0xd9d   : > { %10654 = vmatpush1.bf16.msra.mxu1 %v18176_v7  ;;  %v18272_v7 = vcombine.low %v18143_v2, %v18147_v32  ;;  %v18121_v2 = vld [vmem:[%s29161_s4 + $0xad8] sm:$0xff] }
 0xd9e   : > { %10655 = vmatprep.subr.bf16.mxu1 %v18185_v24  ;;  %v18037_v24 = vld [vmem:[%s29161_s4 + $0x838] sm:$0xff] }
 0xd9f   : > { %v18165_v15 = vcombine.high %v18033_v52, %v18037_v24  ;;  %v18125_v32 = vld [vmem:[%s29161_s4 + $0xaf8] sm:$0xff] }
 0xda1   : > { %10656 = vmatpush1.bf16.msra.mxu1 %v18184_v44  ;;  %v18041_v44 = vld [vmem:[%s29161_s4 + $0x858] sm:$0xff] }
 0xda2   : > { %10657 = vmatprep.subr.bf16.mxu1 %v18193_v4  ;;  %v18164_v4 = vcombine.low %v18033_v52, %v18037_v24  ;;  %v18173_v50 = vcombine.high %v18041_v44, %v18045_v37  ;;  %v18137_v52 = vld [vmem:[%s29161_s4 + $0xb58] sm:$0xff] }
 0xda3   : > { %v18141_v24 = vld [vmem:[%s29161_s4 + $0xb78] sm:$0xff] }
 0xda5   : > { %10658 = vmatpush1.bf16.msra.mxu1 %v18192_v6  ;;  %v18053_v6 = vld [vmem:[%s29161_s4 + $0x8b8] sm:$0xff] }
 0xda6   : > { %10659 = vmatprep.subr.bf16.mxu1 %v18201_v31  ;;  %v18172_v31 = vcombine.low %v18041_v44, %v18045_v37  ;;  %v18181_v12 = vcombine.high %v18049_v0, %v18053_v6  ;;  %v18145_v44 = vld [vmem:[%s29161_s4 + $0xb98] sm:$0xff] }
 0xda7   : > { %v18149_v37 = vld [vmem:[%s29161_s4 + $0xbb8] sm:$0xff] }
 0xda9   : > { %10660 = vmatpush1.bf16.msra.mxu1 %v18200_v54  ;;  %v18061_v54 = vld [vmem:[%s29161_s4 + $0x8f8] sm:$0xff] }
 0xdaa   : > { %10661 = vmatprep.subr.bf16.mxu1 %v18209_v49  ;;  %v18180_v49 = vcombine.low %v18049_v0, %v18053_v6  ;;  %v18189_v39 = vcombine.high %v18057_v34, %v18061_v54  ;;  %v18153_v0 = vld [vmem:[%s29161_s4 + $0xbd8] sm:$0xff] }
 0xdab   : > { %v18157_v6 = vld [vmem:[%s29161_s4 + $0xbf8] sm:$0xff] }
 0xdad   : > { %10662 = vmatpush1.bf16.msra.mxu1 %v18208_v38  ;;  %v18188_v38 = vcombine.low %v18057_v34, %v18061_v54  ;;  %v18290_v34 = vld [vmem:[%s29161_s4 + $0xc00] sm:$0xff] }
 0xdae   : > { %10663 = vmatprep.subr.bf16.mxu1 %v18217_v43  ;;  %v18294_v54 = vld [vmem:[%s29161_s4 + $0xc20] sm:$0xff] }
 0xdb1   : > { %10664 = vmatpush1.bf16.msra.mxu1 %v18216_v29 }
 0xdb2   : > { %10665 = vmatprep.subr.bf16.mxu1 %v18225_v26  ;;  %v18205_v26 = vcombine.high %v18073_v28, %v18077_v21 }
 0xdb5   : > { %10666 = vmatpush1.bf16.msra.mxu1 %v18224_v48  ;;  %v18204_v48 = vcombine.low %v18073_v28, %v18077_v21  ;;  %v18306_v28 = vld [vmem:[%s29161_s4 + $0xc80] sm:$0xff] }
 0xdb6   : > { %10667 = vmatprep.subr.bf16.mxu1 %v18233_v35  ;;  %v18213_v35 = vcombine.high %v18081_v22, %v18085_v10  ;;  %v18310_v21 = vld [vmem:[%s29161_s4 + $0xca0] sm:$0xff] }
 0xdb9   : > { %10668 = vmatpush1.bf16.msra.mxu1 %v18232_v60  ;;  %v18212_v60 = vcombine.low %v18081_v22, %v18085_v10  ;;  %v18435_v10 = vcombine.high %v18306_v28, %v18310_v21 }
 0xdba   : > { %10669 = vmatprep.subr.bf16.mxu1 %v18241_v18  ;;  %v18221_v18 = vcombine.high %v18089_v8, %v18093_v5 }
 0xdbd   : > { %10670 = vmatpush1.bf16.msra.mxu1 %v18240_v62  ;;  %v18220_v62 = vcombine.low %v18089_v8, %v18093_v5  ;;  %v18556_v5 = vld [vmem:[%s29161_s4 + $0x1040] sm:$0xff] }
 0xdbe   : > { %10671 = vmatprep.subr.bf16.mxu1 %v18249_v17  ;;  %v18229_v17 = vcombine.high %v18097_v9, %v18101_v40 }
 0xdc1   : > { %10672 = vmatpush1.bf16.msra.mxu1 %v18248_v16  ;;  %v18228_v16 = vcombine.low %v18097_v9, %v18101_v40  ;;  %v18434_v9 = vcombine.low %v18306_v28, %v18310_v21  ;;  %v18362_v28 = vld [vmem:[%s29161_s4 + $0xe40] sm:$0xff] }
 0xdc2   : > { %10673 = vmatprep.subr.bf16.mxu1 %v18257_v1  ;;  %v18237_v1 = vcombine.high %v18105_v57, %v18109_v46  ;;  %v18366_v21 = vld [vmem:[%s29161_s4 + $0xe60] sm:$0xff] }
 0xdc5   : > { %10674 = vmatpush1.bf16.msra.mxu1 %v18256_v27  ;;  %v18236_v27 = vcombine.low %v18105_v57, %v18109_v46  ;;  %v18322_v57 = vld [vmem:[%s29161_s4 + $0xd00] sm:$0xff] }
 0xdc6   : > { %10675 = vmatprep.subr.bf16.mxu1 %v18265_v45  ;;  %v18245_v45 = vcombine.high %v18113_v25, %v18117_v14  ;;  %v18326_v46 = vld [vmem:[%s29161_s4 + $0xd20] sm:$0xff] }
 0xdc9   : > { %10676 = vmatpush1.bf16.msra.mxu1 %v18264_v61  ;;  %v18244_v61 = vcombine.low %v18113_v25, %v18117_v14 }
 0xdca   : > { %10677 = vmatprep.subr.bf16.mxu1 %v18273_v58  ;;  %v18253_v58 = vcombine.high %v18121_v2, %v18125_v32 }
 0xdcd   : > { %10678 = vmatpush1.bf16.msra.mxu1 %v18272_v7  ;;  %v18252_v7 = vcombine.low %v18121_v2, %v18125_v32  ;;  %v18330_v2 = vld [vmem:[%s29161_s4 + $0xd40] sm:$0xff] }
 0xdce   : > { %10679 = vmatprep.subr.bf16.mxu1 %v18281_v53  ;;  %v18261_v53 = vcombine.high %v18129_v19, %v18133_v33  ;;  %v18334_v32 = vld [vmem:[%s29161_s4 + $0xd60] sm:$0xff] }
 0xdd1   : > { %10680 = vmatpush1.bf16.msra.mxu1 %v18280_v41  ;;  %v18260_v41 = vcombine.low %v18129_v19, %v18133_v33  ;;  %v18605_v19 = vcombine.high %v18572_v11, %v18576_v3  ;;  %v18338_v33 = vld [vmem:[%s29161_s4 + $0xd80] sm:$0xff] }
 0xdd2   : > { %10735 = vmatprep.subr.bf16.mxu1 %v18165_v15  ;;  %v18269_v15 = vcombine.high %v18137_v52, %v18141_v24 }
 0xdd4   : > { %10682 = vmatmul.mubr.bf16.vlgmr.msra.gmra.mrb[52].mxu1 %v26206_v59 }
 0xdd5   : > { %10736 = vmatpush1.bf16.msra.mxu1 %v18164_v4  ;;  %10767 = vmatprep.mubr.bf16.mxu1 %v26208_v47  ;;  %v18069_v47 = vld [vmem:[%s29161_s4 + $0x938] sm:$0xff]  ;;  %v18268_v4 = vcombine.low %v18137_v52, %v18141_v24  ;;  %v18553_v52 = vld [vmem:[%s29161_s4 + $0x1028] sm:$0xff]  ;;  %v18458_v24 = vcombine.low %v18330_v2, %v18334_v32 }
 0xdd6   : > { %10737 = vmatprep.subr.bf16.mxu1 %v18173_v50  ;;  %v18197_v43 = vcombine.high %v18065_v30, %v18069_v47  ;;  %v18196_v29 = vcombine.low %v18065_v30, %v18069_v47  ;;  %v18277_v50 = vcombine.high %v18145_v44, %v18149_v37  ;;  %v18298_v30 = vld [vmem:[%s29161_s4 + $0xc40] sm:$0xff] }
 0xdd7   : > { %v18302_v47 = vld [vmem:[%s29161_s4 + $0xc60] sm:$0xff] }
 0xdd8   : > { %v18426_v22 = vcombine.low %v18298_v30, %v18302_v47 }
 0xdd9   : > { %10738 = vmatpush1.bf16.msra.mxu1 %v18172_v31  ;;  %v18276_v31 = vcombine.low %v18145_v44, %v18149_v37  ;;  %v18346_v37 = vld [vmem:[%s29161_s4 + $0xdc0] sm:$0xff] }
 0xdda   : > { %10739 = vmatprep.subr.bf16.mxu1 %v18181_v12  ;;  %v18285_v12 = vcombine.high %v18153_v0, %v18157_v6 }
 0xddd   : > { %10740 = vmatpush1.bf16.msra.mxu1 %v18180_v49  ;;  %v18284_v49 = vcombine.low %v18153_v0, %v18157_v6  ;;  %v18561_v0 = vld [vmem:[%s29161_s4 + $0x1068] sm:$0xff] }
 0xdde   : > { %10741 = vmatprep.subr.bf16.mxu1 %v18189_v39  ;;  %v18419_v39 = vcombine.high %v18290_v34, %v18294_v54 }
 0xde1   : > { %10742 = vmatpush1.bf16.msra.mxu1 %v18188_v38  ;;  %v18418_v38 = vcombine.low %v18290_v34, %v18294_v54  ;;  %v26751_v34 = vpack.c.bf16 %v23548_v42, %v23546_v36 }
 0xde2   : > { %10743 = vmatprep.subr.bf16.mxu1 %v18197_v43  ;;  %v18427_v43 = vcombine.high %v18298_v30, %v18302_v47  ;;  %v18565_v30 = vld [vmem:[%s29161_s4 + $0x1088] sm:$0xff] }
 0xde3   : > { %v18569_v47 = vld [vmem:[%s29161_s4 + $0x10a8] sm:$0xff] }
 0xde5   : > { %10744 = vmatpush1.bf16.msra.mxu1 %v18196_v29 }
 0xde6   : > { %10745 = vmatprep.subr.bf16.mxu1 %v18205_v26 }
 0xde9   : > { %10746 = vmatpush1.bf16.msra.mxu1 %v18204_v48  ;;  %v18314_v48 = vld [vmem:[%s29161_s4 + $0xcc0] sm:$0xff] }
 0xdea   : > { %10747 = vmatprep.subr.bf16.mxu1 %v18213_v35  ;;  %v18318_v35 = vld [vmem:[%s29161_s4 + $0xce0] sm:$0xff] }
 0xdeb   : > { %v18442_v25 = vcombine.low %v18314_v48, %v18318_v35 }
 0xded   : > { %10748 = vmatpush1.bf16.msra.mxu1 %v18212_v60 }
 0xdee   : > { %10749 = vmatprep.subr.bf16.mxu1 %v18221_v18 }
 0xdf1   : > { %10750 = vmatpush1.bf16.msra.mxu1 %v18220_v62  ;;  %v18443_v62 = vcombine.high %v18314_v48, %v18318_v35  ;;  %v18491_v48 = vcombine.high %v18362_v28, %v18366_v21 }
 0xdf2   : > { %10751 = vmatprep.subr.bf16.mxu1 %v18229_v17 }
 0xdf5   : > { %10752 = vmatpush1.bf16.msra.mxu1 %v18228_v16  ;;  %v18564_v16 = vld [vmem:[%s29161_s4 + $0x1080] sm:$0xff] }
 0xdf6   : > { %10753 = vmatprep.subr.bf16.mxu1 %v18237_v1  ;;  %v18568_v1 = vld [vmem:[%s29161_s4 + $0x10a0] sm:$0xff] }
 0xdf9   : > { %10754 = vmatpush1.bf16.msra.mxu1 %v18236_v27  ;;  %v18451_v27 = vcombine.high %v18322_v57, %v18326_v46 }
 0xdfa   : > { %10755 = vmatprep.subr.bf16.mxu1 %v18245_v45  ;;  %v18597_v45 = vcombine.high %v18564_v16, %v18568_v1 }
 0xdfd   : > { %10756 = vmatpush1.bf16.msra.mxu1 %v18244_v61  ;;  %v18596_v61 = vcombine.low %v18564_v16, %v18568_v1  ;;  %v18382_v16 = vld [vmem:[%s29161_s4 + $0xee0] sm:$0xff]  ;;  %v18558_v1 = vld [vmem:[%s29161_s4 + $0x1050] sm:$0xff] }
 0xdfe   : > { %10757 = vmatprep.subr.bf16.mxu1 %v18253_v58  ;;  %v18459_v58 = vcombine.high %v18330_v2, %v18334_v32  ;;  %v18386_v32 = vld [vmem:[%s29161_s4 + $0xf00] sm:$0xff] }
 0xe01   : > { %10758 = vmatpush1.bf16.msra.mxu1 %v18252_v7  ;;  %v18342_v7 = vld [vmem:[%s29161_s4 + $0xda0] sm:$0xff] }
 0xe02   : > { %10759 = vmatprep.subr.bf16.mxu1 %v18261_v53  ;;  %v18549_v53 = vld [vmem:[%s29161_s4 + $0x1008] sm:$0xff]  ;;  %v18466_v6 = vcombine.low %v18338_v33, %v18342_v7 }
 0xe03   : > { %v18583_v44 = vcombine.high %v18549_v53, %v18553_v52 }
 0xe05   : > { %10760 = vmatpush1.bf16.msra.mxu1 %v18260_v41  ;;  %v18604_v41 = vcombine.low %v18572_v11, %v18576_v3  ;;  %v18390_v11 = vld [vmem:[%s29161_s4 + $0xf20] sm:$0xff]  ;;  %v18566_v3 = vld [vmem:[%s29161_s4 + $0x1090] sm:$0xff] }
 0xe06   : > { %10761 = vmatprep.subr.bf16.mxu1 %v18269_v15  ;;  %v18467_v15 = vcombine.high %v18338_v33, %v18342_v7  ;;  %v18394_v7 = vld [vmem:[%s29161_s4 + $0xf40] sm:$0xff] }
 0xe09   : > { %10762 = vmatpush1.bf16.msra.mxu1 %v18268_v4  ;;  %v18350_v4 = vld [vmem:[%s29161_s4 + $0xde0] sm:$0xff] }
 0xe0a   : > { %10763 = vmatprep.subr.bf16.mxu1 %v18277_v50  ;;  %v18557_v50 = vld [vmem:[%s29161_s4 + $0x1048] sm:$0xff]  ;;  %v18474_v36 = vcombine.low %v18346_v37, %v18350_v4 }
 0xe0b   : > { %v18591_v54 = vcombine.high %v18557_v50, %v18561_v0  ;;  %v18590_v42 = vcombine.low %v18557_v50, %v18561_v0  ;;  %v18406_v50 = vld [vmem:[%s29161_s4 + $0xfa0] sm:$0xff]  ;;  %v18551_v0 = vld [vmem:[%s29161_s4 + $0x1018] sm:$0xff] }
 0xe0d   : > { %10764 = vmatpush1.bf16.msra.mxu1 %v18276_v31  ;;  %v18582_v31 = vcombine.low %v18549_v53, %v18553_v52  ;;  %v18398_v53 = vld [vmem:[%s29161_s4 + $0xf60] sm:$0xff]  ;;  %v18574_v52 = vld [vmem:[%s29161_s4 + $0x10d0] sm:$0xff] }
 0xe0e   : > { %10765 = vmatprep.subr.bf16.mxu1 %v18285_v12  ;;  %v18475_v12 = vcombine.high %v18346_v37, %v18350_v4  ;;  %v18402_v4 = vld [vmem:[%s29161_s4 + $0xf80] sm:$0xff] }
 0xe11   : > { %10766 = vmatpush1.bf16.msra.mxu1 %v18284_v49  ;;  %v18354_v49 = vld [vmem:[%s29161_s4 + $0xe00] sm:$0xff] }
 0xe12   : > { %11651 = vmatprep.subr.bf16.mxu1 %v18419_v39  ;;  %v18358_v39 = vld [vmem:[%s29161_s4 + $0xe20] sm:$0xff] }
 0xe14   : > { %10768 = vmatmul.mubr.bf16.vlgmr.msra.gmra.mrb[56].mxu1 %v26206_v59  ;;  %v10869_v29 = vpop.f32.mrb[98].mxu0  ;;  %v18560_v59 = vld [vmem:[%s29161_s4 + $0x1060] sm:$0xff] }
 0xe15   : > { %11652 = vmatpush1.bf16.msra.mxu1 %v18418_v38  ;;  %v10871_v26 = vpop.f32.mrb[99].mxu0  ;;  %v18589_v17 = vcombine.high %v18556_v5, %v18560_v59  ;;  %v18588_v14 = vcombine.low %v18556_v5, %v18560_v59  ;;  %v18483_v38 = vcombine.high %v18354_v49, %v18358_v39  ;;  %v18374_v5 = vld [vmem:[%s29161_s4 + $0xea0] sm:$0xff]  ;;  %v18550_v59 = vld [vmem:[%s29161_s4 + $0x1010] sm:$0xff] }
 0xe16   : > { %11653 = vmatprep.subr.bf16.mxu1 %v18427_v43  ;;  %v18599_v43 = vcombine.high %v18565_v30, %v18569_v47 }
 0xe18   : > { %v10875_v8 = vpop.f32.mrb[100].mxu0 }
 0xe19   : > { %v26690_v60 = vpack.c.bf16 %v10875_v8, %v10869_v29  ;;  %v10877_v18 = vpop.f32.mrb[101].mxu0  ;;  %11654 = vmatpush1.bf16.msra.mxu1 %v18426_v22  ;;  %v18573_v29 = vld [vmem:[%s29161_s4 + $0x10c8] sm:$0xff]  ;;  %v18482_v22 = vcombine.low %v18354_v49, %v18358_v39  ;;  %v18370_v8 = vld [vmem:[%s29161_s4 + $0xe80] sm:$0xff] }
 0xe1a   : > { %v26692_v40 = vpack.c.bf16 %v10877_v18, %v10871_v26  ;;  %11655 = vmatprep.subr.bf16.mxu1 %v18435_v10  ;;  %v18577_v26 = vld [vmem:[%s29161_s4 + $0x10e8] sm:$0xff]  ;;  %v18598_v10 = vcombine.low %v18565_v30, %v18569_v47  ;;  %v18554_v18 = vld [vmem:[%s29161_s4 + $0x1030] sm:$0xff]  ;;  %v18410_v39 = vld [vmem:[%s29161_s4 + $0xfc0] sm:$0xff] }
 0xe1b   : > { %v18607_v35 = vcombine.high %v18573_v29, %v18577_v26  ;;  %v18414_v30 = vld [vmem:[%s29161_s4 + $0xfe0] sm:$0xff]  ;;  %v18559_v47 = vld [vmem:[%s29161_s4 + $0x1058] sm:$0xff] }
 0xe1c   : > { %11769 = vmatprep.mubr.bf16.mxu0 %v26692_v40  ;;  %11683 = vmatprep.mubr.bf16.mxu1 %v26692_v40 }
 0xe1d   : > { %11770 = vmatmul.mubr.bf16.vlgmr.msra.gmra.mrb[92].mxu0 %v26690_v60  ;;  %11656 = vmatpush1.bf16.msra.mxu1 %v18434_v9  ;;  %v18490_v9 = vcombine.low %v18362_v28, %v18366_v21  ;;  %v18291_v21 = vld [vmem:[%s29161_s4 + $0xc08] sm:$0xff] }
 0xe1e   : > { %12066 = vmatpush1.bf16.msra.mxu0 %v18580_v20  ;;  %11657 = vmatprep.subr.bf16.mxu1 %v18443_v62  ;;  %v18450_v20 = vcombine.low %v18322_v57, %v18326_v46  ;;  %v18606_v62 = vcombine.low %v18573_v29, %v18577_v26  ;;  %v18585_v57 = vcombine.high %v18550_v59, %v18554_v18  ;;  %v18378_v46 = vld [vmem:[%s29161_s4 + $0xec0] sm:$0xff]  ;;  %v18295_v29 = vld [vmem:[%s29161_s4 + $0xc28] sm:$0xff]  ;;  %v18567_v26 = vld [vmem:[%s29161_s4 + $0x1098] sm:$0xff] }
 0xe1f   : > { %12067 = vmatprep.subr.bf16.mxu0 %v18589_v17  ;;  %12097 = vmatprep.mubr.bf16.mxu0 %v22947_v13  ;;  %v18499_v17 = vcombine.high %v18370_v8, %v18374_v5 }
 0xe21   : > { %11658 = vmatpush1.bf16.msra.mxu1 %v18442_v25  ;;  %v18562_v25 = vld [vmem:[%s29161_s4 + $0x1070] sm:$0xff] }
 0xe22   : > { %12068 = vmatpush1.bf16.msra.mxu0 %v18588_v14  ;;  %11659 = vmatprep.subr.bf16.mxu1 %v18451_v27  ;;  %v18498_v14 = vcombine.low %v18370_v8, %v18374_v5  ;;  %v18584_v27 = vcombine.low %v18550_v59, %v18554_v18  ;;  %v18593_v2 = vcombine.high %v18558_v1, %v18562_v25  ;;  %v18299_v5 = vld [vmem:[%s29161_s4 + $0xc48] sm:$0xff]  ;;  %v18575_v18 = vld [vmem:[%s29161_s4 + $0x10d8] sm:$0xff] }
 0xe23   : > { %12069 = vmatprep.subr.bf16.mxu0 %v18597_v45  ;;  %v18507_v45 = vcombine.high %v18378_v46, %v18382_v16  ;;  %v18303_v59 = vld [vmem:[%s29161_s4 + $0xc68] sm:$0xff] }
 0xe25   : > { %11660 = vmatpush1.bf16.msra.mxu1 %v18450_v20  ;;  %v18570_v20 = vld [vmem:[%s29161_s4 + $0x10b0] sm:$0xff] }
 0xe26   : > { %12070 = vmatpush1.bf16.msra.mxu0 %v18596_v61  ;;  %11661 = vmatprep.subr.bf16.mxu1 %v18459_v58  ;;  %v18506_v61 = vcombine.low %v18378_v46, %v18382_v16  ;;  %v18592_v58 = vcombine.low %v18558_v1, %v18562_v25  ;;  %v18601_v33 = vcombine.high %v18566_v3, %v18570_v20  ;;  %v18311_v16 = vld [vmem:[%s29161_s4 + $0xca8] sm:$0xff] }
 0xe27   : > { %12071 = vmatprep.subr.bf16.mxu0 %v18605_v19  ;;  %v18515_v19 = vcombine.high %v18386_v32, %v18390_v11  ;;  %v18428_v1 = vcombine.low %v18299_v5, %v18303_v59 }
 0xe29   : > { %11662 = vmatpush1.bf16.msra.mxu1 %v18458_v24  ;;  %v18578_v24 = vld [vmem:[%s29161_s4 + $0x10f0] sm:$0xff] }
 0xe2a   : > { %12072 = vmatpush1.bf16.msra.mxu0 %v18604_v41  ;;  %11663 = vmatprep.subr.bf16.mxu1 %v18467_v15  ;;  %v18514_v41 = vcombine.low %v18386_v32, %v18390_v11  ;;  %v18600_v15 = vcombine.low %v18566_v3, %v18570_v20  ;;  %v18609_v37 = vcombine.high %v18574_v52, %v18578_v24  ;;  %v18323_v11 = vld [vmem:[%s29161_s4 + $0xd08] sm:$0xff] }
 0xe2b   : > { %12108 = vmatprep.subr.bf16.mxu0 %v18583_v44  ;;  %v18523_v44 = vcombine.high %v18394_v7, %v18398_v53  ;;  %v18327_v3 = vld [vmem:[%s29161_s4 + $0xd28] sm:$0xff] }
 0xe2d   : > { %18612 = vmatmul.mubr.msk.bf16.vlgmr.msra.gmra.mrb[104].mxu0 %vm269_vm1, %v26751_v34  ;;  %11664 = vmatpush1.bf16.msra.mxu1 %v18466_v6  ;;  %v18555_v6 = vld [vmem:[%s29161_s4 + $0x1038] sm:$0xff] }
 0xe2e   : > { %12109 = vmatpush1.bf16.msra.mxu0 %v18582_v31  ;;  %11665 = vmatprep.subr.bf16.mxu1 %v18475_v12  ;;  %v18522_v31 = vcombine.low %v18394_v7, %v18398_v53  ;;  %v18608_v12 = vcombine.low %v18574_v52, %v18578_v24  ;;  %v18587_v49 = vcombine.high %v18551_v0, %v18555_v6  ;;  %v18343_v53 = vld [vmem:[%s29161_s4 + $0xda8] sm:$0xff] }
 0xe2f   : > { %12110 = vmatprep.subr.bf16.mxu0 %v18591_v54  ;;  %12140 = vmatprep.mubr.bf16.mxu0 %v22947_v13  ;;  %v18531_v54 = vcombine.high %v18402_v4, %v18406_v50 }
 0xe31   : > { %11666 = vmatpush1.bf16.msra.mxu1 %v18474_v36  ;;  %v18563_v36 = vld [vmem:[%s29161_s4 + $0x1078] sm:$0xff] }
 0xe32   : > { %12111 = vmatpush1.bf16.msra.mxu0 %v18590_v42  ;;  %11667 = vmatprep.subr.bf16.mxu1 %v18483_v38  ;;  %v18530_v42 = vcombine.low %v18402_v4, %v18406_v50  ;;  %v18586_v38 = vcombine.low %v18551_v0, %v18555_v6  ;;  %v18595_v28 = vcombine.high %v18559_v47, %v18563_v36  ;;  %v18355_v4 = vld [vmem:[%s29161_s4 + $0xe08] sm:$0xff] }
 0xe33   : > { %12112 = vmatprep.subr.bf16.mxu0 %v18599_v43  ;;  %v18539_v43 = vcombine.high %v18410_v39, %v18414_v30  ;;  %v18359_v50 = vld [vmem:[%s29161_s4 + $0xe28] sm:$0xff] }
 0xe34   : > { %v18485_v6 = vcombine.high %v18355_v4, %v18359_v50 }
 0xe35   : > { %11668 = vmatpush1.bf16.msra.mxu1 %v18482_v22  ;;  %v18571_v22 = vld [vmem:[%s29161_s4 + $0x10b8] sm:$0xff] }
 0xe36   : > { %12113 = vmatpush1.bf16.msra.mxu0 %v18598_v10  ;;  %11669 = vmatprep.subr.bf16.mxu1 %v18491_v48  ;;  %v18538_v10 = vcombine.low %v18410_v39, %v18414_v30  ;;  %v18594_v48 = vcombine.low %v18559_v47, %v18563_v36  ;;  %v18603_v8 = vcombine.high %v18567_v26, %v18571_v22  ;;  %v18371_v39 = vld [vmem:[%s29161_s4 + $0xe88] sm:$0xff] }
 0xe37   : > { %12114 = vmatprep.subr.bf16.mxu0 %v18607_v35  ;;  %v18421_v35 = vcombine.high %v18291_v21, %v18295_v29  ;;  %v18375_v30 = vld [vmem:[%s29161_s4 + $0xea8] sm:$0xff] }
 0xe38   : > { %v18501_v36 = vcombine.high %v18371_v39, %v18375_v30 }
 0xe39   : > { %11670 = vmatpush1.bf16.msra.mxu1 %v18490_v9  ;;  %v18579_v9 = vld [vmem:[%s29161_s4 + $0x10f8] sm:$0xff] }
 0xe3a   : > { %12115 = vmatpush1.bf16.msra.mxu0 %v18606_v62  ;;  %11671 = vmatprep.subr.bf16.mxu1 %v18499_v17  ;;  %v18420_v62 = vcombine.low %v18291_v21, %v18295_v29  ;;  %v18602_v17 = vcombine.low %v18567_v26, %v18571_v22  ;;  %v18611_v46 = vcombine.high %v18575_v18, %v18579_v9  ;;  %v18387_v21 = vld [vmem:[%s29161_s4 + $0xf08] sm:$0xff] }
 0xe3b   : > { %12151 = vmatprep.subr.bf16.mxu0 %v18585_v57  ;;  %v18429_v57 = vcombine.high %v18299_v5, %v18303_v59  ;;  %v18610_v25 = vcombine.low %v18575_v18, %v18579_v9  ;;  %v18391_v29 = vld [vmem:[%s29161_s4 + $0xf28] sm:$0xff] }
 0xe3c   : > { %v18517_v22 = vcombine.high %v18387_v21, %v18391_v29  ;;  %v18403_v5 = vld [vmem:[%s29161_s4 + $0xf88] sm:$0xff] }
 0xe3d   : > { %18613 = vmatmul.mubr.msk.bf16.vlgmr.msra.gmra.mrb[108].mxu0 %vm269_vm1, %v26751_v34  ;;  %11672 = vmatpush1.bf16.msra.mxu1 %v18498_v14  ;;  %v18407_v59 = vld [vmem:[%s29161_s4 + $0xfa8] sm:$0xff] }
 0xe3e   : > { %12152 = vmatpush1.bf16.msra.mxu0 %v18584_v27  ;;  %11673 = vmatprep.subr.bf16.mxu1 %v18507_v45  ;;  %v18315_v27 = vld [vmem:[%s29161_s4 + $0xcc8] sm:$0xff]  ;;  %v18533_v9 = vcombine.high %v18403_v5, %v18407_v59 }
 0xe3f   : > { %12153 = vmatprep.subr.bf16.mxu0 %v18593_v2  ;;  %12183 = vmatprep.mubr.bf16.mxu0 %v22947_v13  ;;  %v18319_v45 = vld [vmem:[%s29161_s4 + $0xce8] sm:$0xff] }
 0xe40   : > { %v18445_v32 = vcombine.high %v18315_v27, %v18319_v45  ;;  %v18444_v20 = vcombine.low %v18315_v27, %v18319_v45  ;;  %v18305_v27 = vld [vmem:[%s29161_s4 + $0xc78] sm:$0xff] }
 0xe41   : > { %11674 = vmatpush1.bf16.msra.mxu1 %v18506_v61  ;;  %v18453_v61 = vcombine.high %v18323_v11, %v18327_v3 }
 0xe42   : > { %12154 = vmatpush1.bf16.msra.mxu0 %v18592_v58  ;;  %11675 = vmatprep.subr.bf16.mxu1 %v18515_v19  ;;  %v18331_v58 = vld [vmem:[%s29161_s4 + $0xd48] sm:$0xff] }
 0xe43   : > { %12155 = vmatprep.subr.bf16.mxu0 %v18601_v33  ;;  %v18335_v19 = vld [vmem:[%s29161_s4 + $0xd68] sm:$0xff]  ;;  %v18452_v33 = vcombine.low %v18323_v11, %v18327_v3  ;;  %v18313_v11 = vld [vmem:[%s29161_s4 + $0xcb8] sm:$0xff] }
 0xe44   : > { %v18461_v7 = vcombine.high %v18331_v58, %v18335_v19  ;;  %v18460_v52 = vcombine.low %v18331_v58, %v18335_v19  ;;  %v18321_v58 = vld [vmem:[%s29161_s4 + $0xcf8] sm:$0xff] }
 0xe45   : > { %11676 = vmatpush1.bf16.msra.mxu1 %v18514_v41  ;;  %v18347_v41 = vld [vmem:[%s29161_s4 + $0xdc8] sm:$0xff] }
 0xe46   : > { %12156 = vmatpush1.bf16.msra.mxu0 %v18600_v15  ;;  %11677 = vmatprep.subr.bf16.mxu1 %v18523_v44  ;;  %v18351_v15 = vld [vmem:[%s29161_s4 + $0xde8] sm:$0xff] }
 0xe47   : > { %12157 = vmatprep.subr.bf16.mxu0 %v18609_v37  ;;  %v18477_v37 = vcombine.high %v18347_v41, %v18351_v15  ;;  %v18476_v0 = vcombine.low %v18347_v41, %v18351_v15 }
 0xe49   : > { %11678 = vmatpush1.bf16.msra.mxu1 %v18522_v31  ;;  %v18363_v31 = vld [vmem:[%s29161_s4 + $0xe48] sm:$0xff] }
 0xe4a   : > { %12158 = vmatpush1.bf16.msra.mxu0 %v18608_v12  ;;  %11679 = vmatprep.subr.bf16.mxu1 %v18531_v54  ;;  %v18367_v12 = vld [vmem:[%s29161_s4 + $0xe68] sm:$0xff]  ;;  %v18484_v54 = vcombine.low %v18355_v4, %v18359_v50 }
 0xe4b   : > { %12194 = vmatprep.subr.bf16.mxu0 %v18587_v49  ;;  %v18493_v49 = vcombine.high %v18363_v31, %v18367_v12  ;;  %v18492_v47 = vcombine.low %v18363_v31, %v18367_v12 }
 0xe4d   : > { %18614 = vmatmul.mubr.msk.bf16.vlgmr.msra.gmra.mrb[112].mxu0 %vm269_vm1, %v26751_v34  ;;  %11680 = vmatpush1.bf16.msra.mxu1 %v18530_v42  ;;  %v18379_v42 = vld [vmem:[%s29161_s4 + $0xec8] sm:$0xff] }
 0xe4e   : > { %12195 = vmatpush1.bf16.msra.mxu0 %v18586_v38  ;;  %11681 = vmatprep.subr.bf16.mxu1 %v18539_v43  ;;  %v18383_v38 = vld [vmem:[%s29161_s4 + $0xee8] sm:$0xff]  ;;  %v18500_v43 = vcombine.low %v18371_v39, %v18375_v30 }
 0xe4f   : > { %12196 = vmatprep.subr.bf16.mxu0 %v18595_v28  ;;  %12226 = vmatprep.mubr.bf16.mxu0 %v22947_v13  ;;  %v18307_v13 = vld [vmem:[%s29161_s4 + $0xc88] sm:$0xff]  ;;  %v18509_v28 = vcombine.high %v18379_v42, %v18383_v38  ;;  %v18508_v26 = vcombine.low %v18379_v42, %v18383_v38 }
 0xe50   : > { %v18437_v14 = vcombine.high %v18307_v13, %v18311_v16  ;;  %v18436_v2 = vcombine.low %v18307_v13, %v18311_v16  ;;  %v18293_v13 = vld [vmem:[%s29161_s4 + $0xc18] sm:$0xff] }
 0xe51   : > { %11682 = vmatpush1.bf16.msra.mxu1 %v18538_v10  ;;  %v18395_v10 = vld [vmem:[%s29161_s4 + $0xf48] sm:$0xff]  ;;  %v18297_v16 = vld [vmem:[%s29161_s4 + $0xc38] sm:$0xff] }
 0xe52   : > { %12197 = vmatpush1.bf16.msra.mxu0 %v18594_v48  ;;  %11694 = vmatprep.subr.bf16.mxu1 %v18421_v35  ;;  %v18399_v48 = vld [vmem:[%s29161_s4 + $0xf68] sm:$0xff]  ;;  %v18516_v35 = vcombine.low %v18387_v21, %v18391_v29  ;;  %v18424_v45 = vcombine.low %v18293_v13, %v18297_v16 }
 0xe53   : > { %12198 = vmatprep.subr.bf16.mxu0 %v18603_v8  ;;  %v18525_v8 = vcombine.high %v18395_v10, %v18399_v48  ;;  %v18524_v18 = vcombine.low %v18395_v10, %v18399_v48 }
 0xe54   : > { %11684 = vmatmul.mubr.bf16.vlgmr.msra.gmra.mrb[48].mxu1 %v26690_v60 }
 0xe55   : > { %11695 = vmatpush1.bf16.msra.mxu1 %v18420_v62  ;;  %11726 = vmatprep.mubr.bf16.mxu1 %v26692_v40  ;;  %v18411_v62 = vld [vmem:[%s29161_s4 + $0xfc8] sm:$0xff] }
 0xe56   : > { %12199 = vmatpush1.bf16.msra.mxu0 %v18602_v17  ;;  %11696 = vmatprep.subr.bf16.mxu1 %v18429_v57  ;;  %v18415_v17 = vld [vmem:[%s29161_s4 + $0xfe8] sm:$0xff]  ;;  %v18532_v57 = vcombine.low %v18403_v5, %v18407_v59 }
 0xe57   : > { %12200 = vmatprep.subr.bf16.mxu0 %v18611_v46  ;;  %v18541_v46 = vcombine.high %v18411_v62, %v18415_v17 }
 0xe59   : > { %11697 = vmatpush1.bf16.msra.mxu1 %v18428_v1  ;;  %v18540_v1 = vcombine.low %v18411_v62, %v18415_v17 }
 0xe5a   : > { %12201 = vmatpush1.bf16.msra.mxu0 %v18610_v25  ;;  %11698 = vmatprep.subr.bf16.mxu1 %v18437_v14  ;;  %v18425_v25 = vcombine.high %v18293_v13, %v18297_v16  ;;  %v18301_v14 = vld [vmem:[%s29161_s4 + $0xc58] sm:$0xff] }
 0xe5b   : > { %v18432_v3 = vcombine.low %v18301_v14, %v18305_v27 }
 0xe5d   : > { %18615 = vmatmul.mubr.msk.bf16.vlgmr.msra.gmra.mrb[116].mxu0 %vm269_vm1, %v26751_v34  ;;  %11699 = vmatpush1.bf16.msra.mxu1 %v18436_v2  ;;  %v18339_v34 = vld [vmem:[%s29161_s4 + $0xd88] sm:$0xff]  ;;  %v18433_v2 = vcombine.high %v18301_v14, %v18305_v27  ;;  %vm12351_vm1 = vcmask 269312  }
 0xe5e   : > { %11700 = vmatprep.subr.bf16.mxu1 %v18445_v32  ;;  %12654 = vmatprep.mubr.f32.mxu0 %v29248_v51  ;;  %v18469_v24 = vcombine.high %v18339_v34, %v18343_v53  ;;  %v18468_v44 = vcombine.low %v18339_v34, %v18343_v53  ;;  %v18309_v32 = vld [vmem:[%s29161_s4 + $0xc98] sm:$0xff] }
 0xe5f   : > { %v18440_v19 = vcombine.low %v18309_v32, %v18313_v11 }
 0xe61   : > { %11701 = vmatpush1.bf16.msra.mxu1 %v18444_v20  ;;  %v18441_v20 = vcombine.high %v18309_v32, %v18313_v11 }
 0xe62   : > { %11702 = vmatprep.subr.bf16.mxu1 %v18453_v61  ;;  %v18317_v61 = vld [vmem:[%s29161_s4 + $0xcd8] sm:$0xff] }
 0xe63   : > { %v18448_v34 = vcombine.low %v18317_v61, %v18321_v58 }
 0xe65   : > { %11703 = vmatpush1.bf16.msra.mxu1 %v18452_v33  ;;  %v18449_v33 = vcombine.high %v18317_v61, %v18321_v58 }
 0xe66   : > { %11704 = vmatprep.subr.bf16.mxu1 %v18461_v7  ;;  %v18325_v7 = vld [vmem:[%s29161_s4 + $0xd18] sm:$0xff] }
 0xe69   : > { %11705 = vmatpush1.bf16.msra.mxu1 %v18460_v52  ;;  %v18333_v52 = vld [vmem:[%s29161_s4 + $0xd58] sm:$0xff] }
 0xe6a   : > { %11706 = vmatprep.subr.bf16.mxu1 %v18469_v24  ;;  %v18337_v24 = vld [vmem:[%s29161_s4 + $0xd78] sm:$0xff] }
 0xe6b   : > { %v18465_v15 = vcombine.high %v18333_v52, %v18337_v24  ;;  %v18464_v4 = vcombine.low %v18333_v52, %v18337_v24 }
 0xe6d   : > { %11707 = vmatpush1.bf16.msra.mxu1 %v18468_v44  ;;  %v18341_v44 = vld [vmem:[%s29161_s4 + $0xd98] sm:$0xff] }
 0xe6e   : > { %11708 = vmatprep.subr.bf16.mxu1 %v18477_v37  ;;  %v18345_v37 = vld [vmem:[%s29161_s4 + $0xdb8] sm:$0xff] }
 0xe6f   : > { %v18473_v50 = vcombine.high %v18341_v44, %v18345_v37  ;;  %v18472_v31 = vcombine.low %v18341_v44, %v18345_v37 }
 0xe71   : > { %11709 = vmatpush1.bf16.msra.mxu1 %v18476_v0  ;;  %v18349_v0 = vld [vmem:[%s29161_s4 + $0xdd8] sm:$0xff] }
 0xe72   : > { %11710 = vmatprep.subr.bf16.mxu1 %v18485_v6  ;;  %v18353_v6 = vld [vmem:[%s29161_s4 + $0xdf8] sm:$0xff] }
 0xe73   : > { %v18481_v12 = vcombine.high %v18349_v0, %v18353_v6  ;;  %v18480_v39 = vcombine.low %v18349_v0, %v18353_v6 }
 0xe75   : > { %11711 = vmatpush1.bf16.msra.mxu1 %v18484_v54  ;;  %v18357_v54 = vld [vmem:[%s29161_s4 + $0xe18] sm:$0xff] }
 0xe76   : > { %11712 = vmatprep.subr.bf16.mxu1 %v18493_v49  ;;  %v18361_v49 = vld [vmem:[%s29161_s4 + $0xe38] sm:$0xff] }
 0xe77   : > { %v18489_v30 = vcombine.high %v18357_v54, %v18361_v49  ;;  %v18488_v42 = vcombine.low %v18357_v54, %v18361_v49 }
 0xe79   : > { %11713 = vmatpush1.bf16.msra.mxu1 %v18492_v47  ;;  %v18365_v47 = vld [vmem:[%s29161_s4 + $0xe58] sm:$0xff] }
 0xe7a   : > { %11714 = vmatprep.subr.bf16.mxu1 %v18501_v36  ;;  %v18369_v36 = vld [vmem:[%s29161_s4 + $0xe78] sm:$0xff] }
 0xe7b   : > { %v18497_v38 = vcombine.high %v18365_v47, %v18369_v36  ;;  %v18496_v21 = vcombine.low %v18365_v47, %v18369_v36 }
 0xe7d   : > { %11715 = vmatpush1.bf16.msra.mxu1 %v18500_v43  ;;  %v18373_v43 = vld [vmem:[%s29161_s4 + $0xe98] sm:$0xff] }
 0xe7e   : > { %11716 = vmatprep.subr.bf16.mxu1 %v18509_v28  ;;  %v18377_v28 = vld [vmem:[%s29161_s4 + $0xeb8] sm:$0xff] }
 0xe7f   : > { %v18505_v29 = vcombine.high %v18373_v43, %v18377_v28  ;;  %v18504_v10 = vcombine.low %v18373_v43, %v18377_v28 }
 0xe81   : > { %11717 = vmatpush1.bf16.msra.mxu1 %v18508_v26  ;;  %v18381_v26 = vld [vmem:[%s29161_s4 + $0xed8] sm:$0xff] }
 0xe82   : > { %11718 = vmatprep.subr.bf16.mxu1 %v18517_v22  ;;  %v18385_v22 = vld [vmem:[%s29161_s4 + $0xef8] sm:$0xff] }
 0xe83   : > { %v18513_v48 = vcombine.high %v18381_v26, %v18385_v22  ;;  %v18512_v5 = vcombine.low %v18381_v26, %v18385_v22 }
 0xe85   : > { %11719 = vmatpush1.bf16.msra.mxu1 %v18516_v35  ;;  %v18389_v35 = vld [vmem:[%s29161_s4 + $0xf18] sm:$0xff] }
 0xe86   : > { %11720 = vmatprep.subr.bf16.mxu1 %v18525_v8  ;;  %v18393_v8 = vld [vmem:[%s29161_s4 + $0xf38] sm:$0xff] }
 0xe87   : > { %v18521_v59 = vcombine.high %v18389_v35, %v18393_v8  ;;  %v18520_v62 = vcombine.low %v18389_v35, %v18393_v8 }
 0xe89   : > { %11721 = vmatpush1.bf16.msra.mxu1 %v18524_v18  ;;  %v18397_v18 = vld [vmem:[%s29161_s4 + $0xf58] sm:$0xff] }
 0xe8a   : > { %11722 = vmatprep.subr.bf16.mxu1 %v18533_v9  ;;  %v18401_v9 = vld [vmem:[%s29161_s4 + $0xf78] sm:$0xff] }
 0xe8b   : > { %v18529_v17 = vcombine.high %v18397_v18, %v18401_v9  ;;  %v18528_v13 = vcombine.low %v18397_v18, %v18401_v9 }
 0xe8d   : > { %11723 = vmatpush1.bf16.msra.mxu1 %v18532_v57  ;;  %v18405_v57 = vld [vmem:[%s29161_s4 + $0xf98] sm:$0xff] }
 0xe8e   : > { %11724 = vmatprep.subr.bf16.mxu1 %v18541_v46  ;;  %v18409_v46 = vld [vmem:[%s29161_s4 + $0xfb8] sm:$0xff] }
 0xe8f   : > { %v18537_v16 = vcombine.high %v18405_v57, %v18409_v46  ;;  %v18536_v14 = vcombine.low %v18405_v57, %v18409_v46 }
 0xe91   : > { %11725 = vmatpush1.bf16.msra.mxu1 %v18540_v1  ;;  %v18413_v1 = vld [vmem:[%s29161_s4 + $0xfd8] sm:$0xff] }
 0xe92   : > { %11780 = vmatprep.subr.bf16.mxu1 %v18425_v25  ;;  %v18417_v25 = vld [vmem:[%s29161_s4 + $0xff8] sm:$0xff] }
 0xe93   : > { %v18545_v27 = vcombine.high %v18413_v1, %v18417_v25 }
 0xe94   : > { %11727 = vmatmul.mubr.bf16.vlgmr.msra.gmra.mrb[52].mxu1 %v26690_v60 }
 0xe95   : > { %11781 = vmatpush1.bf16.msra.mxu1 %v18424_v45  ;;  %11812 = vmatprep.mubr.bf16.mxu1 %v26692_v40  ;;  %v18329_v40 = vld [vmem:[%s29161_s4 + $0xd38] sm:$0xff]  ;;  %v18544_v45 = vcombine.low %v18413_v1, %v18417_v25 }
 0xe96   : > { %11782 = vmatprep.subr.bf16.mxu1 %v18433_v2  ;;  %v18457_v53 = vcombine.high %v18325_v7, %v18329_v40  ;;  %v18456_v41 = vcombine.low %v18325_v7, %v18329_v40 }
 0xe99   : > { %11783 = vmatpush1.bf16.msra.mxu1 %v18432_v3 }
 0xe9a   : > { %11784 = vmatprep.subr.bf16.mxu1 %v18441_v20 }
 0xe9d   : > { %11785 = vmatpush1.bf16.msra.mxu1 %v18440_v19 }
 0xe9e   : > { %11786 = vmatprep.subr.bf16.mxu1 %v18449_v33 }
 0xea1   : > { %11787 = vmatpush1.bf16.msra.mxu1 %v18448_v34 }
 0xea2   : > { %11788 = vmatprep.subr.bf16.mxu1 %v18457_v53 }
 0xea5   : > { %11789 = vmatpush1.bf16.msra.mxu1 %v18456_v41 }
 0xea6   : > { %11790 = vmatprep.subr.bf16.mxu1 %v18465_v15 }
 0xea9   : > { %11791 = vmatpush1.bf16.msra.mxu1 %v18464_v4 }
 0xeaa   : > { %11792 = vmatprep.subr.bf16.mxu1 %v18473_v50 }
 0xead   : > { %11793 = vmatpush1.bf16.msra.mxu1 %v18472_v31 }
 0xeae   : > { %11794 = vmatprep.subr.bf16.mxu1 %v18481_v12 }
 0xeb1   : > { %11795 = vmatpush1.bf16.msra.mxu1 %v18480_v39 }
 0xeb2   : > { %11796 = vmatprep.subr.bf16.mxu1 %v18489_v30 }
 0xeb5   : > { %11797 = vmatpush1.bf16.msra.mxu1 %v18488_v42 }
 0xeb6   : > { %11798 = vmatprep.subr.bf16.mxu1 %v18497_v38 }
 0xeb9   : > { %11799 = vmatpush1.bf16.msra.mxu1 %v18496_v21 }
 0xeba   : > { %11800 = vmatprep.subr.bf16.mxu1 %v18505_v29  ;;  %v27164_v29 = vpop.permute.xlu0 %11844 }
 0xebd   : > { %11801 = vmatpush1.bf16.msra.mxu1 %v18504_v10 }
 0xebe   : > { %11802 = vmatprep.subr.bf16.mxu1 %v18513_v48  ;;  %v27169_v48 = vpop.permute.xlu1 %11849 }
 0xec1   : > { %11803 = vmatpush1.bf16.msra.mxu1 %v18512_v5 }
 0xec2   : > { %11804 = vmatprep.subr.bf16.mxu1 %v18521_v59 }
 0xec5   : > { %11805 = vmatpush1.bf16.msra.mxu1 %v18520_v62 }
 0xec6   : > { %11806 = vmatprep.subr.bf16.mxu1 %v18529_v17 }
 0xec9   : > { %11807 = vmatpush1.bf16.msra.mxu1 %v18528_v13 }
 0xeca   : > { %11808 = vmatprep.subr.bf16.mxu1 %v18537_v16 }
 0xecd   : > { %11809 = vmatpush1.bf16.msra.mxu1 %v18536_v14 }
 0xece   : > { %11810 = vmatprep.subr.bf16.mxu1 %v18545_v27 }
 0xed1   : > { %11811 = vmatpush1.bf16.msra.mxu1 %v18544_v45 }
 0xed4   : > { %11813 = vmatmul.mubr.bf16.vlgmr.msra.gmra.mrb[56].mxu1 %v26690_v60 }
 0xef0   : > { %v11771_v2 = vpop.f32.mrb[92].mxu0 }
 0xef1   : > { %v27070_v32 = vpop.f32.mrb[93].mxu0  ;;  %v27189_v17 = vadd.f32 %v27164_v29, %v11771_v2 }
 0xef2   : > { %v27072_v11 = vpop.f32.mrb[94].mxu0  ;;  %v27256_v21 = vadd.f32 %v27164_v29, %v27070_v32 }
 0xef3   : > { %v27074_v3 = vpop.f32.mrb[95].mxu0  ;;  %29283 = vst [vmem:[#allocation25_spill] sm:$0xff] %v27189_v17 }
 0xef4   : > { %29292 = vst [vmem:[#allocation34_spill] sm:$0xff] %v27256_v21 }
 0xf00   : > { %v27076_v20 = vpop.f32.mrb[104].mxu0 }
 0xf01   : > { %29264 = vst [vmem:[#allocation6_spill] sm:$0xff] %v27076_v20  ;;  %v27078_v61 = vpop.f32.mrb[105].mxu0  ;;  %v27082_v58 = vpack.i.bf16 %v27076_v20, %v29248_v51 }
 0xf02   : > { %v27084_v19 = vpop.f32.mrb[106].mxu0 }
 0xf03   : > { %22205 = vrot.lane.b32.xlu0 %v27082_v58, %s22956_s10  ;;  %v27090_v33 = vpop.f32.mrb[107].mxu0  ;;  %v27094_v7 = vpack.i.bf16 %v27084_v19, %v27078_v61  ;;  %v27098_v40 = vpack.i.bf16 %v27084_v19, %v27076_v20 }
 0xf05   : > { %29265 = vst [vmem:[#allocation7_spill] sm:$0xff] %v27098_v40  ;;  %22210 = vrot.lane.b32.xlu1 %v27094_v7, %s22956_s10 }
 0xf10   : > { %v27108_v24 = vpop.f32.mrb[108].mxu0 }
 0xf11   : > { %29266 = vst [vmem:[#allocation8_spill] sm:$0xff] %v27108_v24  ;;  %v27110_v41 = vpop.f32.mrb[109].mxu0  ;;  %v27114_v15 = vpack.i.bf16 %v27108_v24, %v27078_v61 }
 0xf12   : > { %29267 = vst [vmem:[#allocation9_spill] sm:$0xff] %v27110_v41  ;;  %v27116_v44 = vpop.f32.mrb[110].mxu0 }
 0xf13   : > { %29268 = vst [vmem:[#allocation10_spill] sm:$0xff] %v27114_v15  ;;  %29269 = vst [vmem:[#allocation11_spill] sm:$0xff] %v27116_v44  ;;  %v27120_v4 = vpop.f32.mrb[111].mxu0  ;;  %v27124_v50 = vpack.i.bf16 %v27116_v44, %v27110_v41  ;;  %v27128_v0 = vpack.i.bf16 %v27116_v44, %v27090_v33 }
 0xf14   : > { %29270 = vst [vmem:[#allocation12_spill] sm:$0xff] %v27120_v4  ;;  %v27203_v13 = vpack.i.bf16 %v27189_v17, %v27120_v4 }
 0xf15   : > { %29271 = vst [vmem:[#allocation13_spill] sm:$0xff] %v27128_v0 }
 0xf20   : > { %v27136_v54 = vpop.f32.mrb[112].mxu0 }
 0xf21   : > { %29272 = vst [vmem:[#allocation14_spill] sm:$0xff] %v27136_v54  ;;  %v27138_v49 = vpop.f32.mrb[113].mxu0  ;;  %v27142_v39 = vpack.i.bf16 %v27136_v54, %v27110_v41 }
 0xf22   : > { %29273 = vst [vmem:[#allocation15_spill] sm:$0xff] %v27138_v49  ;;  %v27144_v30 = vpop.f32.mrb[114].mxu0 }
 0xf23   : > { %29274 = vst [vmem:[#allocation16_spill] sm:$0xff] %v27142_v39  ;;  %29275 = vst [vmem:[#allocation17_spill] sm:$0xff] %v27144_v30  ;;  %v27148_v36 = vpop.f32.mrb[115].mxu0  ;;  %v27152_v42 = vpack.i.bf16 %v27144_v30, %v27138_v49  ;;  %v27156_v38 = vpack.i.bf16 %v27144_v30, %v27120_v4 }
 0xf24   : > { %29276 = vst [vmem:[#allocation18_spill] sm:$0xff] %v27148_v36 }
 0xf25   : > { %29277 = vst [vmem:[#allocation19_spill] sm:$0xff] %v27156_v38 }
 0xf27   : > { %v11685_v26 = vpop.f32.mrb[48].mxu1 }
 0xf28   : > { %v27167_v22 = vadd.f32 %v27164_v29, %v11685_v26  ;;  %v11687_v10 = vpop.f32.mrb[49].mxu1 }
 0xf29   : > { %v27172_v35 = vadd.f32 %v27164_v29, %v11687_v10  ;;  %v11689_v8 = vpop.f32.mrb[50].mxu1 }
 0xf2a   : > { %29278 = vst [vmem:[#allocation20_spill] sm:$0xff] %v27167_v22  ;;  %v27175_v5 = vadd.f32 %v27169_v48, %v11689_v8  ;;  %v11691_v59 = vpop.f32.mrb[51].mxu1 }
 0xf2b   : > { %29279 = vst [vmem:[#allocation21_spill] sm:$0xff] %v27172_v35  ;;  %v27178_v18 = vadd.f32 %v27169_v48, %v11691_v59  ;;  %v27182_v9 = vpack.i.bf16 %v27172_v35, %v27167_v22  ;;  %v27265_v59 = vadd.f32 %v27169_v48, %v27072_v11  ;;  %v27283_v11 = vadd.f32 %v27169_v48, %v27074_v3 }
 0xf2c   : > { %29280 = vst [vmem:[#allocation22_spill] sm:$0xff] %v27175_v5  ;;  %v27186_v62 = vpack.i.bf16 %v27175_v5, %v27167_v22 }
 0xf2d   : > { %29281 = vst [vmem:[#allocation23_spill] sm:$0xff] %v27178_v18  ;;  %22215 = vrot.lane.b32.xlu0 %v27182_v9, %s22956_s10  ;;  %v27195_v57 = vpack.i.bf16 %v27178_v18, %v27175_v5  ;;  %29294 = vst [vmem:[#allocation36_spill] sm:$0xff] %v27265_v59  ;;  %v27289_v43 = vpack.i.bf16 %v27265_v59, %v27256_v21  ;;  %v27299_v3 = vpack.i.bf16 %v27136_v54, %v27283_v11 }
 0xf2e   : > { %29282 = vst [vmem:[#allocation24_spill] sm:$0xff] %v27186_v62  ;;  %29295 = vst [vmem:[#allocation37_spill] sm:$0xff] %v27283_v11 }
 0xf2f   : > { %22220 = vrot.lane.b32.xlu1 %v27195_v57, %s22956_s10 }
 0xf30   : > { %v27205_v16 = vpop.f32.mrb[116].mxu0 }
 0xf31   : > { %29284 = vst [vmem:[#allocation26_spill] sm:$0xff] %v27205_v16  ;;  %v27207_v1 = vpop.f32.mrb[117].mxu0  ;;  %22230 = vrot.lane.b32.xlu0 %v27203_v13, %s22956_s10  ;;  %v27213_v25 = vpack.i.bf16 %v27205_v16, %v27138_v49 }
 0xf32   : > { %v27215_v14 = vpop.f32.mrb[118].mxu0 }
 0xf33   : > { %29285 = vst [vmem:[#allocation27_spill] sm:$0xff] %v27213_v25  ;;  %29286 = vst [vmem:[#allocation28_spill] sm:$0xff] %v27215_v14  ;;  %v27219_v45 = vpop.f32.mrb[119].mxu0  ;;  %22225 = vrot.lane.b32.xlu1 %v27124_v50, %s22956_s10  ;;  %v27225_v2 = vpack.i.bf16 %v27215_v14, %v27207_v1  ;;  %v27229_v26 = vpack.i.bf16 %v27215_v14, %v27148_v36 }
 0xf34   : > { %v27235_v8 = vpack.i.bf16 %v27219_v45, %v27207_v1 }
 0xf35   : > { %29287 = vst [vmem:[#allocation29_spill] sm:$0xff] %v27229_v26 }
 0xf36   : > { %29288 = vst [vmem:[#allocation30_spill] sm:$0xff] %v27235_v8 }
 0xf67   : > { %v11728_v28 = vpop.f32.mrb[52].mxu1 }
 0xf68   : > { %v27242_v12 = vadd.f32 %v27164_v29, %v11728_v28  ;;  %v11730_v31 = vpop.f32.mrb[53].mxu1 }
 0xf69   : > { %v27245_v52 = vadd.f32 %v27164_v29, %v11730_v31  ;;  %v11732_v53 = vpop.f32.mrb[54].mxu1 }
 0xf6a   : > { %29289 = vst [vmem:[#allocation31_spill] sm:$0xff] %v27242_v12  ;;  %v27248_v46 = vadd.f32 %v27169_v48, %v11732_v53  ;;  %v11734_v10 = vpop.f32.mrb[55].mxu1  ;;  %v27252_v27 = vpack.i.bf16 %v27242_v12, %v27090_v33 }
 0xf6b   : > { %29290 = vst [vmem:[#allocation32_spill] sm:$0xff] %v27245_v52  ;;  %v27259_v28 = vadd.f32 %v27169_v48, %v11734_v10 }
 0xf6c   : > { %29291 = vst [vmem:[#allocation33_spill] sm:$0xff] %v27248_v46  ;;  %22235 = vrot.lane.b32.xlu0 %v27252_v27, %s22956_s10  ;;  %v27271_v53 = vpack.i.bf16 %v27248_v46, %v27245_v52 }
 0xf6d   : > { %29293 = vst [vmem:[#allocation35_spill] sm:$0xff] %v27259_v28  ;;  %v27275_v32 = vpack.i.bf16 %v27108_v24, %v27259_v28 }
 0xf6e   : > { %22240 = vrot.lane.b32.xlu1 %v27271_v53, %s22956_s10 }
 0xf70   : > { %22250 = vrot.lane.b32.xlu0 %v27275_v32, %s22956_s10 }
 0xf72   : > { %22245 = vrot.lane.b32.xlu1 %v27289_v43, %s22956_s10 }
 0xf74   : > { %22255 = vrot.lane.b32.xlu0 %v27299_v3, %s22956_s10 }
 0xf75   : > { %v27309_v6 = vpop.permute.xlu0 %22205 }
 0xf76   : > { %22260 = vrot.lane.b32.xlu1 %v27152_v42, %s22956_s10  ;;  %v27320_v60 = vunpack.i.l.bf16 %v27309_v6 }
 0xf77   : > { %v27311_v47 = vpop.permute.xlu1 %22210 }
 0xf78   : > { %12518 = vrot.lane.b32.xlu0 %v27219_v45, %s22956_s10 }
 0xf7a   : > { %22265 = vrot.lane.b32.xlu1 %v27225_v2, %s22956_s10 }
 0xf9f   : > { %v27313_v37 = vpop.permute.xlu0 %22215 }
 0xfa0   : > { %v22218_v10 = vunpack.i.h.bf16 %v27313_v37  ;;  %v22217_v31 = vunpack.i.l.bf16 %v27313_v37 }
 0xfa1   : > { %v27317_v34 = vpop.permute.xlu1 %22220 }
 0xfa2   : > { %v29184_v56 = vunpack.i.h.bf16 %v27317_v34  ;;  %v22222_v22 = vunpack.i.l.bf16 %v27317_v34  ;;  %v12520_v5 = vsel %vm29232_vm3, %v27320_v60, %v22217_v31  ;;  %v12521_v8 = vsel %vm29232_vm3, %v22217_v31, %v22218_v10 }
 0xfa4   : > { %v12528_v55 = vsel %vm29232_vm3, %v27320_v60, %v22222_v22  ;;  %v12529_v26 = vsel %vm29232_vm3, %v22222_v22, %v29184_v56 }
 0xfa5   : > { %v21096_v25 = vpack.c.bf16 %v12529_v26, %v12521_v8  ;;  %v21098_v38 = vpack.c.bf16 %v12528_v55, %v12520_v5  ;;  %v22213_v5 = vunpack.i.h.bf16 %v27311_v47  ;;  %v22212_v26 = vunpack.i.l.bf16 %v27311_v47 }
 0xfa7   : > { %v11814_v39 = vpop.f32.mrb[56].mxu1  ;;  %21097 = vmatprep.subr.bf16.mxu0 %v21096_v25  ;;  %v22208_v25 = vunpack.i.h.bf16 %v27309_v6 }
 0xfa8   : > { %v27335_v23 = vadd.f32 %v27164_v29, %v11814_v39  ;;  %v11816_v63 = vpop.f32.mrb[57].mxu1  ;;  %21099 = vmatpush1.bf16.msra.mxu0 %v21098_v38 }
 0xfa9   : > { %v27338_v40 = vadd.f32 %v27164_v29, %v11816_v63  ;;  %v11818_v0 = vpop.f32.mrb[58].mxu1  ;;  %v27391_v29 = vpop.permute.xlu0 %22230  ;;  %v12536_v6 = vsel %vm29232_vm3, %v27320_v60, %v22208_v25  ;;  %v12537_v47 = vsel %vm29232_vm3, %v22208_v25, %v22212_v26 }
 0xfaa   : > { %29296 = vst [vmem:[#allocation38_spill] sm:$0xff] %v27335_v23  ;;  %v27341_v15 = vadd.f32 %v27169_v48, %v11818_v0  ;;  %v11820_v31 = vpop.f32.mrb[59].mxu1  ;;  %v27345_v22 = vpack.i.bf16 %v27335_v23, %v27148_v36 }
 0xfab   : > { %v27348_v55 = vadd.f32 %v27169_v48, %v11820_v31  ;;  %v27395_v48 = vpop.permute.xlu1 %22225 }
 0xfac   : > { %29297 = vst [vmem:[#allocation39_spill] sm:$0xff] %v27341_v15  ;;  %22270 = vrot.lane.b32.xlu0 %v27345_v22, %s22956_s10  ;;  %v27356_v63 = vpack.i.bf16 %v27341_v15, %v27338_v40  ;;  %v22228_v25 = vunpack.i.h.bf16 %v27395_v48 }
 0xfad   : > { %v27360_v0 = vpack.i.bf16 %v27205_v16, %v27348_v55 }
 0xfae   : > { %22275 = vrot.lane.b32.xlu1 %v27356_v63, %s22956_s10 }
 0xfb0   : > { %22285 = vrot.lane.b32.xlu0 %v27360_v0, %s22956_s10 }
 0xfb2   : > { %22280 = vrot.lane.b32.xlu1 %v27182_v9, %s22957_s11 }
 0xfb4   : > { %22290 = vrot.lane.b32.xlu0 %v27195_v57, %s22957_s11 }
 0xfb6   : > { %22295 = vrot.lane.b32.xlu1 %v27082_v58, %s22957_s11 }
 0xfb8   : > { %22300 = vrot.lane.b32.xlu0 %v27094_v7, %s22957_s11 }
 0xfba   : > { %22305 = vrot.lane.b32.xlu1 %v27252_v27, %s22957_s11 }
 0xfbc   : > { %22310 = vrot.lane.b32.xlu0 %v27271_v53, %s22957_s11 }
 0xfbe   : > { %22315 = vrot.lane.b32.xlu1 %v27275_v32, %s22957_s11 }
 0xfc0   : > { %22320 = vrot.lane.b32.xlu0 %v27124_v50, %s22957_s11 }
 0xfc2   : > { %22325 = vrot.lane.b32.xlu1 %v27203_v13, %s22957_s11 }
 0xfc4   : > { %22330 = vrot.lane.b32.xlu0 %v27289_v43, %s22957_s11 }
 0xfc6   : > { %22335 = vrot.lane.b32.xlu1 %v27299_v3, %s22957_s11 }
 0xfc8   : > { %22340 = vrot.lane.b32.xlu0 %v27152_v42, %s22957_s11 }
 0xfca   : > { %22345 = vrot.lane.b32.xlu1 %v27345_v22, %s22957_s11 }
 0xfcc   : > { %22350 = vrot.lane.b32.xlu0 %v27356_v63, %s22957_s11 }
 0xfce   : > { %22360 = vrot.lane.b32.xlu1 %v27360_v0, %s22957_s11 }
 0xfd0   : > { %22355 = vrot.lane.b32.xlu0 %v27225_v2, %s22957_s11 }
 0xfd2   : > { %12349 = vrot.lane.b32.xlu1 %v27219_v45, %s22957_s11 }
 0xfd4   : > { %22365 = vrot.lane.b32.xlu0 %v27182_v9, %s22958_s12 }
 0xfd6   : > { %22370 = vrot.lane.b32.xlu1 %v27195_v57, %s22958_s12 }
 0xfd8   : > { %22375 = vrot.lane.b32.xlu0 %v27082_v58, %s22958_s12 }
 0xfda   : > { %22380 = vrot.lane.b32.xlu1 %v27094_v7, %s22958_s12  ;;  %v12544_v7 = vsel %vm29232_vm3, %v27320_v60, %v22213_v5 }
 0xfdb   : > { %v21102_v60 = vpack.c.bf16 %v12544_v7, %v12536_v6 }
 0xfdc   : > { %22385 = vrot.lane.b32.xlu0 %v27252_v27, %s22958_s12 }
 0xfde   : > { %v22236_v8 = vpop.permute.xlu0 %22235  ;;  %22390 = vrot.lane.b32.xlu1 %v27271_v53, %s22958_s12 }
 0xfdf   : > { %v22238_v58 = vunpack.i.h.bf16 %v22236_v8  ;;  %v22237_v31 = vunpack.i.l.bf16 %v22236_v8  ;;  %v29298_v8 = vunpack.i.h.bf16 %v27317_v34 }
 0xfe0   : > { %v22241_v38 = vpop.permute.xlu1 %22240  ;;  %22395 = vrot.lane.b32.xlu0 %v27275_v32, %s22958_s12 }
 0xfe1   : > { %v22243_v27 = vunpack.i.h.bf16 %v22241_v38  ;;  %v22242_v39 = vunpack.i.l.bf16 %v22241_v38  ;;  %v12545_v53 = vsel %vm29232_vm3, %v22213_v5, %v22237_v31  ;;  %v12522_v32 = vsel %vm29232_vm3, %v22218_v10, %v22238_v58 }
 0xfe2   : > { %v22251_v56 = vpop.permute.xlu0 %22250  ;;  %22400 = vrot.lane.b32.xlu1 %v27124_v50, %s22958_s12  ;;  %v21100_v35 = vpack.c.bf16 %v12545_v53, %v12537_v47  ;;  %v22227_v5 = vunpack.i.l.bf16 %v27395_v48  ;;  %v22233_v53 = vunpack.i.h.bf16 %v27391_v29 }
 0xfe3   : > { %v12530_v62 = vsel %vm29232_vm3, %v29298_v8, %v22243_v27  ;;  %v22253_v38 = vunpack.i.h.bf16 %v22251_v56  ;;  %v22252_v18 = vunpack.i.l.bf16 %v22251_v56  ;;  %v12523_v37 = vsel %vm29232_vm3, %v22238_v58, %v22242_v39  ;;  %v27437_v58 = vld [vmem:[%s29158_s1 + $0xa40] sm:$0xff] }
 0xfe4   : > { %22405 = vrot.lane.b32.xlu0 %v27203_v13, %s22958_s12  ;;  %v21106_v50 = vpack.c.bf16 %v12530_v62, %v12522_v32  ;;  %21101 = vmatprep.subr.bf16.mxu0 %v21100_v35  ;;  %v27426_v34 = vpop.permute.xlu1 %22245  ;;  %v22232_v13 = vunpack.i.l.bf16 %v27391_v29  ;;  %v12546_v32 = vsel %vm29232_vm3, %v22237_v31, %v22228_v25  ;;  %v12524_v31 = vsel %vm29232_vm3, %v22242_v39, %v22233_v53 }
 0xfe5   : > { %v12531_v10 = vsel %vm29232_vm3, %v22243_v27, %v22252_v18  ;;  %21103 = vmatpush1.bf16.msra.mxu0 %v21102_v60  ;;  %v12539_v35 = vsel %vm29232_vm3, %v22253_v38, %v22227_v5  ;;  %v29190_v7 = vunpack.i.l.bf16 %v27426_v34  ;;  %v12538_v6 = vsel %vm29232_vm3, %v22212_v26, %v22253_v38 }
 0xfe6   : > { %v27428_v8 = vpop.permute.xlu0 %22255  ;;  %22410 = vrot.lane.b32.xlu1 %v27289_v43, %s22958_s12  ;;  %v21104_v56 = vpack.c.bf16 %v12531_v10, %v12523_v37  ;;  %v22248_v43 = vunpack.i.h.bf16 %v27426_v34  ;;  %v12547_v27 = vsel %vm29232_vm3, %v22228_v25, %v22232_v13  ;;  %v29302_v39 = vpack.i.bf16 %v27259_v28, %v27248_v46 }
 0xfe7   : > { %v29191_v62 = vunpack.i.l.bf16 %v27428_v8  ;;  %v21108_v47 = vpack.c.bf16 %v12547_v27, %v12539_v35  ;;  %v12525_v38 = vsel %vm29232_vm3, %v22233_v53, %v29190_v7  ;;  %v22489_v25 = vpack.i.bf16 %v27283_v11, %v27265_v59 }
 0xfe8   : > { %21105 = vmatprep.subr.bf16.mxu0 %v21104_v56  ;;  %22415 = vrot.lane.b32.xlu0 %v27299_v3, %s22958_s12  ;;  %v27459_v3 = vld [vmem:[%s29158_s1 + $0xa48] sm:$0xff]  ;;  %v12532_v60 = vsel %vm29232_vm3, %v22252_v18, %v22248_v43  ;;  %v29299_v18 = vpack.i.bf16 %v27078_v61, %v27076_v20  ;;  %v29305_v37 = vpack.i.bf16 %v27138_v49, %v27136_v54  ;;  %v22261_v53 = vpop.permute.xlu1 %22260 }
 0xfe9   : > { %18620 = vmatmul.mubr.msk.f32.vlgmr.msra.gmra.mrb[102].mxu0 %vm29232_vm3, %v27437_v58  ;;  %v12533_v26 = vsel %vm29232_vm3, %v22248_v43, %v29191_v62  ;;  %v29306_v10 = vpack.i.bf16 %v27148_v36, %v27144_v30  ;;  %v29307_v56 = vpack.i.bf16 %v27338_v40, %v27335_v23  ;;  %v22514_v35 = vpack.i.bf16 %v27348_v55, %v27341_v15  ;;  %v29316_v54 = vld [vmem:[#allocation3_spill] sm:$0xff] }
 0xfea   : > { %22420 = vrot.lane.b32.xlu1 %v27152_v42, %s22958_s12  ;;  %21107 = vmatpush1.bf16.msra.mxu0 %v21106_v50  ;;  %v21110_v42 = vpack.c.bf16 %v12546_v32, %v12538_v6  ;;  %v21112_v50 = vpack.c.bf16 %v12533_v26, %v12525_v38  ;;  %v29308_v43 = vpack.i.bf16 %v27207_v1, %v27205_v16  ;;  %v29310_v6 = vld [vmem:[#allocation21_spill] sm:$0xff]  ;;  %v29311_v26 = vld [vmem:[#allocation23_spill] sm:$0xff]  ;;  %v29312_v38 = vld [vmem:[#allocation24_spill] sm:$0xff]  ;;  %v29317_v30 = vunpack.i.l.bf16 %v27428_v8 }
 0xfeb   : > { %12660 = vmatprep.mubr.f32.mxu0 %v29248_v51  ;;  %21109 = vmatprep.subr.bf16.mxu0 %v21108_v47  ;;  %v29309_v27 = vpack.i.bf16 %v27219_v45, %v27215_v14  ;;  %v27548_v47 = vpack.i.bf16 %v27242_v12, %v29310_v6  ;;  %v27554_v32 = vpack.i.bf16 %v27248_v46, %v29311_v26 }
 0xfec   : > { %22425 = vrot.lane.b32.xlu0 %v27345_v22, %s22958_s12  ;;  %v21114_v22 = vpack.c.bf16 %v12532_v60, %v12524_v31  ;;  %v27560_v60 = vpop.permute.xlu1 %22265  ;;  %v22263_v31 = vunpack.i.h.bf16 %v22261_v53 }
 0xfed   : > { %18621 = vmatmul.mubr.msk.f32.gmra.mrb[120].mxu0 %vm29232_vm3, %v27459_v3  ;;  %v22268_v62 = vunpack.i.h.bf16 %v27560_v60 }
 0xfee   : > { %22430 = vrot.lane.b32.xlu1 %v27356_v63, %s22958_s12  ;;  %21111 = vmatpush1.bf16.msra.mxu0 %v21110_v42  ;;  %v29304_v63 = vpack.i.bf16 %v27120_v4, %v27116_v44  ;;  %v12519_v42 = vpop.permute.xlu0 %12518 }
 0xfef   : > { %12731 = vmatprep.mubr.f32.mxu0 %v29248_v51  ;;  %21113 = vmatprep.subr.bf16.mxu0 %v21112_v50  ;;  %v29313_v50 = vld [vmem:[#allocation10_spill] sm:$0xff] }
 0xff0   : > { %22440 = vrot.lane.b32.xlu0 %v27360_v0, %s22958_s12  ;;  %v22484_v0 = vpack.i.bf16 %v27256_v21, %v27189_v17 }
 0xff1   : > { %18622 = vmatmul.mubr.msk.f32.vlgmr.msra.gmra.mrb[122].mxu0 %vm29232_vm3, %v27437_v58 }
 0xff2   : > { %22435 = vrot.lane.b32.xlu1 %v27225_v2, %s22958_s12  ;;  %21115 = vmatpush1.bf16.msra.mxu0 %v21114_v22  ;;  %v29300_v2 = vpack.i.bf16 %v27090_v33, %v27084_v19  ;;  %v22262_v22 = vunpack.i.l.bf16 %v22261_v53 }
 0xff3   : > { %12737 = vmatprep.mubr.f32.mxu0 %v29248_v51 }
 0xff4   : > { %13292 = vrot.lane.b32.xlu0 %v27219_v45, %s22958_s12 }
 0xff5   : > { %18623 = vmatmul.mubr.msk.f32.gmra.mrb[124].mxu0 %vm29232_vm3, %v27459_v3 }
 0xff6   : > { %22445 = vrot.lane.b32.xlu1 %v27182_v9, %s22951_s16  ;;  %12808 = vmatprep.mubr.f32.mxu0 %v29248_v51  ;;  %v29301_v9 = vpack.i.bf16 %v27245_v52, %v27242_v12 }
 0xff8   : > { %22450 = vrot.lane.b32.xlu0 %v27195_v57, %s22951_s16  ;;  %v29303_v57 = vpack.i.bf16 %v27110_v41, %v27108_v24 }
 0xffa   : > { %22455 = vrot.lane.b32.xlu1 %v29299_v18, %s22951_s16 }
 0xffc   : > { %22460 = vrot.lane.b32.xlu0 %v29300_v2, %s22951_s16  ;;  %v29314_v2 = vld [vmem:[#allocation13_spill] sm:$0xff] }
 0xffe   : > { %22465 = vrot.lane.b32.xlu1 %v29301_v9, %s22951_s16  ;;  %v22258_v9 = vunpack.i.h.bf16 %v27428_v8 }
0x1000   : > { %22470 = vrot.lane.b32.xlu0 %v29302_v39, %s22951_s16  ;;  %v12540_v29 = vsel %vm29232_vm3, %v22227_v5, %v22258_v9 }
0x1002   : > { %22475 = vrot.lane.b32.xlu1 %v29303_v57, %s22951_s16 }
0x1004   : > { %22480 = vrot.lane.b32.xlu0 %v29304_v63, %s22951_s16  ;;  %v29315_v63 = vld [vmem:[#allocation7_spill] sm:$0xff] }
0x1006   : > { %22485 = vrot.lane.b32.xlu1 %v22484_v0, %s22951_s16  ;;  %v27571_v0 = vpack.i.bf16 %v27189_v17, %v27245_v52 }
0x1008   : > { %22490 = vrot.lane.b32.xlu0 %v22489_v25, %s22951_s16  ;;  %v12548_v25 = vsel %vm29232_vm3, %v22232_v13, %v22263_v31 }
0x1009   : > { %v21118_v14 = vpack.c.bf16 %v12548_v25, %v12540_v29  ;;  %v29320_v25 = vld [vmem:[#allocation16_spill] sm:$0xff] }
0x100a   : > { %22495 = vrot.lane.b32.xlu1 %v29305_v37, %s22951_s16 }
0x100c   : > { %22500 = vrot.lane.b32.xlu0 %v29306_v10, %s22951_s16 }
0x100e   : > { %22505 = vrot.lane.b32.xlu1 %v29307_v56, %s22951_s16  ;;  %v27578_v56 = vpack.i.bf16 %v27265_v59, %v27259_v28 }
0x1010   : > { %22515 = vrot.lane.b32.xlu0 %v22514_v35, %s22951_s16 }
0x1012   : > { %22510 = vrot.lane.b32.xlu1 %v29308_v43, %s22951_s16 }
0x1014   : > { %22520 = vrot.lane.b32.xlu0 %v29309_v27, %s22951_s16  ;;  %v12541_v27 = vsel %vm29232_vm3, %v22258_v9, %v22262_v22  ;;  %s22959_s16 = smov 97  }
0x1016   : > { %22525 = vrot.lane.b32.xlu1 %v27548_v47, %s22952_s17 }
0x1018   : > { %22530 = vrot.lane.b32.xlu0 %v27554_v32, %s22952_s17 }
0x101a   : > { %22535 = vrot.lane.b32.xlu1 %v29312_v38, %s22952_s17 }
0x101c   : > { %22540 = vrot.lane.b32.xlu0 %v29313_v50, %s22952_s17 }
0x101e   : > { %v22271_v18 = vpop.permute.xlu0 %22270  ;;  %22545 = vrot.lane.b32.xlu1 %v29314_v2, %s22952_s17 }
0x101f   : > { %v22272_v39 = vunpack.i.l.bf16 %v22271_v18  ;;  %v22273_v35 = vunpack.i.h.bf16 %v22271_v18  ;;  %v22267_v18 = vunpack.i.l.bf16 %v27560_v60  ;;  %v29319_v60 = vunpack.i.l.bf16 %v27426_v34 }
0x1020   : > { %v22276_v57 = vpop.permute.xlu1 %22275  ;;  %22550 = vrot.lane.b32.xlu0 %v29315_v63, %s22952_s17 }
0x1021   : > { %v22278_v37 = vunpack.i.h.bf16 %v22276_v57  ;;  %v22277_v10 = vunpack.i.l.bf16 %v22276_v57  ;;  %v12549_v53 = vsel %vm29232_vm3, %v22263_v31, %v22272_v39  ;;  %v29196_v31 = vand.u32 31, %v29316_v54 }
0x1022   : > { %22555 = vrot.lane.b32.xlu1 %v27571_v0, %s22952_s17  ;;  %v22286_v43 = vpop.permute.xlu0 %22285  ;;  %v21116_v7 = vpack.c.bf16 %v12549_v53, %v12541_v27  ;;  %v12526_v53 = vsel %vm29232_vm3, %v29319_v60, %v22273_v35 }
0x1023   : > { %v22288_v13 = vunpack.i.h.bf16 %v22286_v43  ;;  %v22287_v57 = vunpack.i.l.bf16 %v22286_v43  ;;  %v12534_v48 = vsel %vm29232_vm3, %v29317_v30, %v22278_v37  ;;  %v12527_v5 = vsel %vm29232_vm3, %v22273_v35, %v22277_v10  ;;  %v29318_v43 = vld [vmem:[#allocation2_spill] sm:$0xff] }
0x1024   : > { %v27589_v16 = vpop.permute.xlu1 %22280  ;;  %22560 = vrot.lane.b32.xlu0 %v27578_v56, %s22952_s17  ;;  %21117 = vmatprep.subr.bf16.mxu0 %v21116_v7  ;;  %v27609_v7 = vadd.s32 384, %v29318_v43  ;;  %vm27626_vm6 = vcmp.ge.s32.totalorder %v29196_v31, 1  ;;  %v12550_v31 = vsel %vm29232_vm3, %v22272_v39, %v22268_v62  ;;  %v27712_v36 = vadd.s32 640, %v29318_v43 }
0x1025   : > { %v12535_v9 = vsel %vm29232_vm3, %v22278_v37, %v22287_v57  ;;  %21119 = vmatpush1.bf16.msra.mxu0 %v21118_v14  ;;  %v12543_v30 = vsel %vm29232_vm3, %v22288_v13, %v22267_v18  ;;  %v22282_v10 = vunpack.i.l.bf16 %v27589_v16  ;;  %v29321_v57 = vld [vmem:[#allocation19_spill] sm:$0xff]  ;;  %v27621_v18 = vpack.i.bf16 %v27335_v23, %v27256_v21  ;;  %vm27669_vm8 = vmpackc.low %vm27626_vm6, %vm27626_vm6 }
0x1026   : > { %22565 = vrot.lane.b32.xlu1 %v29320_v25, %s22952_s17  ;;  %v27605_v29 = vpop.permute.xlu0 %22290  ;;  %v21120_v8 = vpack.c.bf16 %v12535_v9, %v12527_v5  ;;  %v21122_v5 = vpack.c.bf16 %v12534_v48, %v12526_v53  ;;  %v12551_v9 = vsel %vm29232_vm3, %v22268_v62, %v12519_v42  ;;  %v12542_v37 = vsel %vm29232_vm3, %v22262_v22, %v22288_v13 }
0x1027   : > { %v29197_v34 = vunpack.i.h.bf16 %v27605_v29  ;;  %v22292_v35 = vunpack.i.l.bf16 %v27605_v29  ;;  %v21124_v53 = vpack.c.bf16 %v12551_v9, %v12543_v30  ;;  %v29324_v22 = vand.u32 31, %v29318_v43 }
0x1028   : > { %v27615_v14 = vpop.permute.xlu1 %22295  ;;  %22570 = vrot.lane.b32.xlu0 %v29321_v57, %s22952_s17  ;;  %21121 = vmatprep.subr.bf16.mxu0 %v21120_v8  ;;  %v27643_v8 = vpack.i.bf16 %v27341_v15, %v27283_v11  ;;  %v29327_v30 = vunpack.i.h.bf16 %v27589_v16  ;;  %v21126_v62 = vpack.c.bf16 %v12550_v31, %v12542_v37  ;;  %v29330_v31 = vld [vmem:[#allocation27_spill] sm:$0xff] }
0x1029   : > { %v12361_v27 = vsel %vm12351_vm1, %v22292_v35, %v29197_v34  ;;  %18624 = vmatmul.mubr.msk.f32.vlgmr.msra.gmra.mrb[126].mxu0 %vm29232_vm3, %v27437_v58  ;;  %v22297_v48 = vunpack.i.l.bf16 %v27615_v14  ;;  %vm27647_vm7 = vcmp.ge.s32.totalorder %v29324_v22, 1  ;;  %v27658_v34 = vadd.s32 256, %v29318_v43 }
0x102a   : > { %21123 = vmatpush1.bf16.msra.mxu0 %v21122_v5  ;;  %22575 = vrot.lane.b32.xlu1 %v27621_v18, %s22952_s17  ;;  %v27639_v42 = vpop.permute.xlu0 %22300  ;;  %v12353_v5 = vsel %vm12351_vm1, %v22282_v10, %v29327_v30  ;;  %v22298_v23 = vunpack.i.h.bf16 %v27615_v14  ;;  %vm27696_vm9 = vmpackc.low %vm27647_vm7, %vm27647_vm7 }
0x102b   : > { %21125 = vmatprep.subr.bf16.mxu0 %v21124_v53  ;;  %12814 = vmatprep.mubr.f32.mxu0 %v29248_v51  ;;  %v21128_v39 = vpack.c.bf16 %v12361_v27, %v12353_v5  ;;  %v12352_v30 = vsel %vm12351_vm1, %v22297_v48, %v22282_v10  ;;  %v12360_v14 = vsel %vm12351_vm1, %v22297_v48, %v22292_v35  ;;  %v22303_v9 = vunpack.i.h.bf16 %v27639_v42  ;;  %v29337_v35 = vld [vmem:[#allocation29_spill] sm:$0xff] }
0x102c   : > { %v27662_v15 = vpop.permute.xlu1 %22305  ;;  %22580 = vrot.lane.b32.xlu0 %v27643_v8, %s22952_s17  ;;  %v29331_v37 = vunpack.i.l.bf16 %v27639_v42 }
0x102d   : > { %18625 = vmatmul.mubr.msk.f32.gmra.mrb[128].mxu0 %vm29232_vm3, %v27459_v3  ;;  %v29200_v22 = vunpack.i.l.bf16 %v27662_v15  ;;  %v12376_v59 = vsel %vm12351_vm1, %v22297_v48, %v22303_v9  ;;  %v22308_v17 = vunpack.i.h.bf16 %v27662_v15  ;;  %v29354_v21 = vunpack.i.l.bf16 %v27662_v15  ;;  %v27829_v15 = vld [vmem:[%s29158_s1 + $0xa08] sm:$0xff] }
0x102e   : > { %21127 = vmatpush1.bf16.msra.mxu0 %v21126_v62  ;;  %22585 = vrot.lane.b32.xlu1 %v29330_v31, %s22952_s17  ;;  %v27681_v27 = vpop.permute.xlu0 %22310  ;;  %v12369_v60 = vsel %vm12351_vm1, %v22298_v23, %v29331_v37  ;;  %v29334_v62 = vand.u32 31, %v27609_v7 }
0x102f   : > { %v12377_v10 = vsel %vm12351_vm1, %v22303_v9, %v29200_v22  ;;  %21130 = vmatprep.subr.msk.bf16.mxu0 %vm27669_vm8, %v21128_v39  ;;  %12885 = vmatprep.mubr.f32.mxu0 %v29248_v51  ;;  %v21131_v39 = vpack.c.bf16 %v12360_v14, %v12352_v30  ;;  %v22609_v9 = vpack.i.bf16 %v27348_v55, %v27338_v40  ;;  %v27729_v14 = vadd.s32 512, %v29318_v43 }
0x1030   : > { %vm27702_vm10 = vcmp.ge.s32.totalorder %v29334_v62, 1  ;;  %v27706_v22 = vpop.permute.xlu1 %22315  ;;  %22590 = vrot.lane.b32.xlu0 %v29337_v35, %s22952_s17  ;;  %v21134_v49 = vpack.c.bf16 %v12377_v10, %v12369_v60  ;;  %v22313_v62 = vunpack.i.h.bf16 %v27681_v27  ;;  %v12368_v60 = vsel %vm12351_vm1, %v22297_v48, %v22298_v23  ;;  %v29339_v23 = vld [vmem:[#allocation30_spill] sm:$0xff] }
0x1031   : > { %v29208_v24 = vunpack.i.l.bf16 %v27706_v22  ;;  %18626 = vmatmul.mubr.msk.f32.vlgmr.msra.gmra.mrb[130].mxu0 %vm29232_vm3, %v27437_v58  ;;  %v29338_v10 = vunpack.i.l.bf16 %v27681_v27  ;;  %v21137_v44 = vpack.c.bf16 %v12376_v59, %v12368_v60  ;;  %vm27749_vm11 = vmpackc.low %vm27702_vm10, %vm27702_vm10  ;;  %v29345_v60 = vunpack.i.h.bf16 %v27605_v29  ;;  %v27776_v29 = vld [vmem:[%s29158_s1 + $0xa00] sm:$0xff] }
0x1032   : > { %21133 = vmatpush1.bf16.msk.msra.mxu0 %vm27696_vm9, %v21131_v39  ;;  %22600 = vrot.lane.b32.xlu1 %v27548_v47, %s22959_s16  ;;  %v27724_v30 = vpop.permute.xlu0 %22320 }
0x1033   : > { %v12355_v58 = vsel %vm12351_vm1, %v22308_v17, %v29338_v10  ;;  %v12363_v39 = vsel %vm12351_vm1, %v22313_v62, %v29208_v24  ;;  %21136 = vmatprep.subr.msk.bf16.mxu0 %vm27669_vm8, %v21134_v49  ;;  %12891 = vmatprep.mubr.f32.mxu0 %v29248_v51  ;;  %v29342_v24 = vand.u32 31, %v27658_v34  ;;  %v12362_v13 = vsel %vm12351_vm1, %v29345_v60, %v22313_v62 }
0x1034   : > { %v27742_v11 = vpop.permute.xlu1 %22325  ;;  %22595 = vrot.lane.b32.xlu0 %v29339_v23, %s22952_s17  ;;  %v21140_v48 = vpack.c.bf16 %v12363_v39, %v12355_v58  ;;  %v22318_v58 = vunpack.i.h.bf16 %v27706_v22  ;;  %v22323_v37 = vunpack.i.h.bf16 %v27724_v30  ;;  %v29346_v60 = vunpack.i.h.bf16 %v27589_v16 }
0x1035   : > { %vm27755_vm12 = vcmp.ge.s32.totalorder %v29342_v24, 1  ;;  %18627 = vmatmul.mubr.msk.f32.gmra.mrb[132].mxu0 %vm29232_vm3, %v27459_v3  ;;  %v29347_v3 = vunpack.i.l.bf16 %v27724_v30  ;;  %v27810_v49 = vadd.s32 896, %v29318_v43 }
0x1036   : > { %21139 = vmatpush1.bf16.msk.msra.mxu0 %vm27696_vm9, %v21137_v44  ;;  %22610 = vrot.lane.b32.xlu1 %v22609_v9, %s22952_s17  ;;  %v27771_v24 = vpop.permute.xlu0 %22330  ;;  %v12354_v59 = vsel %vm12351_vm1, %v29346_v60, %v22308_v17  ;;  %v29348_v44 = vunpack.i.l.bf16 %v27742_v11  ;;  %vm27795_vm13 = vmpackc.low %vm27755_vm12, %vm27755_vm12  ;;  %v12378_v62 = vsel %vm12351_vm1, %v29354_v21, %v22323_v37  ;;  %v29355_v21 = vand.u32 31, %v27729_v14 }
0x1037   : > { %v12371_v39 = vsel %vm12351_vm1, %v22318_v58, %v29347_v3  ;;  %21142 = vmatprep.subr.msk.bf16.mxu0 %vm27749_vm11, %v21140_v48  ;;  %12968 = vmatprep.mubr.f32.mxu0 %v29248_v51  ;;  %v21143_v16 = vpack.c.bf16 %v12362_v13, %v12354_v59  ;;  %v22328_v13 = vunpack.i.h.bf16 %v27742_v11  ;;  %v22333_v59 = vunpack.i.h.bf16 %v27771_v24 }
0x1038   : > { %v12379_v9 = vsel %vm12351_vm1, %v22323_v37, %v29348_v44  ;;  %v27799_v60 = vpop.permute.xlu1 %22335  ;;  %22605 = vrot.lane.b32.xlu0 %v27554_v32, %s22959_s16  ;;  %v29351_v44 = vand.u32 31, %v27712_v36  ;;  %vm27833_vm4 = vcmp.ge.s32.totalorder %v29355_v21, 1  ;;  %v29370_v37 = vunpack.i.l.bf16 %v27742_v11 }
0x1039   : > { %v21146_v3 = vpack.c.bf16 %v12379_v9, %v12371_v39  ;;  %18636 = vmatmul.mubr.msk.f32.vlgmr.msra.gmra.mrb[102].mxu0 %vm29232_vm3, %v27776_v29  ;;  %v29358_v9 = vunpack.i.l.bf16 %v27639_v42  ;;  %v29360_v4 = vunpack.i.l.bf16 %v27799_v60  ;;  %vm27890_vm6 = vmpackc.low %vm27833_vm4, %vm27833_vm4  ;;  %vm13294_vm4 = vcmask 252928  }
0x103a   : > { %vm27805_vm0 = vcmp.ge.s32.totalorder %v29351_v44, 1  ;;  %21145 = vmatpush1.bf16.msk.msra.mxu0 %vm27795_vm13, %v21143_v16  ;;  %22615 = vrot.lane.b32.xlu1 %v29312_v38, %s22959_s16  ;;  %v27824_v39 = vpop.permute.xlu0 %22340  ;;  %v29359_v44 = vunpack.i.l.bf16 %v27771_v24 }
0x103b   : > { %v12370_v16 = vsel %vm12351_vm1, %v29358_v9, %v22318_v58  ;;  %v12365_v23 = vsel %vm12351_vm1, %v22333_v59, %v29360_v4  ;;  %v29214_v12 = vunpack.i.l.bf16 %v27824_v39  ;;  %21148 = vmatprep.subr.msk.bf16.mxu0 %vm27749_vm11, %v21146_v3  ;;  %12974 = vmatprep.mubr.f32.mxu0 %v29248_v51  ;;  %vm27857_vm5 = vmpackc.low %vm27805_vm0, %vm27805_vm0  ;;  %v27863_v3 = vadd.s32 768, %v29318_v43 }
0x103c   : > { %v12357_v41 = vsel %vm12351_vm1, %v22328_v13, %v29359_v44  ;;  %v21149_v21 = vpack.c.bf16 %v12378_v62, %v12370_v16  ;;  %v27850_v46 = vpop.permute.xlu1 %22345  ;;  %22620 = vrot.lane.b32.xlu0 %v29313_v50, %s22959_s16  ;;  %v29363_v62 = vunpack.i.l.bf16 %v27706_v22  ;;  %v22338_v16 = vunpack.i.h.bf16 %v27799_v60 }
0x103d   : > { %v21152_v42 = vpack.c.bf16 %v12365_v23, %v12357_v41  ;;  %v22343_v41 = vunpack.i.h.bf16 %v27824_v39  ;;  %v22347_v23 = vunpack.i.l.bf16 %v27850_v46  ;;  %18637 = vmatmul.mubr.msk.f32.gmra.mrb[120].mxu0 %vm29232_vm3, %v27829_v15  ;;  %v29364_v22 = vunpack.i.l.bf16 %v27681_v27 }
0x103e   : > { %v12364_v9 = vsel %vm12351_vm1, %v29363_v62, %v22333_v59  ;;  %21151 = vmatpush1.bf16.msk.msra.mxu0 %vm27795_vm13, %v21149_v21  ;;  %22625 = vrot.lane.b32.xlu1 %v29314_v2, %s22959_s16  ;;  %v22351_v48 = vpop.permute.xlu0 %22350  ;;  %v12373_v44 = vsel %vm12351_vm1, %v22338_v16, %v29214_v12  ;;  %v29367_v12 = vand.u32 31, %v27810_v49  ;;  %v22348_v20 = vunpack.i.h.bf16 %v27850_v46 }
0x103f   : > { %v12356_v59 = vsel %vm12351_vm1, %v29364_v22, %v22328_v13  ;;  %v12381_v62 = vsel %vm12351_vm1, %v22343_v41, %v22347_v23  ;;  %v22352_v4 = vunpack.i.l.bf16 %v22351_v48  ;;  %21154 = vmatprep.subr.msk.bf16.mxu0 %vm27857_vm5, %v21152_v42  ;;  %13045 = vmatprep.mubr.f32.mxu0 %v29248_v51  ;;  %v29218_v42 = vand.u32 31, %v27863_v3 }
0x1040   : > { %v21155_v27 = vpack.c.bf16 %v12364_v9, %v12356_v59  ;;  %v22361_v13 = vpop.permute.xlu1 %22360  ;;  %22630 = vrot.lane.b32.xlu0 %v29315_v63, %s22959_s16  ;;  %v21158_v22 = vpack.c.bf16 %v12381_v62, %v12373_v44  ;;  %vm27898_vm7 = vcmp.ge.s32.totalorder %v29367_v12, 1  ;;  %v12380_v28 = vsel %vm12351_vm1, %v29370_v37, %v22343_v41 }
0x1041   : > { %v22353_v9 = vunpack.i.h.bf16 %v22351_v48  ;;  %v22362_v59 = vunpack.i.l.bf16 %v22361_v13  ;;  %18646 = vmatmul.mubr.msk.f32.vlgmr.msra.gmra.mrb[122].mxu0 %vm29232_vm3, %v27776_v29  ;;  %v29371_v44 = vunpack.i.l.bf16 %v27724_v30  ;;  %v12359_v41 = vsel %vm12351_vm1, %v22348_v20, %v22352_v4  ;;  %vm27926_vm10 = vmpackc.low %vm27898_vm7, %vm27898_vm7 }
0x1042   : > { %21157 = vmatpush1.bf16.msk.msra.mxu0 %vm27890_vm6, %v21155_v27  ;;  %22635 = vrot.lane.b32.xlu1 %v27571_v0, %s22959_s16  ;;  %v22356_v11 = vpop.permute.xlu0 %22355  ;;  %vm249_vm12 = vcmp.ge.s32.totalorder %v29218_v42, 1  ;;  %v29387_v42 = vand.u32 31, %v27609_v7  ;;  %v29390_v7 = vand.u32 31, %v27658_v34  ;;  %v29393_v34 = vmov 0 }
0x1043   : > { %v12372_v12 = vsel %vm12351_vm1, %v29371_v44, %v22338_v16  ;;  %v12367_v46 = vsel %vm12351_vm1, %v22353_v9, %v22362_v59  ;;  %v22358_v48 = vunpack.i.h.bf16 %v22356_v11  ;;  %v22357_v62 = vunpack.i.l.bf16 %v22356_v11  ;;  %21160 = vmatprep.subr.msk.bf16.mxu0 %vm27857_vm5, %v21158_v22  ;;  %13051 = vmatprep.mubr.f32.mxu0 %v29248_v51  ;;  %vm27953_vm0 = vmpackc.low %vm249_vm12, %vm249_vm12 }
0x1044   : > { %v21161_v30 = vpack.c.bf16 %v12380_v28, %v12372_v12  ;;  %v22363_v16 = vunpack.i.h.bf16 %v22361_v13  ;;  %v12350_v37 = vpop.permute.xlu1 %12349  ;;  %22640 = vrot.lane.b32.xlu0 %v27578_v56, %s22959_s16  ;;  %v21164_v27 = vpack.c.bf16 %v12367_v46, %v12359_v41  ;;  %v29374_v22 = vunpack.i.l.bf16 %v27799_v60 }
0x1045   : > { %18647 = vmatmul.mubr.msk.f32.gmra.mrb[124].mxu0 %vm29232_vm3, %v27829_v15  ;;  %v12383_v59 = vsel %vm12351_vm1, %v22358_v48, %v12350_v37  ;;  %v29375_v44 = vunpack.i.l.bf16 %v27771_v24  ;;  %v29376_v11 = vmov 0  ;;  %vm28056_vm2 = vcmp.le.s32.totalorder %v29390_v7, 30 }
0x1046   : > { %v12366_v28 = vsel %vm12351_vm1, %v29374_v22, %v22353_v9  ;;  %v12375_v13 = vsel %vm12351_vm1, %v22363_v16, %v22357_v62  ;;  %21163 = vmatpush1.bf16.msk.msra.mxu0 %vm27890_vm6, %v21161_v30  ;;  %22645 = vrot.lane.b32.xlu1 %v29320_v25, %s22959_s16  ;;  %v27943_v52 = vpop.permute.xlu0 %22365  ;;  %v29377_v11 = vsel %vm27953_vm0, 4294967295, %v29376_v11  ;;  %v12382_v62 = vsel %vm12351_vm1, %v22347_v23, %v22358_v48 }
0x1047   : > { %v12358_v60 = vsel %vm12351_vm1, %v29375_v44, %v22348_v20  ;;  %v29220_v9 = vunpack.i.h.bf16 %v27943_v52  ;;  %v22367_v12 = vunpack.i.l.bf16 %v27943_v52  ;;  %21166 = vmatprep.subr.msk.bf16.mxu0 %vm27926_vm10, %v21164_v27  ;;  %13122 = vmatprep.mubr.f32.mxu0 %v29248_v51  ;;  %v29378_v20 = vand.u32 31, %v29316_v54 }
0x1048   : > { %v21167_v41 = vpack.c.bf16 %v12366_v28, %v12358_v60  ;;  %v27957_v46 = vpop.permute.xlu1 %22370  ;;  %22650 = vrot.lane.b32.xlu0 %v29321_v57, %s22959_s16  ;;  %v21170_v30 = vpack.c.bf16 %v12383_v59, %v12375_v13  ;;  %v29381_v22 = vunpack.i.l.bf16 %v27824_v39  ;;  %v29384_v60 = vand.u32 31, %v29318_v43 }
0x1049   : > { %vm27963_vm7 = vcmp.le.s32.totalorder %v29378_v20, 30  ;;  %v22373_v37 = vunpack.i.h.bf16 %v27957_v46  ;;  %v22372_v27 = vunpack.i.l.bf16 %v27957_v46  ;;  %18656 = vmatmul.mubr.msk.f32.vlgmr.msra.gmra.mrb[126].mxu0 %vm29232_vm3, %v27776_v29  ;;  %v13296_v23 = vsel %vm13294_vm4, %v22367_v12, %v29220_v9 }
0x104a   : > { %21169 = vmatpush1.bf16.msk.msra.mxu0 %vm27953_vm0, %v21167_v41  ;;  %22655 = vrot.lane.b32.xlu1 %v27621_v18, %s22959_s16  ;;  %v22376_v54 = vpop.permute.xlu0 %22375  ;;  %v12374_v28 = vsel %vm12351_vm1, %v29381_v22, %v22363_v16  ;;  %vm27993_vm1 = vmpackc.low %vm27963_vm7, %vm27963_vm7  ;;  %v29382_v16 = vmov 0  ;;  %vm251_vm12 = vcmp.le.s32.totalorder %v29384_v60, 30 }
0x104b   : > { %v13304_v48 = vsel %vm13294_vm4, %v22372_v27, %v22373_v37  ;;  %v22377_v13 = vunpack.i.l.bf16 %v22376_v54  ;;  %21172 = vmatprep.subr.msk.bf16.mxu0 %vm27926_vm10, %v21170_v30  ;;  %13128 = vmatprep.mubr.f32.mxu0 %v29248_v51  ;;  %v21173_v59 = vpack.c.bf16 %v12382_v62, %v12374_v28  ;;  %v29383_v16 = vsel %vm27993_vm1, 4294967295, %v29382_v16  ;;  %vm28012_vm7 = vmpackc.low %vm251_vm12, %vm251_vm12 }
0x104c   : > { %v27986_v44 = vpop.permute.xlu1 %22380  ;;  %22660 = vrot.lane.b32.xlu0 %v27643_v8, %s22959_s16  ;;  %v21176_v39 = vpack.c.bf16 %v13304_v48, %v13296_v23  ;;  %v22378_v30 = vunpack.i.h.bf16 %v22376_v54  ;;  %v28023_v54 = vpack.i.bf16 %v29248_v51, %v27338_v40  ;;  %vm28039_vm12 = vcmp.le.s32.totalorder %v29387_v42, 30 }
0x104d   : > { %v13295_v41 = vsel %vm13294_vm4, %v22377_v13, %v22367_v12  ;;  %v13303_v46 = vsel %vm13294_vm4, %v22377_v13, %v22372_v27  ;;  %v22383_v20 = vunpack.i.h.bf16 %v27986_v44  ;;  %18657 = vmatmul.mubr.msk.f32.gmra.mrb[128].mxu0 %vm29232_vm3, %v27829_v15  ;;  %v29219_v62 = vunpack.i.l.bf16 %v27986_v44  ;;  %vm28069_vm15 = vmpackc.low %vm28039_vm12, %vm28039_vm12 }
0x104e   : > { %21175 = vmatpush1.bf16.msk.msra.mxu0 %vm27953_vm0, %v21173_v59  ;;  %22665 = vrot.lane.b32.xlu1 %v29330_v31, %s22959_s16  ;;  %v22386_v24 = vpop.permute.xlu0 %22385  ;;  %v21179_v43 = vpack.c.bf16 %v13303_v46, %v13295_v41  ;;  %v29385_v12 = vmov 0  ;;  %v29394_v34 = vsel %vm28069_vm15, 4294967295, %v29393_v34  ;;  %vm28093_vm12 = vmpackc.low %vm28056_vm2, %vm28056_vm2 }
0x104f   : > { %v22387_v22 = vunpack.i.l.bf16 %v22386_v24  ;;  %21178 = vmatprep.subr.msk.bf16.mxu0 %vm27993_vm1, %v21176_v39  ;;  %13199 = vmatprep.mubr.f32.mxu0 %v29248_v51  ;;  %v29386_v12 = vsel %vm28012_vm7, 4294967295, %v29385_v12  ;;  %v13319_v27 = vsel %vm13294_vm4, %v22377_v13, %v22383_v20  ;;  %v13312_v23 = vsel %vm13294_vm4, %v22378_v30, %v29219_v62 }
0x1050   : > { %v28017_v28 = vpop.permute.xlu1 %22390  ;;  %22670 = vrot.lane.b32.xlu0 %v29337_v35, %s22959_s16  ;;  %v22388_v60 = vunpack.i.h.bf16 %v22386_v24  ;;  %v13311_v62 = vsel %vm13294_vm4, %v22377_v13, %v22378_v30 }
0x1051   : > { %v13320_v48 = vsel %vm13294_vm4, %v22383_v20, %v22387_v22  ;;  %v22393_v59 = vunpack.i.h.bf16 %v28017_v28  ;;  %v29224_v39 = vunpack.i.l.bf16 %v28017_v28  ;;  %18666 = vmatmul.mubr.msk.f32.vlgmr.msra.gmra.mrb[130].mxu0 %vm29232_vm3, %v27776_v29  ;;  %v21185_v29 = vpack.c.bf16 %v13319_v27, %v13311_v62 }
0x1052   : > { %21181 = vmatpush1.bf16.msk.msra.mxu0 %vm28012_vm7, %v21179_v43  ;;  %22675 = vrot.lane.b32.xlu1 %v28023_v54, %s22959_s16  ;;  %v22396_v41 = vpop.permute.xlu0 %22395  ;;  %v21182_v46 = vpack.c.bf16 %v13320_v48, %v13312_v23 }
0x1053   : > { %v22397_v9 = vunpack.i.l.bf16 %v22396_v41  ;;  %13205 = vmatprep.mubr.f32.mxu0 %v29248_v51  ;;  %v13298_v24 = vsel %vm13294_vm4, %v22388_v60, %v29224_v39  ;;  %v13305_v13 = vsel %vm13294_vm4, %v22373_v37, %v22393_v59  ;;  %v22398_v23 = vunpack.i.h.bf16 %v22396_v41 }
0x1054   : > { %v28048_v43 = vpop.permute.xlu1 %22400  ;;  %22680 = vrot.lane.b32.xlu0 %v27548_v47, %s22960_s24  ;;  %21184 = vmatprep.subr.msk.bf16.mxu0 %vm27993_vm1, %v21182_v46  ;;  %v29395_v46 = vunpack.i.h.bf16 %v27943_v52 }
0x1055   : > { %v13306_v62 = vsel %vm13294_vm4, %v22393_v59, %v22397_v9  ;;  %v22403_v30 = vunpack.i.h.bf16 %v28048_v43  ;;  %v29223_v27 = vunpack.i.l.bf16 %v28048_v43  ;;  %18667 = vmatmul.mubr.msk.f32.gmra.mrb[132].mxu0 %vm29232_vm3, %v27829_v15  ;;  %v28079_v59 = vpack.i.bf16 %v27207_v1, %v27348_v55  ;;  %v28084_v15 = vld [vmem:[%s29158_s1 + $0xa80] sm:$0xff] }
0x1056   : > { %v21188_v48 = vpack.c.bf16 %v13306_v62, %v13298_v24  ;;  %21187 = vmatpush1.bf16.msk.msra.mxu0 %vm28012_vm7, %v21185_v29  ;;  %15107 = vrot.lane.b32.xlu1 %v27219_v45, %s22959_s16  ;;  %v22406_v37 = vpop.permute.xlu0 %22405  ;;  %v13297_v41 = vsel %vm13294_vm4, %v29395_v46, %v22388_v60  ;;  %v29396_v29 = vmov 0 }
0x1057   : > { %v22407_v20 = vunpack.i.l.bf16 %v22406_v37  ;;  %13464 = vmatprep.mubr.f32.mxu0 %v29248_v51  ;;  %v29397_v29 = vsel %vm28093_vm12, 4294967295, %v29396_v29  ;;  %v21191_v24 = vpack.c.bf16 %v13305_v13, %v13297_v41  ;;  %v13314_v7 = vsel %vm13294_vm4, %v22398_v23, %v29223_v27 }
0x1058   : > { %29398 = vst [vmem:[#allocation21_spill] sm:$0xff] %v29397_v29  ;;  %v28100_v62 = vpop.permute.xlu1 %22410  ;;  %22690 = vrot.lane.b32.xlu0 %v28079_v59, %s22959_s16  ;;  %21190 = vmatprep.subr.msk.bf16.mxu0 %vm28069_vm15, %v21188_v48  ;;  %v13321_v52 = vsel %vm13294_vm4, %v22387_v22, %v22403_v30  ;;  %v22408_v46 = vunpack.i.h.bf16 %v22406_v37  ;;  %v28119_v22 = vld [vmem:[%s29158_s1 + $0xa88] sm:$0xff]  ;;  %v29400_v27 = vunpack.i.l.bf16 %v27986_v44  ;;  %s218_s16 = scalar_lea.vmem %s29162_s5, %s18916_s14 }
0x1059   : > { %v13322_v60 = vsel %vm13294_vm4, %v22403_v30, %v22407_v20  ;;  %v22413_v42 = vunpack.i.h.bf16 %v28100_v62  ;;  %v29228_v13 = vunpack.i.l.bf16 %v28100_v62  ;;  %18678 = vmatmul.mubr.msk.f32.vlgmr.msra.gmra.mrb[102].mxu0 %vm29232_vm3, %v28084_v15  ;;  %v29399_v30 = vand.u32 31, %v27712_v36 }
0x105a   : > { %v21194_v41 = vpack.c.bf16 %v13322_v60, %v13314_v7  ;;  %21193 = vmatpush1.bf16.msk.msra.mxu0 %vm28093_vm12, %v21191_v24  ;;  %22685 = vrot.lane.b32.xlu1 %v27554_v32, %s22960_s24  ;;  %v22416_v48 = vpop.permute.xlu0 %22415  ;;  %v13313_v37 = vsel %vm13294_vm4, %v29400_v27, %v22398_v23  ;;  %v29401_v36 = vand.u32 31, %v27729_v14 }
0x105b   : > { %vm256_vm2 = vcmp.le.s32.totalorder %v29399_v30, 30  ;;  %v22417_v7 = vunpack.i.l.bf16 %v22416_v48  ;;  %13470 = vmatprep.mubr.f32.mxu0 %v29248_v51  ;;  %v21197_v24 = vpack.c.bf16 %v13321_v52, %v13313_v37  ;;  %v13300_v60 = vsel %vm13294_vm4, %v22408_v46, %v29228_v13 }
0x105c   : > { %v28130_v39 = vpop.permute.xlu1 %22420  ;;  %22695 = vrot.lane.b32.xlu0 %v29312_v38, %s22960_s24  ;;  %21196 = vmatprep.subr.msk.bf16.mxu0 %vm28069_vm15, %v21194_v41  ;;  %vm255_vm14 = vcmp.le.s32.totalorder %v29401_v36, 30  ;;  %v13307_v44 = vsel %vm13294_vm4, %v22397_v9, %v22413_v42  ;;  %vm28144_vm7 = vmpackc.low %vm256_vm2, %vm256_vm2  ;;  %v29402_v30 = vmov 0  ;;  %v22418_v37 = vunpack.i.h.bf16 %v22416_v48 }
0x105d   : > { %v13308_v27 = vsel %vm13294_vm4, %v22413_v42, %v22417_v7  ;;  %v22423_v23 = vunpack.i.h.bf16 %v28130_v39  ;;  %v29229_v52 = vunpack.i.l.bf16 %v28130_v39  ;;  %18679 = vmatmul.mubr.msk.f32.gmra.mrb[120].mxu0 %vm29232_vm3, %v28119_v22  ;;  %v29403_v30 = vsel %vm28144_vm7, 4294967295, %v29402_v30  ;;  %vm28156_vm2 = vmpackc.low %vm255_vm14, %vm255_vm14 }
0x105e   : > { %v21200_v41 = vpack.c.bf16 %v13308_v27, %v13300_v60  ;;  %21199 = vmatpush1.bf16.msk.msra.mxu0 %vm28093_vm12, %v21197_v24  ;;  %22700 = vrot.lane.b32.xlu1 %v29313_v50, %s22960_s24  ;;  %v22426_v14 = vpop.permute.xlu0 %22425  ;;  %v29404_v9 = vunpack.i.l.bf16 %v28017_v28  ;;  %v29405_v13 = vmov 0  ;;  %vm29412_vm12 = vcmask 261120  }
0x105f   : > { %v22427_v36 = vunpack.i.l.bf16 %v22426_v14  ;;  %13541 = vmatprep.mubr.f32.mxu0 %v29248_v51  ;;  %v29406_v13 = vsel %vm28156_vm2, 4294967295, %v29405_v13  ;;  %v13316_v24 = vsel %vm13294_vm4, %v22418_v37, %v29229_v52  ;;  %v13323_v28 = vsel %vm13294_vm4, %v22407_v20, %v22423_v23 }
0x1060   : > { %v13299_v42 = vsel %vm13294_vm4, %v29404_v9, %v22408_v46  ;;  %v22431_v60 = vpop.permute.xlu1 %22430  ;;  %22705 = vrot.lane.b32.xlu0 %v29314_v2, %s22960_s24  ;;  %21202 = vmatprep.subr.msk.bf16.mxu0 %vm28144_vm7, %v21200_v41  ;;  %v29407_v41 = vand.u32 31, %v27810_v49  ;;  %v29411_v49 = vand.u32 31, %v27863_v3 }
0x1061   : > { %v21203_v48 = vpack.c.bf16 %v13307_v44, %v13299_v42  ;;  %v13324_v46 = vsel %vm13294_vm4, %v22423_v23, %v22427_v36  ;;  %v22433_v27 = vunpack.i.h.bf16 %v22431_v60  ;;  %v22432_v9 = vunpack.i.l.bf16 %v22431_v60  ;;  %18688 = vmatmul.mubr.msk.f32.vlgmr.msra.gmra.mrb[122].mxu0 %vm29232_vm3, %v28084_v15 }
0x1062   : > { %v22428_v44 = vunpack.i.h.bf16 %v22426_v14  ;;  %v21206_v42 = vpack.c.bf16 %v13324_v46, %v13316_v24  ;;  %22710 = vrot.lane.b32.xlu1 %v29315_v63, %s22960_s24  ;;  %v22441_v52 = vpop.permute.xlu0 %22440  ;;  %vm28177_vm14 = vcmp.le.s32.totalorder %v29407_v41, 30  ;;  %v29410_v23 = vunpack.i.l.bf16 %v28048_v43  ;;  %13547 = vmatprep.mubr.f32.mxu0 %v29248_v51 }
0x1063   : > { %21205 = vmatpush1.bf16.msk.msra.mxu0 %vm28156_vm2, %v21203_v48  ;;  %v22442_v29 = vunpack.i.l.bf16 %v22441_v52  ;;  %v13309_v24 = vsel %vm13294_vm4, %v22417_v7, %v22433_v27  ;;  %vm257_vm3 = vcmp.le.s32.totalorder %v29411_v49, 30  ;;  %v22443_v43 = vunpack.i.h.bf16 %v22441_v52  ;;  %vm28199_vm15 = vmpackc.low %vm28177_vm14, %vm28177_vm14 }
0x1064   : > { %v13315_v60 = vsel %vm13294_vm4, %v29410_v23, %v22418_v37  ;;  %v13302_v48 = vsel %vm13294_vm4, %v22428_v44, %v22432_v9  ;;  %v22436_v46 = vpop.permute.xlu1 %22435  ;;  %22715 = vrot.lane.b32.xlu0 %v27571_v0, %s22960_s24  ;;  %21208 = vmatprep.subr.msk.bf16.mxu0 %vm28144_vm7, %v21206_v42  ;;  %v29413_v7 = vmov 0  ;;  %vm29418_vm14 = vcmask 261120  }
0x1065   : > { %v21209_v14 = vpack.c.bf16 %v13323_v28, %v13315_v60  ;;  %v13310_v37 = vsel %vm13294_vm4, %v22433_v27, %v22442_v29  ;;  %v22438_v41 = vunpack.i.h.bf16 %v22436_v46  ;;  %v22437_v23 = vunpack.i.l.bf16 %v22436_v46  ;;  %18689 = vmatmul.mubr.msk.f32.gmra.mrb[124].mxu0 %vm29412_vm12, %v28119_v22  ;;  %vm28213_vm12 = vmpackc.low %vm257_vm3, %vm257_vm3 }
0x1066   : > { %v29414_v7 = vsel %vm28199_vm15, 4294967295, %v29413_v7  ;;  %v21212_v28 = vpack.c.bf16 %v13310_v37, %v13302_v48  ;;  %22720 = vrot.lane.b32.xlu1 %v27578_v56, %s22960_s24  ;;  %v13293_v3 = vpop.permute.xlu0 %13292  ;;  %v29415_v29 = vunpack.i.l.bf16 %v28100_v62  ;;  %13618 = vmatprep.mubr.f32.mxu0 %v29248_v51  ;;  %v29419_v46 = vunpack.i.l.bf16 %v28130_v39 }
0x1067   : > { %21211 = vmatpush1.bf16.msk.msra.mxu0 %vm28156_vm2, %v21209_v14  ;;  %v13318_v27 = vsel %vm13294_vm4, %v22443_v43, %v22437_v23  ;;  %v13326_v9 = vsel %vm13294_vm4, %v22438_v41, %v13293_v3  ;;  %v13325_v62 = vsel %vm13294_vm4, %v22427_v36, %v22438_v41  ;;  %v29420_v41 = vld [vmem:[#allocation4_spill] sm:$0xff]  ;;  %vm29421_vm3 = vcmask 7168  }
0x1068   : > { %v13301_v52 = vsel %vm13294_vm4, %v29415_v29, %v22428_v44  ;;  %v21218_v60 = vpack.c.bf16 %v13326_v9, %v13318_v27  ;;  %v22446_v14 = vpop.permute.xlu1 %22445  ;;  %22725 = vrot.lane.b32.xlu0 %v29320_v25, %s22960_s24  ;;  %21214 = vmatprep.subr.msk.bf16.mxu0 %vm28199_vm15, %v21212_v28  ;;  %v13317_v49 = vsel %vm13294_vm4, %v29419_v46, %v22443_v43  ;;  %vm29423_vm2 = vmmov %vm29421_vm3 }
0x1069   : > { %v21215_v20 = vpack.c.bf16 %v13309_v24, %v13301_v52  ;;  %v22448_v44 = vunpack.i.h.bf16 %v22446_v14  ;;  %v22447_v48 = vunpack.i.l.bf16 %v22446_v14  ;;  %v21221_v36 = vpack.c.bf16 %v13325_v62, %v13317_v49  ;;  %vm29424_vm4 = vmmov %vm29423_vm2 }
0x106a   : > { %18698 = vmatmul.mubr.msk.f32.vlgmr.msra.gmra.mrb[126].mxu0 %vm29418_vm14, %v28084_v15  ;;  %22730 = vrot.lane.b32.xlu1 %v29321_v57, %s22960_s24  ;;  %v22451_v24 = vpop.permute.xlu0 %22450  ;;  %vm29422_vm14 = vmmov %vm29421_vm3 }
0x106b   : > { %21217 = vmatpush1.bf16.msk.msra.mxu0 %vm28213_vm12, %v21215_v20  ;;  %v22453_v37 = vunpack.i.h.bf16 %v22451_v24  ;;  %v22452_v23 = vunpack.i.l.bf16 %v22451_v24  ;;  %13624 = vmatprep.mubr.f32.mxu0 %v29248_v51  ;;  %v13788_v28 = vsel %vm29421_vm3, %v29420_v41, %v22447_v48  ;;  %v13789_v3 = vsel %vm29422_vm14, %v22447_v48, %v22448_v44  ;;  %vm29426_vm3 = vmmov %vm29423_vm2 }
0x106c   : > { %21220 = vmatprep.subr.msk.bf16.mxu0 %vm28199_vm15, %v21218_v60  ;;  %v22456_v29 = vpop.permute.xlu1 %22455  ;;  %22735 = vrot.lane.b32.xlu0 %v27621_v18, %s22960_s24  ;;  %vm29425_vm15 = vcmask 261120   ;;  %vm29428_vm14 = vmmov %vm29423_vm2 }
0x106d   : > { %v13796_v39 = vsel %vm29423_vm2, %v29420_v41, %v22452_v23  ;;  %v13797_v43 = vsel %vm29424_vm4, %v22452_v23, %v22453_v37  ;;  %v22458_v52 = vunpack.i.h.bf16 %v22456_v29  ;;  %v22457_v27 = vunpack.i.l.bf16 %v22456_v29 }
0x106e   : > { %18699 = vmatmul.mubr.msk.f32.gmra.mrb[128].mxu0 %vm29425_vm15, %v28119_v22  ;;  %v21224_v9 = vpack.c.bf16 %v13797_v43, %v13789_v3  ;;  %v21227_v20 = vpack.c.bf16 %v13796_v39, %v13788_v28  ;;  %22740 = vrot.lane.b32.xlu1 %v27643_v8, %s22960_s24  ;;  %v22461_v60 = vpop.permute.xlu0 %22460  ;;  %vm29427_vm15 = vmmov %vm29423_vm2  ;;  %vm29429_vm4 = vcmask 261120  }
0x106f   : > { %21223 = vmatpush1.bf16.msk.msra.mxu0 %vm28213_vm12, %v21221_v36  ;;  %v22463_v14 = vunpack.i.h.bf16 %v22461_v60  ;;  %v22462_v62 = vunpack.i.l.bf16 %v22461_v60  ;;  %13695 = vmatprep.mubr.f32.mxu0 %v29248_v51  ;;  %v13804_v48 = vsel %vm29423_vm2, %v29420_v41, %v22457_v27  ;;  %v13805_v24 = vsel %vm29426_vm3, %v22457_v27, %v22458_v52  ;;  %vm29430_vm3 = vmmov %vm29423_vm2 }
0x1070   : > { %v22466_v46 = vpop.permute.xlu1 %22465  ;;  %22745 = vrot.lane.b32.xlu0 %v29330_v31, %s22960_s24  ;;  %21226 = vmatprep.subr.msk.bf16.mxu0 %vm27669_vm8, %v21224_v9 }
0x1071   : > { %v13812_v49 = vsel %vm29427_vm15, %v29420_v41, %v22462_v62  ;;  %v13813_v23 = vsel %vm29428_vm14, %v22462_v62, %v22463_v14  ;;  %v22468_v36 = vunpack.i.h.bf16 %v22466_v46  ;;  %v22467_v28 = vunpack.i.l.bf16 %v22466_v46  ;;  %vm29431_vm15 = vmmov %vm29423_vm2 }
0x1072   : > { %18708 = vmatmul.mubr.msk.f32.vlgmr.msra.gmra.mrb[130].mxu0 %vm29429_vm4, %v28084_v15  ;;  %v21230_v3 = vpack.c.bf16 %v13813_v23, %v13805_v24  ;;  %v21233_v29 = vpack.c.bf16 %v13812_v49, %v13804_v48  ;;  %22750 = vrot.lane.b32.xlu1 %v29337_v35, %s22960_s24  ;;  %v22471_v39 = vpop.permute.xlu0 %22470  ;;  %vm29432_vm14 = vmmov %vm29423_vm2 }
0x1073   : > { %21229 = vmatpush1.bf16.msk.msra.mxu0 %vm27696_vm9, %v21227_v20  ;;  %v22473_v43 = vunpack.i.h.bf16 %v22471_v39  ;;  %v22472_v27 = vunpack.i.l.bf16 %v22471_v39  ;;  %13701 = vmatprep.mubr.f32.mxu0 %v29248_v51  ;;  %v13790_v41 = vsel %vm29423_vm2, %v22448_v44, %v22467_v28  ;;  %v13791_v9 = vsel %vm29430_vm3, %v22467_v28, %v22468_v36  ;;  %vm29433_vm3 = vmmov %vm29423_vm2 }
0x1074   : > { %v22476_v60 = vpop.permute.xlu1 %22475  ;;  %22755 = vrot.lane.b32.xlu0 %v28023_v54, %s22960_s24  ;;  %21232 = vmatprep.subr.msk.bf16.mxu0 %vm27669_vm8, %v21230_v3 }
0x1075   : > { %v13798_v15 = vsel %vm29431_vm15, %v22453_v37, %v22472_v27  ;;  %v13799_v20 = vsel %vm29432_vm14, %v22472_v27, %v22473_v43  ;;  %v22478_v62 = vunpack.i.h.bf16 %v22476_v60  ;;  %v22477_v48 = vunpack.i.l.bf16 %v22476_v60  ;;  %v28283_v37 = vld [vmem:[%s29158_s1 + $0xac0] sm:$0xff]  ;;  %vm29434_vm15 = vmmov %vm29423_vm2 }
0x1076   : > { %18709 = vmatmul.mubr.msk.f32.gmra.mrb[132].mxu0 %vm29429_vm4, %v28119_v22  ;;  %v21236_v24 = vpack.c.bf16 %v13799_v20, %v13791_v9  ;;  %v21239_v44 = vpack.c.bf16 %v13798_v15, %v13790_v41  ;;  %22760 = vrot.lane.b32.xlu1 %v28079_v59, %s22960_s24  ;;  %v22481_v46 = vpop.permute.xlu0 %22480  ;;  %vm29435_vm14 = vmmov %vm29423_vm2 }
0x1077   : > { %21235 = vmatpush1.bf16.msk.msra.mxu0 %vm27696_vm9, %v21233_v29  ;;  %v22483_v49 = vunpack.i.h.bf16 %v22481_v46  ;;  %v22482_v23 = vunpack.i.l.bf16 %v22481_v46  ;;  %13957 = vmatprep.mubr.f32.mxu0 %v29248_v51  ;;  %v13806_v22 = vsel %vm29423_vm2, %v22458_v52, %v22477_v48  ;;  %v13807_v28 = vsel %vm29433_vm3, %v22477_v48, %v22478_v62  ;;  %vm29436_vm3 = vmmov %vm29423_vm2 }
0x1078   : > { %v22486_v3 = vpop.permute.xlu1 %22485  ;;  %15606 = vrot.lane.b32.xlu0 %v27219_v45, %s22960_s24  ;;  %21238 = vmatprep.subr.msk.bf16.mxu0 %vm27749_vm11, %v21236_v24 }
0x1079   : > { %v13814_v59 = vsel %vm29434_vm15, %v22463_v14, %v22482_v23  ;;  %v13815_v29 = vsel %vm29435_vm14, %v22482_v23, %v22483_v49  ;;  %v22488_v39 = vunpack.i.h.bf16 %v22486_v3  ;;  %v22487_v27 = vunpack.i.l.bf16 %v22486_v3  ;;  %v28303_v14 = vld [vmem:[%s29158_s1 + $0xac8] sm:$0xff]  ;;  %vm29437_vm15 = vmmov %vm29423_vm2 }
0x107a   : > { %18720 = vmatmul.mubr.msk.f32.vlgmr.msra.gmra.mrb[102].mxu0 %vm29429_vm4, %v28283_v37  ;;  %v21242_v41 = vpack.c.bf16 %v13815_v29, %v13807_v28  ;;  %v21245_v52 = vpack.c.bf16 %v13814_v59, %v13806_v22  ;;  %22765 = vrot.lane.b32.xlu1 %v27548_v47, %s22961_s6  ;;  %v22491_v9 = vpop.permute.xlu0 %22490  ;;  %vm29438_vm14 = vmmov %vm29423_vm2 }
0x107b   : > { %21241 = vmatpush1.bf16.msk.msra.mxu0 %vm27795_vm13, %v21239_v44  ;;  %v22493_v60 = vunpack.i.h.bf16 %v22491_v9  ;;  %v22492_v15 = vunpack.i.l.bf16 %v22491_v9  ;;  %13963 = vmatprep.mubr.f32.mxu0 %v29248_v51  ;;  %v13792_v20 = vsel %vm29423_vm2, %v22468_v36, %v22487_v27  ;;  %v13793_v48 = vsel %vm29436_vm3, %v22487_v27, %v22488_v39  ;;  %vm29439_vm3 = vmmov %vm29423_vm2 }
0x107c   : > { %v22496_v24 = vpop.permute.xlu1 %22495  ;;  %22770 = vrot.lane.b32.xlu0 %v27554_v32, %s22961_s6  ;;  %21244 = vmatprep.subr.msk.bf16.mxu0 %vm27749_vm11, %v21242_v41 }
0x107d   : > { %v13800_v47 = vsel %vm29437_vm15, %v22473_v43, %v22492_v15  ;;  %v13801_v44 = vsel %vm29438_vm14, %v22492_v15, %v22493_v60  ;;  %v22498_v46 = vunpack.i.h.bf16 %v22496_v24  ;;  %v22497_v23 = vunpack.i.l.bf16 %v22496_v24  ;;  %vm29440_vm15 = vmmov %vm29423_vm2 }
0x107e   : > { %18721 = vmatmul.mubr.msk.f32.gmra.mrb[120].mxu0 %vm29429_vm4, %v28303_v14  ;;  %v21248_v22 = vpack.c.bf16 %v13801_v44, %v13793_v48  ;;  %v21251_v36 = vpack.c.bf16 %v13800_v47, %v13792_v20  ;;  %22775 = vrot.lane.b32.xlu1 %v29312_v38, %s22961_s6  ;;  %v22501_v32 = vpop.permute.xlu0 %22500  ;;  %vm29441_vm14 = vmmov %vm29423_vm2 }
0x107f   : > { %21247 = vmatpush1.bf16.msk.msra.mxu0 %vm27795_vm13, %v21245_v52  ;;  %v22503_v28 = vunpack.i.h.bf16 %v22501_v32  ;;  %v22502_v3 = vunpack.i.l.bf16 %v22501_v32  ;;  %14034 = vmatprep.mubr.f32.mxu0 %v29248_v51  ;;  %v13808_v43 = vsel %vm29423_vm2, %v22478_v62, %v22497_v23  ;;  %v13809_v59 = vsel %vm29439_vm3, %v22497_v23, %v22498_v46  ;;  %vm29442_vm3 = vmmov %vm29423_vm2 }
0x1080   : > { %v22506_v29 = vpop.permute.xlu1 %22505  ;;  %22780 = vrot.lane.b32.xlu0 %v29313_v50, %s22961_s6  ;;  %21250 = vmatprep.subr.msk.bf16.mxu0 %vm27857_vm5, %v21248_v22 }
0x1081   : > { %v13816_v27 = vsel %vm29440_vm15, %v22483_v49, %v22502_v3  ;;  %v13817_v38 = vsel %vm29441_vm14, %v22502_v3, %v22503_v28  ;;  %v22508_v41 = vunpack.i.h.bf16 %v22506_v29  ;;  %v22507_v52 = vunpack.i.l.bf16 %v22506_v29  ;;  %vm29443_vm15 = vmmov %vm29423_vm2 }
0x1082   : > { %18730 = vmatmul.mubr.msk.f32.vlgmr.msra.gmra.mrb[122].mxu0 %vm29429_vm4, %v28283_v37  ;;  %v21254_v9 = vpack.c.bf16 %v13817_v38, %v13809_v59  ;;  %v21257_v62 = vpack.c.bf16 %v13816_v27, %v13808_v43  ;;  %22785 = vrot.lane.b32.xlu1 %v29314_v2, %s22961_s6  ;;  %v22516_v50 = vpop.permute.xlu0 %22515  ;;  %vm29444_vm14 = vmmov %vm29423_vm2 }
0x1083   : > { %21253 = vmatpush1.bf16.msk.msra.mxu0 %vm27890_vm6, %v21251_v36  ;;  %v22518_v15 = vunpack.i.h.bf16 %v22516_v50  ;;  %v22517_v20 = vunpack.i.l.bf16 %v22516_v50  ;;  %14040 = vmatprep.mubr.f32.mxu0 %v29248_v51  ;;  %v13794_v49 = vsel %vm29423_vm2, %v22488_v39, %v22507_v52  ;;  %v13795_v48 = vsel %vm29442_vm3, %v22507_v52, %v22508_v41  ;;  %vm29445_vm3 = vmmov %vm29423_vm2 }
0x1084   : > { %v22511_v24 = vpop.permute.xlu1 %22510  ;;  %22790 = vrot.lane.b32.xlu0 %v29315_v63, %s22961_s6  ;;  %21256 = vmatprep.subr.msk.bf16.mxu0 %vm27857_vm5, %v21254_v9  ;;  %v29453_v41 = vpack.c.bf16 %v27090_v33, %v27078_v61  ;;  %v28420_v61 = vld [vmem:[%s29158_s1 + $0xb00] sm:$0xff]  ;;  %v29457_v33 = vld [vmem:[#allocation35_spill] sm:$0xff]  ;;  %v29458_v9 = vld [vmem:[#allocation32_spill] sm:$0xff] }
0x1085   : > { %v13802_v47 = vsel %vm29443_vm15, %v22493_v60, %v22517_v20  ;;  %v13803_v2 = vsel %vm29444_vm14, %v22517_v20, %v22518_v15  ;;  %v22513_v44 = vunpack.i.h.bf16 %v22511_v24  ;;  %v22512_v23 = vunpack.i.l.bf16 %v22511_v24  ;;  %vm29446_vm15 = vmmov %vm29423_vm2  ;;  %v29464_v15 = vld [vmem:[#allocation30_spill] sm:$0xff]  ;;  %v29466_v24 = vld [vmem:[#allocation9_spill] sm:$0xff] }
0x1086   : > { %18731 = vmatmul.mubr.msk.f32.gmra.mrb[124].mxu0 %vm29429_vm4, %v28303_v14  ;;  %v21260_v22 = vpack.c.bf16 %v13803_v2, %v13795_v48  ;;  %v21263_v39 = vpack.c.bf16 %v13802_v47, %v13794_v49  ;;  %22795 = vrot.lane.b32.xlu1 %v27571_v0, %s22961_s6  ;;  %v22521_v63 = vpop.permute.xlu0 %22520  ;;  %vm29447_vm14 = vmmov %vm29423_vm2  ;;  %v28445_v49 = vld [vmem:[%s29158_s1 + $0xb08] sm:$0xff]  ;;  %v29465_v48 = vld [vmem:[#allocation12_spill] sm:$0xff] }
0x1087   : > { %21259 = vmatpush1.bf16.msk.msra.mxu0 %vm27890_vm6, %v21257_v62  ;;  %v22523_v36 = vunpack.i.h.bf16 %v22521_v63  ;;  %v22522_v32 = vunpack.i.l.bf16 %v22521_v63  ;;  %14111 = vmatprep.mubr.f32.mxu0 %v29248_v51  ;;  %v13810_v3 = vsel %vm29423_vm2, %v22498_v46, %v22512_v23  ;;  %v13811_v43 = vsel %vm29445_vm3, %v22512_v23, %v22513_v44  ;;  %vm29448_vm2 = vmmov %vm29429_vm4  ;;  %v29462_v62 = vld [vmem:[#allocation31_spill] sm:$0xff]  ;;  %v29469_v23 = vld [vmem:[#allocation34_spill] sm:$0xff] }
0x1088   : > { %v28351_v60 = vpop.permute.xlu1 %22525  ;;  %22800 = vrot.lane.b32.xlu0 %v27578_v56, %s22961_s6  ;;  %21262 = vmatprep.subr.msk.bf16.mxu0 %vm27926_vm10, %v21260_v22  ;;  %vm29449_vm3 = vmmov %vm29448_vm2  ;;  %v29467_v47 = vpack.c.bf16 %v29465_v48, %v29466_v24  ;;  %v18899_v2 = vld [vmem:[%s29158_s1 + $0xc48] sm:$0xff]  ;;  %v29470_v22 = vld [vmem:[#allocation37_spill] sm:$0xff] }
0x1089   : > { %v13818_v59 = vsel %vm29446_vm15, %v22503_v28, %v22522_v32  ;;  %v13819_v0 = vsel %vm29447_vm14, %v22522_v32, %v22523_v36  ;;  %v21272_v28 = vpack.c.bf16 %v29311_v26, %v29310_v6  ;;  %v29450_v6 = vld [vmem:[#allocation22_spill] sm:$0xff]  ;;  %v29451_v26 = vld [vmem:[#allocation20_spill] sm:$0xff]  ;;  %vm29454_vm15 = vmmov %vm29448_vm2 }
0x108a   : > { %18740 = vmatmul.mubr.msk.f32.vlgmr.msra.gmra.mrb[126].mxu0 %vm29429_vm4, %v28283_v37  ;;  %v21266_v29 = vpack.c.bf16 %v13819_v0, %v13811_v43  ;;  %v21269_v27 = vpack.c.bf16 %v13818_v59, %v13810_v3  ;;  %22805 = vrot.lane.b32.xlu1 %v29320_v25, %s22961_s6  ;;  %v28367_v56 = vpop.permute.xlu0 %22530  ;;  %v29452_v38 = vpack.c.bf16 %v29450_v6, %v29451_v26  ;;  %vm29460_vm14 = vmmov %vm29448_vm2  ;;  %v18901_v63 = vld [vmem:[%s29159_s2 + $0x1c0] sm:$0xff]  ;;  %v29471_v36 = vld [vmem:[#allocation11_spill] sm:$0xff] }
0x108b   : > { %21265 = vmatpush1.bf16.msk.msra.mxu0 %vm27953_vm0, %v21263_v39  ;;  %14117 = vmatprep.mubr.f32.mxu0 %v29248_v51  ;;  %vm29468_vm4 = vmmov %vm29448_vm2  ;;  %v21288_v39 = vpack.c.bf16 %v29470_v22, %v29469_v23  ;;  %v29472_v32 = vld [vmem:[#allocation8_spill] sm:$0xff]  ;;  %v29474_v0 = vld [vmem:[#allocation25_spill] sm:$0xff] }
0x108c   : > { %v28370_v46 = vpop.permute.xlu1 %22535  ;;  %22810 = vrot.lane.b32.xlu0 %v29321_v57, %s22961_s6  ;;  %21268 = vmatprep.subr.msk.bf16.mxu0 %vm27926_vm10, %v21266_v29  ;;  %v29473_v3 = vpack.c.bf16 %v29471_v36, %v29472_v32  ;;  %v29475_v29 = vld [vmem:[#allocation36_spill] sm:$0xff]  ;;  %v29476_v6 = vld [vmem:[#allocation18_spill] sm:$0xff]  ;;  %v29477_v26 = vld [vmem:[#allocation15_spill] sm:$0xff] }
0x108d   : > { %v22538_v48 = vunpack.i.h.bf16 %v28370_v46 }
0x108e   : > { %18741 = vmatmul.mubr.msk.f32.gmra.mrb[128].mxu0 %vm29448_vm2, %v28303_v14  ;;  %22815 = vrot.lane.b32.xlu1 %v27621_v18, %s22961_s6  ;;  %v28384_v25 = vpop.permute.xlu0 %22540 }
0x108f   : > { %21271 = vmatpush1.bf16.msk.msra.mxu0 %vm27953_vm0, %v21269_v27  ;;  %14188 = vmatprep.mubr.f32.mxu0 %v29248_v51  ;;  %v21290_v27 = vpack.c.bf16 %v29475_v29, %v29474_v0  ;;  %v22543_v36 = vunpack.i.h.bf16 %v28384_v25 }
0x1090   : > { %21273 = vmatprep.subr.bf16.mxu0 %v21272_v28  ;;  %v28387_v57 = vpop.permute.xlu1 %22545  ;;  %22820 = vrot.lane.b32.xlu0 %v27643_v8, %s22961_s6  ;;  %v29455_v8 = vld [vmem:[#allocation6_spill] sm:$0xff] }
0x1091   : > { %v22547_v24 = vunpack.i.l.bf16 %v28387_v57 }
0x1092   : > { %18750 = vmatmul.mubr.msk.f32.vlgmr.msra.gmra.mrb[130].mxu0 %vm29449_vm3, %v28283_v37  ;;  %22825 = vrot.lane.b32.xlu1 %v29330_v31, %s22961_s6  ;;  %v28398_v18 = vpop.permute.xlu0 %22550  ;;  %v29456_v37 = vpack.c.bf16 %v27084_v19, %v29455_v8  ;;  %v18898_v19 = vld [vmem:[%s29158_s1 + $0xc40] sm:$0xff]  ;;  %v22533_v8 = vunpack.i.h.bf16 %v28367_v56  ;;  %vm29479_vm3 = vmmov %vm29448_vm2 }
0x1093   : > { %21275 = vmatpush1.bf16.msra.mxu0 %v29452_v38  ;;  %14194 = vmatprep.mubr.f32.mxu0 %v29248_v51  ;;  %v29478_v38 = vpack.c.bf16 %v29476_v6, %v29477_v26  ;;  %v22553_v29 = vunpack.i.h.bf16 %v28398_v18  ;;  %v29494_v26 = vld [vmem:[#allocation28_spill] sm:$0xff] }
0x1094   : > { %21277 = vmatprep.subr.bf16.mxu0 %v29453_v41  ;;  %v28404_v52 = vpop.permute.xlu1 %22555  ;;  %22830 = vrot.lane.b32.xlu0 %v29337_v35, %s22961_s6  ;;  %v29459_v35 = vpack.c.bf16 %v29457_v33, %v29458_v9  ;;  %v21296_v33 = vpack.c.bf16 %v27348_v55, %v27338_v40  ;;  %v29480_v9 = vld [vmem:[#allocation17_spill] sm:$0xff]  ;;  %v22537_v40 = vunpack.i.l.bf16 %v28370_v46  ;;  %v29489_v46 = vpack.c.bf16 %v27219_v45, %v27207_v1 }
0x1096   : > { %18751 = vmatmul.mubr.msk.f32.gmra.mrb[132].mxu0 %vm29454_vm15, %v28303_v14  ;;  %22835 = vrot.lane.b32.xlu1 %v28023_v54, %s22961_s6  ;;  %v28415_v31 = vpop.permute.xlu0 %22560  ;;  %v29461_v54 = vld [vmem:[#allocation33_spill] sm:$0xff]  ;;  %vm29483_vm15 = vcmask 1039360  }
0x1097   : > { %21279 = vmatpush1.bf16.msra.mxu0 %v29456_v37  ;;  %14290 = vmatprep.mubr.f32.mxu0 %v29248_v51  ;;  %v29463_v50 = vpack.c.bf16 %v29461_v54, %v29462_v62  ;;  %v22532_v37 = vunpack.i.l.bf16 %v28367_v56  ;;  %v22528_v62 = vunpack.i.h.bf16 %v28351_v60  ;;  %v22563_v45 = vunpack.i.h.bf16 %v28415_v31 }
0x1098   : > { %21281 = vmatprep.subr.bf16.mxu0 %v29459_v35  ;;  %v28426_v14 = vpop.permute.xlu1 %22565  ;;  %16035 = vrot.lane.b32.xlu0 %v27348_v55, %s22961_s6  ;;  %v29481_v35 = vld [vmem:[#allocation14_spill] sm:$0xff]  ;;  %v22548_v55 = vunpack.i.h.bf16 %v28387_v57  ;;  %v22542_v57 = vunpack.i.l.bf16 %v28384_v25  ;;  %v22562_v6 = vunpack.i.l.bf16 %v28415_v31  ;;  %v22557_v31 = vunpack.i.l.bf16 %v28404_v52 }
0x109a   : > { %18754 = vmatmul.mubr.msk.f32.vlgmr.msra.gmra.mrb[102].mxu0 %vm29460_vm14, %v28420_v61  ;;  %22840 = vrot.lane.b32.xlu1 %v29464_v15, %s22961_s6  ;;  %v28440_v20 = vpop.permute.xlu0 %22570  ;;  %v14623_v15 = vsel %vm29483_vm15, %v22532_v37, %v22533_v8  ;;  %vm29484_vm14 = vmmov %vm29448_vm2 }
0x109b   : > { %21283 = vmatpush1.bf16.msra.mxu0 %v29463_v50  ;;  %14296 = vmatprep.mubr.f32.mxu0 %v29248_v51  ;;  %v22527_v50 = vunpack.i.l.bf16 %v28351_v60 }
0x109c   : > { %21285 = vmatprep.subr.bf16.mxu0 %v29467_v47  ;;  %v28454_v44 = vpop.permute.xlu1 %22575  ;;  %16504 = vperm.xlu0 %21882, %v18898_v19   ;;  %v29482_v19 = vpack.c.bf16 %v29480_v9, %v29481_v35  ;;  %v29485_v47 = vld [vmem:[#allocation39_spill] sm:$0xff]  ;;  %v22558_v35 = vunpack.i.h.bf16 %v28404_v52 }
0x109e   : > { %18755 = vmatmul.mubr.msk.f32.gmra.mrb[120].mxu0 %vm29468_vm4, %v28445_v49  ;;  %16509 = vperm.xlu1 %21883, %v18899_v2   ;;  %v28466_v43 = vpop.permute.xlu0 %22580  ;;  %v29486_v2 = vld [vmem:[#allocation38_spill] sm:$0xff]  ;;  %vm29488_vm4 = vmmov %vm29483_vm15 }
0x109f   : > { %21287 = vmatpush1.bf16.msra.mxu0 %v29473_v3  ;;  %14367 = vmatprep.mubr.f32.mxu0 %v29248_v51  ;;  %v29487_v23 = vpack.c.bf16 %v29485_v47, %v29486_v2  ;;  %vm29492_vm15 = vmmov %vm29484_vm14  ;;  %v22573_v47 = vunpack.i.h.bf16 %v28440_v20  ;;  %v22572_v2 = vunpack.i.l.bf16 %v28440_v20 }
0x10a0   : > { %21289 = vmatprep.subr.bf16.mxu0 %v21288_v39  ;;  %v28469_v59 = vpop.permute.xlu1 %22585  ;;  %16550 = vperm.xlu0 %21882, %v18901_v63   ;;  %v14615_v39 = vsel %vm29488_vm4, %v22527_v50, %v22528_v62 }
0x10a1   : > { %v21304_v63 = vpack.c.bf16 %v14623_v15, %v14615_v39  ;;  %v22568_v39 = vunpack.i.h.bf16 %v28426_v14 }
0x10a2   : > { %18756 = vmatmul.mubr.msk.f32.vlgmr.msra.gmra.mrb[122].mxu0 %vm29448_vm2, %v28420_v61  ;;  %v28475_v28 = vpop.permute.xlu0 %22590  ;;  %vm29490_vm2 = vmmov %vm29488_vm4 }
0x10a3   : > { %21291 = vmatpush1.bf16.msra.mxu0 %v21290_v27  ;;  %14373 = vmatprep.mubr.f32.mxu0 %v29248_v51  ;;  %v14614_v3 = vsel %vm29490_vm2, %v22537_v40, %v22527_v50  ;;  %v22552_v27 = vunpack.i.l.bf16 %v28398_v18  ;;  %vm29497_vm4 = vmmov %vm29490_vm2  ;;  %v14638_v15 = vsel %vm29490_vm2, %v22553_v29, %v22547_v24  ;;  %v22582_v29 = vunpack.i.l.bf16 %v28466_v43 }
0x10a4   : > { %21293 = vmatprep.subr.bf16.mxu0 %v29478_v38  ;;  %v28481_v41 = vpop.permute.xlu1 %22600  ;;  %v29495_v38 = vld [vmem:[#allocation26_spill] sm:$0xff] }
0x10a6   : > { %18757 = vmatmul.mubr.msk.f32.gmra.mrb[124].mxu0 %vm29479_vm3, %v28445_v49  ;;  %v28492_v54 = vpop.permute.xlu0 %22595  ;;  %vm29491_vm3 = vmmov %vm29490_vm2 }
0x10a7   : > { %21295 = vmatpush1.bf16.msra.mxu0 %v29482_v19  ;;  %14444 = vmatprep.mubr.f32.mxu0 %v29248_v51  ;;  %v14622_v0 = vsel %vm29491_vm3, %v22538_v48, %v22532_v37  ;;  %v14631_v37 = vsel %vm29497_vm4, %v22542_v57, %v22543_v36  ;;  %vm29498_vm3 = vmmov %vm29490_vm2  ;;  %vm29500_vm4 = vnez %v29386_v12  ;;  %v22597_v52 = vunpack.i.l.bf16 %v28492_v54 }
0x10a8   : > { %21297 = vmatprep.subr.bf16.mxu0 %v21296_v33  ;;  %v28497_v56 = vpop.permute.xlu1 %22610  ;;  %v29496_v33 = vpack.c.bf16 %v29494_v26, %v29495_v38  ;;  %v21307_v18 = vpack.c.bf16 %v14622_v0, %v14614_v3  ;;  %v14630_v48 = vsel %vm29498_vm3, %v22552_v27, %v22542_v57  ;;  %vm29501_vm3 = vmmov %vm29490_vm2  ;;  %v22583_v0 = vunpack.i.h.bf16 %v28466_v43 }
0x10aa   : > { %18758 = vmatmul.mubr.msk.f32.vlgmr.msra.gmra.mrb[126].mxu0 %vm29484_vm14, %v28420_v61  ;;  %v28509_v22 = vpop.permute.xlu0 %22605  ;;  %vm29493_vm14 = vmmov %vm29490_vm2 }
0x10ab   : > { %21299 = vmatpush1.bf16.msra.mxu0 %v29487_v23  ;;  %14450 = vmatprep.mubr.f32.mxu0 %v29248_v51  ;;  %v14639_v1 = vsel %vm29493_vm14, %v22547_v24, %v22548_v55  ;;  %vm29499_vm14 = vmmov %vm29490_vm2  ;;  %v21313_v24 = vpack.c.bf16 %v14638_v15, %v14630_v48  ;;  %v22588_v15 = vunpack.i.h.bf16 %v28469_v59  ;;  %v22587_v48 = vunpack.i.l.bf16 %v28469_v59 }
0x10ac   : > { %21301 = vmatprep.subr.bf16.mxu0 %v29489_v46  ;;  %v28520_v32 = vpop.permute.xlu1 %22615  ;;  %v21310_v50 = vpack.c.bf16 %v14639_v1, %v14631_v37  ;;  %v14625_v40 = vsel %vm29499_vm14, %v22562_v6, %v22563_v45  ;;  %v22567_v46 = vunpack.i.l.bf16 %v28426_v14  ;;  %vm29502_vm14 = vmmov %vm29490_vm2  ;;  %v28581_v14 = vld [vmem:[%s29158_s1 + $0xb40] sm:$0xff]  ;;  %v22578_v1 = vunpack.i.h.bf16 %v28454_v44  ;;  %v29508_v37 = vld [vmem:[#allocation21_spill] sm:$0xff] }
0x10ad   : > { %v14641_v3 = vsel %vm29502_vm14, %v22572_v2, %v22573_v47  ;;  %vm29505_vm14 = vmmov %vm29490_vm2 }
0x10ae   : > { %18759 = vmatmul.mubr.msk.f32.gmra.mrb[128].mxu0 %vm29492_vm15, %v28445_v49  ;;  %v28534_v9 = vpop.permute.xlu0 %22620  ;;  %v14640_v38 = vsel %vm29505_vm14, %v22548_v55, %v22572_v2  ;;  %vm29512_vm14 = vcmask 261120  }
0x10af   : > { %21303 = vmatpush1.bf16.msra.mxu0 %v29496_v33  ;;  %14521 = vmatprep.mubr.f32.mxu0 %v29248_v51 }
0x10b0   : > { %21306 = vmatprep.subr.msk.bf16.mxu0 %vm27993_vm1, %v21304_v63  ;;  %v28544_v19 = vpop.permute.xlu1 %22625  ;;  %v14624_v63 = vsel %vm29501_vm3, %v22533_v8, %v22562_v6  ;;  %vm29503_vm3 = vnez %v29394_v34  ;;  %v22577_v6 = vunpack.i.l.bf16 %v28454_v44  ;;  %v28607_v44 = vld [vmem:[%s29158_s1 + $0xb48] sm:$0xff] }
0x10b2   : > { %18760 = vmatmul.mubr.msk.f32.vlgmr.msra.gmra.mrb[130].mxu0 %vm29492_vm15, %v28420_v61  ;;  %v28555_v23 = vpop.permute.xlu0 %22630  ;;  %v14617_v61 = vsel %vm29490_vm2, %v22557_v31, %v22558_v35 }
0x10b3   : > { %21309 = vmatpush1.bf16.msk.msra.mxu0 %vm29500_vm4, %v21307_v18  ;;  %14527 = vmatprep.mubr.f32.mxu0 %v29248_v51  ;;  %v21316_v57 = vpack.c.bf16 %v14625_v40, %v14617_v61  ;;  %v22592_v18 = vunpack.i.l.bf16 %v28475_v28  ;;  %v22612_v61 = vunpack.i.l.bf16 %v28497_v56 }
0x10b4   : > { %21312 = vmatprep.subr.msk.bf16.mxu0 %vm27993_vm1, %v21310_v50  ;;  %v28565_v20 = vpop.permute.xlu1 %22635  ;;  %vm29507_vm1 = vmmov %vm29490_vm2 }
0x10b5   : > { %v14627_v60 = vsel %vm29507_vm1, %v22582_v29, %v22583_v0  ;;  %v14619_v50 = vsel %vm29507_vm1, %v22577_v6, %v22578_v1  ;;  %vm29513_vm0 = vmmov %vm29507_vm1 }
0x10b6   : > { %18761 = vmatmul.mubr.msk.f32.gmra.mrb[132].mxu0 %vm29492_vm15, %v28445_v49  ;;  %v28575_v27 = vpop.permute.xlu0 %22640  ;;  %v14616_v49 = vsel %vm29490_vm2, %v22528_v62, %v22557_v31  ;;  %vm29504_vm15 = vmmov %vm29490_vm2  ;;  %v22593_v62 = vunpack.i.h.bf16 %v28475_v28  ;;  %vm29509_vm2 = vnez %v29508_v37 }
0x10b7   : > { %21315 = vmatpush1.bf16.msk.msra.mxu0 %vm29500_vm4, %v21313_v24  ;;  %14783 = vmatprep.mubr.f32.mxu0 %v29248_v51  ;;  %v21319_v43 = vpack.c.bf16 %v14624_v63, %v14616_v49  ;;  %v14633_v8 = vsel %vm29504_vm15, %v22567_v46, %v22568_v39  ;;  %vm29506_vm4 = vcmask 261120   ;;  %vm29511_vm15 = vmmov %vm29507_vm1  ;;  %v21328_v24 = vpack.c.bf16 %v14627_v60, %v14619_v50  ;;  %v29517_v49 = vld [vmem:[#allocation5_spill] sm:$0xff] }
0x10b8   : > { %21318 = vmatprep.subr.msk.bf16.mxu0 %vm29503_vm3, %v21316_v57  ;;  %v28591_v26 = vpop.permute.xlu1 %22645  ;;  %v21322_v33 = vpack.c.bf16 %v14641_v3, %v14633_v8  ;;  %v14626_v2 = vsel %vm29511_vm15, %v22563_v45, %v22582_v29  ;;  %v14643_v25 = vsel %vm29513_vm0, %v22592_v18, %v22593_v62  ;;  %v14635_v63 = vsel %vm29513_vm0, %v22587_v48, %v22588_v15  ;;  %vm29516_vm15 = vmmov %vm29512_vm14 }
0x10b9   : > { %v21334_v3 = vpack.c.bf16 %v14643_v25, %v14635_v63  ;;  %v22598_v29 = vunpack.i.h.bf16 %v28492_v54  ;;  %v22608_v54 = vunpack.i.h.bf16 %v28509_v22  ;;  %v22628_v63 = vunpack.i.h.bf16 %v28544_v19 }
0x10ba   : > { %18772 = vmatmul.mubr.msk.f32.vlgmr.msra.gmra.mrb[102].mxu0 %vm29506_vm4, %v28581_v14  ;;  %v28601_v31 = vpop.permute.xlu0 %22650  ;;  %vm29510_vm4 = vmmov %vm29507_vm1 }
0x10bb   : > { %21321 = vmatpush1.bf16.msk.msra.mxu0 %vm29509_vm2, %v21319_v43  ;;  %14789 = vmatprep.mubr.f32.mxu0 %v29248_v51  ;;  %v14632_v55 = vsel %vm29510_vm4, %v22543_v36, %v22567_v46  ;;  %v22613_v36 = vunpack.i.h.bf16 %v28497_v56  ;;  %vm29514_vm4 = vmmov %vm29513_vm0 }
0x10bc   : > { %21324 = vmatprep.subr.msk.bf16.mxu0 %vm29503_vm3, %v21322_v33  ;;  %v21325_v28 = vpack.c.bf16 %v14640_v38, %v14632_v55  ;;  %v28617_v40 = vpop.permute.xlu1 %22655  ;;  %v14618_v59 = vsel %vm29514_vm4, %v22558_v35, %v22577_v6  ;;  %vm29515_vm1 = vmmov %vm29513_vm0  ;;  %v22607_v55 = vunpack.i.l.bf16 %v28509_v22  ;;  %v28763_v22 = vld [vmem:[%s29158_s1 + $0xb80] sm:$0xff] }
0x10bd   : > { %v21331_v45 = vpack.c.bf16 %v14626_v2, %v14618_v59  ;;  %v14642_v56 = vsel %vm29515_vm1, %v22573_v47, %v22592_v18  ;;  %vm29519_vm4 = vmmov %vm29513_vm0  ;;  %v14634_v47 = vsel %vm29515_vm1, %v22568_v39, %v22587_v48  ;;  %v14645_v39 = vsel %vm29515_vm1, %v22598_v29, %v29517_v49 }
0x10be   : > { %18773 = vmatmul.mubr.msk.f32.gmra.mrb[120].mxu0 %vm29512_vm14, %v28607_v44  ;;  %v28627_v46 = vpop.permute.xlu0 %22660  ;;  %vm29518_vm14 = vmmov %vm29513_vm0  ;;  %v14621_v43 = vsel %vm29519_vm4, %v22612_v61, %v29517_v49  ;;  %vm29520_vm0 = vnez %v29406_v13  ;;  %v21337_v6 = vpack.c.bf16 %v14642_v56, %v14634_v47  ;;  %vm29523_vm4 = vcmask 261120  }
0x10bf   : > { %21327 = vmatpush1.bf16.msk.msra.mxu0 %vm29509_vm2, %v21325_v28  ;;  %14860 = vmatprep.mubr.f32.mxu0 %v29248_v51  ;;  %v14629_v35 = vsel %vm29518_vm14, %v22613_v36, %v29517_v49  ;;  %vm29522_vm14 = vmmov %vm29515_vm1  ;;  %v14644_v2 = vsel %vm29515_vm1, %v22593_v62, %v22598_v29  ;;  %v22618_v59 = vunpack.i.h.bf16 %v28520_v32  ;;  %v22623_v29 = vunpack.i.h.bf16 %v28534_v9 }
0x10c0   : > { %21330 = vmatprep.subr.msk.bf16.mxu0 %vm28144_vm7, %v21328_v24  ;;  %v28636_v57 = vpop.permute.xlu1 %22665  ;;  %v14628_v60 = vsel %vm29522_vm14, %v22583_v0, %v22613_v36  ;;  %v21340_v18 = vpack.c.bf16 %v14629_v35, %v14621_v43  ;;  %v22603_v0 = vunpack.i.h.bf16 %v28481_v41  ;;  %vm15109_vm14 = vcmask 793600  }
0x10c1   : > { %v15118_v43 = vsel %vm15109_vm14, %v22618_v59, %v22607_v55  ;;  %v22633_v47 = vunpack.i.h.bf16 %v28555_v23  ;;  %v22652_v59 = vunpack.i.l.bf16 %v28601_v31 }
0x10c2   : > { %18782 = vmatmul.mubr.msk.f32.vlgmr.msra.gmra.mrb[122].mxu0 %vm29516_vm15, %v28581_v14  ;;  %v28649_v8 = vpop.permute.xlu0 %22670  ;;  %vm29521_vm15 = vmmov %vm29515_vm1 }
0x10c3   : > { %21333 = vmatpush1.bf16.msk.msra.mxu0 %vm29520_vm0, %v21331_v45  ;;  %14866 = vmatprep.mubr.f32.mxu0 %v29248_v51  ;;  %v14620_v33 = vsel %vm29521_vm15, %v22578_v1, %v22612_v61  ;;  %v22602_v1 = vunpack.i.l.bf16 %v28481_v41  ;;  %vm29525_vm15 = vnez %v29414_v7  ;;  %v15119_v61 = vsel %vm15109_vm14, %v22607_v55, %v22608_v54 }
0x10c4   : > { %21336 = vmatprep.subr.msk.bf16.mxu0 %vm28144_vm7, %v21334_v3  ;;  %v28656_v38 = vpop.permute.xlu1 %22675  ;;  %vm29524_vm7 = vmmov %vm29515_vm1  ;;  %v21343_v24 = vpack.c.bf16 %v14628_v60, %v14620_v33  ;;  %v22617_v45 = vunpack.i.l.bf16 %v28520_v32  ;;  %v22643_v60 = vunpack.i.h.bf16 %v28575_v27 }
0x10c5   : > { %v14637_v28 = vsel %vm29524_vm7, %v22597_v52, %v29517_v49  ;;  %vm29527_vm7 = vcmask 261120   ;;  %v15111_v56 = vsel %vm15109_vm14, %v22602_v1, %v22603_v0 }
0x10c6   : > { %18783 = vmatmul.mubr.msk.f32.gmra.mrb[124].mxu0 %vm29523_vm4, %v28607_v44  ;;  %v28669_v50 = vpop.permute.xlu0 %22680  ;;  %vm29526_vm4 = vmmov %vm29515_vm1  ;;  %v21346_v36 = vpack.c.bf16 %v14645_v39, %v14637_v28  ;;  %v21352_v3 = vpack.c.bf16 %v15119_v61, %v15111_v56  ;;  %v15110_v35 = vsel %vm15109_vm14, %v22617_v45, %v22602_v1  ;;  %v22638_v28 = vunpack.i.h.bf16 %v28565_v20 }
0x10c7   : > { %21339 = vmatpush1.bf16.msk.msra.mxu0 %vm29520_vm0, %v21337_v6  ;;  %14937 = vmatprep.mubr.f32.mxu0 %v29248_v51  ;;  %v14636_v48 = vsel %vm29526_vm4, %v22588_v15, %v22597_v52  ;;  %v22627_v15 = vunpack.i.l.bf16 %v28544_v19  ;;  %v22622_v52 = vunpack.i.l.bf16 %v28534_v9  ;;  %v22632_v6 = vunpack.i.l.bf16 %v28555_v23  ;;  %vm29528_vm4 = vmmov %vm29527_vm7  ;;  %v28791_v19 = vld [vmem:[%s29158_s1 + $0xb88] sm:$0xff] }
0x10c8   : > { %21342 = vmatprep.subr.msk.bf16.mxu0 %vm29525_vm15, %v21340_v18  ;;  %v28678_v25 = vpop.permute.xlu1 %15107  ;;  %v21349_v32 = vpack.c.bf16 %v14644_v2, %v14636_v48  ;;  %v22642_v18 = vunpack.i.l.bf16 %v28575_v27  ;;  %v21355_v23 = vpack.c.bf16 %v15118_v43, %v15110_v35  ;;  %v22637_v1 = vunpack.i.l.bf16 %v28565_v20  ;;  %vm29529_vm1 = vmmov %vm29528_vm4 }
0x10c9   : > { %v15135_v33 = vsel %vm15109_vm14, %v22627_v15, %v22628_v63  ;;  %v15127_v55 = vsel %vm15109_vm14, %v22622_v52, %v22623_v29  ;;  %v15134_v2 = vsel %vm15109_vm14, %v22633_v47, %v22627_v15  ;;  %v22653_v61 = vunpack.i.h.bf16 %v28601_v31 }
0x10ca   : > { %18792 = vmatmul.mubr.msk.f32.vlgmr.msra.gmra.mrb[126].mxu0 %vm29527_vm7, %v28581_v14  ;;  %v28691_v62 = vpop.permute.xlu0 %22690  ;;  %v21358_v48 = vpack.c.bf16 %v15135_v33, %v15127_v55  ;;  %v15113_v15 = vsel %vm15109_vm14, %v22637_v1, %v22638_v28  ;;  %v22647_v56 = vunpack.i.l.bf16 %v28591_v26  ;;  %v15120_v31 = vsel %vm15109_vm14, %v22608_v54, %v22642_v18  ;;  %vm29530_vm7 = vmmov %vm29529_vm1 }
0x10cb   : > { %21345 = vmatpush1.bf16.msk.msra.mxu0 %vm28213_vm12, %v21343_v24  ;;  %14943 = vmatprep.mubr.f32.mxu0 %v29248_v51  ;;  %v15126_v24 = vsel %vm15109_vm14, %v22632_v6, %v22622_v52  ;;  %v15137_v53 = vsel %vm15109_vm14, %v22652_v59, %v22653_v61  ;;  %v22663_v52 = vunpack.i.h.bf16 %v28627_v46  ;;  %v22662_v35 = vunpack.i.l.bf16 %v28627_v46 }
0x10cc   : > { %21348 = vmatprep.subr.msk.bf16.mxu0 %vm29525_vm15, %v21346_v36  ;;  %v28701_v49 = vpop.permute.xlu1 %22685  ;;  %v15121_v36 = vsel %vm15109_vm14, %v22642_v18, %v22643_v60  ;;  %v21361_v45 = vpack.c.bf16 %v15134_v2, %v15126_v24  ;;  %v22658_v54 = vunpack.i.h.bf16 %v28617_v40  ;;  %v22657_v43 = vunpack.i.l.bf16 %v28617_v40 }
0x10cd   : > { %v15136_v6 = vsel %vm15109_vm14, %v22628_v63, %v22652_v59  ;;  %v15123_v41 = vsel %vm15109_vm14, %v22662_v35, %v22663_v52  ;;  %v22672_v18 = vunpack.i.l.bf16 %v28649_v8  ;;  %v15128_v63 = vsel %vm15109_vm14, %v22623_v29, %v22647_v56 }
0x10ce   : > { %18793 = vmatmul.mubr.msk.f32.gmra.mrb[128].mxu0 %vm29528_vm4, %v28607_v44  ;;  %v28716_v39 = vpop.permute.xlu0 %22695  ;;  %v15115_v55 = vsel %vm15109_vm14, %v22657_v43, %v22658_v54  ;;  %v15122_v24 = vsel %vm15109_vm14, %v22643_v60, %v22662_v35  ;;  %v22692_v9 = vunpack.i.l.bf16 %v28691_v62  ;;  %vm29536_vm4 = vnez %v29377_v11 }
0x10cf   : > { %21351 = vmatpush1.bf16.msk.msra.mxu0 %vm28213_vm12, %v21349_v32  ;;  %15014 = vmatprep.mubr.f32.mxu0 %v29248_v51  ;;  %v15138_v17 = vsel %vm15109_vm14, %v22653_v61, %v22672_v18  ;;  %v22698_v21 = vunpack.i.h.bf16 %v28716_v39 }
0x10d0   : > { %21354 = vmatprep.subr.msk.bf16.mxu0 %vm27669_vm8, %v21352_v3  ;;  %v28726_v27 = vpop.permute.xlu1 %22700  ;;  %v21364_v3 = vpack.c.bf16 %v15121_v36, %v15113_v15  ;;  %v21376_v36 = vpack.c.bf16 %v15123_v41, %v15115_v55  ;;  %v22677_v15 = vunpack.i.l.bf16 %v28656_v38 }
0x10d2   : > { %18802 = vmatmul.mubr.msk.f32.vlgmr.msra.gmra.mrb[130].mxu0 %vm29529_vm1, %v28581_v14  ;;  %v28737_v20 = vpop.permute.xlu0 %22705  ;;  %v22648_v14 = vunpack.i.h.bf16 %v28591_v26  ;;  %v15116_v58 = vsel %vm15109_vm14, %v22658_v54, %v22677_v15  ;;  %v22697_v54 = vunpack.i.l.bf16 %v28716_v39 }
0x10d3   : > { %21357 = vmatpush1.bf16.msk.msra.mxu0 %vm27696_vm9, %v21355_v23  ;;  %15020 = vmatprep.mubr.f32.mxu0 %v29248_v51  ;;  %v21373_v23 = vpack.c.bf16 %v15136_v6, %v15128_v63  ;;  %v22683_v6 = vunpack.i.h.bf16 %v28669_v50 }
0x10d4   : > { %21360 = vmatprep.subr.msk.bf16.mxu0 %vm27669_vm8, %v21358_v48  ;;  %v28745_v32 = vpop.permute.xlu1 %22710  ;;  %v15129_v5 = vsel %vm15109_vm14, %v22647_v56, %v22648_v14  ;;  %vm29531_vm8 = vmmov %vm29529_vm1  ;;  %v22667_v48 = vunpack.i.l.bf16 %v28636_v57 }
0x10d5   : > { %v21370_v33 = vpack.c.bf16 %v15137_v53, %v15129_v5 }
0x10d6   : > { %18803 = vmatmul.mubr.msk.f32.gmra.mrb[132].mxu0 %vm29530_vm7, %v28607_v44  ;;  %v28757_v26 = vpop.permute.xlu0 %22715  ;;  %v15112_v44 = vsel %vm15109_vm14, %v22603_v0, %v22637_v1  ;;  %v22673_v0 = vunpack.i.h.bf16 %v28649_v8  ;;  %v22668_v1 = vunpack.i.h.bf16 %v28636_v57  ;;  %v15114_v57 = vsel %vm15109_vm14, %v22638_v28, %v22657_v43  ;;  %vm29539_vm7 = vmmov %vm29529_vm1 }
0x10d7   : > { %21363 = vmatpush1.bf16.msk.msra.mxu0 %vm27696_vm9, %v21361_v45  ;;  %15279 = vmatprep.mubr.f32.mxu0 %v29248_v51  ;;  %v21367_v46 = vpack.c.bf16 %v15120_v31, %v15112_v44  ;;  %vm29532_vm9 = vmmov %vm29529_vm1  ;;  %v21379_v60 = vpack.c.bf16 %v15122_v24, %v15114_v57  ;;  %v22678_v45 = vunpack.i.h.bf16 %v28656_v38  ;;  %v22693_v28 = vunpack.i.h.bf16 %v28691_v62 }
0x10d8   : > { %21366 = vmatprep.subr.msk.bf16.mxu0 %vm27749_vm11, %v21364_v3  ;;  %v28773_v47 = vpop.permute.xlu1 %22720  ;;  %v15139_v10 = vsel %vm15109_vm14, %v22672_v18, %v22673_v0  ;;  %v15131_v59 = vsel %vm15109_vm14, %v22667_v48, %v22668_v1  ;;  %v15130_v38 = vsel %vm15109_vm14, %v22648_v14, %v22667_v48  ;;  %v15124_v62 = vsel %vm15109_vm14, %v22663_v52, %v22692_v9 }
0x10d9   : > { %v21382_v31 = vpack.c.bf16 %v15139_v10, %v15131_v59  ;;  %v15125_v3 = vsel %vm15109_vm14, %v22692_v9, %v22678_v45  ;;  %v21385_v61 = vpack.c.bf16 %v15138_v17, %v15130_v38  ;;  %v15117_v35 = vsel %vm15109_vm14, %v22677_v15, %v22678_v45 }
0x10da   : > { %18814 = vmatmul.mubr.msk.f32.vlgmr.msra.gmra.mrb[102].mxu0 %vm29531_vm8, %v28763_v22  ;;  %v28785_v40 = vpop.permute.xlu0 %22725  ;;  %v15133_v5 = vsel %vm15109_vm14, %v22693_v28, %v22678_v45  ;;  %v22688_v43 = vunpack.i.h.bf16 %v28701_v49  ;;  %v22687_v14 = vunpack.i.l.bf16 %v28701_v49  ;;  %v22682_v52 = vunpack.i.l.bf16 %v28669_v50  ;;  %vm29540_vm8 = vmmov %vm29529_vm1 }
0x10db   : > { %21369 = vmatpush1.bf16.msk.msra.mxu0 %vm27795_vm13, %v21367_v46  ;;  %15285 = vmatprep.mubr.f32.mxu0 %v29248_v51  ;;  %v21388_v46 = vpack.c.bf16 %v15125_v3, %v15117_v35  ;;  %v15141_v41 = vsel %vm15109_vm14, %v28678_v25, %v22678_v45  ;;  %v21391_v18 = vpack.c.bf16 %v15124_v62, %v15116_v58  ;;  %v22708_v48 = vunpack.i.h.bf16 %v28737_v20 }
0x10dc   : > { %21372 = vmatprep.subr.msk.bf16.mxu0 %vm27749_vm11, %v21370_v33  ;;  %v28801_v2 = vpop.permute.xlu1 %22730  ;;  %vm29533_vm11 = vmmov %vm29529_vm1  ;;  %v15132_v63 = vsel %vm15109_vm14, %v22668_v1, %v22693_v28  ;;  %v22707_v24 = vunpack.i.l.bf16 %v28737_v20  ;;  %v15140_v39 = vsel %vm15109_vm14, %v22673_v0, %v28678_v25  ;;  %v22703_v9 = vunpack.i.h.bf16 %v28726_v27 }
0x10dd   : > { %v22702_v57 = vunpack.i.l.bf16 %v28726_v27  ;;  %v22713_v8 = vunpack.i.h.bf16 %v28745_v32  ;;  %v22712_v25 = vunpack.i.l.bf16 %v28745_v32  ;;  %v22723_v59 = vunpack.i.h.bf16 %v28773_v47  ;;  %vm29538_vm14 = vmmov %vm29529_vm1 }
0x10de   : > { %18815 = vmatmul.mubr.msk.f32.gmra.mrb[120].mxu0 %vm29532_vm9, %v28791_v19  ;;  %v28812_v29 = vpop.permute.xlu0 %22735  ;;  %v22722_v45 = vunpack.i.l.bf16 %v28773_v47  ;;  %v22718_v17 = vunpack.i.h.bf16 %v28757_v26  ;;  %v22733_v38 = vunpack.i.h.bf16 %v28801_v2  ;;  %vm29541_vm9 = vmmov %vm29529_vm1 }
0x10df   : > { %21375 = vmatpush1.bf16.msk.msra.mxu0 %vm27795_vm13, %v21373_v23  ;;  %15356 = vmatprep.mubr.f32.mxu0 %v29248_v51  ;;  %vm29534_vm13 = vmmov %vm29529_vm1  ;;  %v21394_v23 = vpack.c.bf16 %v15141_v41, %v15133_v5  ;;  %v22727_v5 = vunpack.i.l.bf16 %v28785_v40 }
0x10e0   : > { %21378 = vmatprep.subr.msk.bf16.mxu0 %vm27857_vm5, %v21376_v36  ;;  %v28821_v56 = vpop.permute.xlu1 %22740  ;;  %v21397_v36 = vpack.c.bf16 %v15140_v39, %v15132_v63 }
0x10e1   : > { %v22742_v41 = vunpack.i.l.bf16 %v28821_v56 }
0x10e2   : > { %18824 = vmatmul.mubr.msk.f32.vlgmr.msra.gmra.mrb[122].mxu0 %vm29533_vm11, %v28763_v22  ;;  %v28830_v53 = vpop.permute.xlu0 %22745  ;;  %vm29542_vm11 = vmmov %vm29529_vm1 }
0x10e3   : > { %21381 = vmatpush1.bf16.msk.msra.mxu0 %vm27890_vm6, %v21379_v60  ;;  %15362 = vmatprep.mubr.f32.mxu0 %v29248_v51 }
0x10e4   : > { %21384 = vmatprep.subr.msk.bf16.mxu0 %vm27857_vm5, %v21382_v31  ;;  %v28837_v44 = vpop.permute.xlu1 %22750  ;;  %vm15608_vm5 = vcmask 785408   ;;  %v22717_v31 = vunpack.i.l.bf16 %v28757_v26 }
0x10e5   : > { %v15618_v1 = vsel %vm15608_vm5, %v22687_v14, %v22688_v43  ;;  %v15610_v20 = vsel %vm15608_vm5, %v22682_v52, %v22683_v6  ;;  %v15617_v10 = vsel %vm15608_vm5, %v22698_v21, %v22687_v14  ;;  %v15609_v60 = vsel %vm15608_vm5, %v22697_v54, %v22682_v52 }
0x10e6   : > { %18825 = vmatmul.mubr.msk.f32.gmra.mrb[124].mxu0 %vm29534_vm13, %v28791_v19  ;;  %v28851_v33 = vpop.permute.xlu0 %22755  ;;  %v21400_v4 = vpack.c.bf16 %v15618_v1, %v15610_v20  ;;  %v15634_v27 = vsel %vm15608_vm5, %v22707_v24, %v22708_v48  ;;  %v21402_v32 = vpack.c.bf16 %v15617_v10, %v15609_v60  ;;  %v15626_v28 = vsel %vm15608_vm5, %v22702_v57, %v22703_v9 }
0x10e7   : > { %21387 = vmatpush1.bf16.msk.msra.mxu0 %vm27890_vm6, %v21385_v61  ;;  %15433 = vmatprep.mubr.f32.mxu0 %v29248_v51  ;;  %vm29535_vm6 = vmmov %vm29529_vm1  ;;  %v15625_v3 = vsel %vm15608_vm5, %v22712_v25, %v22702_v57  ;;  %v15633_v47 = vsel %vm15608_vm5, %v22713_v8, %v22707_v24  ;;  %v21404_v11 = vpack.c.bf16 %v15634_v27, %v15626_v28  ;;  %v22732_v61 = vunpack.i.l.bf16 %v28801_v2 }
0x10e8   : > { %21390 = vmatprep.subr.msk.bf16.mxu0 %vm27926_vm10, %v21388_v46  ;;  %v28860_v55 = vpop.permute.xlu1 %22760  ;;  %v15620_v35 = vsel %vm15608_vm5, %v22722_v45, %v22723_v59  ;;  %v21406_v62 = vpack.c.bf16 %v15633_v47, %v15625_v3  ;;  %v22728_v46 = vunpack.i.h.bf16 %v28785_v40  ;;  %v15619_v14 = vsel %vm15608_vm5, %v22688_v43, %v22722_v45  ;;  %v28928_v40 = vld [vmem:[%s29158_s1 + $0xbc0] sm:$0xff] }
0x10e9   : > { %v22743_v52 = vunpack.i.h.bf16 %v28821_v56  ;;  %v15636_v49 = vsel %vm15608_vm5, %v22732_v61, %v22733_v38  ;;  %v15611_v43 = vsel %vm15608_vm5, %v22683_v6, %v22717_v31  ;;  %v22737_v56 = vunpack.i.l.bf16 %v28812_v29 }
0x10ea   : > { %18834 = vmatmul.mubr.msk.f32.vlgmr.msra.gmra.mrb[126].mxu0 %vm29535_vm6, %v28763_v22  ;;  %v28887_v0 = vpop.permute.xlu0 %15606  ;;  %v15628_v21 = vsel %vm15608_vm5, %v22727_v5, %v22728_v46  ;;  %v15635_v63 = vsel %vm15608_vm5, %v22708_v48, %v22732_v61  ;;  %v22753_v50 = vunpack.i.h.bf16 %v28837_v44  ;;  %v22752_v6 = vunpack.i.l.bf16 %v28837_v44  ;;  %vm29543_vm6 = vmmov %vm29529_vm1 }
0x10eb   : > { %21393 = vmatpush1.bf16.msk.msra.mxu0 %vm29536_vm4, %v21391_v18  ;;  %15439 = vmatprep.mubr.f32.mxu0 %v29248_v51  ;;  %v22738_v18 = vunpack.i.h.bf16 %v28812_v29  ;;  %v21412_v54 = vpack.c.bf16 %v15636_v49, %v15628_v21  ;;  %v28948_v29 = vld [vmem:[%s29158_s1 + $0xbc8] sm:$0xff]  ;;  %v15622_v48 = vsel %vm15608_vm5, %v22742_v41, %v22743_v52  ;;  %v15627_v24 = vsel %vm15608_vm5, %v22703_v9, %v22727_v5 }
0x10ec   : > { %21396 = vmatprep.subr.msk.bf16.mxu0 %vm27926_vm10, %v21394_v23  ;;  %vm29537_vm10 = vmmov %vm29529_vm1  ;;  %v28897_v15 = vpop.permute.xlu1 %22765  ;;  %v21414_v39 = vpack.c.bf16 %v15635_v63, %v15627_v24  ;;  %v22748_v20 = vunpack.i.h.bf16 %v28830_v53  ;;  %v22747_v44 = vunpack.i.l.bf16 %v28830_v53  ;;  %v15621_v10 = vsel %vm15608_vm5, %v22723_v59, %v22742_v41 }
0x10ed   : > { %v22762_v60 = vunpack.i.l.bf16 %v28860_v55  ;;  %v15638_v9 = vsel %vm15608_vm5, %v22752_v6, %v22753_v50  ;;  %v15613_v8 = vsel %vm15608_vm5, %v22718_v17, %v22737_v56  ;;  %v22757_v59 = vunpack.i.l.bf16 %v28851_v33 }
0x10ee   : > { %18835 = vmatmul.mubr.msk.f32.gmra.mrb[128].mxu0 %vm29537_vm10, %v28791_v19  ;;  %v28910_v26 = vpop.permute.xlu0 %22770  ;;  %v21418_v53 = vpack.c.bf16 %v15621_v10, %v15613_v8  ;;  %v15630_v45 = vsel %vm15608_vm5, %v22747_v44, %v22748_v20  ;;  %v15637_v27 = vsel %vm15608_vm5, %v22733_v38, %v22752_v6  ;;  %v15629_v3 = vsel %vm15608_vm5, %v22728_v46, %v22747_v44  ;;  %vm29546_vm10 = vmmov %vm29529_vm1 }
0x10ef   : > { %21399 = vmatpush1.bf16.msk.msra.mxu0 %vm29536_vm4, %v21397_v36  ;;  %15510 = vmatprep.mubr.f32.mxu0 %v29248_v51  ;;  %v15614_v36 = vsel %vm15608_vm5, %v22737_v56, %v22738_v18  ;;  %v22773_v38 = vunpack.i.h.bf16 %v28910_v26  ;;  %v22772_v61 = vunpack.i.l.bf16 %v28910_v26  ;;  %v15615_v5 = vsel %vm15608_vm5, %v22738_v18, %v22757_v59  ;;  %v29065_v26 = vld [vmem:[%s29158_s1 + $0xc00] sm:$0xff] }
0x10f0   : > { %21401 = vmatprep.subr.bf16.mxu0 %v21400_v4  ;;  %v28918_v2 = vpop.permute.xlu1 %22775  ;;  %v21416_v57 = vpack.c.bf16 %v15622_v48, %v15614_v36  ;;  %v22758_v4 = vunpack.i.h.bf16 %v28851_v33  ;;  %v21422_v33 = vpack.c.bf16 %v15637_v27, %v15629_v3  ;;  %v15639_v49 = vsel %vm15608_vm5, %v22753_v50, %v28887_v0 }
0x10f1   : > { %vm16069_vm13 = vcmask 777216   ;;  %v22778_v18 = vunpack.i.h.bf16 %v28918_v2  ;;  %v22777_v56 = vunpack.i.l.bf16 %v28918_v2  ;;  %vm29545_vm4 = vnez %v29383_v16 }
0x10f2   : > { %18844 = vmatmul.mubr.msk.f32.vlgmr.msra.gmra.mrb[130].mxu0 %vm29538_vm14, %v28763_v22  ;;  %v15612_v22 = vsel %vm15608_vm5, %v22717_v31, %v22718_v17  ;;  %v28938_v23 = vpop.permute.xlu0 %22780  ;;  %v21420_v31 = vpack.c.bf16 %v15638_v9, %v15630_v45  ;;  %v22763_v17 = vunpack.i.h.bf16 %v28860_v55  ;;  %v15624_v28 = vsel %vm15608_vm5, %v22762_v60, %v22758_v4 }
0x10f3   : > { %21403 = vmatpush1.bf16.msra.mxu0 %v21402_v32  ;;  %15516 = vmatprep.mubr.f32.mxu0 %v29248_v51  ;;  %v21408_v58 = vpack.c.bf16 %v15620_v35, %v15612_v22  ;;  %v15616_v47 = vsel %vm15608_vm5, %v22757_v59, %v22758_v4  ;;  %v15640_v46 = vsel %vm15608_vm5, %v28887_v0, %v22758_v4  ;;  %v22768_v22 = vunpack.i.h.bf16 %v28897_v15 }
0x10f4   : > { %21405 = vmatprep.subr.bf16.mxu0 %v21404_v11  ;;  %v28952_v1 = vpop.permute.xlu1 %22785  ;;  %v15623_v11 = vsel %vm15608_vm5, %v22743_v52, %v22762_v60  ;;  %v21424_v55 = vpack.c.bf16 %v15624_v28, %v15616_v47  ;;  %v15631_v41 = vsel %vm15608_vm5, %v22748_v20, %v22763_v17  ;;  %v22783_v2 = vunpack.i.h.bf16 %v28938_v23 }
0x10f5   : > { %v21426_v52 = vpack.c.bf16 %v15623_v11, %v15615_v5  ;;  %v22788_v21 = vunpack.i.h.bf16 %v28952_v1  ;;  %v22787_v63 = vunpack.i.l.bf16 %v28952_v1  ;;  %v21430_v50 = vpack.c.bf16 %v15639_v49, %v15631_v41 }
0x10f6   : > { %18845 = vmatmul.mubr.msk.f32.gmra.mrb[132].mxu0 %vm29529_vm1, %v28791_v19  ;;  %v21410_v19 = vpack.c.bf16 %v15619_v14, %v15611_v43  ;;  %v28964_v25 = vpop.permute.xlu0 %22790  ;;  %v22767_v14 = vunpack.i.l.bf16 %v28897_v15  ;;  %v22782_v48 = vunpack.i.l.bf16 %v28938_v23  ;;  %v16078_v1 = vsel %vm16069_vm13, %v22778_v18, %v22772_v61 }
0x10f7   : > { %21407 = vmatpush1.bf16.msra.mxu0 %v21406_v62  ;;  %15743 = vmatprep.mubr.f32.mxu0 %v29248_v51  ;;  %v15632_v62 = vsel %vm15608_vm5, %v22763_v17, %v22758_v4  ;;  %v22792_v20 = vunpack.i.l.bf16 %v28964_v25  ;;  %vm29544_vm5 = vmmov %vm29529_vm1  ;;  %v16095_v36 = vsel %vm16069_vm13, %v22787_v63, %v22788_v21  ;;  %vm29547_vm14 = vnez %v29386_v12 }
0x10f8   : > { %21409 = vmatprep.subr.bf16.mxu0 %v21408_v58  ;;  %v28970_v32 = vpop.permute.xlu1 %22795  ;;  %v21428_v43 = vpack.c.bf16 %v15640_v46, %v15632_v62  ;;  %v16071_v0 = vsel %vm16069_vm13, %v22767_v14, %v22768_v22  ;;  %v16070_v24 = vsel %vm16069_vm13, %v22777_v56, %v22767_v14  ;;  %v16087_v60 = vsel %vm16069_vm13, %v22782_v48, %v22783_v2 }
0x10f9   : > { %v21435_v23 = vpack.c.bf16 %v16078_v1, %v16070_v24  ;;  %v22798_v9 = vunpack.i.h.bf16 %v28970_v32  ;;  %v22797_v8 = vunpack.i.l.bf16 %v28970_v32  ;;  %v16086_v4 = vsel %vm16069_vm13, %v22792_v20, %v22782_v48 }
0x10fa   : > { %18848 = vmatmul.mubr.msk.f32.vlgmr.msra.gmra.mrb[102].mxu0 %vm29539_vm7, %v28928_v40  ;;  %v28982_v35 = vpop.permute.xlu0 %22800  ;;  %vm29548_vm7 = vmmov %vm29529_vm1 }
0x10fb   : > { %21411 = vmatpush1.bf16.msra.mxu0 %v21410_v19  ;;  %15749 = vmatprep.mubr.f32.mxu0 %v29248_v51  ;;  %v16079_v19 = vsel %vm16069_vm13, %v22772_v61, %v22773_v38  ;;  %v22803_v10 = vunpack.i.h.bf16 %v28982_v35  ;;  %v16073_v28 = vsel %vm16069_vm13, %v22797_v8, %v22798_v9 }
0x10fc   : > { %21413 = vmatprep.subr.bf16.mxu0 %v21412_v54  ;;  %v28993_v58 = vpop.permute.xlu1 %22805  ;;  %v21432_v6 = vpack.c.bf16 %v16079_v19, %v16071_v0 }
0x10fd   : > { %v22807_v3 = vunpack.i.l.bf16 %v28993_v58 }
0x10fe   : > { %18849 = vmatmul.mubr.msk.f32.gmra.mrb[120].mxu0 %vm29540_vm8, %v28948_v29  ;;  %v29011_v54 = vpop.permute.xlu0 %22810  ;;  %vm29549_vm8 = vmmov %vm29529_vm1 }
0x10ff   : > { %21415 = vmatpush1.bf16.msra.mxu0 %v21414_v39  ;;  %15820 = vmatprep.mubr.f32.mxu0 %v29248_v51  ;;  %v22793_v39 = vunpack.i.h.bf16 %v28964_v25  ;;  %v21438_v25 = vpack.c.bf16 %v16095_v36, %v16087_v60  ;;  %v22813_v27 = vunpack.i.h.bf16 %v29011_v54  ;;  %v16088_v41 = vsel %vm16069_vm13, %v22783_v2, %v22807_v3 }
0x1100   : > { %21417 = vmatprep.subr.bf16.mxu0 %v21416_v57  ;;  %v29019_v44 = vpop.permute.xlu1 %22815  ;;  %v22802_v57 = vunpack.i.l.bf16 %v28982_v35 }
0x1101   : > { %v22818_v12 = vunpack.i.h.bf16 %v29019_v44  ;;  %v22817_v62 = vunpack.i.l.bf16 %v29019_v44 }
0x1102   : > { %18850 = vmatmul.mubr.msk.f32.vlgmr.msra.gmra.mrb[122].mxu0 %vm29541_vm9, %v28928_v40  ;;  %v29034_v59 = vpop.permute.xlu0 %22820  ;;  %v16081_v45 = vsel %vm16069_vm13, %v22802_v57, %v22803_v10  ;;  %vm29551_vm9 = vmmov %vm29529_vm1 }
0x1103   : > { %21419 = vmatpush1.bf16.msra.mxu0 %v21418_v53  ;;  %15826 = vmatprep.mubr.f32.mxu0 %v29248_v51  ;;  %v16094_v53 = vsel %vm16069_vm13, %v22793_v39, %v22787_v63  ;;  %v21444_v47 = vpack.c.bf16 %v16081_v45, %v16073_v28  ;;  %v22823_v16 = vunpack.i.h.bf16 %v29034_v59  ;;  %v22822_v61 = vunpack.i.l.bf16 %v29034_v59 }
0x1104   : > { %21421 = vmatprep.subr.bf16.mxu0 %v21420_v31  ;;  %v22812_v31 = vunpack.i.l.bf16 %v29011_v54  ;;  %v29044_v32 = vpop.permute.xlu1 %22825  ;;  %v21441_v17 = vpack.c.bf16 %v16094_v53, %v16086_v4  ;;  %v16074_v34 = vsel %vm16069_vm13, %v22798_v9, %v22817_v62 }
0x1105   : > { %v16083_v15 = vsel %vm16069_vm13, %v22822_v61, %v22823_v16  ;;  %v22828_v19 = vunpack.i.h.bf16 %v29044_v32  ;;  %v22827_v18 = vunpack.i.l.bf16 %v29044_v32  ;;  %v16082_v56 = vsel %vm16069_vm13, %v22803_v10, %v22822_v61 }
0x1106   : > { %18851 = vmatmul.mubr.msk.f32.gmra.mrb[124].mxu0 %vm29542_vm11, %v28948_v29  ;;  %v16097_v11 = vsel %vm16069_vm13, %v22812_v31, %v22813_v27  ;;  %v16096_v46 = vsel %vm16069_vm13, %v22788_v21, %v22812_v31  ;;  %v21459_v2 = vpack.c.bf16 %v16082_v56, %v16074_v34  ;;  %vm29553_vm11 = vmmov %vm29529_vm1 }
0x1107   : > { %21423 = vmatpush1.bf16.msra.mxu0 %v21422_v33  ;;  %15897 = vmatprep.mubr.f32.mxu0 %v29248_v51  ;;  %v16080_v33 = vsel %vm16069_vm13, %v22773_v38, %v22802_v57  ;;  %v22831_v38 = vpop.permute.xlu0 %22830  ;;  %v21453_v49 = vpack.c.bf16 %v16096_v46, %v16088_v41  ;;  %v16091_v48 = vsel %vm16069_vm13, %v22827_v18, %v22828_v19  ;;  %v18900_v46 = vld [vmem:[%s29159_s2 + $0x140] sm:$0xff] }
0x1108   : > { %21425 = vmatprep.subr.bf16.mxu0 %v21424_v55  ;;  %v22836_v14 = vpop.permute.xlu1 %22835 }
0x1109   : > { %v22838_v0 = vunpack.i.h.bf16 %v22836_v14  ;;  %v22837_v54 = vunpack.i.l.bf16 %v22836_v14 }
0x110a   : > { %18852 = vmatmul.mubr.msk.f32.vlgmr.msra.gmra.mrb[126].mxu0 %vm29543_vm6, %v28928_v40 }
0x110b   : > { %21427 = vmatpush1.bf16.msra.mxu0 %v21426_v52  ;;  %15903 = vmatprep.mubr.f32.mxu0 %v29248_v51  ;;  %v18857_v52 = vld [vmem:[%s29158_s1 + $0xc08] sm:$0xff]  ;;  %v16077_v37 = vsel %vm16069_vm13, %v22837_v54, %v22838_v0  ;;  %v16076_v57 = vsel %vm16069_vm13, %v22818_v12, %v22837_v54 }
0x110c   : > { %21429 = vmatprep.subr.bf16.mxu0 %v21428_v43  ;;  %v16075_v43 = vsel %vm16069_vm13, %v22817_v62, %v22818_v12 }
0x110d   : > { %v21456_v21 = vpack.c.bf16 %v16083_v15, %v16075_v43 }
0x110e   : > { %18853 = vmatmul.mubr.msk.f32.gmra.mrb[128].mxu0 %vm29544_vm5, %v28948_v29 }
0x110f   : > { %21431 = vmatpush1.bf16.msra.mxu0 %v21430_v50  ;;  %15974 = vmatprep.mubr.f32.mxu0 %v29248_v51  ;;  %v16036_v50 = vpop.permute.xlu0 %16035 }
0x1110   : > { %21434 = vmatprep.subr.msk.bf16.mxu0 %vm29545_vm4, %v21432_v6  ;;  %v22841_v6 = vpop.permute.xlu1 %22840  ;;  %v16085_v39 = vsel %vm16069_vm13, %v16036_v50, %v22838_v0 }
0x1111   : > { %v22843_v20 = vunpack.i.h.bf16 %v22841_v6  ;;  %v22842_v44 = vunpack.i.l.bf16 %v22841_v6  ;;  %v21468_v60 = vpack.c.bf16 %v16085_v39, %v16077_v37 }
0x1112   : > { %18854 = vmatmul.mubr.msk.f32.vlgmr.msra.gmra.mrb[130].mxu0 %vm29546_vm10, %v28928_v40  ;;  %v22808_v40 = vunpack.i.h.bf16 %v28993_v58  ;;  %v22832_v58 = vunpack.i.l.bf16 %v22831_v38 }
0x1113   : > { %21437 = vmatpush1.bf16.msk.msra.mxu0 %vm29547_vm14, %v21435_v23  ;;  %15980 = vmatprep.mubr.f32.mxu0 %v29248_v51  ;;  %v16084_v23 = vsel %vm16069_vm13, %v22823_v16, %v16036_v50  ;;  %v16093_v9 = vsel %vm16069_vm13, %v22842_v44, %v22838_v0 }
0x1114   : > { %21440 = vmatprep.subr.msk.bf16.mxu0 %vm29545_vm4, %v21438_v25  ;;  %v16089_v55 = vsel %vm16069_vm13, %v22807_v3, %v22808_v40  ;;  %v16098_v24 = vsel %vm16069_vm13, %v22813_v27, %v22832_v58  ;;  %v16090_v36 = vsel %vm16069_vm13, %v22808_v40, %v22827_v18  ;;  %v16092_v25 = vsel %vm16069_vm13, %v22828_v19, %v22842_v44 }
0x1115   : > { %v21450_v5 = vpack.c.bf16 %v16097_v11, %v16089_v55  ;;  %v21465_v10 = vpack.c.bf16 %v16098_v24, %v16090_v36 }
0x1116   : > { %18855 = vmatmul.mubr.msk.f32.gmra.mrb[132].mxu0 %vm29529_vm1, %v28948_v29  ;;  %v16072_v29 = vsel %vm16069_vm13, %v22768_v22, %v22797_v8  ;;  %v22833_v22 = vunpack.i.h.bf16 %v22831_v38  ;;  %v16101_v8 = vsel %vm16069_vm13, %v22843_v20, %v22838_v0 }
0x1117   : > { %21443 = vmatpush1.bf16.msk.msra.mxu0 %vm29547_vm14, %v21441_v17  ;;  %16239 = vmatprep.mubr.f32.mxu0 %v29248_v51  ;;  %v21447_v35 = vpack.c.bf16 %v16080_v33, %v16072_v29  ;;  %v21474_v4 = vpack.c.bf16 %v16101_v8, %v16093_v9 }
0x1118   : > { %21446 = vmatprep.subr.msk.bf16.mxu0 %vm29503_vm3, %v21444_v47  ;;  %v16099_v63 = vsel %vm16069_vm13, %v22832_v58, %v22833_v22  ;;  %v16100_v53 = vsel %vm16069_vm13, %v22833_v22, %v22843_v20 }
0x1119   : > { %v21462_v1 = vpack.c.bf16 %v16099_v63, %v16091_v48  ;;  %v21477_v13 = vpack.c.bf16 %v16100_v53, %v16092_v25 }
0x111a   : > { %18866 = vmatmul.mubr.msk.f32.vlgmr.msra.gmra.mrb[102].mxu0 %vm29548_vm7, %v29065_v26 }
0x111b   : > { %21449 = vmatpush1.bf16.msk.msra.mxu0 %vm29509_vm2, %v21447_v35  ;;  %16245 = vmatprep.mubr.f32.mxu0 %v29248_v51  ;;  %v16505_v45 = vpop.permute.xlu0 %16504 }
0x111c   : > { %21452 = vmatprep.subr.msk.bf16.mxu0 %vm29503_vm3, %v21450_v5  ;;  %vm29550_vm3 = vnez %v29403_v30  ;;  %v21471_v30 = vpack.c.bf16 %v16084_v23, %v16076_v57 }
0x111d   : > { %v16510_v31 = vpop.permute.xlu1 %16509 }
0x111e   : > { %18867 = vmatmul.mubr.msk.f32.gmra.mrb[120].mxu0 %vm29549_vm8, %v18857_v52 }
0x111f   : > { %21455 = vmatpush1.bf16.msk.msra.mxu0 %vm29509_vm2, %v21453_v49  ;;  %16316 = vmatprep.mubr.f32.mxu0 %v29248_v51  ;;  %vm29552_vm2 = vmmov %vm29529_vm1  ;;  %v16551_v25 = vpop.permute.xlu0 %16550 }
0x1120   : > { %21458 = vmatprep.subr.msk.bf16.mxu0 %vm29550_vm3, %v21456_v21 }
0x1122   : > { %18876 = vmatmul.mubr.msk.f32.vlgmr.msra.gmra.mrb[122].mxu0 %vm29551_vm9, %v29065_v26 }
0x1123   : > { %21461 = vmatpush1.bf16.msk.msra.mxu0 %vm29520_vm0, %v21459_v2  ;;  %16322 = vmatprep.mubr.f32.mxu0 %v29248_v51 }
0x1124   : > { %21464 = vmatprep.subr.msk.bf16.mxu0 %vm29550_vm3, %v21462_v1 }
0x1126   : > { %18877 = vmatmul.mubr.msk.f32.gmra.mrb[124].mxu0 %vm29552_vm2, %v18857_v52 }
0x1127   : > { %21467 = vmatpush1.bf16.msk.msra.mxu0 %vm29520_vm0, %v21465_v10  ;;  %16393 = vmatprep.mubr.f32.mxu0 %v29248_v51  ;;  %vm29554_vm0 = vmmov %vm29529_vm1 }
0x1128   : > { %21470 = vmatprep.subr.msk.bf16.mxu0 %vm29525_vm15, %v21468_v60  ;;  %vm29555_vm13 = vmmov %vm29554_vm0 }
0x1129   : > { %vm29556_vm6 = vmmov %vm29554_vm0 }
0x112a   : > { %18886 = vmatmul.mubr.msk.f32.vlgmr.msra.gmra.mrb[126].mxu0 %vm29553_vm11, %v29065_v26 }
0x112b   : > { %21473 = vmatpush1.bf16.msk.msra.mxu0 %vm28213_vm12, %v21471_v30  ;;  %16399 = vmatprep.mubr.f32.mxu0 %v29248_v51 }
0x112c   : > { %21476 = vmatprep.subr.msk.bf16.mxu0 %vm29525_vm15, %v21474_v4 }
0x112e   : > { %18887 = vmatmul.mubr.msk.f32.gmra.mrb[128].mxu0 %vm29554_vm0, %v18857_v52 }
0x112f   : > { %21479 = vmatpush1.bf16.msk.msra.mxu0 %vm28213_vm12, %v21477_v13  ;;  %16470 = vmatprep.mubr.f32.mxu0 %v29248_v51  ;;  %vm29557_vm12 = vcmask 130048  }
0x1130   : > { %vm29558_vm15 = vmmov %vm29557_vm12 }
0x1131   : > { %vm29559_vm5 = vmmov %vm29557_vm12 }
0x1132   : > { %18896 = vmatmul.mubr.msk.f32.vlgmr.msra.gmra.mrb[130].mxu0 %vm29555_vm13, %v29065_v26  ;;  %vm29560_vm4 = vmmov %vm29559_vm5 }
0x1133   : > { %16476 = vmatprep.mubr.f32.mxu0 %v29248_v51 }
0x1136   : > { %18897 = vmatmul.mubr.msk.f32.gmra.mrb[132].mxu0 %vm29556_vm6, %v18857_v52 }
0x1137   : > { %16620 = vmatprep.mubr.f32.mxu0 %v29248_v51 }
0x11ed   : > { %v16241_v59 = vpop.f32.mrb[102].mxu0 }
0x11ee   : > { %v16243_v7 = vpop.f32.mrb[103].mxu0  ;;  %v16512_v27 = vadd.f32 %v16505_v45, %v16241_v59 }
0x11ef   : > { %v16513_v32 = vadd.f32 %v16505_v45, %v16243_v7 }
0x11f0   : > { %v16528_v3 = vmax.f32 %v16512_v27, 0.0 }
0x11f1   : > { %v16247_v17 = vpop.f32.mrb[120].mxu0  ;;  %v16529_v47 = vmax.f32 %v16513_v32, 0.0 }
0x11f2   : > { %v16520_v42 = vadd.f32 %v16510_v31, %v16247_v17  ;;  %v16249_v28 = vpop.f32.mrb[121].mxu0 }
0x11f3   : > { %v16521_v40 = vadd.f32 %v16510_v31, %v16249_v28 }
0x11f4   : > { %v16536_v33 = vmax.f32 %v16520_v42, 0.0 }
0x11f5   : > { %v16537_v11 = vmax.f32 %v16521_v40, 0.0  ;;  %v16318_v16 = vpop.f32.mrb[122].mxu0 }
0x11f6   : > { %v21482_v61 = vpack.c.bf16 %v16536_v33, %v16528_v3  ;;  %v16320_v26 = vpop.f32.mrb[123].mxu0  ;;  %v16514_v38 = vadd.f32 %v16505_v45, %v16318_v16 }
0x11f7   : > { %v21480_v29 = vpack.c.bf16 %v16537_v11, %v16529_v47  ;;  %v16515_v35 = vadd.f32 %v16505_v45, %v16320_v26 }
0x11f8   : > { %v16530_v14 = vmax.f32 %v16514_v38, 0.0 }
0x11f9   : > { %v16324_v55 = vpop.f32.mrb[124].mxu0  ;;  %21481 = vmatprep.subr.bf16.mxu0 %v21480_v29  ;;  %v16531_v22 = vmax.f32 %v16515_v35, 0.0 }
0x11fa   : > { %v16522_v12 = vadd.f32 %v16510_v31, %v16324_v55  ;;  %v16326_v62 = vpop.f32.mrb[125].mxu0  ;;  %21483 = vmatpush1.bf16.msra.mxu0 %v21482_v61 }
0x11fb   : > { %v16523_v5 = vadd.f32 %v16510_v31, %v16326_v62 }
0x11fc   : > { %v16538_v15 = vmax.f32 %v16522_v12, 0.0 }
0x11fd   : > { %v16539_v58 = vmax.f32 %v16523_v5, 0.0  ;;  %v16395_v52 = vpop.f32.mrb[126].mxu0  ;;  %18902 = vmatmul.mubr.msk.f32.vlgmr.msra.gmra.mrb[134].mxu0 %vm29557_vm12, %v18900_v46 }
0x11fe   : > { %v21486_v41 = vpack.c.bf16 %v16538_v15, %v16530_v14  ;;  %v16397_v49 = vpop.f32.mrb[127].mxu0  ;;  %16691 = vmatprep.mubr.f32.mxu0 %v29248_v51  ;;  %v16516_v19 = vadd.f32 %v16505_v45, %v16395_v52 }
0x11ff   : > { %v21484_v43 = vpack.c.bf16 %v16539_v58, %v16531_v22  ;;  %v16517_v18 = vadd.f32 %v16505_v45, %v16397_v49 }
0x1200   : > { %v16532_v54 = vmax.f32 %v16516_v19, 0.0 }
0x1201   : > { %v16401_v56 = vpop.f32.mrb[128].mxu0  ;;  %21485 = vmatprep.subr.bf16.mxu0 %v21484_v43  ;;  %v16533_v50 = vmax.f32 %v16517_v18, 0.0 }
0x1202   : > { %v16524_v21 = vadd.f32 %v16510_v31, %v16401_v56  ;;  %v16403_v63 = vpop.f32.mrb[129].mxu0  ;;  %21487 = vmatpush1.bf16.msra.mxu0 %v21486_v41 }
0x1203   : > { %v16525_v0 = vadd.f32 %v16510_v31, %v16403_v63 }
0x1204   : > { %v16540_v34 = vmax.f32 %v16524_v21, 0.0 }
0x1205   : > { %v16541_v6 = vmax.f32 %v16525_v0, 0.0  ;;  %v16472_v2 = vpop.f32.mrb[130].mxu0  ;;  %18903 = vmatmul.mubr.msk.f32.vlgmr.msra.gmra.mrb[136].mxu0 %vm29558_vm15, %v18900_v46 }
0x1206   : > { %v21490_v48 = vpack.c.bf16 %v16540_v34, %v16532_v54  ;;  %v16474_v24 = vpop.f32.mrb[131].mxu0  ;;  %16762 = vmatprep.mubr.f32.mxu0 %v29248_v51  ;;  %v16518_v37 = vadd.f32 %v16505_v45, %v16472_v2 }
0x1207   : > { %v21488_v1 = vpack.c.bf16 %v16541_v6, %v16533_v50  ;;  %v16519_v39 = vadd.f32 %v16505_v45, %v16474_v24 }
0x1208   : > { %v16534_v57 = vmax.f32 %v16518_v37, 0.0 }
0x1209   : > { %v16478_v20 = vpop.f32.mrb[132].mxu0  ;;  %21489 = vmatprep.subr.bf16.mxu0 %v21488_v1  ;;  %v16535_v60 = vmax.f32 %v16519_v39, 0.0 }
0x120a   : > { %v16526_v44 = vadd.f32 %v16510_v31, %v16478_v20  ;;  %v16480_v36 = vpop.f32.mrb[133].mxu0  ;;  %21491 = vmatpush1.bf16.msra.mxu0 %v21490_v48 }
0x120b   : > { %v16527_v10 = vadd.f32 %v16510_v31, %v16480_v36 }
0x120c   : > { %v16542_v23 = vmax.f32 %v16526_v44, 0.0 }
0x120d   : > { %v16543_v9 = vmax.f32 %v16527_v10, 0.0  ;;  %18904 = vmatmul.mubr.msk.f32.vlgmr.msra.gmra.mrb[138].mxu0 %vm29559_vm5, %v18900_v46 }
0x120e   : > { %v21494_v8 = vpack.c.bf16 %v16542_v23, %v16534_v57  ;;  %16833 = vmatprep.mubr.f32.mxu0 %v29248_v51 }
0x120f   : > { %v21492_v30 = vpack.c.bf16 %v16543_v9, %v16535_v60 }
0x1211   : > { %21493 = vmatprep.subr.bf16.mxu0 %v21492_v30 }
0x1212   : > { %21495 = vmatpush1.bf16.msra.mxu0 %v21494_v8 }
0x1215   : > { %18905 = vmatmul.mubr.msk.f32.vlgmr.msra.gmra.mrb[140].mxu0 %vm29560_vm4, %v18900_v46 }
0x12d0   : > { %v16622_v53 = vpop.f32.mrb[134].mxu0 }
0x12d1   : > { %v16623_v4 = vadd.f32 %v16622_v53, %v16551_v25  ;;  %v16624_v13 = vpop.f32.mrb[135].mxu0 }
0x12d2   : > { %v16625_v59 = vadd.f32 %v16624_v13, %v16551_v25 }
0x12d3   : > { %v18906_v7 = vmul.f32 -1.442695, %v16623_v4 }
0x12d4   : > { %v18907_v45 = vmul.f32 -1.442695, %v16625_v59 }
0x12d5   : > { %22904 = vpow2.f32 %v18906_v7 }
0x12d6   : > { %22906 = vpow2.f32 %v18907_v45 }
0x12d8   : > { %v16693_v27 = vpop.f32.mrb[136].mxu0 }
0x12d9   : > { %v16694_v31 = vadd.f32 %v16693_v27, %v16551_v25  ;;  %v16695_v32 = vpop.f32.mrb[137].mxu0 }
0x12da   : > { %v16696_v17 = vadd.f32 %v16695_v32, %v16551_v25 }
0x12db   : > { %v18908_v42 = vmul.f32 -1.442695, %v16694_v31 }
0x12dc   : > { %v18909_v51 = vmul.f32 -1.442695, %v16696_v17 }
0x12dd   : > { %22908 = vpow2.f32 %v18908_v42 }
0x12de   : > { %22910 = vpow2.f32 %v18909_v51 }
0x12df   : > { %v22905_v28 = vpop.eup %22904 }
0x12e0   : > { %v22907_v40 = vpop.eup %22906  ;;  %v16864_v3 = vadd.f32 1.0, %v22905_v28  ;;  %v16764_v33 = vpop.f32.mrb[138].mxu0 }
0x12e1   : > { %v16865_v47 = vadd.f32 1.0, %v22907_v40  ;;  %v16765_v11 = vadd.f32 %v16764_v33, %v16551_v25  ;;  %v16766_v16 = vpop.f32.mrb[139].mxu0 }
0x12e2   : > { %22912 = vrcp.f32 %v16864_v3  ;;  %v16767_v61 = vadd.f32 %v16766_v16, %v16551_v25 }
0x12e3   : > { %22914 = vrcp.f32 %v16865_v47  ;;  %v18910_v26 = vmul.f32 -1.442695, %v16765_v11 }
0x12e4   : > { %v18911_v29 = vmul.f32 -1.442695, %v16767_v61 }
0x12e5   : > { %22916 = vpow2.f32 %v18910_v26 }
0x12e6   : > { %22918 = vpow2.f32 %v18911_v29 }
0x12e7   : > { %v22909_v38 = vpop.eup %22908 }
0x12e8   : > { %v22911_v35 = vpop.eup %22910  ;;  %v16866_v55 = vadd.f32 1.0, %v22909_v38  ;;  %v16835_v12 = vpop.f32.mrb[140].mxu0 }
0x12e9   : > { %v16867_v62 = vadd.f32 1.0, %v22911_v35  ;;  %v16836_v46 = vadd.f32 %v16835_v12, %v16551_v25  ;;  %v16837_v5 = vpop.f32.mrb[141].mxu0 }
0x12ea   : > { %22920 = vrcp.f32 %v16866_v55  ;;  %v16838_v14 = vadd.f32 %v16837_v5, %v16551_v25 }
0x12eb   : > { %22922 = vrcp.f32 %v16867_v62  ;;  %v18912_v15 = vmul.f32 -1.442695, %v16836_v46 }
0x12ec   : > { %v22913_v22 = vpop.eup %22912  ;;  %v18913_v58 = vmul.f32 -1.442695, %v16838_v14 }
0x12ed   : > { %v22915_v52 = vpop.eup %22914  ;;  %22924 = vpow2.f32 %v18912_v15 }
0x12ee   : > { %v16896_v41 = vcombine.low %v22913_v22, %v22915_v52  ;;  %22926 = vpow2.f32 %v18913_v58 }
0x12ef   : > { %v22917_v49 = vpop.eup %22916 }
0x12f0   : > { %v22919_v43 = vpop.eup %22918  ;;  %16904 = vst [vmem:[%s218_s16] sm:$0xff] %v16896_v41  ;;  %v16868_v19 = vadd.f32 1.0, %v22917_v49 }
0x12f1   : > { %v16869_v18 = vadd.f32 1.0, %v22919_v43 }
0x12f2   : > { %22928 = vrcp.f32 %v16868_v19 }
0x12f3   : > { %22930 = vrcp.f32 %v16869_v18 }
0x12f4   : > { %v22921_v56 = vpop.eup %22920 }
0x12f5   : > { %v22923_v21 = vpop.eup %22922 }
0x12f6   : > { %v16897_v63 = vcombine.low %v22921_v56, %v22923_v21 }
0x12f7   : > { %v22925_v0 = vpop.eup %22924 }
0x12f8   : > { %v22927_v54 = vpop.eup %22926  ;;  %16905 = vst [vmem:[%s218_s16 + $0x8] sm:$0xff] %v16897_v63  ;;  %v16870_v34 = vadd.f32 1.0, %v22925_v0 }
0x12f9   : > { %v16871_v50 = vadd.f32 1.0, %v22927_v54 }
0x12fa   : > { %22932 = vrcp.f32 %v16870_v34 }
0x12fb   : > { %22934 = vrcp.f32 %v16871_v50 }
0x12fc   : > { %v22929_v6 = vpop.eup %22928 }
0x12fd   : > { %v22931_v2 = vpop.eup %22930 }
0x12fe   : > { %v16898_v48 = vcombine.low %v22929_v6, %v22931_v2 }
0x1300   : > { %16906 = vst [vmem:[%s218_s16 + $0x10] sm:$0xff] %v16898_v48 }
0x1304   : > { %v22933_v24 = vpop.eup %22932 }
0x1305   : > { %v22935_v1 = vpop.eup %22934 }
0x1306   : > { %v16899_v37 = vcombine.low %v22933_v24, %v22935_v1 }
0x1308   : > { %16907 = vst [vmem:[%s218_s16 + $0x18] sm:$0xff] %v16899_v37 }
0x1309 PF: > { %s15_s18 = sadd.s32 1, %s22942_s18  }
0x130a   : > { %p12_p4 = scmp.ge.s32.totalorder %s15_s18, 4  }
0x130c   :  { %14 = sbr.rel (!%p12_p4) target bundleno = 1 (0x1), region = 147 }

</bundles_post_ra>
